<compile_context>
chip_gen: v6e
topology: v6e:2x2x1
jax: 0.10.0
libtpu: 0.0.40
codegen_flags: <defaults>
</compile_context>

<pallas_src>
import jax
import jax.numpy as jnp
from jax import lax
from jax.experimental import pallas as pl
from jax.experimental.pallas import tpu as pltpu

# -------------------- model dims (small, lane-aligned) --------------------
B, T = 16, 16         # total batch, sequence length
BC = 8                # batch chunk per grid step (independent sequences)
V = 128               # vocab_size
E = 128               # embedding_dim
H = 256               # hidden_dim (PyTorch default)

assert B % BC == 0
N_CHUNKS = B // BC


# -------------------- fused Pallas kernel --------------------
def fused_lstm_kernel(ids_ref, embproj_ref, whh_ref, bg_ref,
                      w1_ref, b1_ref, s2_ref, t2_ref, w2_ref, b2_ref,
                      out_ref, xproj):
    """Embedding/input-proj -> LSTM recurrence -> (BN1-folded fc1 -> relu -> BN2 -> +res -> fc2).

    ids_ref     : (T*BC, 1) int32, time-major within the chunk (row t*BC+j = ids[chunk_j, t])
    embproj_ref : (V, 4H) bf16   embedding @ W_ih, folded at trace time
    whh_ref     : (H, 4H) bf16 ; bg_ref : (1, 4H) f32  (b_ih + b_hh)
    w1_ref      : (H, H) bf16 BN1-folded fc1 weight ; b1_ref : (1, H) f32 folded bias
    s2_ref,t2_ref : (1, H) f32 eval-mode BN2 scale / shift
    w2_ref      : (H, V) bf16 ; b2_ref : (1, V) f32
    out_ref     : (BC, V) f32
    xproj       : (T*BC, 4H) f32 scratch holding x_t @ W_ih + b for every timestep
    """
    tb = xproj.shape[0]            # T * BC
    nb = out_ref.shape[0]          # BC
    hid = whh_ref.shape[0]         # H
    vocab = embproj_ref.shape[0]   # V
    n_steps = tb // nb             # T

    # ---- embedding lookup folded into the input projection (one bf16 MXU matmul) ----
    ids = ids_ref[...]                                               # (T*BC, 1) int32
    lane = lax.broadcasted_iota(jnp.int32, (tb, vocab), 1)
    one_hot = (lane == ids).astype(jnp.bfloat16)                     # (T*BC, V)
    xproj[...] = (
        jnp.dot(one_hot, embproj_ref[...], preferred_element_type=jnp.float32)
        + bg_ref[...]
    )                                                                # (T*BC, 4H) f32

    # ---- serial recurrence: h/c carried as f32 values; bf16 only at the MXU operand ----
    def step(t, carry):
        h, c = carry
        row = pl.multiple_of(t * nb, nb)
        gates = xproj[pl.ds(row, nb), :] + jnp.dot(
            h.astype(jnp.bfloat16), whh_ref[...],
            preferred_element_type=jnp.float32)                      # (BC, 4H) f32
        i = jax.nn.sigmoid(gates[:, 0 * hid:1 * hid])
        f = jax.nn.sigmoid(gates[:, 1 * hid:2 * hid])
        g = jnp.tanh(gates[:, 2 * hid:3 * hid])
        o = jax.nn.sigmoid(gates[:, 3 * hid:4 * hid])
        c_new = f * c + i * g
        h_new = o * jnp.tanh(c_new)
        return (h_new, c_new)

    h0 = jnp.zeros((nb, hid), jnp.float32)
    c0 = jnp.zeros((nb, hid), jnp.float32)
    h_last, _ = lax.fori_loop(0, n_steps, step, (h0, c0), unroll=True)

    # ---- head: BN1 folded into w1/b1; dropout = identity (eval) ----
    y = jnp.dot(h_last.astype(jnp.bfloat16), w1_ref[...],
                preferred_element_type=jnp.float32) + b1_ref[...]
    y = jnp.maximum(y, 0.0)                                          # relu
    y = y * s2_ref[...] + t2_ref[...]                                # batch_norm2 (eval)
    z = y + h_last                                                   # residual from pre-BN1 h_last
    out_ref[...] = (
        jnp.dot(z.astype(jnp.bfloat16), w2_ref[...],
                preferred_element_type=jnp.float32) + b2_ref[...]
    ).astype(out_ref.dtype)


# -------------------- wrapper --------------------
def _const_spec(shape):
    zeros = (0,) * len(shape)
    return pl.BlockSpec(shape, lambda i, _z=zeros: _z)


def lstm_forward(token_ids, params):
    eps = 1e-5
    # Fold eval-mode BN1 into fc1: (x*s1 + t1) @ W1 + b1 = x @ (s1[:,None]*W1) + (t1 @ W1 + b1)
    s1 = params["bn1_gamma"] / jnp.sqrt(params["bn1_var"] + eps)
    t1 = params["bn1_beta"] - params["bn1_mean"] * s1
    w1_eff = (params["fc1_w"] * s1[:, None]).astype(jnp.bfloat16)
    b1_eff = (params["fc1_b"] + t1 @ params["fc1_w"]).reshape(1, H)

    # Eval-mode BN2 as per-feature scale/shift applied in-kernel (post-relu).
    s2 = params["bn2_gamma"] / jnp.sqrt(params["bn2_var"] + eps)
    t2 = params["bn2_beta"] - params["bn2_mean"] * s2

    # Fold embedding into the input projection (exact: one_hot only selects rows);
    # PyTorch LSTM bias = b_ih + b_hh folded into the same projection.
    emb_proj = (params["embedding"] @ params["w_ih"]).astype(jnp.bfloat16)   # (V, 4H)
    bias_g = (params["lstm_b_ih"] + params["lstm_b_hh"]).reshape(1, 4 * H)
    whh_bf16 = params["w_hh"].astype(jnp.bfloat16)
    w2_bf16 = params["fc2_w"].astype(jnp.bfloat16)

    # Per-chunk time-major ids: row c*(T*BC) + t*BC + j = token_ids[c*BC + j, t].
    ids_tm = (jnp.transpose(token_ids.reshape(N_CHUNKS, BC, T), (0, 2, 1))
              .reshape(N_CHUNKS * T * BC, 1).astype(jnp.int32))

    grid_spec = pltpu.PrefetchScalarGridSpec(
        num_scalar_prefetch=0,
        grid=(N_CHUNKS,),
        in_specs=[
            pl.BlockSpec((T * BC, 1), lambda i: (i, 0)),   # ids: one chunk per step
            _const_spec((V, 4 * H)),                       # emb_proj   (VMEM-resident)
            _const_spec((H, 4 * H)),                       # w_hh
            _const_spec((1, 4 * H)),                       # lstm bias
            _const_spec((H, H)),                           # fc1 (BN1-folded)
            _const_spec((1, H)),                           # fc1 bias (BN1-folded)
            _const_spec((1, H)),                           # bn2 scale
            _const_spec((1, H)),                           # bn2 shift
            _const_spec((H, V)),                           # fc2
            _const_spec((1, V)),                           # fc2 bias
        ],
        out_specs=pl.BlockSpec((BC, V), lambda i: (i, 0)),
        scratch_shapes=[pltpu.VMEM((T * BC, 4 * H), jnp.float32)],
    )

    return pl.pallas_call(
        fused_lstm_kernel,
        out_shape=jax.ShapeDtypeStruct((B, V), jnp.float32),
        grid_spec=grid_spec,
        compiler_params=pltpu.CompilerParams(
            dimension_semantics=("parallel",)),            # v7x: chunks on both TCs
    )(ids_tm, emb_proj, whh_bf16, bias_g,
      w1_eff, b1_eff, s2.reshape(1, H), t2.reshape(1, H),
      w2_bf16, params["fc2_b"].reshape(1, V))


# -------------------- deterministic parameter init --------------------
def init_params(key):
    ks = jax.random.split(key, 10)
    scale = 0.1
    return {
        "embedding": jax.random.normal(ks[0], (V, E), jnp.float32) * scale,
        # PyTorch stores (4H, E)/(4H, H); we keep transposed (in, out) layout.
        "w_ih": jax.random.normal(ks[1], (E, 4 * H), jnp.float32) * scale,
        "w_hh": jax.random.normal(ks[2], (H, 4 * H), jnp.float32) * scale,
        "lstm_b_ih": jax.random.normal(ks[3], (4 * H,), jnp.float32) * scale,
        "lstm_b_hh": jax.random.normal(ks[4], (4 * H,), jnp.float32) * scale,
        "bn1_gamma": jnp.ones((H,), jnp.float32),
        "bn1_beta": jnp.zeros((H,), jnp.float32),
        "bn1_mean": jnp.zeros((H,), jnp.float32),
        "bn1_var": jnp.ones((H,), jnp.float32),
        "fc1_w": jax.random.normal(ks[5], (H, H), jnp.float32) * scale,
        "fc1_b": jax.random.normal(ks[6], (H,), jnp.float32) * scale,
        "bn2_gamma": jnp.ones((H,), jnp.float32),
        "bn2_beta": jnp.zeros((H,), jnp.float32),
        "bn2_mean": jnp.zeros((H,), jnp.float32),
        "bn2_var": jnp.ones((H,), jnp.float32),
        "fc2_w": jax.random.normal(ks[7], (H, V), jnp.float32) * scale,
        "fc2_b": jax.random.normal(ks[8], (V,), jnp.float32) * scale,
    }


if __name__ == "__main__":
    key = jax.random.PRNGKey(0)
    k_tok, k_par = jax.random.split(key)
    token_ids = jax.random.randint(k_tok, (B, T), 0, V, dtype=jnp.int32)
    # Out-of-range ids would silently map to a zero embedding (PyTorch raises) — assert.
    assert bool(jnp.all((token_ids >= 0) & (token_ids < V)))
    params = init_params(k_par)

    out = jax.jit(lstm_forward)(token_ids, params)
    out = jax.block_until_ready(out)
    assert out.shape == (B, V) and out.dtype == jnp.float32
    assert bool(jnp.all(jnp.isfinite(out)))
    print("KERNEL_OK")
</pallas_src>

<mosaic_0001>
module attributes {stable_mosaic.version = 11 : i64} {
  func.func @fused_lstm_kernel(%arg0: i32, %arg1: memref<128x1xi32, #tpu.memory_space<vmem>>, %arg2: memref<128x1024xbf16, #tpu.memory_space<vmem>>, %arg3: memref<256x1024xbf16, #tpu.memory_space<vmem>>, %arg4: memref<1x1024xf32, #tpu.memory_space<vmem>>, %arg5: memref<256x256xbf16, #tpu.memory_space<vmem>>, %arg6: memref<1x256xf32, #tpu.memory_space<vmem>>, %arg7: memref<1x256xf32, #tpu.memory_space<vmem>>, %arg8: memref<1x256xf32, #tpu.memory_space<vmem>>, %arg9: memref<256x128xbf16, #tpu.memory_space<vmem>>, %arg10: memref<1x128xf32, #tpu.memory_space<vmem>>, %arg11: memref<8x128xf32, #tpu.memory_space<vmem>>, %arg12: memref<128x1024xf32, #tpu.memory_space<vmem>>) attributes {dimension_semantics = [#tpu.dimension_semantics<parallel>], iteration_bounds = array<i64: 2>, scalar_prefetch = 0 : i64, scratch_operands = 1 : i64, tpu.core_type = #tpu.core_type<tc>, window_params = [{transform_indices = @transform_0, window_bounds = array<i64: 128, 1>}, {pipeline_mode = #tpu.pipeline_mode<synchronous>, transform_indices = @transform_1, window_bounds = array<i64: 128, 1024>}, {pipeline_mode = #tpu.pipeline_mode<synchronous>, transform_indices = @transform_2, window_bounds = array<i64: 256, 1024>}, {pipeline_mode = #tpu.pipeline_mode<synchronous>, transform_indices = @transform_3, window_bounds = array<i64: 1, 1024>}, {pipeline_mode = #tpu.pipeline_mode<synchronous>, transform_indices = @transform_4, window_bounds = array<i64: 256, 256>}, {pipeline_mode = #tpu.pipeline_mode<synchronous>, transform_indices = @transform_5, window_bounds = array<i64: 1, 256>}, {pipeline_mode = #tpu.pipeline_mode<synchronous>, transform_indices = @transform_6, window_bounds = array<i64: 1, 256>}, {pipeline_mode = #tpu.pipeline_mode<synchronous>, transform_indices = @transform_7, window_bounds = array<i64: 1, 256>}, {pipeline_mode = #tpu.pipeline_mode<synchronous>, transform_indices = @transform_8, window_bounds = array<i64: 256, 128>}, {pipeline_mode = #tpu.pipeline_mode<synchronous>, transform_indices = @transform_9, window_bounds = array<i64: 1, 128>}, {transform_indices = @transform_10, window_bounds = array<i64: 8, 128>}]} {
    %c0 = arith.constant 0 : index
    %c0_0 = arith.constant 0 : index
    %0 = vector.load %arg1[%c0, %c0_0] : memref<128x1xi32, #tpu.memory_space<vmem>>, vector<128x1xi32>
    %1 = tpu.iota {dimensions = array<i32: 1>} : vector<128x128xi32>
    %2 = vector.broadcast %0 : vector<128x1xi32> to vector<128x128xi32>
    %3 = arith.cmpi eq, %1, %2 : vector<128x128xi32>
    %4 = arith.extui %3 : vector<128x128xi1> to vector<128x128xi32>
    %5 = arith.sitofp %4 : vector<128x128xi32> to vector<128x128xf32>
    %6 = arith.truncf %5 : vector<128x128xf32> to vector<128x128xbf16>
    %c0_1 = arith.constant 0 : index
    %c0_2 = arith.constant 0 : index
    %7 = vector.load %arg2[%c0_1, %c0_2] : memref<128x1024xbf16, #tpu.memory_space<vmem>>, vector<128x1024xbf16>
    %cst = arith.constant dense<0.000000e+00> : vector<128x1024xf32>
    %8 = tpu.matmul %6, %7, %cst {dimension_numbers = #tpu.dot_dimension_numbers<[1], [0], [0], [1], [0, 0, 1, 1], [], []>} : vector<128x128xbf16>, vector<128x1024xbf16>, vector<128x1024xf32> -> vector<128x1024xf32>
    %c0_3 = arith.constant 0 : index
    %c0_4 = arith.constant 0 : index
    %9 = vector.load %arg4[%c0_3, %c0_4] : memref<1x1024xf32, #tpu.memory_space<vmem>>, vector<1x1024xf32>
    %10 = vector.broadcast %9 : vector<1x1024xf32> to vector<128x1024xf32>
    %11 = arith.addf %8, %10 : vector<128x1024xf32>
    %c0_5 = arith.constant 0 : index
    %c0_6 = arith.constant 0 : index
    %12 = vector.load %arg12[%c0_5, %c0_6] : memref<128x1024xf32, #tpu.memory_space<vmem>>, vector<128x1024xf32>
    tpu.vector_store %arg12[%c0_5, %c0_6], %11 {strides = array<i32>} : memref<128x1024xf32, #tpu.memory_space<vmem>>, vector<128x1024xf32>,
    %cst_7 = arith.constant 0.000000e+00 : f32
    %13 = vector.broadcast %cst_7 : f32 to vector<8x256xf32>
    %cst_8 = arith.constant 0.000000e+00 : f32
    %14 = vector.broadcast %cst_8 : f32 to vector<8x256xf32>
    %c0_i32 = arith.constant 0 : i32
    %c8_i32 = arith.constant 8 : i32
    %15 = arith.muli %c0_i32, %c8_i32 : i32
    %16 = tpu.assume_multiple %15, 8 : i32
    %17 = arith.index_cast %16 : i32 to index
    %c0_9 = arith.constant 0 : index
    %18 = vector.load %arg12[%17, %c0_9] : memref<128x1024xf32, #tpu.memory_space<vmem>>, vector<8x1024xf32>
    %19 = arith.truncf %13 : vector<8x256xf32> to vector<8x256xbf16>
    %c0_10 = arith.constant 0 : index
    %c0_11 = arith.constant 0 : index
    %20 = vector.load %arg3[%c0_10, %c0_11] : memref<256x1024xbf16, #tpu.memory_space<vmem>>, vector<256x1024xbf16>
    %cst_12 = arith.constant dense<0.000000e+00> : vector<8x1024xf32>
    %21 = tpu.matmul %19, %20, %cst_12 {dimension_numbers = #tpu.dot_dimension_numbers<[1], [0], [0], [1], [0, 0, 1, 1], [], []>} : vector<8x256xbf16>, vector<256x1024xbf16>, vector<8x1024xf32> -> vector<8x1024xf32>
    %22 = arith.addf %18, %21 : vector<8x1024xf32>
    %23 = vector.extract_strided_slice %22 {offsets = [0, 0], sizes = [8, 256], strides = [1, 1]} : vector<8x1024xf32> to vector<8x256xf32>
    %24 = arith.negf %23 : vector<8x256xf32>
    %25 = math.exp %24 : vector<8x256xf32>
    %cst_13 = arith.constant 1.000000e+00 : f32
    %26 = vector.broadcast %cst_13 : f32 to vector<8x256xf32>
    %27 = arith.addf %26, %25 : vector<8x256xf32>
    %28 = arith.divf %26, %27 : vector<8x256xf32>
    %29 = vector.extract_strided_slice %22 {offsets = [0, 256], sizes = [8, 256], strides = [1, 1]} : vector<8x1024xf32> to vector<8x256xf32>
    %30 = arith.negf %29 : vector<8x256xf32>
    %31 = math.exp %30 : vector<8x256xf32>
    %cst_14 = arith.constant 1.000000e+00 : f32
    %32 = vector.broadcast %cst_14 : f32 to vector<8x256xf32>
    %33 = arith.addf %32, %31 : vector<8x256xf32>
    %34 = arith.divf %32, %33 : vector<8x256xf32>
    %35 = vector.extract_strided_slice %22 {offsets = [0, 512], sizes = [8, 256], strides = [1, 1]} : vector<8x1024xf32> to vector<8x256xf32>
    %36 = math.tanh %35 : vector<8x256xf32>
    %37 = vector.extract_strided_slice %22 {offsets = [0, 768], sizes = [8, 256], strides = [1, 1]} : vector<8x1024xf32> to vector<8x256xf32>
    %38 = arith.negf %37 : vector<8x256xf32>
    %39 = math.exp %38 : vector<8x256xf32>
    %cst_15 = arith.constant 1.000000e+00 : f32
    %40 = vector.broadcast %cst_15 : f32 to vector<8x256xf32>
    %41 = arith.addf %40, %39 : vector<8x256xf32>
    %42 = arith.divf %40, %41 : vector<8x256xf32>
    %43 = arith.mulf %34, %14 : vector<8x256xf32>
    %44 = arith.mulf %28, %36 : vector<8x256xf32>
    %45 = arith.addf %43, %44 : vector<8x256xf32>
    %46 = math.tanh %45 : vector<8x256xf32>
    %47 = arith.mulf %42, %46 : vector<8x256xf32>
    %c1_i32 = arith.constant 1 : i32
    %c8_i32_16 = arith.constant 8 : i32
    %48 = arith.muli %c1_i32, %c8_i32_16 : i32
    %49 = tpu.assume_multiple %48, 8 : i32
    %50 = arith.index_cast %49 : i32 to index
    %c0_17 = arith.constant 0 : index
    %51 = vector.load %arg12[%50, %c0_17] : memref<128x1024xf32, #tpu.memory_space<vmem>>, vector<8x1024xf32>
    %52 = arith.truncf %47 : vector<8x256xf32> to vector<8x256xbf16>
    %c0_18 = arith.constant 0 : index
    %c0_19 = arith.constant 0 : index
    %53 = vector.load %arg3[%c0_18, %c0_19] : memref<256x1024xbf16, #tpu.memory_space<vmem>>, vector<256x1024xbf16>
    %cst_20 = arith.constant dense<0.000000e+00> : vector<8x1024xf32>
    %54 = tpu.matmul %52, %53, %cst_20 {dimension_numbers = #tpu.dot_dimension_numbers<[1], [0], [0], [1], [0, 0, 1, 1], [], []>} : vector<8x256xbf16>, vector<256x1024xbf16>, vector<8x1024xf32> -> vector<8x1024xf32>
    %55 = arith.addf %51, %54 : vector<8x1024xf32>
    %56 = vector.extract_strided_slice %55 {offsets = [0, 0], sizes = [8, 256], strides = [1, 1]} : vector<8x1024xf32> to vector<8x256xf32>
    %57 = arith.negf %56 : vector<8x256xf32>
    %58 = math.exp %57 : vector<8x256xf32>
    %cst_21 = arith.constant 1.000000e+00 : f32
    %59 = vector.broadcast %cst_21 : f32 to vector<8x256xf32>
    %60 = arith.addf %59, %58 : vector<8x256xf32>
    %61 = arith.divf %59, %60 : vector<8x256xf32>
    %62 = vector.extract_strided_slice %55 {offsets = [0, 256], sizes = [8, 256], strides = [1, 1]} : vector<8x1024xf32> to vector<8x256xf32>
    %63 = arith.negf %62 : vector<8x256xf32>
    %64 = math.exp %63 : vector<8x256xf32>
    %cst_22 = arith.constant 1.000000e+00 : f32
    %65 = vector.broadcast %cst_22 : f32 to vector<8x256xf32>
    %66 = arith.addf %65, %64 : vector<8x256xf32>
    %67 = arith.divf %65, %66 : vector<8x256xf32>
    %68 = vector.extract_strided_slice %55 {offsets = [0, 512], sizes = [8, 256], strides = [1, 1]} : vector<8x1024xf32> to vector<8x256xf32>
    %69 = math.tanh %68 : vector<8x256xf32>
    %70 = vector.extract_strided_slice %55 {offsets = [0, 768], sizes = [8, 256], strides = [1, 1]} : vector<8x1024xf32> to vector<8x256xf32>
    %71 = arith.negf %70 : vector<8x256xf32>
    %72 = math.exp %71 : vector<8x256xf32>
    %cst_23 = arith.constant 1.000000e+00 : f32
    %73 = vector.broadcast %cst_23 : f32 to vector<8x256xf32>
    %74 = arith.addf %73, %72 : vector<8x256xf32>
    %75 = arith.divf %73, %74 : vector<8x256xf32>
    %76 = arith.mulf %67, %45 : vector<8x256xf32>
    %77 = arith.mulf %61, %69 : vector<8x256xf32>
    %78 = arith.addf %76, %77 : vector<8x256xf32>
    %79 = math.tanh %78 : vector<8x256xf32>
    %80 = arith.mulf %75, %79 : vector<8x256xf32>
    %c2_i32 = arith.constant 2 : i32
    %c8_i32_24 = arith.constant 8 : i32
    %81 = arith.muli %c2_i32, %c8_i32_24 : i32
    %82 = tpu.assume_multiple %81, 8 : i32
    %83 = arith.index_cast %82 : i32 to index
    %c0_25 = arith.constant 0 : index
    %84 = vector.load %arg12[%83, %c0_25] : memref<128x1024xf32, #tpu.memory_space<vmem>>, vector<8x1024xf32>
    %85 = arith.truncf %80 : vector<8x256xf32> to vector<8x256xbf16>
    %c0_26 = arith.constant 0 : index
    %c0_27 = arith.constant 0 : index
    %86 = vector.load %arg3[%c0_26, %c0_27] : memref<256x1024xbf16, #tpu.memory_space<vmem>>, vector<256x1024xbf16>
    %cst_28 = arith.constant dense<0.000000e+00> : vector<8x1024xf32>
    %87 = tpu.matmul %85, %86, %cst_28 {dimension_numbers = #tpu.dot_dimension_numbers<[1], [0], [0], [1], [0, 0, 1, 1], [], []>} : vector<8x256xbf16>, vector<256x1024xbf16>, vector<8x1024xf32> -> vector<8x1024xf32>
    %88 = arith.addf %84, %87 : vector<8x1024xf32>
    %89 = vector.extract_strided_slice %88 {offsets = [0, 0], sizes = [8, 256], strides = [1, 1]} : vector<8x1024xf32> to vector<8x256xf32>
    %90 = arith.negf %89 : vector<8x256xf32>
    %91 = math.exp %90 : vector<8x256xf32>
    %cst_29 = arith.constant 1.000000e+00 : f32
    %92 = vector.broadcast %cst_29 : f32 to vector<8x256xf32>
    %93 = arith.addf %92, %91 : vector<8x256xf32>
    %94 = arith.divf %92, %93 : vector<8x256xf32>
    %95 = vector.extract_strided_slice %88 {offsets = [0, 256], sizes = [8, 256], strides = [1, 1]} : vector<8x1024xf32> to vector<8x256xf32>
    %96 = arith.negf %95 : vector<8x256xf32>
    %97 = math.exp %96 : vector<8x256xf32>
    %cst_30 = arith.constant 1.000000e+00 : f32
    %98 = vector.broadcast %cst_30 : f32 to vector<8x256xf32>
    %99 = arith.addf %98, %97 : vector<8x256xf32>
    %100 = arith.divf %98, %99 : vector<8x256xf32>
    %101 = vector.extract_strided_slice %88 {offsets = [0, 512], sizes = [8, 256], strides = [1, 1]} : vector<8x1024xf32> to vector<8x256xf32>
    %102 = math.tanh %101 : vector<8x256xf32>
    %103 = vector.extract_strided_slice %88 {offsets = [0, 768], sizes = [8, 256], strides = [1, 1]} : vector<8x1024xf32> to vector<8x256xf32>
    %104 = arith.negf %103 : vector<8x256xf32>
    %105 = math.exp %104 : vector<8x256xf32>
    %cst_31 = arith.constant 1.000000e+00 : f32
    %106 = vector.broadcast %cst_31 : f32 to vector<8x256xf32>
    %107 = arith.addf %106, %105 : vector<8x256xf32>
    %108 = arith.divf %106, %107 : vector<8x256xf32>
    %109 = arith.mulf %100, %78 : vector<8x256xf32>
    %110 = arith.mulf %94, %102 : vector<8x256xf32>
    %111 = arith.addf %109, %110 : vector<8x256xf32>
    %112 = math.tanh %111 : vector<8x256xf32>
    %113 = arith.mulf %108, %112 : vector<8x256xf32>
    %c3_i32 = arith.constant 3 : i32
    %c8_i32_32 = arith.constant 8 : i32
    %114 = arith.muli %c3_i32, %c8_i32_32 : i32
    %115 = tpu.assume_multiple %114, 8 : i32
    %116 = arith.index_cast %115 : i32 to index
    %c0_33 = arith.constant 0 : index
    %117 = vector.load %arg12[%116, %c0_33] : memref<128x1024xf32, #tpu.memory_space<vmem>>, vector<8x1024xf32>
    %118 = arith.truncf %113 : vector<8x256xf32> to vector<8x256xbf16>
    %c0_34 = arith.constant 0 : index
    %c0_35 = arith.constant 0 : index
    %119 = vector.load %arg3[%c0_34, %c0_35] : memref<256x1024xbf16, #tpu.memory_space<vmem>>, vector<256x1024xbf16>
    %cst_36 = arith.constant dense<0.000000e+00> : vector<8x1024xf32>
    %120 = tpu.matmul %118, %119, %cst_36 {dimension_numbers = #tpu.dot_dimension_numbers<[1], [0], [0], [1], [0, 0, 1, 1], [], []>} : vector<8x256xbf16>, vector<256x1024xbf16>, vector<8x1024xf32> -> vector<8x1024xf32>
    %121 = arith.addf %117, %120 : vector<8x1024xf32>
    %122 = vector.extract_strided_slice %121 {offsets = [0, 0], sizes = [8, 256], strides = [1, 1]} : vector<8x1024xf32> to vector<8x256xf32>
    %123 = arith.negf %122 : vector<8x256xf32>
    %124 = math.exp %123 : vector<8x256xf32>
    %cst_37 = arith.constant 1.000000e+00 : f32
    %125 = vector.broadcast %cst_37 : f32 to vector<8x256xf32>
    %126 = arith.addf %125, %124 : vector<8x256xf32>
    %127 = arith.divf %125, %126 : vector<8x256xf32>
    %128 = vector.extract_strided_slice %121 {offsets = [0, 256], sizes = [8, 256], strides = [1, 1]} : vector<8x1024xf32> to vector<8x256xf32>
    %129 = arith.negf %128 : vector<8x256xf32>
    %130 = math.exp %129 : vector<8x256xf32>
    %cst_38 = arith.constant 1.000000e+00 : f32
    %131 = vector.broadcast %cst_38 : f32 to vector<8x256xf32>
    %132 = arith.addf %131, %130 : vector<8x256xf32>
    %133 = arith.divf %131, %132 : vector<8x256xf32>
    %134 = vector.extract_strided_slice %121 {offsets = [0, 512], sizes = [8, 256], strides = [1, 1]} : vector<8x1024xf32> to vector<8x256xf32>
    %135 = math.tanh %134 : vector<8x256xf32>
    %136 = vector.extract_strided_slice %121 {offsets = [0, 768], sizes = [8, 256], strides = [1, 1]} : vector<8x1024xf32> to vector<8x256xf32>
    %137 = arith.negf %136 : vector<8x256xf32>
    %138 = math.exp %137 : vector<8x256xf32>
    %cst_39 = arith.constant 1.000000e+00 : f32
    %139 = vector.broadcast %cst_39 : f32 to vector<8x256xf32>
    %140 = arith.addf %139, %138 : vector<8x256xf32>
    %141 = arith.divf %139, %140 : vector<8x256xf32>
    %142 = arith.mulf %133, %111 : vector<8x256xf32>
    %143 = arith.mulf %127, %135 : vector<8x256xf32>
    %144 = arith.addf %142, %143 : vector<8x256xf32>
    %145 = math.tanh %144 : vector<8x256xf32>
    %146 = arith.mulf %141, %145 : vector<8x256xf32>
    %c4_i32 = arith.constant 4 : i32
    %c8_i32_40 = arith.constant 8 : i32
    %147 = arith.muli %c4_i32, %c8_i32_40 : i32
    %148 = tpu.assume_multiple %147, 8 : i32
    %149 = arith.index_cast %148 : i32 to index
    %c0_41 = arith.constant 0 : index
    %150 = vector.load %arg12[%149, %c0_41] : memref<128x1024xf32, #tpu.memory_space<vmem>>, vector<8x1024xf32>
    %151 = arith.truncf %146 : vector<8x256xf32> to vector<8x256xbf16>
    %c0_42 = arith.constant 0 : index
    %c0_43 = arith.constant 0 : index
    %152 = vector.load %arg3[%c0_42, %c0_43] : memref<256x1024xbf16, #tpu.memory_space<vmem>>, vector<256x1024xbf16>
    %cst_44 = arith.constant dense<0.000000e+00> : vector<8x1024xf32>
    %153 = tpu.matmul %151, %152, %cst_44 {dimension_numbers = #tpu.dot_dimension_numbers<[1], [0], [0], [1], [0, 0, 1, 1], [], []>} : vector<8x256xbf16>, vector<256x1024xbf16>, vector<8x1024xf32> -> vector<8x1024xf32>
    %154 = arith.addf %150, %153 : vector<8x1024xf32>
    %155 = vector.extract_strided_slice %154 {offsets = [0, 0], sizes = [8, 256], strides = [1, 1]} : vector<8x1024xf32> to vector<8x256xf32>
    %156 = arith.negf %155 : vector<8x256xf32>
    %157 = math.exp %156 : vector<8x256xf32>
    %cst_45 = arith.constant 1.000000e+00 : f32
    %158 = vector.broadcast %cst_45 : f32 to vector<8x256xf32>
    %159 = arith.addf %158, %157 : vector<8x256xf32>
    %160 = arith.divf %158, %159 : vector<8x256xf32>
    %161 = vector.extract_strided_slice %154 {offsets = [0, 256], sizes = [8, 256], strides = [1, 1]} : vector<8x1024xf32> to vector<8x256xf32>
    %162 = arith.negf %161 : vector<8x256xf32>
    %163 = math.exp %162 : vector<8x256xf32>
    %cst_46 = arith.constant 1.000000e+00 : f32
    %164 = vector.broadcast %cst_46 : f32 to vector<8x256xf32>
    %165 = arith.addf %164, %163 : vector<8x256xf32>
    %166 = arith.divf %164, %165 : vector<8x256xf32>
    %167 = vector.extract_strided_slice %154 {offsets = [0, 512], sizes = [8, 256], strides = [1, 1]} : vector<8x1024xf32> to vector<8x256xf32>
    %168 = math.tanh %167 : vector<8x256xf32>
    %169 = vector.extract_strided_slice %154 {offsets = [0, 768], sizes = [8, 256], strides = [1, 1]} : vector<8x1024xf32> to vector<8x256xf32>
    %170 = arith.negf %169 : vector<8x256xf32>
    %171 = math.exp %170 : vector<8x256xf32>
    %cst_47 = arith.constant 1.000000e+00 : f32
    %172 = vector.broadcast %cst_47 : f32 to vector<8x256xf32>
    %173 = arith.addf %172, %171 : vector<8x256xf32>
    %174 = arith.divf %172, %173 : vector<8x256xf32>
    %175 = arith.mulf %166, %144 : vector<8x256xf32>
    %176 = arith.mulf %160, %168 : vector<8x256xf32>
    %177 = arith.addf %175, %176 : vector<8x256xf32>
    %178 = math.tanh %177 : vector<8x256xf32>
    %179 = arith.mulf %174, %178 : vector<8x256xf32>
    %c5_i32 = arith.constant 5 : i32
    %c8_i32_48 = arith.constant 8 : i32
    %180 = arith.muli %c5_i32, %c8_i32_48 : i32
    %181 = tpu.assume_multiple %180, 8 : i32
    %182 = arith.index_cast %181 : i32 to index
    %c0_49 = arith.constant 0 : index
    %183 = vector.load %arg12[%182, %c0_49] : memref<128x1024xf32, #tpu.memory_space<vmem>>, vector<8x1024xf32>
    %184 = arith.truncf %179 : vector<8x256xf32> to vector<8x256xbf16>
    %c0_50 = arith.constant 0 : index
    %c0_51 = arith.constant 0 : index
    %185 = vector.load %arg3[%c0_50, %c0_51] : memref<256x1024xbf16, #tpu.memory_space<vmem>>, vector<256x1024xbf16>
    %cst_52 = arith.constant dense<0.000000e+00> : vector<8x1024xf32>
    %186 = tpu.matmul %184, %185, %cst_52 {dimension_numbers = #tpu.dot_dimension_numbers<[1], [0], [0], [1], [0, 0, 1, 1], [], []>} : vector<8x256xbf16>, vector<256x1024xbf16>, vector<8x1024xf32> -> vector<8x1024xf32>
    %187 = arith.addf %183, %186 : vector<8x1024xf32>
    %188 = vector.extract_strided_slice %187 {offsets = [0, 0], sizes = [8, 256], strides = [1, 1]} : vector<8x1024xf32> to vector<8x256xf32>
    %189 = arith.negf %188 : vector<8x256xf32>
    %190 = math.exp %189 : vector<8x256xf32>
    %cst_53 = arith.constant 1.000000e+00 : f32
    %191 = vector.broadcast %cst_53 : f32 to vector<8x256xf32>
    %192 = arith.addf %191, %190 : vector<8x256xf32>
    %193 = arith.divf %191, %192 : vector<8x256xf32>
    %194 = vector.extract_strided_slice %187 {offsets = [0, 256], sizes = [8, 256], strides = [1, 1]} : vector<8x1024xf32> to vector<8x256xf32>
    %195 = arith.negf %194 : vector<8x256xf32>
    %196 = math.exp %195 : vector<8x256xf32>
    %cst_54 = arith.constant 1.000000e+00 : f32
    %197 = vector.broadcast %cst_54 : f32 to vector<8x256xf32>
    %198 = arith.addf %197, %196 : vector<8x256xf32>
    %199 = arith.divf %197, %198 : vector<8x256xf32>
    %200 = vector.extract_strided_slice %187 {offsets = [0, 512], sizes = [8, 256], strides = [1, 1]} : vector<8x1024xf32> to vector<8x256xf32>
    %201 = math.tanh %200 : vector<8x256xf32>
    %202 = vector.extract_strided_slice %187 {offsets = [0, 768], sizes = [8, 256], strides = [1, 1]} : vector<8x1024xf32> to vector<8x256xf32>
    %203 = arith.negf %202 : vector<8x256xf32>
    %204 = math.exp %203 : vector<8x256xf32>
    %cst_55 = arith.constant 1.000000e+00 : f32
    %205 = vector.broadcast %cst_55 : f32 to vector<8x256xf32>
    %206 = arith.addf %205, %204 : vector<8x256xf32>
    %207 = arith.divf %205, %206 : vector<8x256xf32>
    %208 = arith.mulf %199, %177 : vector<8x256xf32>
    %209 = arith.mulf %193, %201 : vector<8x256xf32>
    %210 = arith.addf %208, %209 : vector<8x256xf32>
    %211 = math.tanh %210 : vector<8x256xf32>
    %212 = arith.mulf %207, %211 : vector<8x256xf32>
    %c6_i32 = arith.constant 6 : i32
    %c8_i32_56 = arith.constant 8 : i32
    %213 = arith.muli %c6_i32, %c8_i32_56 : i32
    %214 = tpu.assume_multiple %213, 8 : i32
    %215 = arith.index_cast %214 : i32 to index
    %c0_57 = arith.constant 0 : index
    %216 = vector.load %arg12[%215, %c0_57] : memref<128x1024xf32, #tpu.memory_space<vmem>>, vector<8x1024xf32>
    %217 = arith.truncf %212 : vector<8x256xf32> to vector<8x256xbf16>
    %c0_58 = arith.constant 0 : index
    %c0_59 = arith.constant 0 : index
    %218 = vector.load %arg3[%c0_58, %c0_59] : memref<256x1024xbf16, #tpu.memory_space<vmem>>, vector<256x1024xbf16>
    %cst_60 = arith.constant dense<0.000000e+00> : vector<8x1024xf32>
    %219 = tpu.matmul %217, %218, %cst_60 {dimension_numbers = #tpu.dot_dimension_numbers<[1], [0], [0], [1], [0, 0, 1, 1], [], []>} : vector<8x256xbf16>, vector<256x1024xbf16>, vector<8x1024xf32> -> vector<8x1024xf32>
    %220 = arith.addf %216, %219 : vector<8x1024xf32>
    %221 = vector.extract_strided_slice %220 {offsets = [0, 0], sizes = [8, 256], strides = [1, 1]} : vector<8x1024xf32> to vector<8x256xf32>
    %222 = arith.negf %221 : vector<8x256xf32>
    %223 = math.exp %222 : vector<8x256xf32>
    %cst_61 = arith.constant 1.000000e+00 : f32
    %224 = vector.broadcast %cst_61 : f32 to vector<8x256xf32>
    %225 = arith.addf %224, %223 : vector<8x256xf32>
    %226 = arith.divf %224, %225 : vector<8x256xf32>
    %227 = vector.extract_strided_slice %220 {offsets = [0, 256], sizes = [8, 256], strides = [1, 1]} : vector<8x1024xf32> to vector<8x256xf32>
    %228 = arith.negf %227 : vector<8x256xf32>
    %229 = math.exp %228 : vector<8x256xf32>
    %cst_62 = arith.constant 1.000000e+00 : f32
    %230 = vector.broadcast %cst_62 : f32 to vector<8x256xf32>
    %231 = arith.addf %230, %229 : vector<8x256xf32>
    %232 = arith.divf %230, %231 : vector<8x256xf32>
    %233 = vector.extract_strided_slice %220 {offsets = [0, 512], sizes = [8, 256], strides = [1, 1]} : vector<8x1024xf32> to vector<8x256xf32>
    %234 = math.tanh %233 : vector<8x256xf32>
    %235 = vector.extract_strided_slice %220 {offsets = [0, 768], sizes = [8, 256], strides = [1, 1]} : vector<8x1024xf32> to vector<8x256xf32>
    %236 = arith.negf %235 : vector<8x256xf32>
    %237 = math.exp %236 : vector<8x256xf32>
    %cst_63 = arith.constant 1.000000e+00 : f32
    %238 = vector.broadcast %cst_63 : f32 to vector<8x256xf32>
    %239 = arith.addf %238, %237 : vector<8x256xf32>
    %240 = arith.divf %238, %239 : vector<8x256xf32>
    %241 = arith.mulf %232, %210 : vector<8x256xf32>
    %242 = arith.mulf %226, %234 : vector<8x256xf32>
    %243 = arith.addf %241, %242 : vector<8x256xf32>
    %244 = math.tanh %243 : vector<8x256xf32>
    %245 = arith.mulf %240, %244 : vector<8x256xf32>
    %c7_i32 = arith.constant 7 : i32
    %c8_i32_64 = arith.constant 8 : i32
    %246 = arith.muli %c7_i32, %c8_i32_64 : i32
    %247 = tpu.assume_multiple %246, 8 : i32
    %248 = arith.index_cast %247 : i32 to index
    %c0_65 = arith.constant 0 : index
    %249 = vector.load %arg12[%248, %c0_65] : memref<128x1024xf32, #tpu.memory_space<vmem>>, vector<8x1024xf32>
    %250 = arith.truncf %245 : vector<8x256xf32> to vector<8x256xbf16>
    %c0_66 = arith.constant 0 : index
    %c0_67 = arith.constant 0 : index
    %251 = vector.load %arg3[%c0_66, %c0_67] : memref<256x1024xbf16, #tpu.memory_space<vmem>>, vector<256x1024xbf16>
    %cst_68 = arith.constant dense<0.000000e+00> : vector<8x1024xf32>
    %252 = tpu.matmul %250, %251, %cst_68 {dimension_numbers = #tpu.dot_dimension_numbers<[1], [0], [0], [1], [0, 0, 1, 1], [], []>} : vector<8x256xbf16>, vector<256x1024xbf16>, vector<8x1024xf32> -> vector<8x1024xf32>
    %253 = arith.addf %249, %252 : vector<8x1024xf32>
    %254 = vector.extract_strided_slice %253 {offsets = [0, 0], sizes = [8, 256], strides = [1, 1]} : vector<8x1024xf32> to vector<8x256xf32>
    %255 = arith.negf %254 : vector<8x256xf32>
    %256 = math.exp %255 : vector<8x256xf32>
    %cst_69 = arith.constant 1.000000e+00 : f32
    %257 = vector.broadcast %cst_69 : f32 to vector<8x256xf32>
    %258 = arith.addf %257, %256 : vector<8x256xf32>
    %259 = arith.divf %257, %258 : vector<8x256xf32>
    %260 = vector.extract_strided_slice %253 {offsets = [0, 256], sizes = [8, 256], strides = [1, 1]} : vector<8x1024xf32> to vector<8x256xf32>
    %261 = arith.negf %260 : vector<8x256xf32>
    %262 = math.exp %261 : vector<8x256xf32>
    %cst_70 = arith.constant 1.000000e+00 : f32
    %263 = vector.broadcast %cst_70 : f32 to vector<8x256xf32>
    %264 = arith.addf %263, %262 : vector<8x256xf32>
    %265 = arith.divf %263, %264 : vector<8x256xf32>
    %266 = vector.extract_strided_slice %253 {offsets = [0, 512], sizes = [8, 256], strides = [1, 1]} : vector<8x1024xf32> to vector<8x256xf32>
    %267 = math.tanh %266 : vector<8x256xf32>
    %268 = vector.extract_strided_slice %253 {offsets = [0, 768], sizes = [8, 256], strides = [1, 1]} : vector<8x1024xf32> to vector<8x256xf32>
    %269 = arith.negf %268 : vector<8x256xf32>
    %270 = math.exp %269 : vector<8x256xf32>
    %cst_71 = arith.constant 1.000000e+00 : f32
    %271 = vector.broadcast %cst_71 : f32 to vector<8x256xf32>
    %272 = arith.addf %271, %270 : vector<8x256xf32>
    %273 = arith.divf %271, %272 : vector<8x256xf32>
    %274 = arith.mulf %265, %243 : vector<8x256xf32>
    %275 = arith.mulf %259, %267 : vector<8x256xf32>
    %276 = arith.addf %274, %275 : vector<8x256xf32>
    %277 = math.tanh %276 : vector<8x256xf32>
    %278 = arith.mulf %273, %277 : vector<8x256xf32>
    %c8_i32_72 = arith.constant 8 : i32
    %c8_i32_73 = arith.constant 8 : i32
    %279 = arith.muli %c8_i32_72, %c8_i32_73 : i32
    %280 = tpu.assume_multiple %279, 8 : i32
    %281 = arith.index_cast %280 : i32 to index
    %c0_74 = arith.constant 0 : index
    %282 = vector.load %arg12[%281, %c0_74] : memref<128x1024xf32, #tpu.memory_space<vmem>>, vector<8x1024xf32>
    %283 = arith.truncf %278 : vector<8x256xf32> to vector<8x256xbf16>
    %c0_75 = arith.constant 0 : index
    %c0_76 = arith.constant 0 : index
    %284 = vector.load %arg3[%c0_75, %c0_76] : memref<256x1024xbf16, #tpu.memory_space<vmem>>, vector<256x1024xbf16>
    %cst_77 = arith.constant dense<0.000000e+00> : vector<8x1024xf32>
    %285 = tpu.matmul %283, %284, %cst_77 {dimension_numbers = #tpu.dot_dimension_numbers<[1], [0], [0], [1], [0, 0, 1, 1], [], []>} : vector<8x256xbf16>, vector<256x1024xbf16>, vector<8x1024xf32> -> vector<8x1024xf32>
    %286 = arith.addf %282, %285 : vector<8x1024xf32>
    %287 = vector.extract_strided_slice %286 {offsets = [0, 0], sizes = [8, 256], strides = [1, 1]} : vector<8x1024xf32> to vector<8x256xf32>
    %288 = arith.negf %287 : vector<8x256xf32>
    %289 = math.exp %288 : vector<8x256xf32>
    %cst_78 = arith.constant 1.000000e+00 : f32
    %290 = vector.broadcast %cst_78 : f32 to vector<8x256xf32>
    %291 = arith.addf %290, %289 : vector<8x256xf32>
    %292 = arith.divf %290, %291 : vector<8x256xf32>
    %293 = vector.extract_strided_slice %286 {offsets = [0, 256], sizes = [8, 256], strides = [1, 1]} : vector<8x1024xf32> to vector<8x256xf32>
    %294 = arith.negf %293 : vector<8x256xf32>
    %295 = math.exp %294 : vector<8x256xf32>
    %cst_79 = arith.constant 1.000000e+00 : f32
    %296 = vector.broadcast %cst_79 : f32 to vector<8x256xf32>
    %297 = arith.addf %296, %295 : vector<8x256xf32>
    %298 = arith.divf %296, %297 : vector<8x256xf32>
    %299 = vector.extract_strided_slice %286 {offsets = [0, 512], sizes = [8, 256], strides = [1, 1]} : vector<8x1024xf32> to vector<8x256xf32>
    %300 = math.tanh %299 : vector<8x256xf32>
    %301 = vector.extract_strided_slice %286 {offsets = [0, 768], sizes = [8, 256], strides = [1, 1]} : vector<8x1024xf32> to vector<8x256xf32>
    %302 = arith.negf %301 : vector<8x256xf32>
    %303 = math.exp %302 : vector<8x256xf32>
    %cst_80 = arith.constant 1.000000e+00 : f32
    %304 = vector.broadcast %cst_80 : f32 to vector<8x256xf32>
    %305 = arith.addf %304, %303 : vector<8x256xf32>
    %306 = arith.divf %304, %305 : vector<8x256xf32>
    %307 = arith.mulf %298, %276 : vector<8x256xf32>
    %308 = arith.mulf %292, %300 : vector<8x256xf32>
    %309 = arith.addf %307, %308 : vector<8x256xf32>
    %310 = math.tanh %309 : vector<8x256xf32>
    %311 = arith.mulf %306, %310 : vector<8x256xf32>
    %c9_i32 = arith.constant 9 : i32
    %c8_i32_81 = arith.constant 8 : i32
    %312 = arith.muli %c9_i32, %c8_i32_81 : i32
    %313 = tpu.assume_multiple %312, 8 : i32
    %314 = arith.index_cast %313 : i32 to index
    %c0_82 = arith.constant 0 : index
    %315 = vector.load %arg12[%314, %c0_82] : memref<128x1024xf32, #tpu.memory_space<vmem>>, vector<8x1024xf32>
    %316 = arith.truncf %311 : vector<8x256xf32> to vector<8x256xbf16>
    %c0_83 = arith.constant 0 : index
    %c0_84 = arith.constant 0 : index
    %317 = vector.load %arg3[%c0_83, %c0_84] : memref<256x1024xbf16, #tpu.memory_space<vmem>>, vector<256x1024xbf16>
    %cst_85 = arith.constant dense<0.000000e+00> : vector<8x1024xf32>
    %318 = tpu.matmul %316, %317, %cst_85 {dimension_numbers = #tpu.dot_dimension_numbers<[1], [0], [0], [1], [0, 0, 1, 1], [], []>} : vector<8x256xbf16>, vector<256x1024xbf16>, vector<8x1024xf32> -> vector<8x1024xf32>
    %319 = arith.addf %315, %318 : vector<8x1024xf32>
    %320 = vector.extract_strided_slice %319 {offsets = [0, 0], sizes = [8, 256], strides = [1, 1]} : vector<8x1024xf32> to vector<8x256xf32>
    %321 = arith.negf %320 : vector<8x256xf32>
    %322 = math.exp %321 : vector<8x256xf32>
    %cst_86 = arith.constant 1.000000e+00 : f32
    %323 = vector.broadcast %cst_86 : f32 to vector<8x256xf32>
    %324 = arith.addf %323, %322 : vector<8x256xf32>
    %325 = arith.divf %323, %324 : vector<8x256xf32>
    %326 = vector.extract_strided_slice %319 {offsets = [0, 256], sizes = [8, 256], strides = [1, 1]} : vector<8x1024xf32> to vector<8x256xf32>
    %327 = arith.negf %326 : vector<8x256xf32>
    %328 = math.exp %327 : vector<8x256xf32>
    %cst_87 = arith.constant 1.000000e+00 : f32
    %329 = vector.broadcast %cst_87 : f32 to vector<8x256xf32>
    %330 = arith.addf %329, %328 : vector<8x256xf32>
    %331 = arith.divf %329, %330 : vector<8x256xf32>
    %332 = vector.extract_strided_slice %319 {offsets = [0, 512], sizes = [8, 256], strides = [1, 1]} : vector<8x1024xf32> to vector<8x256xf32>
    %333 = math.tanh %332 : vector<8x256xf32>
    %334 = vector.extract_strided_slice %319 {offsets = [0, 768], sizes = [8, 256], strides = [1, 1]} : vector<8x1024xf32> to vector<8x256xf32>
    %335 = arith.negf %334 : vector<8x256xf32>
    %336 = math.exp %335 : vector<8x256xf32>
    %cst_88 = arith.constant 1.000000e+00 : f32
    %337 = vector.broadcast %cst_88 : f32 to vector<8x256xf32>
    %338 = arith.addf %337, %336 : vector<8x256xf32>
    %339 = arith.divf %337, %338 : vector<8x256xf32>
    %340 = arith.mulf %331, %309 : vector<8x256xf32>
    %341 = arith.mulf %325, %333 : vector<8x256xf32>
    %342 = arith.addf %340, %341 : vector<8x256xf32>
    %343 = math.tanh %342 : vector<8x256xf32>
    %344 = arith.mulf %339, %343 : vector<8x256xf32>
    %c10_i32 = arith.constant 10 : i32
    %c8_i32_89 = arith.constant 8 : i32
    %345 = arith.muli %c10_i32, %c8_i32_89 : i32
    %346 = tpu.assume_multiple %345, 8 : i32
    %347 = arith.index_cast %346 : i32 to index
    %c0_90 = arith.constant 0 : index
    %348 = vector.load %arg12[%347, %c0_90] : memref<128x1024xf32, #tpu.memory_space<vmem>>, vector<8x1024xf32>
    %349 = arith.truncf %344 : vector<8x256xf32> to vector<8x256xbf16>
    %c0_91 = arith.constant 0 : index
    %c0_92 = arith.constant 0 : index
    %350 = vector.load %arg3[%c0_91, %c0_92] : memref<256x1024xbf16, #tpu.memory_space<vmem>>, vector<256x1024xbf16>
    %cst_93 = arith.constant dense<0.000000e+00> : vector<8x1024xf32>
    %351 = tpu.matmul %349, %350, %cst_93 {dimension_numbers = #tpu.dot_dimension_numbers<[1], [0], [0], [1], [0, 0, 1, 1], [], []>} : vector<8x256xbf16>, vector<256x1024xbf16>, vector<8x1024xf32> -> vector<8x1024xf32>
    %352 = arith.addf %348, %351 : vector<8x1024xf32>
    %353 = vector.extract_strided_slice %352 {offsets = [0, 0], sizes = [8, 256], strides = [1, 1]} : vector<8x1024xf32> to vector<8x256xf32>
    %354 = arith.negf %353 : vector<8x256xf32>
    %355 = math.exp %354 : vector<8x256xf32>
    %cst_94 = arith.constant 1.000000e+00 : f32
    %356 = vector.broadcast %cst_94 : f32 to vector<8x256xf32>
    %357 = arith.addf %356, %355 : vector<8x256xf32>
    %358 = arith.divf %356, %357 : vector<8x256xf32>
    %359 = vector.extract_strided_slice %352 {offsets = [0, 256], sizes = [8, 256], strides = [1, 1]} : vector<8x1024xf32> to vector<8x256xf32>
    %360 = arith.negf %359 : vector<8x256xf32>
    %361 = math.exp %360 : vector<8x256xf32>
    %cst_95 = arith.constant 1.000000e+00 : f32
    %362 = vector.broadcast %cst_95 : f32 to vector<8x256xf32>
    %363 = arith.addf %362, %361 : vector<8x256xf32>
    %364 = arith.divf %362, %363 : vector<8x256xf32>
    %365 = vector.extract_strided_slice %352 {offsets = [0, 512], sizes = [8, 256], strides = [1, 1]} : vector<8x1024xf32> to vector<8x256xf32>
    %366 = math.tanh %365 : vector<8x256xf32>
    %367 = vector.extract_strided_slice %352 {offsets = [0, 768], sizes = [8, 256], strides = [1, 1]} : vector<8x1024xf32> to vector<8x256xf32>
    %368 = arith.negf %367 : vector<8x256xf32>
    %369 = math.exp %368 : vector<8x256xf32>
    %cst_96 = arith.constant 1.000000e+00 : f32
    %370 = vector.broadcast %cst_96 : f32 to vector<8x256xf32>
    %371 = arith.addf %370, %369 : vector<8x256xf32>
    %372 = arith.divf %370, %371 : vector<8x256xf32>
    %373 = arith.mulf %364, %342 : vector<8x256xf32>
    %374 = arith.mulf %358, %366 : vector<8x256xf32>
    %375 = arith.addf %373, %374 : vector<8x256xf32>
    %376 = math.tanh %375 : vector<8x256xf32>
    %377 = arith.mulf %372, %376 : vector<8x256xf32>
    %c11_i32 = arith.constant 11 : i32
    %c8_i32_97 = arith.constant 8 : i32
    %378 = arith.muli %c11_i32, %c8_i32_97 : i32
    %379 = tpu.assume_multiple %378, 8 : i32
    %380 = arith.index_cast %379 : i32 to index
    %c0_98 = arith.constant 0 : index
    %381 = vector.load %arg12[%380, %c0_98] : memref<128x1024xf32, #tpu.memory_space<vmem>>, vector<8x1024xf32>
    %382 = arith.truncf %377 : vector<8x256xf32> to vector<8x256xbf16>
    %c0_99 = arith.constant 0 : index
    %c0_100 = arith.constant 0 : index
    %383 = vector.load %arg3[%c0_99, %c0_100] : memref<256x1024xbf16, #tpu.memory_space<vmem>>, vector<256x1024xbf16>
    %cst_101 = arith.constant dense<0.000000e+00> : vector<8x1024xf32>
    %384 = tpu.matmul %382, %383, %cst_101 {dimension_numbers = #tpu.dot_dimension_numbers<[1], [0], [0], [1], [0, 0, 1, 1], [], []>} : vector<8x256xbf16>, vector<256x1024xbf16>, vector<8x1024xf32> -> vector<8x1024xf32>
    %385 = arith.addf %381, %384 : vector<8x1024xf32>
    %386 = vector.extract_strided_slice %385 {offsets = [0, 0], sizes = [8, 256], strides = [1, 1]} : vector<8x1024xf32> to vector<8x256xf32>
    %387 = arith.negf %386 : vector<8x256xf32>
    %388 = math.exp %387 : vector<8x256xf32>
    %cst_102 = arith.constant 1.000000e+00 : f32
    %389 = vector.broadcast %cst_102 : f32 to vector<8x256xf32>
    %390 = arith.addf %389, %388 : vector<8x256xf32>
    %391 = arith.divf %389, %390 : vector<8x256xf32>
    %392 = vector.extract_strided_slice %385 {offsets = [0, 256], sizes = [8, 256], strides = [1, 1]} : vector<8x1024xf32> to vector<8x256xf32>
    %393 = arith.negf %392 : vector<8x256xf32>
    %394 = math.exp %393 : vector<8x256xf32>
    %cst_103 = arith.constant 1.000000e+00 : f32
    %395 = vector.broadcast %cst_103 : f32 to vector<8x256xf32>
    %396 = arith.addf %395, %394 : vector<8x256xf32>
    %397 = arith.divf %395, %396 : vector<8x256xf32>
    %398 = vector.extract_strided_slice %385 {offsets = [0, 512], sizes = [8, 256], strides = [1, 1]} : vector<8x1024xf32> to vector<8x256xf32>
    %399 = math.tanh %398 : vector<8x256xf32>
    %400 = vector.extract_strided_slice %385 {offsets = [0, 768], sizes = [8, 256], strides = [1, 1]} : vector<8x1024xf32> to vector<8x256xf32>
    %401 = arith.negf %400 : vector<8x256xf32>
    %402 = math.exp %401 : vector<8x256xf32>
    %cst_104 = arith.constant 1.000000e+00 : f32
    %403 = vector.broadcast %cst_104 : f32 to vector<8x256xf32>
    %404 = arith.addf %403, %402 : vector<8x256xf32>
    %405 = arith.divf %403, %404 : vector<8x256xf32>
    %406 = arith.mulf %397, %375 : vector<8x256xf32>
    %407 = arith.mulf %391, %399 : vector<8x256xf32>
    %408 = arith.addf %406, %407 : vector<8x256xf32>
    %409 = math.tanh %408 : vector<8x256xf32>
    %410 = arith.mulf %405, %409 : vector<8x256xf32>
    %c12_i32 = arith.constant 12 : i32
    %c8_i32_105 = arith.constant 8 : i32
    %411 = arith.muli %c12_i32, %c8_i32_105 : i32
    %412 = tpu.assume_multiple %411, 8 : i32
    %413 = arith.index_cast %412 : i32 to index
    %c0_106 = arith.constant 0 : index
    %414 = vector.load %arg12[%413, %c0_106] : memref<128x1024xf32, #tpu.memory_space<vmem>>, vector<8x1024xf32>
    %415 = arith.truncf %410 : vector<8x256xf32> to vector<8x256xbf16>
    %c0_107 = arith.constant 0 : index
    %c0_108 = arith.constant 0 : index
    %416 = vector.load %arg3[%c0_107, %c0_108] : memref<256x1024xbf16, #tpu.memory_space<vmem>>, vector<256x1024xbf16>
    %cst_109 = arith.constant dense<0.000000e+00> : vector<8x1024xf32>
    %417 = tpu.matmul %415, %416, %cst_109 {dimension_numbers = #tpu.dot_dimension_numbers<[1], [0], [0], [1], [0, 0, 1, 1], [], []>} : vector<8x256xbf16>, vector<256x1024xbf16>, vector<8x1024xf32> -> vector<8x1024xf32>
    %418 = arith.addf %414, %417 : vector<8x1024xf32>
    %419 = vector.extract_strided_slice %418 {offsets = [0, 0], sizes = [8, 256], strides = [1, 1]} : vector<8x1024xf32> to vector<8x256xf32>
    %420 = arith.negf %419 : vector<8x256xf32>
    %421 = math.exp %420 : vector<8x256xf32>
    %cst_110 = arith.constant 1.000000e+00 : f32
    %422 = vector.broadcast %cst_110 : f32 to vector<8x256xf32>
    %423 = arith.addf %422, %421 : vector<8x256xf32>
    %424 = arith.divf %422, %423 : vector<8x256xf32>
    %425 = vector.extract_strided_slice %418 {offsets = [0, 256], sizes = [8, 256], strides = [1, 1]} : vector<8x1024xf32> to vector<8x256xf32>
    %426 = arith.negf %425 : vector<8x256xf32>
    %427 = math.exp %426 : vector<8x256xf32>
    %cst_111 = arith.constant 1.000000e+00 : f32
    %428 = vector.broadcast %cst_111 : f32 to vector<8x256xf32>
    %429 = arith.addf %428, %427 : vector<8x256xf32>
    %430 = arith.divf %428, %429 : vector<8x256xf32>
    %431 = vector.extract_strided_slice %418 {offsets = [0, 512], sizes = [8, 256], strides = [1, 1]} : vector<8x1024xf32> to vector<8x256xf32>
    %432 = math.tanh %431 : vector<8x256xf32>
    %433 = vector.extract_strided_slice %418 {offsets = [0, 768], sizes = [8, 256], strides = [1, 1]} : vector<8x1024xf32> to vector<8x256xf32>
    %434 = arith.negf %433 : vector<8x256xf32>
    %435 = math.exp %434 : vector<8x256xf32>
    %cst_112 = arith.constant 1.000000e+00 : f32
    %436 = vector.broadcast %cst_112 : f32 to vector<8x256xf32>
    %437 = arith.addf %436, %435 : vector<8x256xf32>
    %438 = arith.divf %436, %437 : vector<8x256xf32>
    %439 = arith.mulf %430, %408 : vector<8x256xf32>
    %440 = arith.mulf %424, %432 : vector<8x256xf32>
    %441 = arith.addf %439, %440 : vector<8x256xf32>
    %442 = math.tanh %441 : vector<8x256xf32>
    %443 = arith.mulf %438, %442 : vector<8x256xf32>
    %c13_i32 = arith.constant 13 : i32
    %c8_i32_113 = arith.constant 8 : i32
    %444 = arith.muli %c13_i32, %c8_i32_113 : i32
    %445 = tpu.assume_multiple %444, 8 : i32
    %446 = arith.index_cast %445 : i32 to index
    %c0_114 = arith.constant 0 : index
    %447 = vector.load %arg12[%446, %c0_114] : memref<128x1024xf32, #tpu.memory_space<vmem>>, vector<8x1024xf32>
    %448 = arith.truncf %443 : vector<8x256xf32> to vector<8x256xbf16>
    %c0_115 = arith.constant 0 : index
    %c0_116 = arith.constant 0 : index
    %449 = vector.load %arg3[%c0_115, %c0_116] : memref<256x1024xbf16, #tpu.memory_space<vmem>>, vector<256x1024xbf16>
    %cst_117 = arith.constant dense<0.000000e+00> : vector<8x1024xf32>
    %450 = tpu.matmul %448, %449, %cst_117 {dimension_numbers = #tpu.dot_dimension_numbers<[1], [0], [0], [1], [0, 0, 1, 1], [], []>} : vector<8x256xbf16>, vector<256x1024xbf16>, vector<8x1024xf32> -> vector<8x1024xf32>
    %451 = arith.addf %447, %450 : vector<8x1024xf32>
    %452 = vector.extract_strided_slice %451 {offsets = [0, 0], sizes = [8, 256], strides = [1, 1]} : vector<8x1024xf32> to vector<8x256xf32>
    %453 = arith.negf %452 : vector<8x256xf32>
    %454 = math.exp %453 : vector<8x256xf32>
    %cst_118 = arith.constant 1.000000e+00 : f32
    %455 = vector.broadcast %cst_118 : f32 to vector<8x256xf32>
    %456 = arith.addf %455, %454 : vector<8x256xf32>
    %457 = arith.divf %455, %456 : vector<8x256xf32>
    %458 = vector.extract_strided_slice %451 {offsets = [0, 256], sizes = [8, 256], strides = [1, 1]} : vector<8x1024xf32> to vector<8x256xf32>
    %459 = arith.negf %458 : vector<8x256xf32>
    %460 = math.exp %459 : vector<8x256xf32>
    %cst_119 = arith.constant 1.000000e+00 : f32
    %461 = vector.broadcast %cst_119 : f32 to vector<8x256xf32>
    %462 = arith.addf %461, %460 : vector<8x256xf32>
    %463 = arith.divf %461, %462 : vector<8x256xf32>
    %464 = vector.extract_strided_slice %451 {offsets = [0, 512], sizes = [8, 256], strides = [1, 1]} : vector<8x1024xf32> to vector<8x256xf32>
    %465 = math.tanh %464 : vector<8x256xf32>
    %466 = vector.extract_strided_slice %451 {offsets = [0, 768], sizes = [8, 256], strides = [1, 1]} : vector<8x1024xf32> to vector<8x256xf32>
    %467 = arith.negf %466 : vector<8x256xf32>
    %468 = math.exp %467 : vector<8x256xf32>
    %cst_120 = arith.constant 1.000000e+00 : f32
    %469 = vector.broadcast %cst_120 : f32 to vector<8x256xf32>
    %470 = arith.addf %469, %468 : vector<8x256xf32>
    %471 = arith.divf %469, %470 : vector<8x256xf32>
    %472 = arith.mulf %463, %441 : vector<8x256xf32>
    %473 = arith.mulf %457, %465 : vector<8x256xf32>
    %474 = arith.addf %472, %473 : vector<8x256xf32>
    %475 = math.tanh %474 : vector<8x256xf32>
    %476 = arith.mulf %471, %475 : vector<8x256xf32>
    %c14_i32 = arith.constant 14 : i32
    %c8_i32_121 = arith.constant 8 : i32
    %477 = arith.muli %c14_i32, %c8_i32_121 : i32
    %478 = tpu.assume_multiple %477, 8 : i32
    %479 = arith.index_cast %478 : i32 to index
    %c0_122 = arith.constant 0 : index
    %480 = vector.load %arg12[%479, %c0_122] : memref<128x1024xf32, #tpu.memory_space<vmem>>, vector<8x1024xf32>
    %481 = arith.truncf %476 : vector<8x256xf32> to vector<8x256xbf16>
    %c0_123 = arith.constant 0 : index
    %c0_124 = arith.constant 0 : index
    %482 = vector.load %arg3[%c0_123, %c0_124] : memref<256x1024xbf16, #tpu.memory_space<vmem>>, vector<256x1024xbf16>
    %cst_125 = arith.constant dense<0.000000e+00> : vector<8x1024xf32>
    %483 = tpu.matmul %481, %482, %cst_125 {dimension_numbers = #tpu.dot_dimension_numbers<[1], [0], [0], [1], [0, 0, 1, 1], [], []>} : vector<8x256xbf16>, vector<256x1024xbf16>, vector<8x1024xf32> -> vector<8x1024xf32>
    %484 = arith.addf %480, %483 : vector<8x1024xf32>
    %485 = vector.extract_strided_slice %484 {offsets = [0, 0], sizes = [8, 256], strides = [1, 1]} : vector<8x1024xf32> to vector<8x256xf32>
    %486 = arith.negf %485 : vector<8x256xf32>
    %487 = math.exp %486 : vector<8x256xf32>
    %cst_126 = arith.constant 1.000000e+00 : f32
    %488 = vector.broadcast %cst_126 : f32 to vector<8x256xf32>
    %489 = arith.addf %488, %487 : vector<8x256xf32>
    %490 = arith.divf %488, %489 : vector<8x256xf32>
    %491 = vector.extract_strided_slice %484 {offsets = [0, 256], sizes = [8, 256], strides = [1, 1]} : vector<8x1024xf32> to vector<8x256xf32>
    %492 = arith.negf %491 : vector<8x256xf32>
    %493 = math.exp %492 : vector<8x256xf32>
    %cst_127 = arith.constant 1.000000e+00 : f32
    %494 = vector.broadcast %cst_127 : f32 to vector<8x256xf32>
    %495 = arith.addf %494, %493 : vector<8x256xf32>
    %496 = arith.divf %494, %495 : vector<8x256xf32>
    %497 = vector.extract_strided_slice %484 {offsets = [0, 512], sizes = [8, 256], strides = [1, 1]} : vector<8x1024xf32> to vector<8x256xf32>
    %498 = math.tanh %497 : vector<8x256xf32>
    %499 = vector.extract_strided_slice %484 {offsets = [0, 768], sizes = [8, 256], strides = [1, 1]} : vector<8x1024xf32> to vector<8x256xf32>
    %500 = arith.negf %499 : vector<8x256xf32>
    %501 = math.exp %500 : vector<8x256xf32>
    %cst_128 = arith.constant 1.000000e+00 : f32
    %502 = vector.broadcast %cst_128 : f32 to vector<8x256xf32>
    %503 = arith.addf %502, %501 : vector<8x256xf32>
    %504 = arith.divf %502, %503 : vector<8x256xf32>
    %505 = arith.mulf %496, %474 : vector<8x256xf32>
    %506 = arith.mulf %490, %498 : vector<8x256xf32>
    %507 = arith.addf %505, %506 : vector<8x256xf32>
    %508 = math.tanh %507 : vector<8x256xf32>
    %509 = arith.mulf %504, %508 : vector<8x256xf32>
    %c15_i32 = arith.constant 15 : i32
    %c8_i32_129 = arith.constant 8 : i32
    %510 = arith.muli %c15_i32, %c8_i32_129 : i32
    %511 = tpu.assume_multiple %510, 8 : i32
    %512 = arith.index_cast %511 : i32 to index
    %c0_130 = arith.constant 0 : index
    %513 = vector.load %arg12[%512, %c0_130] : memref<128x1024xf32, #tpu.memory_space<vmem>>, vector<8x1024xf32>
    %514 = arith.truncf %509 : vector<8x256xf32> to vector<8x256xbf16>
    %c0_131 = arith.constant 0 : index
    %c0_132 = arith.constant 0 : index
    %515 = vector.load %arg3[%c0_131, %c0_132] : memref<256x1024xbf16, #tpu.memory_space<vmem>>, vector<256x1024xbf16>
    %cst_133 = arith.constant dense<0.000000e+00> : vector<8x1024xf32>
    %516 = tpu.matmul %514, %515, %cst_133 {dimension_numbers = #tpu.dot_dimension_numbers<[1], [0], [0], [1], [0, 0, 1, 1], [], []>} : vector<8x256xbf16>, vector<256x1024xbf16>, vector<8x1024xf32> -> vector<8x1024xf32>
    %517 = arith.addf %513, %516 : vector<8x1024xf32>
    %518 = vector.extract_strided_slice %517 {offsets = [0, 0], sizes = [8, 256], strides = [1, 1]} : vector<8x1024xf32> to vector<8x256xf32>
    %519 = arith.negf %518 : vector<8x256xf32>
    %520 = math.exp %519 : vector<8x256xf32>
    %cst_134 = arith.constant 1.000000e+00 : f32
    %521 = vector.broadcast %cst_134 : f32 to vector<8x256xf32>
    %522 = arith.addf %521, %520 : vector<8x256xf32>
    %523 = arith.divf %521, %522 : vector<8x256xf32>
    %524 = vector.extract_strided_slice %517 {offsets = [0, 256], sizes = [8, 256], strides = [1, 1]} : vector<8x1024xf32> to vector<8x256xf32>
    %525 = arith.negf %524 : vector<8x256xf32>
    %526 = math.exp %525 : vector<8x256xf32>
    %cst_135 = arith.constant 1.000000e+00 : f32
    %527 = vector.broadcast %cst_135 : f32 to vector<8x256xf32>
    %528 = arith.addf %527, %526 : vector<8x256xf32>
    %529 = arith.divf %527, %528 : vector<8x256xf32>
    %530 = vector.extract_strided_slice %517 {offsets = [0, 512], sizes = [8, 256], strides = [1, 1]} : vector<8x1024xf32> to vector<8x256xf32>
    %531 = math.tanh %530 : vector<8x256xf32>
    %532 = vector.extract_strided_slice %517 {offsets = [0, 768], sizes = [8, 256], strides = [1, 1]} : vector<8x1024xf32> to vector<8x256xf32>
    %533 = arith.negf %532 : vector<8x256xf32>
    %534 = math.exp %533 : vector<8x256xf32>
    %cst_136 = arith.constant 1.000000e+00 : f32
    %535 = vector.broadcast %cst_136 : f32 to vector<8x256xf32>
    %536 = arith.addf %535, %534 : vector<8x256xf32>
    %537 = arith.divf %535, %536 : vector<8x256xf32>
    %538 = arith.mulf %529, %507 : vector<8x256xf32>
    %539 = arith.mulf %523, %531 : vector<8x256xf32>
    %540 = arith.addf %538, %539 : vector<8x256xf32>
    %541 = math.tanh %540 : vector<8x256xf32>
    %542 = arith.mulf %537, %541 : vector<8x256xf32>
    %c16_i32 = arith.constant 16 : i32
    %543 = arith.truncf %542 : vector<8x256xf32> to vector<8x256xbf16>
    %c0_137 = arith.constant 0 : index
    %c0_138 = arith.constant 0 : index
    %544 = vector.load %arg5[%c0_137, %c0_138] : memref<256x256xbf16, #tpu.memory_space<vmem>>, vector<256x256xbf16>
    %cst_139 = arith.constant dense<0.000000e+00> : vector<8x256xf32>
    %545 = tpu.matmul %543, %544, %cst_139 {dimension_numbers = #tpu.dot_dimension_numbers<[1], [0], [0], [1], [0, 0, 1, 1], [], []>} : vector<8x256xbf16>, vector<256x256xbf16>, vector<8x256xf32> -> vector<8x256xf32>
    %c0_140 = arith.constant 0 : index
    %c0_141 = arith.constant 0 : index
    %546 = vector.load %arg6[%c0_140, %c0_141] : memref<1x256xf32, #tpu.memory_space<vmem>>, vector<1x256xf32>
    %547 = vector.broadcast %546 : vector<1x256xf32> to vector<8x256xf32>
    %548 = arith.addf %545, %547 : vector<8x256xf32>
    %cst_142 = arith.constant 0.000000e+00 : f32
    %549 = vector.broadcast %cst_142 : f32 to vector<8x256xf32>
    %550 = arith.maximumf %548, %549 : vector<8x256xf32>
    %c0_143 = arith.constant 0 : index
    %c0_144 = arith.constant 0 : index
    %551 = vector.load %arg7[%c0_143, %c0_144] : memref<1x256xf32, #tpu.memory_space<vmem>>, vector<1x256xf32>
    %552 = vector.broadcast %551 : vector<1x256xf32> to vector<8x256xf32>
    %553 = arith.mulf %550, %552 : vector<8x256xf32>
    %c0_145 = arith.constant 0 : index
    %c0_146 = arith.constant 0 : index
    %554 = vector.load %arg8[%c0_145, %c0_146] : memref<1x256xf32, #tpu.memory_space<vmem>>, vector<1x256xf32>
    %555 = vector.broadcast %554 : vector<1x256xf32> to vector<8x256xf32>
    %556 = arith.addf %553, %555 : vector<8x256xf32>
    %557 = arith.addf %556, %542 : vector<8x256xf32>
    %558 = arith.truncf %557 : vector<8x256xf32> to vector<8x256xbf16>
    %c0_147 = arith.constant 0 : index
    %c0_148 = arith.constant 0 : index
    %559 = vector.load %arg9[%c0_147, %c0_148] : memref<256x128xbf16, #tpu.memory_space<vmem>>, vector<256x128xbf16>
    %cst_149 = arith.constant dense<0.000000e+00> : vector<8x128xf32>
    %560 = tpu.matmul %558, %559, %cst_149 {dimension_numbers = #tpu.dot_dimension_numbers<[1], [0], [0], [1], [0, 0, 1, 1], [], []>} : vector<8x256xbf16>, vector<256x128xbf16>, vector<8x128xf32> -> vector<8x128xf32>
    %c0_150 = arith.constant 0 : index
    %c0_151 = arith.constant 0 : index
    %561 = vector.load %arg10[%c0_150, %c0_151] : memref<1x128xf32, #tpu.memory_space<vmem>>, vector<1x128xf32>
    %562 = vector.broadcast %561 : vector<1x128xf32> to vector<8x128xf32>
    %563 = arith.addf %560, %562 : vector<8x128xf32>
    %c0_152 = arith.constant 0 : index
    %c0_153 = arith.constant 0 : index
    %564 = vector.load %arg11[%c0_152, %c0_153] : memref<8x128xf32, #tpu.memory_space<vmem>>, vector<8x128xf32>
    tpu.vector_store %arg11[%c0_152, %c0_153], %563 {strides = array<i32>} : memref<8x128xf32, #tpu.memory_space<vmem>>, vector<8x128xf32>,
    return
  }
  func.func @transform_0(%arg0: i32) -> (i32, i32) {
    %c0_i32 = arith.constant 0 : i32
    %c0_i32_0 = arith.constant 0 : i32
    return %arg0, %c0_i32 : i32, i32
  }
  func.func @transform_1(%arg0: i32) -> (i32, i32) {
    %c0_i32 = arith.constant 0 : i32
    %c0_i32_0 = arith.constant 0 : i32
    %c0_i32_1 = arith.constant 0 : i32
    return %c0_i32, %c0_i32_0 : i32, i32
  }
  func.func @transform_2(%arg0: i32) -> (i32, i32) {
    %c0_i32 = arith.constant 0 : i32
    %c0_i32_0 = arith.constant 0 : i32
    %c0_i32_1 = arith.constant 0 : i32
    return %c0_i32, %c0_i32_0 : i32, i32
  }
  func.func @transform_3(%arg0: i32) -> (i32, i32) {
    %c0_i32 = arith.constant 0 : i32
    %c0_i32_0 = arith.constant 0 : i32
    %c0_i32_1 = arith.constant 0 : i32
    return %c0_i32, %c0_i32_0 : i32, i32
  }
  func.func @transform_4(%arg0: i32) -> (i32, i32) {
    %c0_i32 = arith.constant 0 : i32
    %c0_i32_0 = arith.constant 0 : i32
    %c0_i32_1 = arith.constant 0 : i32
    return %c0_i32, %c0_i32_0 : i32, i32
  }
  func.func @transform_5(%arg0: i32) -> (i32, i32) {
    %c0_i32 = arith.constant 0 : i32
    %c0_i32_0 = arith.constant 0 : i32
    %c0_i32_1 = arith.constant 0 : i32
    return %c0_i32, %c0_i32_0 : i32, i32
  }
  func.func @transform_6(%arg0: i32) -> (i32, i32) {
    %c0_i32 = arith.constant 0 : i32
    %c0_i32_0 = arith.constant 0 : i32
    %c0_i32_1 = arith.constant 0 : i32
    return %c0_i32, %c0_i32_0 : i32, i32
  }
  func.func @transform_7(%arg0: i32) -> (i32, i32) {
    %c0_i32 = arith.constant 0 : i32
    %c0_i32_0 = arith.constant 0 : i32
    %c0_i32_1 = arith.constant 0 : i32
    return %c0_i32, %c0_i32_0 : i32, i32
  }
  func.func @transform_8(%arg0: i32) -> (i32, i32) {
    %c0_i32 = arith.constant 0 : i32
    %c0_i32_0 = arith.constant 0 : i32
    %c0_i32_1 = arith.constant 0 : i32
    return %c0_i32, %c0_i32_0 : i32, i32
  }
  func.func @transform_9(%arg0: i32) -> (i32, i32) {
    %c0_i32 = arith.constant 0 : i32
    %c0_i32_0 = arith.constant 0 : i32
    %c0_i32_1 = arith.constant 0 : i32
    return %c0_i32, %c0_i32_0 : i32, i32
  }
  func.func @transform_10(%arg0: i32) -> (i32, i32) {
    %c0_i32 = arith.constant 0 : i32
    %c0_i32_0 = arith.constant 0 : i32
    return %arg0, %c0_i32 : i32, i32
  }
}

</mosaic_0001>

<bundles_post_ra>
// kernel: lstm_forward.1
= control target key start
LH: loop header
LB: loop body
LE: loop exit
PB: predicated region body
PF: predicated region fallthrough
CT: control target
= control target key end

     0   :  { %s11848_s0 = inlined_call_operand.vmem [shape: s32[256,1], index: 0, kind: input, shape index: {}]   ;;  %s11849_s1 = inlined_call_operand.vmem [shape: bf16[128,1024], index: 1, kind: input, shape index: {}]   ;;  %s11850_s2 = inlined_call_operand.vmem [shape: bf16[256,1024], index: 2, kind: input, shape index: {}]   ;;  %s11851_s3 = inlined_call_operand.vmem [shape: f32[1,1024], index: 3, kind: input, shape index: {}]   ;;  %s11852_s4 = inlined_call_operand.vmem [shape: bf16[256,256], index: 4, kind: input, shape index: {}]   ;;  %s11853_s5 = inlined_call_operand.vmem [shape: f32[1,256], index: 5, kind: input, shape index: {}]   ;;  %s11854_s6 = inlined_call_operand.vmem [shape: f32[1,256], index: 6, kind: input, shape index: {}]   ;;  %s11855_s7 = inlined_call_operand.vmem [shape: f32[1,256], index: 7, kind: input, shape index: {}]   ;;  %s11856_s8 = inlined_call_operand.vmem [shape: bf16[256,128], index: 8, kind: input, shape index: {}]   ;;  %s11857_s9 = inlined_call_operand.vmem [shape: f32[1,128], index: 9, kind: input, shape index: {}]   ;;  %s11858_s10 = inlined_call_operand.hbm [shape: f32[16,128], index: 10, kind: output, shape index: {}]  }
   0x1   :  { %12164 = sst [smem:[#allocation260_spill]] %s11848_s0 }
   0x2   :  { %15 = vsyncpa [#allocation4], 0 }
   0x3   :  { %17 = vsyncpa [#allocation4 + $0x1], 0  ;;  %s7717_s13 = smov 0   ;;  %s7719_s14 = smov 0  }
   0x4   :  { %s7721_s15 = smov 0   ;;  %s7723_s16 = smov 0  }
   0x5 LB: > { %s7738_s17 = sadd.s32 4294967295, %s7657_s16   ;;  %s6528_s18 = sadd.s32 4294967294, %s7657_s16   ;;  %s7657_s16 = sphi %s7723_s16, %s13875_s16   ;;  %s7653_s15 = sphi %s7721_s15, %s13874_s15   ;;  %s7649_s14 = sphi %s7719_s14, %s13873_s14   ;;  %s7645_s13 = sphi %s7717_s13, %s13872_s13  }
   0x6   : > { %s7742_s19 = sadd.s32 1, %s7657_s16   ;;  %s245_s20 = sadd.s32 1, %s7653_s15 }
   0x7   : > { %s242_s21 = ssub.s32 %s7657_s16, %s7742_s19  ;;  %p255_p0 = scmp.ne.s32.totalorder %s7653_s15, %s7649_s14 }
   0x8   : > { %p243_p1 = scmp.eq.s32.totalorder %s242_s21, 0  ;;  %p256_p2 = scmp.eq.s32.totalorder %s7738_s17, 1 }
   0x9   : > { %p261_p3 = scmp.ne.s32.totalorder %s7649_s14, %s7645_s13  ;;  %p262_p4 = scmp.eq.s32.totalorder %s6528_s18, 1 }
   0xa   : > { %s7753_s22 = scalar_select %p243_p1, %s7653_s15, %s245_s20  }
   0xb   : > { %p7755_p5 = por %p256_p2, %p255_p0  ;;  %p7759_p6 = por %p262_p4, %p261_p3 }
   0xc   : > { %p6531_p7 = scmp.ge.s32.totalorder %s7657_s16, 1  ;;  %p316_p8 = scmp.lt.s32.totalorder %s7657_s16, 3 }
   0xe   : > { %p317_p9 = pnand %p6531_p7, %p316_p8 }
  0x10   : > { %320 = sbr.rel (%p317_p9) target bundleno = 5492 (0x1574), region = 60 }
  0x15   : > { %s6533_s25 = sshll.u32 %s7738_s17, 4  ;;  %v539_v0 = vld [vmem:[%s11849_s1 + $0x1c0] sm:$0xff]  ;;  %v540_v2 = vld [vmem:[%s11849_s1 + $0x1c8] sm:$0xff]  ;;  %v11860_v3 = vmov 0   ;;  %s12167_s0 = sld [smem:[#allocation260_spill]]  ;;  %v7858_v51 = vld [vmem:[%s11849_s1 + $0x1d0] sm:$0xff] }
  0x16   : > { %v543_v1 = vld [vmem:[%s11849_s1 + $0x1e0] sm:$0xff]  ;;  %7020 = vset.pattern.permute.xlu1 %v11860_v3  ;;  %7019 = vset.pattern.permute.xlu0 %v11860_v3  ;;  %p355_p10 = scmp.lt.s32.totalorder %s6533_s25, 31  ;;  %v544_v5 = vld [vmem:[%s11849_s1 + $0x1e8] sm:$0xff]  ;;  %v7863_v52 = vld [vmem:[%s11849_s1 + $0x1f0] sm:$0xff]  ;;  %s351_s29 = sand.u32 1, %s7649_s14  }
  0x17   : > { %v6608_v4 = vcombine.high %v539_v0, %v543_v1  ;;  %v6607_v6 = vcombine.low %v539_v0, %v543_v1  ;;  %v531_v7 = vld [vmem:[%s11849_s1 + $0x180] sm:$0xff]  ;;  %v6610_v9 = vcombine.high %v540_v2, %v544_v5  ;;  %v6609_v10 = vcombine.low %v540_v2, %v544_v5  ;;  %v532_v12 = vld [vmem:[%s11849_s1 + $0x188] sm:$0xff]  ;;  %941 = vmatprep.mubr.bf16.mxu0 %v11860_v3  ;;  %v7868_v53 = vld [vmem:[%s11849_s1 + $0x1d8] sm:$0xff]  ;;  %s6953_s20 = sshll.u32 %s7738_s17, 7  ;;  %s6441_s28 = scalar_lea.sflag [#allocation4], %s351_s29 }
  0x18   : > { %v535_v8 = vld [vmem:[%s11849_s1 + $0x1a0] sm:$0xff]  ;;  %v536_v13 = vld [vmem:[%s11849_s1 + $0x1a8] sm:$0xff]  ;;  %s13877_s25 = smov (!%p355_p10, %s6533_s25), 31  ;;  %1054 = vmatprep.mubr.bf16.mxu1 %v11860_v3  ;;  %v6611_v58 = vcombine.low %v7858_v51, %v7863_v52  ;;  %v7881_v59 = vld [vmem:[%s11849_s1 + $0x1f8] sm:$0xff]  ;;  %s11813_s27 = scalar_lea.hbm %s11858_s10, %s6953_s20 }
  0x19   : > { %v6600_v11 = vcombine.high %v531_v7, %v535_v8  ;;  %v523_v14 = vld [vmem:[%s11849_s1 + $0x140] sm:$0xff]  ;;  %909 = vmatprep.subr.bf16.mxu0 %v6608_v4  ;;  %v6602_v15 = vcombine.high %v532_v12, %v536_v13  ;;  %v524_v17 = vld [vmem:[%s11849_s1 + $0x148] sm:$0xff]  ;;  %1022 = vmatprep.subr.bf16.mxu1 %v6610_v9  ;;  %s6534_s30 = sshll.u32 %s13877_s25, 3  ;;  %v6599_v19 = vcombine.low %v531_v7, %v535_v8  ;;  %s7661_s17 = smov [#allocation3]  }
  0x1a   : > { %v527_v16 = vld [vmem:[%s11849_s1 + $0x160] sm:$0xff]  ;;  %v528_v18 = vld [vmem:[%s11849_s1 + $0x168] sm:$0xff]  ;;  %910 = vmatpush1.bf16.msra.mxu0 %v6607_v6  ;;  %1023 = vmatpush1.bf16.msra.mxu1 %v6609_v10  ;;  %v6601_v20 = vcombine.low %v532_v12, %v536_v13  ;;  %v6613_v0 = vcombine.low %v7868_v53, %v7881_v59 }
  0x1b   : > { %911 = vmatprep.subr.bf16.mxu0 %v6600_v11  ;;  %s7809_s18 = scalar_lea.vmem %s12167_s0, %s6534_s30  ;;  %1024 = vmatprep.subr.bf16.mxu1 %v6602_v15  ;;  %v6592_v21 = vcombine.high %v523_v14, %v527_v16  ;;  %v6594_v22 = vcombine.high %v524_v17, %v528_v18  ;;  %v515_v23 = vld [vmem:[%s11849_s1 + $0x100] sm:$0xff]  ;;  %v516_v25 = vld [vmem:[%s11849_s1 + $0x108] sm:$0xff]  ;;  %v6591_v31 = vcombine.low %v523_v14, %v527_v16  ;;  %s6532_s30 = sshll.u32 %s351_s29, 3 }
  0x1c   : > { %v519_v24 = vld [vmem:[%s11849_s1 + $0x120] sm:$0xff]  ;;  %v363_v26 = vld [vmem:[%s7809_s18 + $0x10] sm:$0xff]  ;;  %v520_v28 = vld [vmem:[%s11849_s1 + $0x128] sm:$0xff]  ;;  %v6593_v32 = vcombine.low %v524_v17, %v528_v18  ;;  %s353_s21 = scalar_lea.vmem [#allocation3], %s6532_s30  ;;  %s7601_s30 = sshll.u32 %s7661_s17, 4  ;;  %s7602_s30 = int_to_ptr.vmem [resolvable:$false] %s7601_s30 }
  0x1d   : > { %v361_v27 = vld [vmem:[%s7809_s18] sm:$0xff]  ;;  %386 = vperm.xlu1 %7020, %v363_v26   ;;  %v364_v29 = vld [vmem:[%s7809_s18 + $0x18] sm:$0xff]  ;;  %v362_v30 = vld [vmem:[%s7809_s18 + $0x8] sm:$0xff]  ;;  %v6584_v33 = vcombine.high %v515_v23, %v519_v24  ;;  %v6586_v34 = vcombine.high %v516_v25, %v520_v28  ;;  %v6583_v41 = vcombine.low %v515_v23, %v519_v24  ;;  %v6585_v42 = vcombine.low %v516_v25, %v520_v28  ;;  %s7603_s11 = scalar_lea.vmem %s7602_s30, 256 }
  0x1e   : > { %380 = vperm.xlu0 %7019, %v361_v27   ;;  %912 = vmatpush1.bf16.msra.mxu0 %v6599_v19  ;;  %v507_v35 = vld [vmem:[%s11849_s1 + $0xc0] sm:$0xff]  ;;  %v508_v37 = vld [vmem:[%s11849_s1 + $0xc8] sm:$0xff]  ;;  %v368_v46 = vld [vmem:[%s7809_s18 + $0x38] sm:$0xff]  ;;  %v6614_v23 = vcombine.high %v7868_v53, %v7881_v59  ;;  %v11859_v26 = vlaneseq }
  0x1f   : > { %1025 = vmatpush1.bf16.msra.mxu1 %v6601_v20  ;;  %913 = vmatprep.subr.bf16.mxu0 %v6592_v21  ;;  %v511_v36 = vld [vmem:[%s11849_s1 + $0xe0] sm:$0xff]  ;;  %v512_v38 = vld [vmem:[%s11849_s1 + $0xe8] sm:$0xff]  ;;  %v367_v47 = vld [vmem:[%s7809_s18 + $0x30] sm:$0xff] }
  0x20   : > { %1026 = vmatprep.subr.bf16.mxu1 %v6594_v22  ;;  %v366_v39 = vld [vmem:[%s7809_s18 + $0x28] sm:$0xff]  ;;  %v365_v40 = vld [vmem:[%s7809_s18 + $0x20] sm:$0xff]  ;;  %v6576_v43 = vcombine.high %v507_v35, %v511_v36  ;;  %v6578_v44 = vcombine.high %v508_v37, %v512_v38  ;;  %v6575_v54 = vcombine.low %v507_v35, %v511_v36  ;;  %v6577_v55 = vcombine.low %v508_v37, %v512_v38  ;;  %v372_v12 = vld [vmem:[%s7809_s18 + $0x58] sm:$0xff] }
  0x21   : > { %389 = vperm.xlu1 %7020, %v364_v29   ;;  %v499_v45 = vld [vmem:[%s11849_s1 + $0x80] sm:$0xff]  ;;  %v500_v49 = vld [vmem:[%s11849_s1 + $0x88] sm:$0xff]  ;;  %v371_v13 = vld [vmem:[%s7809_s18 + $0x50] sm:$0xff]  ;;  %v6612_v22 = vcombine.high %v7858_v51, %v7863_v52  ;;  %v7916_v28 = vand.u32 127, %v11859_v26 }
  0x22   : > { %383 = vperm.xlu0 %7019, %v362_v30   ;;  %914 = vmatpush1.bf16.msra.mxu0 %v6591_v31  ;;  %v503_v48 = vld [vmem:[%s11849_s1 + $0xa0] sm:$0xff]  ;;  %v504_v50 = vld [vmem:[%s11849_s1 + $0xa8] sm:$0xff]  ;;  %v376_v24 = vld [vmem:[%s7809_s18 + $0x78] sm:$0xff] }
  0x23   : > { %1027 = vmatpush1.bf16.msra.mxu1 %v6593_v32  ;;  %915 = vmatprep.subr.bf16.mxu0 %v6584_v33  ;;  %v491_v56 = vld [vmem:[%s11849_s1 + $0x40] sm:$0xff]  ;;  %v6568_v60 = vcombine.high %v499_v45, %v503_v48  ;;  %v6570_v61 = vcombine.high %v500_v49, %v504_v50  ;;  %v492_v62 = vld [vmem:[%s11849_s1 + $0x48] sm:$0xff]  ;;  %v6567_v4 = vcombine.low %v499_v45, %v503_v48  ;;  %v375_v25 = vld [vmem:[%s7809_s18 + $0x70] sm:$0xff] }
  0x24   : > { %1028 = vmatprep.subr.bf16.mxu1 %v6586_v34  ;;  %v495_v57 = vld [vmem:[%s11849_s1 + $0x60] sm:$0xff]  ;;  %v496_v63 = vld [vmem:[%s11849_s1 + $0x68] sm:$0xff]  ;;  %v6569_v5 = vcombine.low %v500_v49, %v504_v50  ;;  %v533_v29 = vld [vmem:[%s11849_s1 + $0x190] sm:$0xff] }
  0x25   : > { %395 = vperm.xlu1 %7020, %v366_v39   ;;  %v370_v1 = vld [vmem:[%s7809_s18 + $0x48] sm:$0xff]  ;;  %v369_v2 = vld [vmem:[%s7809_s18 + $0x40] sm:$0xff]  ;;  %v6560_v10 = vcombine.high %v491_v56, %v495_v57  ;;  %v6562_v11 = vcombine.high %v492_v62, %v496_v63  ;;  %v6559_v14 = vcombine.low %v491_v56, %v495_v57  ;;  %v6561_v15 = vcombine.low %v492_v62, %v496_v63  ;;  %v537_v31 = vld [vmem:[%s11849_s1 + $0x1b0] sm:$0xff] }
  0x26   : > { %392 = vperm.xlu0 %7019, %v365_v40   ;;  %916 = vmatpush1.bf16.msra.mxu0 %v6583_v41  ;;  %v483_v6 = vld [vmem:[%s11849_s1] sm:$0xff]  ;;  %v484_v8 = vld [vmem:[%s11849_s1 + $0x8] sm:$0xff]  ;;  %v534_v32 = vld [vmem:[%s11849_s1 + $0x198] sm:$0xff]  ;;  %v6604_v38 = vcombine.high %v533_v29, %v537_v31 }
  0x27   : > { %1029 = vmatpush1.bf16.msra.mxu1 %v6585_v42  ;;  %917 = vmatprep.subr.bf16.mxu0 %v6576_v43  ;;  %v487_v7 = vld [vmem:[%s11849_s1 + $0x20] sm:$0xff]  ;;  %v488_v9 = vld [vmem:[%s11849_s1 + $0x28] sm:$0xff]  ;;  %v538_v33 = vld [vmem:[%s11849_s1 + $0x1b8] sm:$0xff]  ;;  %v11862_v42 = vmov 1.0|1.0   ;;  %v6603_v43 = vcombine.low %v533_v29, %v537_v31 }
  0x28   : > { %1030 = vmatprep.subr.bf16.mxu1 %v6578_v44  ;;  %v6552_v16 = vcombine.high %v483_v6, %v487_v7  ;;  %v6554_v17 = vcombine.high %v484_v8, %v488_v9  ;;  %v374_v18 = vld [vmem:[%s7809_s18 + $0x68] sm:$0xff]  ;;  %v373_v19 = vld [vmem:[%s7809_s18 + $0x60] sm:$0xff]  ;;  %v6551_v20 = vcombine.low %v483_v6, %v487_v7  ;;  %v6553_v21 = vcombine.low %v484_v8, %v488_v9  ;;  %v525_v35 = vld [vmem:[%s11849_s1 + $0x150] sm:$0xff]  ;;  %s6454_s18 = sshll.u32 %s353_s21, 4  ;;  %s6455_s18 = int_to_ptr.vmem [resolvable:$true] %s6454_s18 }
  0x29   : > { %401 = vperm.xlu1 %7020, %v368_v46   ;;  %v529_v36 = vld [vmem:[%s11849_s1 + $0x170] sm:$0xff]  ;;  %v6606_v39 = vcombine.high %v534_v32, %v538_v33  ;;  %v526_v40 = vld [vmem:[%s11849_s1 + $0x158] sm:$0xff]  ;;  %v6605_v44 = vcombine.low %v534_v32, %v538_v33  ;;  %v1532_v37 = vld [vmem:[%s11850_s2 + $0x100] sm:$0xff]  ;;  %s7597_s0 = scalar_lea.vmem %s6455_s18, 128  ;;  %p7604_p0 = scmp.lt.s32.totalorder %s6455_s18, %s7602_s30 }
  0x2a   : > { %398 = vperm.xlu0 %7019, %v367_v47   ;;  %918 = vmatpush1.bf16.msra.mxu0 %v6575_v54  ;;  %v530_v41 = vld [vmem:[%s11849_s1 + $0x178] sm:$0xff]  ;;  %v6596_v45 = vcombine.high %v525_v35, %v529_v36  ;;  %v517_v48 = vld [vmem:[%s11849_s1 + $0x110] sm:$0xff]  ;;  %v6595_v52 = vcombine.low %v525_v35, %v529_v36  ;;  %v1560_v35 = vld [vmem:[%s11850_s2 + $0x1e0] sm:$0xff]  ;;  %p7598_p11 = scmp.ne.s32.totalorder %s6455_s18, %s7597_s0  ;;  %p7605_p1 = scmp.lt.s32.totalorder %s7603_s11, %s7597_s0 }
  0x2b   : > { %1031 = vmatpush1.bf16.msra.mxu1 %v6577_v55  ;;  %919 = vmatprep.subr.bf16.mxu0 %v6568_v60  ;;  %v6598_v46 = vcombine.high %v526_v40, %v530_v41  ;;  %v521_v49 = vld [vmem:[%s11849_s1 + $0x130] sm:$0xff]  ;;  %v518_v50 = vld [vmem:[%s11849_s1 + $0x118] sm:$0xff]  ;;  %v6597_v53 = vcombine.low %v526_v40, %v530_v41  ;;  %v1557_v36 = vld [vmem:[%s11850_s2 + $0x1c8] sm:$0xff] }
  0x2c   : > { %1032 = vmatprep.subr.bf16.mxu1 %v6570_v61  ;;  %v522_v51 = vld [vmem:[%s11849_s1 + $0x138] sm:$0xff]  ;;  %v6588_v55 = vcombine.high %v517_v48, %v521_v49  ;;  %v509_v57 = vld [vmem:[%s11849_s1 + $0xd0] sm:$0xff]  ;;  %v6587_v63 = vcombine.low %v517_v48, %v521_v49  ;;  %v1516_v54 = vld [vmem:[%s11850_s2 + $0x80] sm:$0xff]  ;;  %p7599_p12 = pnand %p7598_p11, %p7755_p5  ;;  %p7606_p2 = por %p7605_p1, %p7604_p0 }
  0x2d   : > { %407 = vperm.xlu1 %7020, %v370_v1   ;;  %v6590_v56 = vcombine.high %v518_v50, %v522_v51  ;;  %v510_v59 = vld [vmem:[%s11849_s1 + $0xd8] sm:$0xff]  ;;  %v1612_v31 = vld [vmem:[%s11850_s2 + $0x380] sm:$0xff] }
  0x2e   : > { %404 = vperm.xlu0 %7019, %v369_v2   ;;  %920 = vmatpush1.bf16.msra.mxu0 %v6567_v4  ;;  %v514_v60 = vld [vmem:[%s11849_s1 + $0xf8] sm:$0xff]  ;;  %v501_v4 = vld [vmem:[%s11849_s1 + $0x90] sm:$0xff]  ;;  %v1580_v49 = vld [vmem:[%s11850_s2 + $0x280] sm:$0xff]  ;;  %p7600_p13 = pneg %p7599_p12 }
  0x2f   : > { %1033 = vmatpush1.bf16.msra.mxu1 %v6569_v5  ;;  %921 = vmatprep.subr.bf16.mxu0 %v6560_v10  ;;  %v6582_v2 = vcombine.high %v510_v59, %v514_v60  ;;  %v505_v5 = vld [vmem:[%s11849_s1 + $0xb0] sm:$0xff]  ;;  %v502_v6 = vld [vmem:[%s11849_s1 + $0x98] sm:$0xff]  ;;  %v6581_v9 = vcombine.low %v510_v59, %v514_v60  ;;  %v1553_v59 = vld [vmem:[%s11850_s2 + $0x1a8] sm:$0xff] }
  0x30   : > { %1034 = vmatprep.subr.bf16.mxu1 %v6562_v11  ;;  %v506_v7 = vld [vmem:[%s11849_s1 + $0xb8] sm:$0xff]  ;;  %v6572_v11 = vcombine.high %v501_v4, %v505_v5  ;;  %v1500_v10 = vld [vmem:[%s11850_s2] sm:$0xff]  ;;  %p7607_p3 = pnand %p7606_p2, %p7600_p13 }
  0x31   : > { %413 = vperm.xlu1 %7020, %v372_v12   ;;  %v6574_v12 = vcombine.high %v502_v6, %v506_v7 }
  0x32   : > { %410 = vperm.xlu0 %7019, %v371_v13   ;;  %922 = vmatpush1.bf16.msra.mxu0 %v6559_v14  ;;  %v493_v13 = vld [vmem:[%s11849_s1 + $0x50] sm:$0xff] }
  0x33   : > { %1035 = vmatpush1.bf16.msra.mxu1 %v6561_v15  ;;  %923 = vmatprep.subr.bf16.mxu0 %v6552_v16  ;;  %v497_v14 = vld [vmem:[%s11849_s1 + $0x70] sm:$0xff]  ;;  %v494_v15 = vld [vmem:[%s11849_s1 + $0x58] sm:$0xff] }
  0x34   : > { %1036 = vmatprep.subr.bf16.mxu1 %v6554_v17  ;;  %v498_v16 = vld [vmem:[%s11849_s1 + $0x78] sm:$0xff]  ;;  %v6563_v29 = vcombine.low %v493_v13, %v497_v14 }
  0x35   : > { %419 = vperm.xlu1 %7020, %v374_v18  }
  0x36   : > { %416 = vperm.xlu0 %7019, %v373_v19   ;;  %924 = vmatpush1.bf16.msra.mxu0 %v6551_v20  ;;  %v6571_v19 = vcombine.low %v501_v4, %v505_v5  ;;  %v6573_v20 = vcombine.low %v502_v6, %v506_v7  ;;  %v1545_v4 = vld [vmem:[%s11850_s2 + $0x168] sm:$0xff] }
  0x37   : > { %1037 = vmatpush1.bf16.msra.mxu1 %v6553_v21  ;;  %1135 = vmatprep.subr.bf16.mxu0 %v6612_v22  ;;  %v6564_v21 = vcombine.high %v493_v13, %v497_v14  ;;  %v6566_v22 = vcombine.high %v494_v15, %v498_v16 }
  0x38   : > { %1248 = vmatprep.subr.bf16.mxu1 %v6614_v23  ;;  %v485_v23 = vld [vmem:[%s11849_s1 + $0x10] sm:$0xff] }
  0x39   : > { %425 = vperm.xlu1 %7020, %v376_v24   ;;  %v489_v24 = vld [vmem:[%s11849_s1 + $0x30] sm:$0xff] }
  0x3a   : > { %422 = vperm.xlu0 %7019, %v375_v25   ;;  %v486_v25 = vld [vmem:[%s11849_s1 + $0x18] sm:$0xff]  ;;  %v6556_v32 = vcombine.high %v485_v23, %v489_v24  ;;  %v6555_v41 = vcombine.low %v485_v23, %v489_v24 }
  0x98   : > { %v387_v34 = vpop.permute.xlu1 %386 }
  0x99   : > { %v381_v27 = vpop.permute.xlu0 %380  ;;  %vm429_vm3 = vcmp.eq.s32.totalorder %v7916_v28, %v387_v34  ;;  %v1556_v34 = vld [vmem:[%s11850_s2 + $0x1c0] sm:$0xff] }
  0x9a   : > { %vm427_vm1 = vcmp.eq.s32.totalorder %v7916_v28, %v381_v27  ;;  %v490_v27 = vld [vmem:[%s11849_s1 + $0x38] sm:$0xff]  ;;  %v8150_v60 = vcombine.low %v1556_v34, %v1560_v35 }
  0x9b   : > { %v6558_v33 = vcombine.high %v486_v25, %v490_v27 }
  0x9c   : > { %v390_v47 = vpop.permute.xlu1 %389  ;;  %12186 = vst [vmem:[#allocation8_spill] sm:$0xff] %v8150_v60 }
  0x9d   : > { %v384_v30 = vpop.permute.xlu0 %383  ;;  %vm430_vm4 = vcmp.eq.s32.totalorder %v7916_v28, %v390_v47 }
  0x9e   : > { %vm428_vm0 = vcmp.eq.s32.totalorder %v7916_v28, %v384_v30  ;;  %vm7976_vm5 = vmpackc.low %vm430_vm4, %vm429_vm3  ;;  %v6565_v30 = vcombine.low %v494_v15, %v498_v16 }
  0x9f   : > { %vm7938_vm2 = vmpackc.low %vm428_vm0, %vm427_vm1 }
  0xa0   : > { %6616 = vmatmul.mubr.msk.bf16.vlgmr.msra.gmra.mxu0 %vm7938_vm2, %v11862_v42  ;;  %6632 = vmatmul.mubr.msk.bf16.vlgmr.msra.gmra.mxu1 %vm7938_vm2, %v11862_v42  ;;  %v396_v61 = vpop.permute.xlu1 %395 }
  0xa1   : > { %1136 = vmatpush1.bf16.msra.mxu0 %v6611_v58  ;;  %1249 = vmatpush1.bf16.msra.mxu1 %v6613_v0  ;;  %v513_v58 = vld [vmem:[%s11849_s1 + $0xf0] sm:$0xff]  ;;  %v393_v62 = vpop.permute.xlu0 %392  ;;  %v6589_v0 = vcombine.low %v518_v50, %v522_v51  ;;  %vm432_vm6 = vcmp.eq.s32.totalorder %v7916_v28, %v396_v61 }
  0xa2   : > { %951 = vmatprep.mubr.bf16.mxu0 %v11860_v3  ;;  %1064 = vmatprep.mubr.bf16.mxu1 %v11860_v3  ;;  %v6580_v1 = vcombine.high %v509_v57, %v513_v58  ;;  %vm431_vm7 = vcmp.eq.s32.totalorder %v7916_v28, %v393_v62  ;;  %v6579_v8 = vcombine.low %v509_v57, %v513_v58  ;;  %v1552_v57 = vld [vmem:[%s11850_s2 + $0x1a0] sm:$0xff]  ;;  %v1549_v58 = vld [vmem:[%s11850_s2 + $0x188] sm:$0xff] }
  0xa3   : > { %1137 = vmatprep.subr.bf16.mxu0 %v6604_v38  ;;  %1250 = vmatprep.subr.bf16.mxu1 %v6606_v39  ;;  %vm8014_vm8 = vmpackc.low %vm432_vm6, %vm431_vm7  ;;  %v1561_v38 = vld [vmem:[%s11850_s2 + $0x1e8] sm:$0xff]  ;;  %v8180_v6 = vcombine.low %v1549_v58, %v1553_v59 }
  0xa4   : > { %v402_v17 = vpop.permute.xlu1 %401  ;;  %v8152_v61 = vcombine.low %v1557_v36, %v1561_v38 }
  0xa5   : > { %1138 = vmatpush1.bf16.msra.mxu0 %v6603_v43  ;;  %1251 = vmatpush1.bf16.msra.mxu1 %v6605_v44  ;;  %v399_v18 = vpop.permute.xlu0 %398  ;;  %vm434_vm9 = vcmp.eq.s32.totalorder %v7916_v28, %v402_v17  ;;  %v6557_v43 = vcombine.low %v486_v25, %v490_v27  ;;  %v8076_v44 = vcombine.high %v1556_v34, %v1560_v35  ;;  %v1524_v17 = vld [vmem:[%s11850_s2 + $0xc0] sm:$0xff]  ;;  %v1517_v27 = vld [vmem:[%s11850_s2 + $0x88] sm:$0xff] }
  0xa6   : > { %1139 = vmatprep.subr.bf16.mxu0 %v6596_v45  ;;  %1252 = vmatprep.subr.bf16.mxu1 %v6598_v46  ;;  %vm433_vm10 = vcmp.eq.s32.totalorder %v7916_v28, %v399_v18  ;;  %v8078_v45 = vcombine.high %v1557_v36, %v1561_v38  ;;  %12187 = vst [vmem:[#allocation9_spill] sm:$0xff] %v8152_v61  ;;  %12191 = vst [vmem:[#allocation13_spill] sm:$0xff] %v8180_v6  ;;  %v1528_v18 = vld [vmem:[%s11850_s2 + $0xe0] sm:$0xff]  ;;  %v1509_v38 = vld [vmem:[%s11850_s2 + $0x48] sm:$0xff] }
  0xa7   : > { %vm8052_vm11 = vmpackc.low %vm434_vm9, %vm433_vm10  ;;  %12176 = vst [vmem:[#allocation6_spill] sm:$0xff] %v8076_v44  ;;  %v8240_v23 = vcombine.high %v1524_v17, %v1528_v18  ;;  %v1520_v25 = vld [vmem:[%s11850_s2 + $0xa0] sm:$0xff] }
  0xa8   : > { %6618 = vmatmul.mubr.msk.bf16.gmra.mxu0 %vm7976_vm5, %v11862_v42  ;;  %6634 = vmatmul.mubr.msk.bf16.gmra.mxu1 %vm7976_vm5, %v11862_v42  ;;  %v408_v39 = vpop.permute.xlu1 %407  ;;  %12177 = vst [vmem:[#allocation7_spill] sm:$0xff] %v8078_v45  ;;  %v1508_v35 = vld [vmem:[%s11850_s2 + $0x40] sm:$0xff] }
  0xa9   : > { %961 = vmatprep.mubr.bf16.mxu0 %v11860_v3  ;;  %1074 = vmatprep.mubr.bf16.mxu1 %v11860_v3  ;;  %v405_v40 = vpop.permute.xlu0 %404  ;;  %vm436_vm12 = vcmp.eq.s32.totalorder %v7916_v28, %v408_v39  ;;  %12200 = vst [vmem:[#allocation22_spill] sm:$0xff] %v8240_v23  ;;  %v1512_v36 = vld [vmem:[%s11850_s2 + $0x60] sm:$0xff]  ;;  %v1513_v39 = vld [vmem:[%s11850_s2 + $0x68] sm:$0xff] }
  0xaa   : > { %1140 = vmatpush1.bf16.msra.mxu0 %v6595_v52  ;;  %1253 = vmatpush1.bf16.msra.mxu1 %v6597_v53  ;;  %vm435_vm13 = vcmp.eq.s32.totalorder %v7916_v28, %v405_v40  ;;  %v8290_v40 = vcombine.low %v1516_v54, %v1520_v25  ;;  %v1596_v46 = vld [vmem:[%s11850_s2 + $0x300] sm:$0xff] }
  0xab   : > { %1141 = vmatprep.subr.bf16.mxu0 %v6588_v55  ;;  %1254 = vmatprep.subr.bf16.mxu1 %v6590_v56  ;;  %vm8082_vm14 = vmpackc.low %vm436_vm12, %vm435_vm13  ;;  %v1564_v52 = vld [vmem:[%s11850_s2 + $0x200] sm:$0xff]  ;;  %v1550_v56 = vld [vmem:[%s11850_s2 + $0x190] sm:$0xff] }
  0xac   : > { %v414_v47 = vpop.permute.xlu1 %413  ;;  %12206 = vst [vmem:[#allocation28_spill] sm:$0xff] %v8290_v40 }
  0xad   : > { %v411_v48 = vpop.permute.xlu0 %410  ;;  %vm438_vm15 = vcmp.eq.s32.totalorder %v7916_v28, %v414_v47  ;;  %v8298_v47 = vcombine.high %v1509_v38, %v1513_v39 }
  0xae   : > { %1142 = vmatpush1.bf16.msra.mxu0 %v6587_v63  ;;  %1255 = vmatpush1.bf16.msra.mxu1 %v6589_v0  ;;  %vm437_vm0 = vcmp.eq.s32.totalorder %v7916_v28, %v411_v48  ;;  %v8156_v63 = vcombine.high %v1549_v58, %v1553_v59  ;;  %v1540_v0 = vld [vmem:[%s11850_s2 + $0x140] sm:$0xff] }
  0xaf   : > { %1143 = vmatprep.subr.bf16.mxu0 %v6580_v1  ;;  %1256 = vmatprep.subr.bf16.mxu1 %v6582_v2  ;;  %vm8098_vm1 = vmpackc.low %vm438_vm15, %vm437_vm0  ;;  %v1544_v1 = vld [vmem:[%s11850_s2 + $0x160] sm:$0xff]  ;;  %v1541_v2 = vld [vmem:[%s11850_s2 + $0x148] sm:$0xff]  ;;  %12209 = vst [vmem:[#allocation31_spill] sm:$0xff] %v8298_v47 }
  0xb0   : > { %6620 = vmatmul.mubr.msk.bf16.gmra.mxu0 %vm8014_vm8, %v11862_v42  ;;  %6636 = vmatmul.mubr.msk.bf16.gmra.mxu1 %vm8014_vm8, %v11862_v42  ;;  %v420_v50 = vpop.permute.xlu1 %419  ;;  %12189 = vst [vmem:[#allocation11_spill] sm:$0xff] %v8156_v63  ;;  %v8184_v7 = vcombine.high %v1540_v0, %v1544_v1  ;;  %v8204_v13 = vcombine.low %v1540_v0, %v1544_v1  ;;  %v1504_v48 = vld [vmem:[%s11850_s2 + $0x20] sm:$0xff]  ;;  %v1621_v0 = vld [vmem:[%s11850_s2 + $0x3c8] sm:$0xff] }
  0xb1   : > { %971 = vmatprep.mubr.bf16.mxu0 %v11860_v3  ;;  %1084 = vmatprep.mubr.bf16.mxu1 %v11860_v3  ;;  %v417_v51 = vpop.permute.xlu0 %416  ;;  %vm440_vm3 = vcmp.eq.s32.totalorder %v7916_v28, %v420_v50  ;;  %v8206_v14 = vcombine.low %v1541_v2, %v1545_v4  ;;  %v1501_v50 = vld [vmem:[%s11850_s2 + $0x8] sm:$0xff]  ;;  %v1620_v58 = vld [vmem:[%s11850_s2 + $0x3c0] sm:$0xff] }
  0xb2   : > { %1144 = vmatpush1.bf16.msra.mxu0 %v6579_v8  ;;  %1257 = vmatpush1.bf16.msra.mxu1 %v6581_v9  ;;  %vm439_vm4 = vcmp.eq.s32.totalorder %v7916_v28, %v417_v51  ;;  %12192 = vst [vmem:[#allocation14_spill] sm:$0xff] %v8184_v7  ;;  %v8186_v8 = vcombine.high %v1541_v2, %v1545_v4  ;;  %v1536_v9 = vld [vmem:[%s11850_s2 + $0x120] sm:$0xff]  ;;  %12194 = vst [vmem:[#allocation16_spill] sm:$0xff] %v8204_v13  ;;  %v1505_v51 = vld [vmem:[%s11850_s2 + $0x28] sm:$0xff] }
  0xb3   : > { %1145 = vmatprep.subr.bf16.mxu0 %v6572_v11  ;;  %1258 = vmatprep.subr.bf16.mxu1 %v6574_v12  ;;  %vm8112_vm6 = vmpackc.low %vm440_vm3, %vm439_vm4  ;;  %v1533_v11 = vld [vmem:[%s11850_s2 + $0x108] sm:$0xff]  ;;  %12195 = vst [vmem:[#allocation17_spill] sm:$0xff] %v8206_v14  ;;  %v8210_v15 = vcombine.high %v1532_v37, %v1536_v9  ;;  %v1624_v59 = vld [vmem:[%s11850_s2 + $0x3e0] sm:$0xff]  ;;  %v8346_v2 = vcombine.low %v1500_v10, %v1504_v48 }
  0xb4   : > { %v426_v53 = vpop.permute.xlu1 %425  ;;  %12193 = vst [vmem:[#allocation15_spill] sm:$0xff] %v8186_v8  ;;  %v1537_v12 = vld [vmem:[%s11850_s2 + $0x128] sm:$0xff]  ;;  %v8348_v4 = vcombine.low %v1501_v50, %v1505_v51 }
  0xb5   : > { %v423_v55 = vpop.permute.xlu0 %422  ;;  %vm442_vm7 = vcmp.eq.s32.totalorder %v7916_v28, %v426_v53  ;;  %12196 = vst [vmem:[#allocation18_spill] sm:$0xff] %v8210_v15  ;;  %v8212_v16 = vcombine.high %v1533_v11, %v1537_v12  ;;  %v8316_v53 = vcombine.low %v1508_v35, %v1512_v36  ;;  %v1625_v1 = vld [vmem:[%s11850_s2 + $0x3e8] sm:$0xff]  ;;  %12214 = vst [vmem:[#allocation36_spill] sm:$0xff] %v8346_v2 }
  0xb6   : > { %1146 = vmatpush1.bf16.msra.mxu0 %v6571_v19  ;;  %1259 = vmatpush1.bf16.msra.mxu1 %v6573_v20  ;;  %vm441_vm9 = vcmp.eq.s32.totalorder %v7916_v28, %v423_v55  ;;  %v1548_v28 = vld [vmem:[%s11850_s2 + $0x180] sm:$0xff]  ;;  %v1525_v19 = vld [vmem:[%s11850_s2 + $0xc8] sm:$0xff]  ;;  %v8318_v55 = vcombine.low %v1509_v38, %v1513_v39  ;;  %12215 = vst [vmem:[#allocation37_spill] sm:$0xff] %v8348_v4 }
  0xb7   : > { %1147 = vmatprep.subr.bf16.mxu0 %v6564_v21  ;;  %1260 = vmatprep.subr.bf16.mxu1 %v6566_v22  ;;  %vm8126_vm10 = vmpackc.low %vm442_vm7, %vm441_vm9  ;;  %v8154_v62 = vcombine.high %v1548_v28, %v1552_v57  ;;  %v8178_v5 = vcombine.low %v1548_v28, %v1552_v57  ;;  %12197 = vst [vmem:[#allocation19_spill] sm:$0xff] %v8212_v16  ;;  %v1529_v20 = vld [vmem:[%s11850_s2 + $0xe8] sm:$0xff] }
  0xb8   : > { %6622 = vmatmul.mubr.msk.bf16.gmra.mxu0 %vm8052_vm11, %v11862_v42  ;;  %6638 = vmatmul.mubr.msk.bf16.gmra.mxu1 %vm8052_vm11, %v11862_v42  ;;  %v8234_v21 = vcombine.low %v1532_v37, %v1536_v9  ;;  %v8236_v22 = vcombine.low %v1533_v11, %v1537_v12  ;;  %v8242_v24 = vcombine.high %v1525_v19, %v1529_v20  ;;  %v1616_v11 = vld [vmem:[%s11850_s2 + $0x3a0] sm:$0xff]  ;;  %v1613_v12 = vld [vmem:[%s11850_s2 + $0x388] sm:$0xff] }
  0xb9   : > { %981 = vmatprep.mubr.bf16.mxu0 %v11860_v3  ;;  %1094 = vmatprep.mubr.bf16.mxu1 %v11860_v3  ;;  %12188 = vst [vmem:[#allocation10_spill] sm:$0xff] %v8154_v62  ;;  %12190 = vst [vmem:[#allocation12_spill] sm:$0xff] %v8178_v5  ;;  %v8322_v28 = vcombine.high %v1500_v10, %v1504_v48  ;;  %v8324_v57 = vcombine.high %v1501_v50, %v1505_v51  ;;  %v1600_v48 = vld [vmem:[%s11850_s2 + $0x320] sm:$0xff]  ;;  %v1597_v50 = vld [vmem:[%s11850_s2 + $0x308] sm:$0xff] }
  0xba   : > { %1148 = vmatpush1.bf16.msra.mxu0 %v6563_v29  ;;  %1261 = vmatpush1.bf16.msra.mxu1 %v6565_v30  ;;  %12198 = vst [vmem:[#allocation20_spill] sm:$0xff] %v8234_v21  ;;  %12199 = vst [vmem:[#allocation21_spill] sm:$0xff] %v8236_v22  ;;  %v1521_v29 = vld [vmem:[%s11850_s2 + $0xa8] sm:$0xff]  ;;  %v8260_v30 = vcombine.low %v1524_v17, %v1528_v18  ;;  %v8352_v37 = vcombine.high %v1620_v58, %v1624_v59 }
  0xbb   : > { %1149 = vmatprep.subr.bf16.mxu0 %v6556_v32  ;;  %1262 = vmatprep.subr.bf16.mxu1 %v6558_v33  ;;  %12201 = vst [vmem:[#allocation23_spill] sm:$0xff] %v8242_v24  ;;  %v8262_v32 = vcombine.low %v1525_v19, %v1529_v20  ;;  %v8266_v33 = vcombine.high %v1516_v54, %v1520_v25  ;;  %12210 = vst [vmem:[#allocation32_spill] sm:$0xff] %v8316_v53  ;;  %v1617_v17 = vld [vmem:[%s11850_s2 + $0x3a8] sm:$0xff]  ;;  %v1604_v25 = vld [vmem:[%s11850_s2 + $0x340] sm:$0xff] }
  0xbc   : > { %12202 = vst [vmem:[#allocation24_spill] sm:$0xff] %v8260_v30  ;;  %v8268_v34 = vcombine.high %v1517_v27, %v1521_v29  ;;  %12211 = vst [vmem:[#allocation33_spill] sm:$0xff] %v8318_v55  ;;  %v8354_v9 = vcombine.high %v1621_v0, %v1625_v1  ;;  %v8372_v18 = vcombine.low %v1620_v58, %v1624_v59  ;;  %v1601_v51 = vld [vmem:[%s11850_s2 + $0x328] sm:$0xff] }
  0xbd   : > { %12203 = vst [vmem:[#allocation25_spill] sm:$0xff] %v8262_v32  ;;  %12204 = vst [vmem:[#allocation26_spill] sm:$0xff] %v8266_v33  ;;  %v8374_v19 = vcombine.low %v1621_v0, %v1625_v1  ;;  %v8378_v20 = vcombine.high %v1612_v31, %v1616_v11  ;;  %v8380_v54 = vcombine.high %v1613_v12, %v1617_v17 }
  0xbe   : > { %1150 = vmatpush1.bf16.msra.mxu0 %v6555_v41  ;;  %1263 = vmatpush1.bf16.msra.mxu1 %v6557_v43  ;;  %12205 = vst [vmem:[#allocation27_spill] sm:$0xff] %v8268_v34  ;;  %v8292_v41 = vcombine.low %v1517_v27, %v1521_v29  ;;  %v8296_v43 = vcombine.high %v1508_v35, %v1512_v36  ;;  %12212 = vst [vmem:[#allocation34_spill] sm:$0xff] %v8322_v28  ;;  %v1608_v27 = vld [vmem:[%s11850_s2 + $0x360] sm:$0xff]  ;;  %v1605_v29 = vld [vmem:[%s11850_s2 + $0x348] sm:$0xff] }
  0xbf   : > { %2268 = vmatprep.subr.bf16.mxu0 %v8076_v44  ;;  %2309 = vmatprep.subr.bf16.mxu1 %v8078_v45  ;;  %12213 = vst [vmem:[#allocation35_spill] sm:$0xff] %v8324_v57  ;;  %12216 = vst [vmem:[#allocation38_spill] sm:$0xff] %v8352_v37  ;;  %v1609_v35 = vld [vmem:[%s11850_s2 + $0x368] sm:$0xff]  ;;  %v8402_v36 = vcombine.low %v1612_v31, %v1616_v11  ;;  %v8404_v38 = vcombine.low %v1613_v12, %v1617_v17  ;;  %v1588_v31 = vld [vmem:[%s11850_s2 + $0x2c0] sm:$0xff] }
  0xc0   : > { %6624 = vmatmul.mubr.msk.bf16.gmra.mxu0 %vm8082_vm14, %v11862_v42  ;;  %6640 = vmatmul.mubr.msk.bf16.gmra.mxu1 %vm8082_vm14, %v11862_v42  ;;  %12207 = vst [vmem:[#allocation29_spill] sm:$0xff] %v8292_v41  ;;  %12208 = vst [vmem:[#allocation30_spill] sm:$0xff] %v8296_v43  ;;  %v8408_v39 = vcombine.high %v1604_v25, %v1608_v27  ;;  %v8410_v10 = vcombine.high %v1605_v29, %v1609_v35  ;;  %v1592_v11 = vld [vmem:[%s11850_s2 + $0x2e0] sm:$0xff]  ;;  %v1589_v12 = vld [vmem:[%s11850_s2 + $0x2c8] sm:$0xff] }
  0xc1   : > { %991 = vmatprep.mubr.bf16.mxu0 %v11860_v3  ;;  %1104 = vmatprep.mubr.bf16.mxu1 %v11860_v3  ;;  %12217 = vst [vmem:[#allocation39_spill] sm:$0xff] %v8354_v9  ;;  %12218 = vst [vmem:[#allocation40_spill] sm:$0xff] %v8372_v18  ;;  %v8428_v58 = vcombine.low %v1604_v25, %v1608_v27  ;;  %v8430_v59 = vcombine.low %v1605_v29, %v1609_v35  ;;  %v1593_v17 = vld [vmem:[%s11850_s2 + $0x2e8] sm:$0xff] }
  0xc2   : > { %12219 = vst [vmem:[#allocation41_spill] sm:$0xff] %v8374_v19  ;;  %12220 = vst [vmem:[#allocation42_spill] sm:$0xff] %v8378_v20  ;;  %v8434_v0 = vcombine.high %v1596_v46, %v1600_v48  ;;  %v8436_v1 = vcombine.high %v1597_v50, %v1601_v51  ;;  %v8458_v25 = vcombine.low %v1596_v46, %v1600_v48  ;;  %v1584_v46 = vld [vmem:[%s11850_s2 + $0x2a0] sm:$0xff]  ;;  %v1581_v48 = vld [vmem:[%s11850_s2 + $0x288] sm:$0xff] }
  0xc3   : > { %12221 = vst [vmem:[#allocation43_spill] sm:$0xff] %v8380_v54  ;;  %12222 = vst [vmem:[#allocation44_spill] sm:$0xff] %v8402_v36  ;;  %v8460_v27 = vcombine.low %v1597_v50, %v1601_v51  ;;  %v8464_v29 = vcombine.high %v1588_v31, %v1592_v11  ;;  %v8466_v35 = vcombine.high %v1589_v12, %v1593_v17  ;;  %v1585_v50 = vld [vmem:[%s11850_s2 + $0x2a8] sm:$0xff] }
  0xc4   : > { %12223 = vst [vmem:[#allocation45_spill] sm:$0xff] %v8404_v38  ;;  %12224 = vst [vmem:[#allocation46_spill] sm:$0xff] %v8408_v39  ;;  %v8484_v51 = vcombine.low %v1588_v31, %v1592_v11  ;;  %v8486_v26 = vcombine.low %v1589_v12, %v1593_v17  ;;  %v1573_v31 = vld [vmem:[%s11850_s2 + $0x248] sm:$0xff]  ;;  %v12238_v12 = vmov 1.0|1.0   ;;  %v8514_v17 = vcombine.low %v1580_v49, %v1584_v46 }
  0xc5   : > { %12225 = vst [vmem:[#allocation47_spill] sm:$0xff] %v8410_v10  ;;  %12226 = vst [vmem:[#allocation48_spill] sm:$0xff] %v8428_v58  ;;  %v1577_v11 = vld [vmem:[%s11850_s2 + $0x268] sm:$0xff] }
  0xc6   : > { %12227 = vst [vmem:[#allocation49_spill] sm:$0xff] %v8430_v59  ;;  %12228 = vst [vmem:[#allocation50_spill] sm:$0xff] %v8434_v0 }
  0xc7   : > { %12229 = vst [vmem:[#allocation51_spill] sm:$0xff] %v8436_v1  ;;  %12230 = vst [vmem:[#allocation52_spill] sm:$0xff] %v8458_v25 }
  0xc8   : > { %6626 = vmatmul.mubr.msk.bf16.gmra.mxu0 %vm8098_vm1, %v11862_v42  ;;  %6642 = vmatmul.mubr.msk.bf16.gmra.mxu1 %vm8098_vm1, %v11862_v42  ;;  %12231 = vst [vmem:[#allocation53_spill] sm:$0xff] %v8460_v27  ;;  %12232 = vst [vmem:[#allocation54_spill] sm:$0xff] %v8464_v29 }
  0xc9   : > { %1001 = vmatprep.mubr.bf16.mxu0 %v11860_v3  ;;  %1114 = vmatprep.mubr.bf16.mxu1 %v11860_v3  ;;  %12233 = vst [vmem:[#allocation55_spill] sm:$0xff] %v8466_v35  ;;  %12234 = vst [vmem:[#allocation56_spill] sm:$0xff] %v8484_v51 }
  0xca   : > { %12235 = vst [vmem:[#allocation57_spill] sm:$0xff] %v8486_v26  ;;  %12239 = vst [vmem:[#allocation60_spill] sm:$0xff] %v8514_v17 }
  0xd0   : > { %6628 = vmatmul.mubr.msk.bf16.gmra.mxu0 %vm8112_vm6, %v11862_v42  ;;  %6644 = vmatmul.mubr.msk.bf16.gmra.mxu1 %vm8112_vm6, %v11862_v42 }
  0xd1   : > { %1011 = vmatprep.mubr.bf16.mxu0 %v11860_v3  ;;  %1124 = vmatprep.mubr.bf16.mxu1 %v11860_v3 }
  0xd8   : > { %6630 = vmatmul.mubr.msk.bf16.gmra.mxu0 %vm8126_vm10, %v11862_v42  ;;  %6646 = vmatmul.mubr.msk.bf16.gmra.mxu1 %vm8126_vm10, %v11862_v42 }
  0xd9   : > { %1167 = vmatprep.mubr.bf16.mxu0 %v11860_v3  ;;  %1280 = vmatprep.mubr.bf16.mxu1 %v11860_v3 }
  0xe0   : > { %6648 = vmatmul.mubr.msk.bf16.vlgmr.msra.gmra.mxu0 %vm7938_vm2, %v11862_v42  ;;  %6664 = vmatmul.mubr.msk.bf16.vlgmr.msra.gmra.mxu1 %vm7938_vm2, %v11862_v42 }
  0xe1   : > { %2269 = vmatpush1.bf16.msra.mxu0 %v8150_v60  ;;  %2310 = vmatpush1.bf16.msra.mxu1 %v8152_v61 }
  0xe2   : > { %2270 = vmatprep.subr.bf16.mxu0 %v8154_v62  ;;  %2311 = vmatprep.subr.bf16.mxu1 %v8156_v63 }
  0xe3   : > { %1177 = vmatprep.mubr.bf16.mxu0 %v11860_v3  ;;  %1290 = vmatprep.mubr.bf16.mxu1 %v11860_v3 }
  0xe5   : > { %2271 = vmatpush1.bf16.msra.mxu0 %v8178_v5  ;;  %2312 = vmatpush1.bf16.msra.mxu1 %v8180_v6 }
  0xe6   : > { %2272 = vmatprep.subr.bf16.mxu0 %v8184_v7  ;;  %2313 = vmatprep.subr.bf16.mxu1 %v8186_v8 }
  0xe8   : > { %6650 = vmatmul.mubr.msk.bf16.gmra.mxu0 %vm7976_vm5, %v11862_v42  ;;  %6666 = vmatmul.mubr.msk.bf16.gmra.mxu1 %vm7976_vm5, %v11862_v42 }
  0xe9   : > { %2273 = vmatpush1.bf16.msra.mxu0 %v8204_v13  ;;  %2314 = vmatpush1.bf16.msra.mxu1 %v8206_v14 }
  0xea   : > { %2274 = vmatprep.subr.bf16.mxu0 %v8210_v15  ;;  %2315 = vmatprep.subr.bf16.mxu1 %v8212_v16 }
  0xeb   : > { %1187 = vmatprep.mubr.bf16.mxu0 %v11860_v3  ;;  %1300 = vmatprep.mubr.bf16.mxu1 %v11860_v3 }
  0xed   : > { %2275 = vmatpush1.bf16.msra.mxu0 %v8234_v21  ;;  %2316 = vmatpush1.bf16.msra.mxu1 %v8236_v22 }
  0xee   : > { %2276 = vmatprep.subr.bf16.mxu0 %v8240_v23  ;;  %2317 = vmatprep.subr.bf16.mxu1 %v8242_v24 }
  0xf0   : > { %6652 = vmatmul.mubr.msk.bf16.gmra.mxu0 %vm8014_vm8, %v11862_v42  ;;  %6668 = vmatmul.mubr.msk.bf16.gmra.mxu1 %vm8014_vm8, %v11862_v42 }
  0xf1   : > { %2277 = vmatpush1.bf16.msra.mxu0 %v8260_v30  ;;  %2318 = vmatpush1.bf16.msra.mxu1 %v8262_v32 }
  0xf2   : > { %2278 = vmatprep.subr.bf16.mxu0 %v8266_v33  ;;  %2319 = vmatprep.subr.bf16.mxu1 %v8268_v34 }
  0xf3   : > { %1197 = vmatprep.mubr.bf16.mxu0 %v11860_v3  ;;  %1310 = vmatprep.mubr.bf16.mxu1 %v11860_v3 }
  0xf5   : > { %2279 = vmatpush1.bf16.msra.mxu0 %v8290_v40  ;;  %2320 = vmatpush1.bf16.msra.mxu1 %v8292_v41 }
  0xf6   : > { %2280 = vmatprep.subr.bf16.mxu0 %v8296_v43  ;;  %2321 = vmatprep.subr.bf16.mxu1 %v8298_v47 }
  0xf8   : > { %6654 = vmatmul.mubr.msk.bf16.gmra.mxu0 %vm8052_vm11, %v11862_v42  ;;  %6670 = vmatmul.mubr.msk.bf16.gmra.mxu1 %vm8052_vm11, %v11862_v42 }
  0xf9   : > { %2281 = vmatpush1.bf16.msra.mxu0 %v8316_v53  ;;  %2322 = vmatpush1.bf16.msra.mxu1 %v8318_v55 }
  0xfa   : > { %2282 = vmatprep.subr.bf16.mxu0 %v8322_v28  ;;  %2323 = vmatprep.subr.bf16.mxu1 %v8324_v57 }
  0xfb   : > { %1207 = vmatprep.mubr.bf16.mxu0 %v11860_v3  ;;  %1320 = vmatprep.mubr.bf16.mxu1 %v11860_v3 }
  0xfd   : > { %2283 = vmatpush1.bf16.msra.mxu0 %v8346_v2  ;;  %2324 = vmatpush1.bf16.msra.mxu1 %v8348_v4 }
  0xfe   : > { %2284 = vmatprep.subr.bf16.mxu0 %v8352_v37  ;;  %2325 = vmatprep.subr.bf16.mxu1 %v8354_v9 }
 0x100   : > { %6656 = vmatmul.mubr.msk.bf16.gmra.mxu0 %vm8082_vm14, %v11862_v42  ;;  %6672 = vmatmul.mubr.msk.bf16.gmra.mxu1 %vm8082_vm14, %v11862_v42 }
 0x101   : > { %2285 = vmatpush2.bf16.msra.mxu0 %v8372_v18  ;;  %2326 = vmatpush2.bf16.msra.mxu1 %v8374_v19 }
 0x102   : > { %2286 = vmatprep.subr.bf16.mxu0 %v8378_v20  ;;  %2327 = vmatprep.subr.bf16.mxu1 %v8380_v54 }
 0x103   : > { %1217 = vmatprep.mubr.bf16.mxu0 %v11860_v3  ;;  %1330 = vmatprep.mubr.bf16.mxu1 %v11860_v3 }
 0x105   : > { %2287 = vmatpush2.bf16.msra.mxu0 %v8402_v36  ;;  %2328 = vmatpush2.bf16.msra.mxu1 %v8404_v38 }
 0x106   : > { %2288 = vmatprep.subr.bf16.mxu0 %v8408_v39  ;;  %2329 = vmatprep.subr.bf16.mxu1 %v8410_v10 }
 0x108   : > { %6658 = vmatmul.mubr.msk.bf16.gmra.mxu0 %vm8098_vm1, %v11862_v42  ;;  %6674 = vmatmul.mubr.msk.bf16.gmra.mxu1 %vm8098_vm1, %v11862_v42  ;;  %v8492_v42 = vcombine.high %v1581_v48, %v1585_v50 }
 0x109   : > { %2289 = vmatpush2.bf16.msra.mxu0 %v8428_v58  ;;  %2330 = vmatpush2.bf16.msra.mxu1 %v8430_v59 }
 0x10a   : > { %2290 = vmatprep.subr.bf16.mxu0 %v8434_v0  ;;  %2331 = vmatprep.subr.bf16.mxu1 %v8436_v1  ;;  %12237 = vst [vmem:[#allocation59_spill] sm:$0xff] %v8492_v42  ;;  %v1572_v1 = vld [vmem:[%s11850_s2 + $0x240] sm:$0xff]  ;;  %v12243_v0 = vmov 0  }
 0x10b   : > { %1227 = vmatprep.mubr.bf16.mxu0 %v11860_v3  ;;  %1340 = vmatprep.mubr.bf16.mxu1 %v11860_v3  ;;  %v8490_v3 = vcombine.high %v1580_v49, %v1584_v46  ;;  %v1568_v49 = vld [vmem:[%s11850_s2 + $0x220] sm:$0xff]  ;;  %v1565_v46 = vld [vmem:[%s11850_s2 + $0x208] sm:$0xff] }
 0x10d   : > { %2291 = vmatpush2.bf16.msra.mxu0 %v8458_v25  ;;  %2332 = vmatpush2.bf16.msra.mxu1 %v8460_v27  ;;  %12236 = vst [vmem:[#allocation58_spill] sm:$0xff] %v8490_v3  ;;  %v1576_v27 = vld [vmem:[%s11850_s2 + $0x260] sm:$0xff]  ;;  %v8522_v25 = vcombine.high %v1573_v31, %v1577_v11 }
 0x10e   : > { %2292 = vmatprep.subr.bf16.mxu0 %v8464_v29  ;;  %2333 = vmatprep.subr.bf16.mxu1 %v8466_v35  ;;  %v8516_v35 = vcombine.low %v1581_v48, %v1585_v50  ;;  %v8520_v29 = vcombine.high %v1572_v1, %v1576_v27  ;;  %v1569_v48 = vld [vmem:[%s11850_s2 + $0x228] sm:$0xff]  ;;  %v8540_v50 = vcombine.low %v1572_v1, %v1576_v27  ;;  %v1559_v1 = vld [vmem:[%s11850_s2 + $0x1d8] sm:$0xff] }
 0x10f   : > { %12242 = vst [vmem:[#allocation63_spill] sm:$0xff] %v8522_v25  ;;  %v1563_v27 = vld [vmem:[%s11850_s2 + $0x1f8] sm:$0xff] }
 0x110   : > { %6660 = vmatmul.mubr.msk.bf16.gmra.mxu0 %vm8112_vm6, %v12238_v12  ;;  %6676 = vmatmul.mubr.msk.bf16.gmra.mxu1 %vm8112_vm6, %v12238_v12  ;;  %12240 = vst [vmem:[#allocation61_spill] sm:$0xff] %v8516_v35  ;;  %12241 = vst [vmem:[#allocation62_spill] sm:$0xff] %v8520_v29 }
 0x111   : > { %2293 = vmatpush2.bf16.msra.mxu0 %v8484_v51  ;;  %2334 = vmatpush2.bf16.msra.mxu1 %v8486_v26  ;;  %12244 = vst [vmem:[#allocation64_spill] sm:$0xff] %v8540_v50  ;;  %v8548_v26 = vcombine.high %v1565_v46, %v1569_v48  ;;  %v1558_v51 = vld [vmem:[%s11850_s2 + $0x1d0] sm:$0xff] }
 0x112   : > { %2294 = vmatprep.subr.bf16.mxu0 %v8490_v3  ;;  %2335 = vmatprep.subr.bf16.mxu1 %v8492_v42  ;;  %v8542_v42 = vcombine.low %v1573_v31, %v1577_v11  ;;  %v8546_v3 = vcombine.high %v1564_v52, %v1568_v49  ;;  %v8570_v31 = vcombine.low %v1564_v52, %v1568_v49  ;;  %v1551_v52 = vld [vmem:[%s11850_s2 + $0x198] sm:$0xff] }
 0x113   : > { %1237 = vmatprep.mubr.bf16.mxu0 %v12243_v0  ;;  %1350 = vmatprep.mubr.bf16.mxu1 %v12243_v0  ;;  %12247 = vst [vmem:[#allocation67_spill] sm:$0xff] %v8548_v26  ;;  %v8572_v11 = vcombine.low %v1565_v46, %v1569_v48  ;;  %v1555_v49 = vld [vmem:[%s11850_s2 + $0x1b8] sm:$0xff]  ;;  %v8598_v48 = vcombine.low %v1559_v1, %v1563_v27 }
 0x114   : > { %12245 = vst [vmem:[#allocation65_spill] sm:$0xff] %v8542_v42  ;;  %12246 = vst [vmem:[#allocation66_spill] sm:$0xff] %v8546_v3 }
 0x115   : > { %2295 = vmatpush2.bf16.msra.mxu0 %v8514_v17  ;;  %2336 = vmatpush2.bf16.msra.mxu1 %v8516_v35  ;;  %v1562_v35 = vld [vmem:[%s11850_s2 + $0x1f0] sm:$0xff]  ;;  %12248 = vst [vmem:[#allocation68_spill] sm:$0xff] %v8570_v31  ;;  %12249 = vst [vmem:[#allocation69_spill] sm:$0xff] %v8572_v11 }
 0x116   : > { %2296 = vmatprep.subr.bf16.mxu0 %v8520_v29  ;;  %2337 = vmatprep.subr.bf16.mxu1 %v8522_v25  ;;  %v8576_v25 = vcombine.high %v1558_v51, %v1562_v35  ;;  %v8578_v29 = vcombine.high %v1559_v1, %v1563_v27  ;;  %v8596_v46 = vcombine.low %v1558_v51, %v1562_v35  ;;  %v1543_v35 = vld [vmem:[%s11850_s2 + $0x158] sm:$0xff] }
 0x117   : > { %12253 = vst [vmem:[#allocation73_spill] sm:$0xff] %v8598_v48  ;;  %v1547_v51 = vld [vmem:[%s11850_s2 + $0x178] sm:$0xff]  ;;  %v8624_v27 = vcombine.low %v1551_v52, %v1555_v49 }
 0x118   : > { %6662 = vmatmul.mubr.msk.bf16.gmra.mxu0 %vm8126_vm10, %v12238_v12  ;;  %6678 = vmatmul.mubr.msk.bf16.gmra.mxu1 %vm8126_vm10, %v12238_v12  ;;  %12250 = vst [vmem:[#allocation70_spill] sm:$0xff] %v8576_v25  ;;  %12251 = vst [vmem:[#allocation71_spill] sm:$0xff] %v8578_v29  ;;  %v1554_v12 = vld [vmem:[%s11850_s2 + $0x1b0] sm:$0xff] }
 0x119   : > { %2297 = vmatpush2.bf16.msra.mxu0 %v8540_v50  ;;  %2338 = vmatpush2.bf16.msra.mxu1 %v8542_v42  ;;  %12252 = vst [vmem:[#allocation72_spill] sm:$0xff] %v8596_v46  ;;  %v1542_v42 = vld [vmem:[%s11850_s2 + $0x150] sm:$0xff]  ;;  %v8622_v1 = vcombine.low %v1550_v56, %v1554_v12  ;;  %12257 = vst [vmem:[#allocation77_spill] sm:$0xff] %v8624_v27 }
 0x11a   : > { %2298 = vmatprep.subr.bf16.mxu0 %v8546_v3  ;;  %2339 = vmatprep.subr.bf16.mxu1 %v8548_v26  ;;  %v8602_v26 = vcombine.high %v1550_v56, %v1554_v12  ;;  %v8604_v3 = vcombine.high %v1551_v52, %v1555_v49  ;;  %v1535_v56 = vld [vmem:[%s11850_s2 + $0x118] sm:$0xff]  ;;  %v8650_v49 = vcombine.low %v1543_v35, %v1547_v51 }
 0x11b   : > { %2300 = vmatprep.mubr.bf16.mxu0 %v12243_v0  ;;  %2341 = vmatprep.mubr.bf16.mxu1 %v12243_v0  ;;  %12256 = vst [vmem:[#allocation76_spill] sm:$0xff] %v8622_v1  ;;  %v1539_v12 = vld [vmem:[%s11850_s2 + $0x138] sm:$0xff] }
 0x11c   : > { %12254 = vst [vmem:[#allocation74_spill] sm:$0xff] %v8602_v26  ;;  %12255 = vst [vmem:[#allocation75_spill] sm:$0xff] %v8604_v3 }
 0x11d   : > { %2299 = vmatpush2.bf16.msra.mxu0 %v8570_v31  ;;  %2340 = vmatpush2.bf16.msra.mxu1 %v8572_v11  ;;  %v1546_v11 = vld [vmem:[%s11850_s2 + $0x170] sm:$0xff]  ;;  %12261 = vst [vmem:[#allocation81_spill] sm:$0xff] %v8650_v49 }
 0x11e   : > { %2350 = vmatprep.subr.bf16.mxu0 %v8576_v25  ;;  %2391 = vmatprep.subr.bf16.mxu1 %v8578_v29  ;;  %v8628_v29 = vcombine.high %v1542_v42, %v1546_v11  ;;  %v8630_v25 = vcombine.high %v1543_v35, %v1547_v51  ;;  %v1534_v31 = vld [vmem:[%s11850_s2 + $0x110] sm:$0xff]  ;;  %v8648_v52 = vcombine.low %v1542_v42, %v1546_v11  ;;  %v1527_v42 = vld [vmem:[%s11850_s2 + $0xd8] sm:$0xff] }
 0x11f   : > { %v1531_v11 = vld [vmem:[%s11850_s2 + $0xf8] sm:$0xff]  ;;  %v8674_v51 = vcombine.low %v1535_v56, %v1539_v12 }
 0x120   : > { %2301 = vmatmul.mubr.bf16.vlgmr.msra.gmra.mxu0 %v12243_v0  ;;  %2342 = vmatmul.mubr.bf16.vlgmr.msra.gmra.mxu1 %v12243_v0  ;;  %12258 = vst [vmem:[#allocation78_spill] sm:$0xff] %v8628_v29  ;;  %12259 = vst [vmem:[#allocation79_spill] sm:$0xff] %v8630_v25 }
 0x121   : > { %2351 = vmatpush1.bf16.msra.mxu0 %v8596_v46  ;;  %2392 = vmatpush1.bf16.msra.mxu1 %v8598_v48  ;;  %v1538_v48 = vld [vmem:[%s11850_s2 + $0x130] sm:$0xff]  ;;  %12260 = vst [vmem:[#allocation80_spill] sm:$0xff] %v8648_v52  ;;  %12265 = vst [vmem:[#allocation85_spill] sm:$0xff] %v8674_v51 }
 0x122   : > { %2352 = vmatprep.subr.bf16.mxu0 %v8602_v26  ;;  %2393 = vmatprep.subr.bf16.mxu1 %v8604_v3  ;;  %v8654_v3 = vcombine.high %v1534_v31, %v1538_v48  ;;  %v8656_v26 = vcombine.high %v1535_v56, %v1539_v12  ;;  %v1526_v46 = vld [vmem:[%s11850_s2 + $0xd0] sm:$0xff]  ;;  %v8672_v35 = vcombine.low %v1534_v31, %v1538_v48  ;;  %v1519_v31 = vld [vmem:[%s11850_s2 + $0x98] sm:$0xff] }
 0x123   : > { %2382 = vmatprep.mubr.bf16.mxu0 %v12243_v0  ;;  %2423 = vmatprep.mubr.bf16.mxu1 %v12243_v0  ;;  %v1523_v48 = vld [vmem:[%s11850_s2 + $0xb8] sm:$0xff]  ;;  %v8698_v12 = vcombine.low %v1527_v42, %v1531_v11 }
 0x124   : > { %12262 = vst [vmem:[#allocation82_spill] sm:$0xff] %v8654_v3  ;;  %12263 = vst [vmem:[#allocation83_spill] sm:$0xff] %v8656_v26 }
 0x125   : > { %2353 = vmatpush1.bf16.msra.mxu0 %v8622_v1  ;;  %2394 = vmatpush1.bf16.msra.mxu1 %v8624_v27  ;;  %v1530_v27 = vld [vmem:[%s11850_s2 + $0xf0] sm:$0xff]  ;;  %12264 = vst [vmem:[#allocation84_spill] sm:$0xff] %v8672_v35  ;;  %12269 = vst [vmem:[#allocation89_spill] sm:$0xff] %v8698_v12 }
 0x126   : > { %2354 = vmatprep.subr.bf16.mxu0 %v8628_v29  ;;  %2395 = vmatprep.subr.bf16.mxu1 %v8630_v25  ;;  %v8678_v25 = vcombine.high %v1526_v46, %v1530_v27  ;;  %v8680_v29 = vcombine.high %v1527_v42, %v1531_v11  ;;  %v1518_v1 = vld [vmem:[%s11850_s2 + $0x90] sm:$0xff]  ;;  %v8696_v56 = vcombine.low %v1526_v46, %v1530_v27  ;;  %v1511_v46 = vld [vmem:[%s11850_s2 + $0x58] sm:$0xff] }
 0x127   : > { %v1515_v27 = vld [vmem:[%s11850_s2 + $0x78] sm:$0xff]  ;;  %v8722_v11 = vcombine.low %v1519_v31, %v1523_v48 }
 0x128   : > { %12266 = vst [vmem:[#allocation86_spill] sm:$0xff] %v8678_v25  ;;  %12267 = vst [vmem:[#allocation87_spill] sm:$0xff] %v8680_v29 }
 0x129   : > { %2355 = vmatpush1.bf16.msra.mxu0 %v8648_v52  ;;  %2396 = vmatpush1.bf16.msra.mxu1 %v8650_v49  ;;  %v1522_v49 = vld [vmem:[%s11850_s2 + $0xb0] sm:$0xff]  ;;  %12268 = vst [vmem:[#allocation88_spill] sm:$0xff] %v8696_v56  ;;  %12273 = vst [vmem:[#allocation93_spill] sm:$0xff] %v8722_v11 }
 0x12a   : > { %2356 = vmatprep.subr.bf16.mxu0 %v8654_v3  ;;  %2397 = vmatprep.subr.bf16.mxu1 %v8656_v26  ;;  %v8702_v26 = vcombine.high %v1518_v1, %v1522_v49  ;;  %v8704_v3 = vcombine.high %v1519_v31, %v1523_v48  ;;  %v1510_v52 = vld [vmem:[%s11850_s2 + $0x50] sm:$0xff]  ;;  %v8720_v42 = vcombine.low %v1518_v1, %v1522_v49  ;;  %v1503_v1 = vld [vmem:[%s11850_s2 + $0x18] sm:$0xff] }
 0x12b   : > { %v1507_v49 = vld [vmem:[%s11850_s2 + $0x38] sm:$0xff]  ;;  %v8746_v48 = vcombine.low %v1511_v46, %v1515_v27 }
 0x12c   : > { %12270 = vst [vmem:[#allocation90_spill] sm:$0xff] %v8702_v26  ;;  %12271 = vst [vmem:[#allocation91_spill] sm:$0xff] %v8704_v3 }
 0x12d   : > { %2357 = vmatpush1.bf16.msra.mxu0 %v8672_v35  ;;  %2398 = vmatpush1.bf16.msra.mxu1 %v8674_v51  ;;  %v1514_v51 = vld [vmem:[%s11850_s2 + $0x70] sm:$0xff]  ;;  %12272 = vst [vmem:[#allocation92_spill] sm:$0xff] %v8720_v42  ;;  %12277 = vst [vmem:[#allocation97_spill] sm:$0xff] %v8746_v48 }
 0x12e   : > { %2358 = vmatprep.subr.bf16.mxu0 %v8678_v25  ;;  %2399 = vmatprep.subr.bf16.mxu1 %v8680_v29  ;;  %v8726_v29 = vcombine.high %v1510_v52, %v1514_v51  ;;  %v8728_v25 = vcombine.high %v1511_v46, %v1515_v27  ;;  %v1502_v35 = vld [vmem:[%s11850_s2 + $0x10] sm:$0xff]  ;;  %v8744_v31 = vcombine.low %v1510_v52, %v1514_v51  ;;  %v1623_v52 = vld [vmem:[%s11850_s2 + $0x3d8] sm:$0xff] }
 0x12f   : > { %v1627_v51 = vld [vmem:[%s11850_s2 + $0x3f8] sm:$0xff]  ;;  %v8770_v27 = vcombine.low %v1503_v1, %v1507_v49 }
 0x130   : > { %12274 = vst [vmem:[#allocation94_spill] sm:$0xff] %v8726_v29  ;;  %12275 = vst [vmem:[#allocation95_spill] sm:$0xff] %v8728_v25 }
 0x131   : > { %2359 = vmatpush1.bf16.msra.mxu0 %v8696_v56  ;;  %2400 = vmatpush1.bf16.msra.mxu1 %v8698_v12  ;;  %v1506_v12 = vld [vmem:[%s11850_s2 + $0x30] sm:$0xff]  ;;  %12276 = vst [vmem:[#allocation96_spill] sm:$0xff] %v8744_v31  ;;  %12281 = vst [vmem:[#allocation101_spill] sm:$0xff] %v8770_v27 }
 0x132   : > { %2360 = vmatprep.subr.bf16.mxu0 %v8702_v26  ;;  %2401 = vmatprep.subr.bf16.mxu1 %v8704_v3  ;;  %v8750_v3 = vcombine.high %v1502_v35, %v1506_v12  ;;  %v8752_v26 = vcombine.high %v1503_v1, %v1507_v49  ;;  %v1622_v56 = vld [vmem:[%s11850_s2 + $0x3d0] sm:$0xff]  ;;  %v8768_v46 = vcombine.low %v1502_v35, %v1506_v12  ;;  %v1615_v35 = vld [vmem:[%s11850_s2 + $0x398] sm:$0xff] }
 0x133   : > { %v1619_v12 = vld [vmem:[%s11850_s2 + $0x3b8] sm:$0xff]  ;;  %v8794_v49 = vcombine.low %v1623_v52, %v1627_v51 }
 0x134   : > { %12278 = vst [vmem:[#allocation98_spill] sm:$0xff] %v8750_v3  ;;  %12279 = vst [vmem:[#allocation99_spill] sm:$0xff] %v8752_v26 }
 0x135   : > { %2361 = vmatpush1.bf16.msra.mxu0 %v8720_v42  ;;  %2402 = vmatpush1.bf16.msra.mxu1 %v8722_v11  ;;  %v1626_v11 = vld [vmem:[%s11850_s2 + $0x3f0] sm:$0xff]  ;;  %12280 = vst [vmem:[#allocation100_spill] sm:$0xff] %v8768_v46  ;;  %12285 = vst [vmem:[#allocation105_spill] sm:$0xff] %v8794_v49 }
 0x136   : > { %2362 = vmatprep.subr.bf16.mxu0 %v8726_v29  ;;  %2403 = vmatprep.subr.bf16.mxu1 %v8728_v25  ;;  %v8774_v25 = vcombine.high %v1622_v56, %v1626_v11  ;;  %v8776_v29 = vcombine.high %v1623_v52, %v1627_v51  ;;  %v1614_v42 = vld [vmem:[%s11850_s2 + $0x390] sm:$0xff]  ;;  %v8792_v1 = vcombine.low %v1622_v56, %v1626_v11  ;;  %v1607_v56 = vld [vmem:[%s11850_s2 + $0x358] sm:$0xff] }
 0x137   : > { %v1611_v11 = vld [vmem:[%s11850_s2 + $0x378] sm:$0xff]  ;;  %v8818_v51 = vcombine.low %v1615_v35, %v1619_v12 }
 0x138   : > { %12282 = vst [vmem:[#allocation102_spill] sm:$0xff] %v8774_v25  ;;  %12283 = vst [vmem:[#allocation103_spill] sm:$0xff] %v8776_v29 }
 0x139   : > { %2363 = vmatpush1.bf16.msra.mxu0 %v8744_v31  ;;  %2404 = vmatpush1.bf16.msra.mxu1 %v8746_v48  ;;  %v1618_v48 = vld [vmem:[%s11850_s2 + $0x3b0] sm:$0xff]  ;;  %12284 = vst [vmem:[#allocation104_spill] sm:$0xff] %v8792_v1  ;;  %12289 = vst [vmem:[#allocation109_spill] sm:$0xff] %v8818_v51 }
 0x13a   : > { %2364 = vmatprep.subr.bf16.mxu0 %v8750_v3  ;;  %2405 = vmatprep.subr.bf16.mxu1 %v8752_v26  ;;  %v8798_v26 = vcombine.high %v1614_v42, %v1618_v48  ;;  %v8800_v3 = vcombine.high %v1615_v35, %v1619_v12  ;;  %v1606_v31 = vld [vmem:[%s11850_s2 + $0x350] sm:$0xff]  ;;  %v8816_v52 = vcombine.low %v1614_v42, %v1618_v48  ;;  %v1599_v42 = vld [vmem:[%s11850_s2 + $0x318] sm:$0xff] }
 0x13b   : > { %v1603_v48 = vld [vmem:[%s11850_s2 + $0x338] sm:$0xff]  ;;  %v8842_v12 = vcombine.low %v1607_v56, %v1611_v11 }
 0x13c   : > { %12286 = vst [vmem:[#allocation106_spill] sm:$0xff] %v8798_v26  ;;  %12287 = vst [vmem:[#allocation107_spill] sm:$0xff] %v8800_v3 }
 0x13d   : > { %2365 = vmatpush1.bf16.msra.mxu0 %v8768_v46  ;;  %2406 = vmatpush1.bf16.msra.mxu1 %v8770_v27  ;;  %v1610_v27 = vld [vmem:[%s11850_s2 + $0x370] sm:$0xff]  ;;  %12288 = vst [vmem:[#allocation108_spill] sm:$0xff] %v8816_v52  ;;  %12293 = vst [vmem:[#allocation113_spill] sm:$0xff] %v8842_v12 }
 0x13e   : > { %2366 = vmatprep.subr.bf16.mxu0 %v8774_v25  ;;  %2407 = vmatprep.subr.bf16.mxu1 %v8776_v29  ;;  %v8822_v29 = vcombine.high %v1606_v31, %v1610_v27  ;;  %v8824_v25 = vcombine.high %v1607_v56, %v1611_v11  ;;  %v1598_v46 = vld [vmem:[%s11850_s2 + $0x310] sm:$0xff]  ;;  %v8840_v35 = vcombine.low %v1606_v31, %v1610_v27  ;;  %v1591_v31 = vld [vmem:[%s11850_s2 + $0x2d8] sm:$0xff] }
 0x13f   : > { %v1595_v27 = vld [vmem:[%s11850_s2 + $0x2f8] sm:$0xff]  ;;  %v8866_v11 = vcombine.low %v1599_v42, %v1603_v48 }
 0x140   : > { %12290 = vst [vmem:[#allocation110_spill] sm:$0xff] %v8822_v29  ;;  %12291 = vst [vmem:[#allocation111_spill] sm:$0xff] %v8824_v25 }
 0x141   : > { %2367 = vmatpush2.bf16.msra.mxu0 %v8792_v1  ;;  %2408 = vmatpush2.bf16.msra.mxu1 %v8794_v49  ;;  %v1602_v49 = vld [vmem:[%s11850_s2 + $0x330] sm:$0xff]  ;;  %12292 = vst [vmem:[#allocation112_spill] sm:$0xff] %v8840_v35  ;;  %12297 = vst [vmem:[#allocation117_spill] sm:$0xff] %v8866_v11 }
 0x142   : > { %2368 = vmatprep.subr.bf16.mxu0 %v8798_v26  ;;  %2409 = vmatprep.subr.bf16.mxu1 %v8800_v3  ;;  %v8846_v3 = vcombine.high %v1598_v46, %v1602_v49  ;;  %v8848_v26 = vcombine.high %v1599_v42, %v1603_v48  ;;  %v1590_v1 = vld [vmem:[%s11850_s2 + $0x2d0] sm:$0xff]  ;;  %v8864_v56 = vcombine.low %v1598_v46, %v1602_v49  ;;  %v1583_v46 = vld [vmem:[%s11850_s2 + $0x298] sm:$0xff] }
 0x143   : > { %v1587_v49 = vld [vmem:[%s11850_s2 + $0x2b8] sm:$0xff]  ;;  %v8890_v48 = vcombine.low %v1591_v31, %v1595_v27 }
 0x144   : > { %12294 = vst [vmem:[#allocation114_spill] sm:$0xff] %v8846_v3  ;;  %12295 = vst [vmem:[#allocation115_spill] sm:$0xff] %v8848_v26 }
 0x145   : > { %2369 = vmatpush2.bf16.msra.mxu0 %v8816_v52  ;;  %2410 = vmatpush2.bf16.msra.mxu1 %v8818_v51  ;;  %v1594_v51 = vld [vmem:[%s11850_s2 + $0x2f0] sm:$0xff]  ;;  %12296 = vst [vmem:[#allocation116_spill] sm:$0xff] %v8864_v56  ;;  %12301 = vst [vmem:[#allocation121_spill] sm:$0xff] %v8890_v48 }
 0x146   : > { %2370 = vmatprep.subr.bf16.mxu0 %v8822_v29  ;;  %2411 = vmatprep.subr.bf16.mxu1 %v8824_v25  ;;  %v8870_v25 = vcombine.high %v1590_v1, %v1594_v51  ;;  %v8872_v29 = vcombine.high %v1591_v31, %v1595_v27  ;;  %v1582_v52 = vld [vmem:[%s11850_s2 + $0x290] sm:$0xff]  ;;  %v8888_v42 = vcombine.low %v1590_v1, %v1594_v51  ;;  %v1575_v1 = vld [vmem:[%s11850_s2 + $0x258] sm:$0xff] }
 0x147   : > { %v1579_v51 = vld [vmem:[%s11850_s2 + $0x278] sm:$0xff]  ;;  %v8914_v27 = vcombine.low %v1583_v46, %v1587_v49 }
 0x148   : > { %12298 = vst [vmem:[#allocation118_spill] sm:$0xff] %v8870_v25  ;;  %12299 = vst [vmem:[#allocation119_spill] sm:$0xff] %v8872_v29 }
 0x149   : > { %2371 = vmatpush2.bf16.msra.mxu0 %v8840_v35  ;;  %2412 = vmatpush2.bf16.msra.mxu1 %v8842_v12  ;;  %v1586_v12 = vld [vmem:[%s11850_s2 + $0x2b0] sm:$0xff]  ;;  %12300 = vst [vmem:[#allocation120_spill] sm:$0xff] %v8888_v42  ;;  %12305 = vst [vmem:[#allocation125_spill] sm:$0xff] %v8914_v27 }
 0x14a   : > { %2372 = vmatprep.subr.bf16.mxu0 %v8846_v3  ;;  %2413 = vmatprep.subr.bf16.mxu1 %v8848_v26  ;;  %v8894_v26 = vcombine.high %v1582_v52, %v1586_v12  ;;  %v8896_v3 = vcombine.high %v1583_v46, %v1587_v49  ;;  %v1574_v35 = vld [vmem:[%s11850_s2 + $0x250] sm:$0xff]  ;;  %v8912_v31 = vcombine.low %v1582_v52, %v1586_v12  ;;  %v1567_v52 = vld [vmem:[%s11850_s2 + $0x218] sm:$0xff]  ;;  %v12308_v46 = vlaneseq }
 0x14b   : > { %v1571_v12 = vld [vmem:[%s11850_s2 + $0x238] sm:$0xff] }
 0x14c   : > { %12302 = vst [vmem:[#allocation122_spill] sm:$0xff] %v8894_v26  ;;  %12303 = vst [vmem:[#allocation123_spill] sm:$0xff] %v8896_v3  ;;  %v8935_v49 = vshrl.u32 %v12308_v46, 7  ;;  %v8947_v50 = vcombine.high %v1567_v52, %v1571_v12 }
 0x14d   : > { %2373 = vmatpush2.bf16.msra.mxu0 %v8864_v56  ;;  %2414 = vmatpush2.bf16.msra.mxu1 %v8866_v11  ;;  %v1578_v11 = vld [vmem:[%s11850_s2 + $0x270] sm:$0xff]  ;;  %12304 = vst [vmem:[#allocation124_spill] sm:$0xff] %v8912_v31 }
 0x14e   : > { %2374 = vmatprep.subr.bf16.mxu0 %v8870_v25  ;;  %2415 = vmatprep.subr.bf16.mxu1 %v8872_v29  ;;  %v8918_v29 = vcombine.high %v1574_v35, %v1578_v11  ;;  %v8920_v25 = vcombine.high %v1575_v1, %v1579_v51  ;;  %v1566_v56 = vld [vmem:[%s11850_s2 + $0x210] sm:$0xff]  ;;  %12312 = vst [vmem:[#allocation131_spill] sm:$0xff] %v8947_v50 }
 0x150   : > { %12306 = vst [vmem:[#allocation126_spill] sm:$0xff] %v8918_v29  ;;  %12307 = vst [vmem:[#allocation127_spill] sm:$0xff] %v8920_v25 }
 0x151   : > { %2375 = vmatpush2.bf16.msra.mxu0 %v8888_v42  ;;  %2416 = vmatpush2.bf16.msra.mxu1 %v8890_v48  ;;  %v1570_v48 = vld [vmem:[%s11850_s2 + $0x230] sm:$0xff] }
 0x152   : > { %2376 = vmatprep.subr.bf16.mxu0 %v8894_v26  ;;  %2417 = vmatprep.subr.bf16.mxu1 %v8896_v3  ;;  %v8939_v3 = vcombine.low %v1574_v35, %v1578_v11  ;;  %v8941_v26 = vcombine.low %v1575_v1, %v1579_v51  ;;  %v8945_v42 = vcombine.high %v1566_v56, %v1570_v48  ;;  %v559_v35 = vsub.s32 2, %v8935_v49  ;;  %v8961_v11 = vld [vmem:[%s11851_s3] sm:$0xff] }
 0x153   : > { %v8951_v46 = vcombine.low %v1566_v56, %v1570_v48  ;;  %v563_v1 = vsub.s32 3, %v8935_v49  ;;  %v8972_v48 = vsub.s32 0, %v8935_v49 }
 0x154   : > { %12309 = vst [vmem:[#allocation128_spill] sm:$0xff] %v8939_v3  ;;  %12310 = vst [vmem:[#allocation129_spill] sm:$0xff] %v8941_v26  ;;  %v8967_v56 = vrot.slane %v8961_v11, %v559_v35 }
 0x155   : > { %2377 = vmatpush2.bf16.msra.mxu0 %v8912_v31  ;;  %2418 = vmatpush2.bf16.msra.mxu1 %v8914_v27  ;;  %12311 = vst [vmem:[#allocation130_spill] sm:$0xff] %v8945_v42  ;;  %12313 = vst [vmem:[#allocation132_spill] sm:$0xff] %v8951_v46  ;;  %v8953_v31 = vcombine.low %v1567_v52, %v1571_v12  ;;  %v8975_v51 = vrot.slane %v8961_v11, %v563_v1 }
 0x156   : > { %2378 = vmatprep.subr.bf16.mxu0 %v8918_v29  ;;  %2419 = vmatprep.subr.bf16.mxu1 %v8920_v25  ;;  %12315 = vst [vmem:[#allocation134_spill] sm:$0xff] %v8972_v48 }
 0x157   : > { %12314 = vst [vmem:[#allocation133_spill] sm:$0xff] %v8953_v31  ;;  %12316 = vst [vmem:[#allocation135_spill] sm:$0xff] %v8975_v51 }
 0x159   : > { %2379 = vmatpush2.bf16.msra.mxu0 %v8939_v3  ;;  %2420 = vmatpush2.bf16.msra.mxu1 %v8941_v26 }
 0x15a   : > { %2380 = vmatprep.subr.bf16.mxu0 %v8945_v42  ;;  %2421 = vmatprep.subr.bf16.mxu1 %v8947_v50 }
 0x15d   : > { %2381 = vmatpush2.bf16.msra.mxu0 %v8951_v46  ;;  %2422 = vmatpush2.bf16.msra.mxu1 %v8953_v31 }
 0x15e   : > { %2501 = vmatprep.subr.bf16.mxu0 %v8076_v44  ;;  %2542 = vmatprep.subr.bf16.mxu1 %v8078_v45 }
 0x160   : > { %2383 = vmatmul.mubr.bf16.vlgmr.msra.gmra.mxu0 %v12243_v0  ;;  %2424 = vmatmul.mubr.bf16.vlgmr.msra.gmra.mxu1 %v12243_v0  ;;  %v8979_v52 = vpop.f32.mrf.mxu0  ;;  %v1056_v12 = vpop.f32.mrf.mxu1  ;;  %v8992_v0 = vrot.slane %v8961_v11, %v8972_v48 }
 0x161   : > { %v8982_v35 = vadd.f32 %v1056_v12, %v8967_v56  ;;  %2502 = vmatpush1.bf16.msra.mxu0 %v8150_v60  ;;  %2543 = vmatpush1.bf16.msra.mxu1 %v8152_v61  ;;  %v8998_v60 = vsub.s32 1, %v8935_v49 }
 0x162   : > { %v8986_v45 = vpop.f32.mrf.mxu0  ;;  %v1058_v44 = vpop.f32.mrf.mxu1  ;;  %2503 = vmatprep.subr.bf16.mxu0 %v8154_v62  ;;  %2544 = vmatprep.subr.bf16.mxu1 %v8156_v63 }
 0x163   : > { %v8995_v1 = vadd.f32 %v1058_v44, %v8975_v51  ;;  %12317 = vst [vmem:[#allocation136_spill] sm:$0xff] %v8998_v60 }
 0x164   : > { %v947_v12 = vpop.f32.mrf.mxu0  ;;  %v1060_v31 = vpop.f32.mrf.mxu1 }
 0x165   : > { %v9001_v61 = vadd.f32 %v947_v12, %v8992_v0  ;;  %v9004_v46 = vadd.f32 %v1060_v31, %v8967_v56  ;;  %2504 = vmatpush1.bf16.msra.mxu0 %v8178_v5  ;;  %2545 = vmatpush1.bf16.msra.mxu1 %v8180_v6  ;;  %v9016_v12 = vrot.slane %v8961_v11, %v8998_v60 }
 0x166   : > { %v9008_v48 = vpop.f32.mrf.mxu0  ;;  %v9010_v63 = vpop.f32.mrf.mxu1  ;;  %2505 = vmatprep.subr.bf16.mxu0 %v8184_v7  ;;  %2546 = vmatprep.subr.bf16.mxu1 %v8186_v8 }
 0x167   : > { %12318 = vst [vmem:[#allocation137_spill] sm:$0xff] %v9001_v61  ;;  %12319 = vst [vmem:[#allocation138_spill] sm:$0xff] %v9004_v46 }
 0x168   : > { %12320 = vst [vmem:[#allocation139_spill] sm:$0xff] %v9008_v48  ;;  %12321 = vst [vmem:[#allocation140_spill] sm:$0xff] %v9010_v63  ;;  %v953_v44 = vpop.f32.mrf.mxu0  ;;  %v1066_v62 = vpop.f32.mrf.mxu1 }
 0x169   : > { %12322 = vst [vmem:[#allocation141_spill] sm:$0xff] %v9016_v12  ;;  %v9019_v31 = vadd.f32 %v953_v44, %v8992_v0  ;;  %v9022_v46 = vadd.f32 %v1066_v62, %v8967_v56  ;;  %2506 = vmatpush1.bf16.msra.mxu0 %v8204_v13  ;;  %2547 = vmatpush1.bf16.msra.mxu1 %v8206_v14 }
 0x16a   : > { %v955_v63 = vpop.f32.mrf.mxu0  ;;  %v1068_v61 = vpop.f32.mrf.mxu1  ;;  %2507 = vmatprep.subr.bf16.mxu0 %v8210_v15  ;;  %2548 = vmatprep.subr.bf16.mxu1 %v8212_v16 }
 0x16b   : > { %12323 = vst [vmem:[#allocation142_spill] sm:$0xff] %v9019_v31  ;;  %12324 = vst [vmem:[#allocation143_spill] sm:$0xff] %v9022_v46  ;;  %v9029_v48 = vadd.f32 %v955_v63, %v9016_v12  ;;  %v9032_v60 = vadd.f32 %v1068_v61, %v8975_v51 }
 0x16c   : > { %v957_v44 = vpop.f32.mrf.mxu0  ;;  %v1070_v31 = vpop.f32.mrf.mxu1 }
 0x16d   : > { %12325 = vst [vmem:[#allocation144_spill] sm:$0xff] %v9029_v48  ;;  %12326 = vst [vmem:[#allocation145_spill] sm:$0xff] %v9032_v60  ;;  %v9035_v62 = vadd.f32 %v957_v44, %v8992_v0  ;;  %v9038_v46 = vadd.f32 %v1070_v31, %v8967_v56  ;;  %2508 = vmatpush1.bf16.msra.mxu0 %v8234_v21  ;;  %2549 = vmatpush1.bf16.msra.mxu1 %v8236_v22 }
 0x16e   : > { %v9042_v15 = vpop.f32.mrf.mxu0  ;;  %v9044_v16 = vpop.f32.mrf.mxu1  ;;  %2509 = vmatprep.subr.bf16.mxu0 %v8240_v23  ;;  %2550 = vmatprep.subr.bf16.mxu1 %v8242_v24 }
 0x16f   : > { %12327 = vst [vmem:[#allocation146_spill] sm:$0xff] %v9035_v62  ;;  %12328 = vst [vmem:[#allocation147_spill] sm:$0xff] %v9038_v46 }
 0x170   : > { %12329 = vst [vmem:[#allocation148_spill] sm:$0xff] %v9042_v15  ;;  %12330 = vst [vmem:[#allocation149_spill] sm:$0xff] %v9044_v16  ;;  %v963_v61 = vpop.f32.mrf.mxu0  ;;  %v1076_v63 = vpop.f32.mrf.mxu1 }
 0x171   : > { %v9049_v44 = vadd.f32 %v963_v61, %v8992_v0  ;;  %v9052_v31 = vadd.f32 %v1076_v63, %v8967_v56  ;;  %2510 = vmatpush1.bf16.msra.mxu0 %v8260_v30  ;;  %2551 = vmatpush1.bf16.msra.mxu1 %v8262_v32 }
 0x172   : > { %v965_v46 = vpop.f32.mrf.mxu0  ;;  %v1078_v62 = vpop.f32.mrf.mxu1  ;;  %2511 = vmatprep.subr.bf16.mxu0 %v8266_v33  ;;  %2552 = vmatprep.subr.bf16.mxu1 %v8268_v34 }
 0x173   : > { %12331 = vst [vmem:[#allocation150_spill] sm:$0xff] %v9049_v44  ;;  %12332 = vst [vmem:[#allocation151_spill] sm:$0xff] %v9052_v31  ;;  %v9059_v16 = vadd.f32 %v965_v46, %v9016_v12  ;;  %v9062_v15 = vadd.f32 %v1078_v62, %v8975_v51 }
 0x174   : > { %v967_v61 = vpop.f32.mrf.mxu0  ;;  %v1080_v44 = vpop.f32.mrf.mxu1 }
 0x175   : > { %12333 = vst [vmem:[#allocation152_spill] sm:$0xff] %v9059_v16  ;;  %12334 = vst [vmem:[#allocation153_spill] sm:$0xff] %v9062_v15  ;;  %v9065_v63 = vadd.f32 %v967_v61, %v8992_v0  ;;  %v9068_v31 = vadd.f32 %v1080_v44, %v8967_v56  ;;  %2512 = vmatpush1.bf16.msra.mxu0 %v8290_v40  ;;  %2553 = vmatpush1.bf16.msra.mxu1 %v8292_v41 }
 0x176   : > { %v9072_v60 = vpop.f32.mrf.mxu0  ;;  %v9074_v48 = vpop.f32.mrf.mxu1  ;;  %2513 = vmatprep.subr.bf16.mxu0 %v8296_v43  ;;  %2554 = vmatprep.subr.bf16.mxu1 %v8298_v47 }
 0x177   : > { %12335 = vst [vmem:[#allocation154_spill] sm:$0xff] %v9065_v63  ;;  %12336 = vst [vmem:[#allocation155_spill] sm:$0xff] %v9068_v31 }
 0x178   : > { %12337 = vst [vmem:[#allocation156_spill] sm:$0xff] %v9072_v60  ;;  %12338 = vst [vmem:[#allocation157_spill] sm:$0xff] %v9074_v48  ;;  %v973_v46 = vpop.f32.mrf.mxu0  ;;  %v1086_v62 = vpop.f32.mrf.mxu1 }
 0x179   : > { %v9079_v61 = vadd.f32 %v973_v46, %v8992_v0  ;;  %v9082_v44 = vadd.f32 %v1086_v62, %v8967_v56  ;;  %2514 = vmatpush1.bf16.msra.mxu0 %v8316_v53  ;;  %2555 = vmatpush1.bf16.msra.mxu1 %v8318_v55 }
 0x17a   : > { %v975_v31 = vpop.f32.mrf.mxu0  ;;  %v1088_v63 = vpop.f32.mrf.mxu1  ;;  %2515 = vmatprep.subr.bf16.mxu0 %v8322_v28  ;;  %2556 = vmatprep.subr.bf16.mxu1 %v8324_v57 }
 0x17b   : > { %12339 = vst [vmem:[#allocation158_spill] sm:$0xff] %v9079_v61  ;;  %12340 = vst [vmem:[#allocation159_spill] sm:$0xff] %v9082_v44  ;;  %v9089_v48 = vadd.f32 %v975_v31, %v9016_v12  ;;  %v9092_v60 = vadd.f32 %v1088_v63, %v8975_v51 }
 0x17c   : > { %v977_v46 = vpop.f32.mrf.mxu0  ;;  %v1090_v61 = vpop.f32.mrf.mxu1 }
 0x17d   : > { %12341 = vst [vmem:[#allocation160_spill] sm:$0xff] %v9089_v48  ;;  %12342 = vst [vmem:[#allocation161_spill] sm:$0xff] %v9092_v60  ;;  %v9095_v62 = vadd.f32 %v977_v46, %v8992_v0  ;;  %v9098_v44 = vadd.f32 %v1090_v61, %v8967_v56  ;;  %2516 = vmatpush1.bf16.msra.mxu0 %v8346_v2  ;;  %2557 = vmatpush1.bf16.msra.mxu1 %v8348_v4 }
 0x17e   : > { %v9102_v15 = vpop.f32.mrf.mxu0  ;;  %v9104_v16 = vpop.f32.mrf.mxu1  ;;  %2517 = vmatprep.subr.bf16.mxu0 %v8352_v37  ;;  %2558 = vmatprep.subr.bf16.mxu1 %v8354_v9 }
 0x17f   : > { %12343 = vst [vmem:[#allocation162_spill] sm:$0xff] %v9095_v62  ;;  %12344 = vst [vmem:[#allocation163_spill] sm:$0xff] %v9098_v44 }
 0x180   : > { %12345 = vst [vmem:[#allocation164_spill] sm:$0xff] %v9102_v15  ;;  %12346 = vst [vmem:[#allocation165_spill] sm:$0xff] %v9104_v16  ;;  %v983_v31 = vpop.f32.mrf.mxu0  ;;  %v1096_v63 = vpop.f32.mrf.mxu1 }
 0x181   : > { %v9109_v46 = vadd.f32 %v983_v31, %v8992_v0  ;;  %v9112_v61 = vadd.f32 %v1096_v63, %v8967_v56  ;;  %2518 = vmatpush2.bf16.msra.mxu0 %v8372_v18  ;;  %2559 = vmatpush2.bf16.msra.mxu1 %v8374_v19 }
 0x182   : > { %v985_v44 = vpop.f32.mrf.mxu0  ;;  %v1098_v62 = vpop.f32.mrf.mxu1  ;;  %2519 = vmatprep.subr.bf16.mxu0 %v8378_v20  ;;  %2560 = vmatprep.subr.bf16.mxu1 %v8380_v54 }
 0x183   : > { %12347 = vst [vmem:[#allocation166_spill] sm:$0xff] %v9109_v46  ;;  %12348 = vst [vmem:[#allocation167_spill] sm:$0xff] %v9112_v61  ;;  %v9119_v16 = vadd.f32 %v985_v44, %v9016_v12  ;;  %v9122_v15 = vadd.f32 %v1098_v62, %v8975_v51 }
 0x184   : > { %v987_v31 = vpop.f32.mrf.mxu0  ;;  %v1100_v46 = vpop.f32.mrf.mxu1 }
 0x185   : > { %12349 = vst [vmem:[#allocation168_spill] sm:$0xff] %v9119_v16  ;;  %12350 = vst [vmem:[#allocation169_spill] sm:$0xff] %v9122_v15  ;;  %v9125_v63 = vadd.f32 %v987_v31, %v8992_v0  ;;  %v9128_v61 = vadd.f32 %v1100_v46, %v8967_v56  ;;  %2520 = vmatpush2.bf16.msra.mxu0 %v8402_v36  ;;  %2561 = vmatpush2.bf16.msra.mxu1 %v8404_v38 }
 0x186   : > { %v9132_v60 = vpop.f32.mrf.mxu0  ;;  %v9134_v48 = vpop.f32.mrf.mxu1  ;;  %2521 = vmatprep.subr.bf16.mxu0 %v8408_v39  ;;  %2562 = vmatprep.subr.bf16.mxu1 %v8410_v10 }
 0x187   : > { %12351 = vst [vmem:[#allocation170_spill] sm:$0xff] %v9125_v63  ;;  %12352 = vst [vmem:[#allocation171_spill] sm:$0xff] %v9128_v61 }
 0x188   : > { %12353 = vst [vmem:[#allocation172_spill] sm:$0xff] %v9132_v60  ;;  %12354 = vst [vmem:[#allocation173_spill] sm:$0xff] %v9134_v48  ;;  %v993_v44 = vpop.f32.mrf.mxu0  ;;  %v1106_v62 = vpop.f32.mrf.mxu1  ;;  %v12357_v60 = vld [vmem:[#allocation50_spill] sm:$0xff]  ;;  %v12358_v48 = vld [vmem:[#allocation51_spill] sm:$0xff] }
 0x189   : > { %v9139_v31 = vadd.f32 %v993_v44, %v8992_v0  ;;  %v9142_v46 = vadd.f32 %v1106_v62, %v8967_v56  ;;  %2522 = vmatpush2.bf16.msra.mxu0 %v8428_v58  ;;  %2563 = vmatpush2.bf16.msra.mxu1 %v8430_v59  ;;  %v12363_v59 = vld [vmem:[#allocation52_spill] sm:$0xff]  ;;  %v12364_v58 = vld [vmem:[#allocation53_spill] sm:$0xff] }
 0x18a   : > { %v995_v61 = vpop.f32.mrf.mxu0  ;;  %v1108_v63 = vpop.f32.mrf.mxu1  ;;  %2523 = vmatprep.subr.bf16.mxu0 %v12357_v60  ;;  %2564 = vmatprep.subr.bf16.mxu1 %v12358_v48 }
 0x18b   : > { %12355 = vst [vmem:[#allocation174_spill] sm:$0xff] %v9139_v31  ;;  %12356 = vst [vmem:[#allocation175_spill] sm:$0xff] %v9142_v46  ;;  %v9149_v15 = vadd.f32 %v995_v61, %v9016_v12  ;;  %v9152_v16 = vadd.f32 %v1108_v63, %v8975_v51  ;;  %v12367_v61 = vld [vmem:[#allocation54_spill] sm:$0xff]  ;;  %v12368_v63 = vld [vmem:[#allocation55_spill] sm:$0xff] }
 0x18c   : > { %v997_v44 = vpop.f32.mrf.mxu0  ;;  %v1110_v31 = vpop.f32.mrf.mxu1 }
 0x18d   : > { %12359 = vst [vmem:[#allocation176_spill] sm:$0xff] %v9149_v15  ;;  %12360 = vst [vmem:[#allocation177_spill] sm:$0xff] %v9152_v16  ;;  %v9155_v62 = vadd.f32 %v997_v44, %v8992_v0  ;;  %v9158_v46 = vadd.f32 %v1110_v31, %v8967_v56  ;;  %2524 = vmatpush2.bf16.msra.mxu0 %v12363_v59  ;;  %2565 = vmatpush2.bf16.msra.mxu1 %v12364_v58  ;;  %v12373_v59 = vld [vmem:[#allocation58_spill] sm:$0xff] }
 0x18e   : > { %v9162_v60 = vpop.f32.mrf.mxu0  ;;  %v9164_v48 = vpop.f32.mrf.mxu1  ;;  %2525 = vmatprep.subr.bf16.mxu0 %v12367_v61  ;;  %2566 = vmatprep.subr.bf16.mxu1 %v12368_v63 }
 0x18f   : > { %12361 = vst [vmem:[#allocation178_spill] sm:$0xff] %v9155_v62  ;;  %12362 = vst [vmem:[#allocation179_spill] sm:$0xff] %v9158_v46  ;;  %v12371_v46 = vld [vmem:[#allocation56_spill] sm:$0xff]  ;;  %v12372_v62 = vld [vmem:[#allocation57_spill] sm:$0xff] }
 0x190   : > { %12365 = vst [vmem:[#allocation180_spill] sm:$0xff] %v9162_v60  ;;  %12366 = vst [vmem:[#allocation181_spill] sm:$0xff] %v9164_v48  ;;  %v1003_v16 = vpop.f32.mrf.mxu0  ;;  %v1116_v15 = vpop.f32.mrf.mxu1  ;;  %v12374_v48 = vld [vmem:[#allocation59_spill] sm:$0xff] }
 0x191   : > { %v9169_v44 = vadd.f32 %v1003_v16, %v8992_v0  ;;  %v9172_v31 = vadd.f32 %v1116_v15, %v8967_v56  ;;  %2526 = vmatpush2.bf16.msra.mxu0 %v12371_v46  ;;  %2567 = vmatpush2.bf16.msra.mxu1 %v12372_v62  ;;  %v12379_v62 = vld [vmem:[#allocation61_spill] sm:$0xff] }
 0x192   : > { %v1005_v58 = vpop.f32.mrf.mxu0  ;;  %v1118_v60 = vpop.f32.mrf.mxu1  ;;  %2527 = vmatprep.subr.bf16.mxu0 %v12373_v59  ;;  %2568 = vmatprep.subr.bf16.mxu1 %v12374_v48 }
 0x193   : > { %12369 = vst [vmem:[#allocation182_spill] sm:$0xff] %v9169_v44  ;;  %12370 = vst [vmem:[#allocation183_spill] sm:$0xff] %v9172_v31  ;;  %v9179_v63 = vadd.f32 %v1005_v58, %v9016_v12  ;;  %v9182_v61 = vadd.f32 %v1118_v60, %v8975_v51  ;;  %v12382_v58 = vld [vmem:[#allocation62_spill] sm:$0xff]  ;;  %v12383_v60 = vld [vmem:[#allocation63_spill] sm:$0xff] }
 0x194   : > { %v1007_v16 = vpop.f32.mrf.mxu0  ;;  %v1120_v44 = vpop.f32.mrf.mxu1 }
 0x195   : > { %12375 = vst [vmem:[#allocation184_spill] sm:$0xff] %v9179_v63  ;;  %12376 = vst [vmem:[#allocation185_spill] sm:$0xff] %v9182_v61  ;;  %v9185_v15 = vadd.f32 %v1007_v16, %v8992_v0  ;;  %v9188_v31 = vadd.f32 %v1120_v44, %v8967_v56  ;;  %2528 = vmatpush2.bf16.msra.mxu0 %v8514_v17  ;;  %2569 = vmatpush2.bf16.msra.mxu1 %v12379_v62  ;;  %v567_v16 = vsub.s32 4, %v8935_v49  ;;  %v12386_v62 = vld [vmem:[#allocation64_spill] sm:$0xff]  ;;  %v12388_v17 = vld [vmem:[#allocation66_spill] sm:$0xff] }
 0x196   : > { %v9192_v59 = vpop.f32.mrf.mxu0  ;;  %v9194_v48 = vpop.f32.mrf.mxu1  ;;  %2529 = vmatprep.subr.bf16.mxu0 %v12382_v58  ;;  %2570 = vmatprep.subr.bf16.mxu1 %v12383_v60  ;;  %v12389_v60 = vld [vmem:[#allocation67_spill] sm:$0xff] }
 0x197   : > { %12377 = vst [vmem:[#allocation186_spill] sm:$0xff] %v9185_v15  ;;  %12378 = vst [vmem:[#allocation187_spill] sm:$0xff] %v9188_v31  ;;  %v575_v31 = vsub.s32 6, %v8935_v49 }
 0x198   : > { %12380 = vst [vmem:[#allocation188_spill] sm:$0xff] %v9192_v59  ;;  %12381 = vst [vmem:[#allocation189_spill] sm:$0xff] %v9194_v48  ;;  %v1013_v61 = vpop.f32.mrf.mxu0  ;;  %v1126_v63 = vpop.f32.mrf.mxu1  ;;  %v12387_v59 = vld [vmem:[#allocation65_spill] sm:$0xff] }
 0x199   : > { %v9200_v15 = vadd.f32 %v1013_v61, %v8992_v0  ;;  %v9203_v44 = vadd.f32 %v1126_v63, %v8967_v56  ;;  %2530 = vmatpush2.bf16.msra.mxu0 %v12386_v62  ;;  %2571 = vmatpush2.bf16.msra.mxu1 %v12387_v59  ;;  %v571_v63 = vsub.s32 5, %v8935_v49  ;;  %v9219_v59 = vrot.slane %v8961_v11, %v567_v16  ;;  %v12399_v16 = vld [vmem:[#allocation71_spill] sm:$0xff] }
 0x19a   : > { %v1015_v48 = vpop.f32.mrf.mxu0  ;;  %v1128_v58 = vpop.f32.mrf.mxu1  ;;  %2531 = vmatprep.subr.bf16.mxu0 %v12388_v17  ;;  %2572 = vmatprep.subr.bf16.mxu1 %v12389_v60 }
 0x19b   : > { %12384 = vst [vmem:[#allocation190_spill] sm:$0xff] %v9200_v15  ;;  %12385 = vst [vmem:[#allocation191_spill] sm:$0xff] %v9203_v44  ;;  %v9211_v46 = vadd.f32 %v1015_v48, %v9016_v12  ;;  %v9214_v61 = vadd.f32 %v1128_v58, %v8975_v51  ;;  %v579_v44 = vsub.s32 7, %v8935_v49  ;;  %v9228_v48 = vrot.slane %v8961_v11, %v575_v31  ;;  %v12394_v58 = vld [vmem:[#allocation68_spill] sm:$0xff]  ;;  %v12398_v51 = vld [vmem:[#allocation70_spill] sm:$0xff] }
 0x19c   : > { %v1017_v15 = vpop.f32.mrf.mxu0  ;;  %v1130_v62 = vpop.f32.mrf.mxu1 }
 0x19d   : > { %12390 = vst [vmem:[#allocation192_spill] sm:$0xff] %v9211_v46  ;;  %12391 = vst [vmem:[#allocation193_spill] sm:$0xff] %v9214_v61  ;;  %v9222_v10 = vadd.f32 %v1017_v15, %v8992_v0  ;;  %v9225_v60 = vadd.f32 %v1130_v62, %v8967_v56  ;;  %2532 = vmatpush2.bf16.msra.mxu0 %v12394_v58  ;;  %v12395_v61 = vld [vmem:[#allocation69_spill] sm:$0xff]  ;;  %v9239_v15 = vrot.slane %v8961_v11, %v571_v63 }
 0x19e   : > { %2573 = vmatpush2.bf16.msra.mxu1 %v12395_v61  ;;  %v9232_v46 = vpop.f32.mrf.mxu0  ;;  %v9234_v49 = vpop.f32.mrf.mxu1  ;;  %2583 = vmatprep.subr.bf16.mxu0 %v12398_v51  ;;  %v9242_v56 = vrot.slane %v8961_v11, %v579_v44 }
 0x19f   : > { %12392 = vst [vmem:[#allocation194_spill] sm:$0xff] %v9222_v10  ;;  %12393 = vst [vmem:[#allocation195_spill] sm:$0xff] %v9225_v60  ;;  %2624 = vmatprep.subr.bf16.mxu1 %v12399_v16 }
 0x1a0   : > { %12396 = vst [vmem:[#allocation196_spill] sm:$0xff] %v9232_v46  ;;  %12397 = vst [vmem:[#allocation197_spill] sm:$0xff] %v9234_v49  ;;  %v1169_v62 = vpop.f32.mrf.mxu0  ;;  %v1282_v31 = vpop.f32.mrf.mxu1 }
 0x1a1   : > { %12400 = vst [vmem:[#allocation198_spill] sm:$0xff] %v9239_v15  ;;  %12401 = vst [vmem:[#allocation199_spill] sm:$0xff] %v9242_v56  ;;  %v9245_v60 = vadd.f32 %v1169_v62, %v9219_v59  ;;  %v9248_v10 = vadd.f32 %v1282_v31, %v9228_v48 }
 0x1a2   : > { %v1171_v46 = vpop.f32.mrf.mxu0  ;;  %v1284_v49 = vpop.f32.mrf.mxu1 }
 0x1a3   : > { %v9251_v51 = vadd.f32 %v1171_v46, %v9239_v15  ;;  %v9254_v16 = vadd.f32 %v1284_v49, %v9242_v56 }
 0x1a4   : > { %v1173_v63 = vpop.f32.mrf.mxu0  ;;  %v1286_v61 = vpop.f32.mrf.mxu1 }
 0x1a5   : > { %v9257_v11 = vadd.f32 %v1173_v63, %v9219_v59  ;;  %v9260_v44 = vadd.f32 %v1286_v61, %v9228_v48 }
 0x1a6   : > { %v9262_v62 = vpop.f32.mrf.mxu0  ;;  %v9264_v31 = vpop.f32.mrf.mxu1 }
 0x1a7   : > { %12402 = vst [vmem:[#allocation200_spill] sm:$0xff] %v9257_v11  ;;  %12403 = vst [vmem:[#allocation201_spill] sm:$0xff] %v9260_v44 }
 0x1a8   : > { %12404 = vst [vmem:[#allocation202_spill] sm:$0xff] %v9262_v62  ;;  %12405 = vst [vmem:[#allocation203_spill] sm:$0xff] %v9264_v31  ;;  %v1179_v58 = vpop.f32.mrf.mxu0  ;;  %v1292_v17 = vpop.f32.mrf.mxu1 }
 0x1a9   : > { %v9267_v46 = vadd.f32 %v1179_v58, %v9219_v59  ;;  %v9270_v49 = vadd.f32 %v1292_v17, %v9228_v48 }
 0x1aa   : > { %v1181_v39 = vpop.f32.mrf.mxu0  ;;  %v1294_v38 = vpop.f32.mrf.mxu1 }
 0x1ab   : > { %12406 = vst [vmem:[#allocation204_spill] sm:$0xff] %v9267_v46  ;;  %12407 = vst [vmem:[#allocation205_spill] sm:$0xff] %v9270_v49  ;;  %v9273_v63 = vadd.f32 %v1181_v39, %v9239_v15  ;;  %v9276_v61 = vadd.f32 %v1294_v38, %v9242_v56 }
 0x1ac   : > { %v1183_v44 = vpop.f32.mrf.mxu0  ;;  %v1296_v11 = vpop.f32.mrf.mxu1 }
 0x1ad   : > { %12408 = vst [vmem:[#allocation206_spill] sm:$0xff] %v9273_v63  ;;  %12409 = vst [vmem:[#allocation207_spill] sm:$0xff] %v9276_v61  ;;  %v9279_v31 = vadd.f32 %v1183_v44, %v9219_v59  ;;  %v9282_v62 = vadd.f32 %v1296_v11, %v9228_v48 }
 0x1ae   : > { %v9284_v58 = vpop.f32.mrf.mxu0  ;;  %v9286_v17 = vpop.f32.mrf.mxu1 }
 0x1af   : > { %12410 = vst [vmem:[#allocation208_spill] sm:$0xff] %v9279_v31  ;;  %12411 = vst [vmem:[#allocation209_spill] sm:$0xff] %v9282_v62 }
 0x1b0   : > { %12412 = vst [vmem:[#allocation210_spill] sm:$0xff] %v9284_v58  ;;  %12413 = vst [vmem:[#allocation211_spill] sm:$0xff] %v9286_v17  ;;  %v1189_v49 = vpop.f32.mrf.mxu0  ;;  %v1302_v46 = vpop.f32.mrf.mxu1 }
 0x1b1   : > { %v9289_v39 = vadd.f32 %v1189_v49, %v9219_v59  ;;  %v9292_v38 = vadd.f32 %v1302_v46, %v9228_v48 }
 0x1b2   : > { %v1191_v61 = vpop.f32.mrf.mxu0  ;;  %v1304_v63 = vpop.f32.mrf.mxu1 }
 0x1b3   : > { %12414 = vst [vmem:[#allocation212_spill] sm:$0xff] %v9289_v39  ;;  %12415 = vst [vmem:[#allocation213_spill] sm:$0xff] %v9292_v38  ;;  %v9295_v44 = vadd.f32 %v1191_v61, %v9239_v15  ;;  %v9298_v11 = vadd.f32 %v1304_v63, %v9242_v56 }
 0x1b4   : > { %v1193_v62 = vpop.f32.mrf.mxu0  ;;  %v1306_v31 = vpop.f32.mrf.mxu1 }
 0x1b5   : > { %12416 = vst [vmem:[#allocation214_spill] sm:$0xff] %v9295_v44  ;;  %12417 = vst [vmem:[#allocation215_spill] sm:$0xff] %v9298_v11  ;;  %v9301_v17 = vadd.f32 %v1193_v62, %v9219_v59  ;;  %v9304_v58 = vadd.f32 %v1306_v31, %v9228_v48 }
 0x1b6   : > { %v9306_v49 = vpop.f32.mrf.mxu0  ;;  %v9308_v46 = vpop.f32.mrf.mxu1 }
 0x1b7   : > { %12418 = vst [vmem:[#allocation216_spill] sm:$0xff] %v9301_v17  ;;  %12419 = vst [vmem:[#allocation217_spill] sm:$0xff] %v9304_v58 }
 0x1b8   : > { %12420 = vst [vmem:[#allocation218_spill] sm:$0xff] %v9306_v49  ;;  %12421 = vst [vmem:[#allocation219_spill] sm:$0xff] %v9308_v46  ;;  %v1199_v38 = vpop.f32.mrf.mxu0  ;;  %v1312_v39 = vpop.f32.mrf.mxu1 }
 0x1b9   : > { %v9311_v61 = vadd.f32 %v1199_v38, %v9219_v59  ;;  %v9314_v63 = vadd.f32 %v1312_v39, %v9228_v48 }
 0x1ba   : > { %v1201_v11 = vpop.f32.mrf.mxu0  ;;  %v1314_v44 = vpop.f32.mrf.mxu1 }
 0x1bb   : > { %12422 = vst [vmem:[#allocation220_spill] sm:$0xff] %v9311_v61  ;;  %12423 = vst [vmem:[#allocation221_spill] sm:$0xff] %v9314_v63  ;;  %v9317_v62 = vadd.f32 %v1201_v11, %v9239_v15  ;;  %v9320_v31 = vadd.f32 %v1314_v44, %v9242_v56 }
 0x1bc   : > { %v1203_v58 = vpop.f32.mrf.mxu0  ;;  %v1316_v17 = vpop.f32.mrf.mxu1 }
 0x1bd   : > { %12424 = vst [vmem:[#allocation222_spill] sm:$0xff] %v9317_v62  ;;  %12425 = vst [vmem:[#allocation223_spill] sm:$0xff] %v9320_v31  ;;  %v9323_v46 = vadd.f32 %v1203_v58, %v9219_v59  ;;  %v9326_v49 = vadd.f32 %v1316_v17, %v9228_v48 }
 0x1be   : > { %v9328_v38 = vpop.f32.mrf.mxu0  ;;  %v9330_v39 = vpop.f32.mrf.mxu1 }
 0x1bf   : > { %12426 = vst [vmem:[#allocation224_spill] sm:$0xff] %v9323_v46  ;;  %12427 = vst [vmem:[#allocation225_spill] sm:$0xff] %v9326_v49 }
 0x1c0   : > { %12428 = vst [vmem:[#allocation226_spill] sm:$0xff] %v9328_v38  ;;  %12429 = vst [vmem:[#allocation227_spill] sm:$0xff] %v9330_v39  ;;  %v1209_v63 = vpop.f32.mrf.mxu0  ;;  %v1322_v61 = vpop.f32.mrf.mxu1 }
 0x1c1   : > { %v9333_v11 = vadd.f32 %v1209_v63, %v9219_v59  ;;  %v9336_v44 = vadd.f32 %v1322_v61, %v9228_v48 }
 0x1c2   : > { %v1211_v31 = vpop.f32.mrf.mxu0  ;;  %v1324_v62 = vpop.f32.mrf.mxu1 }
 0x1c3   : > { %12430 = vst [vmem:[#allocation228_spill] sm:$0xff] %v9333_v11  ;;  %12431 = vst [vmem:[#allocation229_spill] sm:$0xff] %v9336_v44  ;;  %v9339_v58 = vadd.f32 %v1211_v31, %v9239_v15  ;;  %v9342_v17 = vadd.f32 %v1324_v62, %v9242_v56 }
 0x1c4   : > { %v1213_v49 = vpop.f32.mrf.mxu0  ;;  %v1326_v46 = vpop.f32.mrf.mxu1 }
 0x1c5   : > { %12432 = vst [vmem:[#allocation230_spill] sm:$0xff] %v9339_v58  ;;  %12433 = vst [vmem:[#allocation231_spill] sm:$0xff] %v9342_v17  ;;  %v9345_v39 = vadd.f32 %v1213_v49, %v9219_v59  ;;  %v9348_v38 = vadd.f32 %v1326_v46, %v9228_v48 }
 0x1c6   : > { %v9350_v63 = vpop.f32.mrf.mxu0  ;;  %v9352_v61 = vpop.f32.mrf.mxu1 }
 0x1c7   : > { %12434 = vst [vmem:[#allocation232_spill] sm:$0xff] %v9345_v39  ;;  %12435 = vst [vmem:[#allocation233_spill] sm:$0xff] %v9348_v38 }
 0x1c8   : > { %12436 = vst [vmem:[#allocation234_spill] sm:$0xff] %v9350_v63  ;;  %12437 = vst [vmem:[#allocation235_spill] sm:$0xff] %v9352_v61  ;;  %v1219_v44 = vpop.f32.mrf.mxu0  ;;  %v1332_v11 = vpop.f32.mrf.mxu1 }
 0x1c9   : > { %v9355_v31 = vadd.f32 %v1219_v44, %v9219_v59  ;;  %v9358_v62 = vadd.f32 %v1332_v11, %v9228_v48 }
 0x1ca   : > { %v1221_v17 = vpop.f32.mrf.mxu0  ;;  %v1334_v58 = vpop.f32.mrf.mxu1 }
 0x1cb   : > { %12438 = vst [vmem:[#allocation236_spill] sm:$0xff] %v9355_v31  ;;  %12439 = vst [vmem:[#allocation237_spill] sm:$0xff] %v9358_v62  ;;  %v9361_v49 = vadd.f32 %v1221_v17, %v9239_v15  ;;  %v9364_v46 = vadd.f32 %v1334_v58, %v9242_v56 }
 0x1cc   : > { %v1223_v38 = vpop.f32.mrf.mxu0  ;;  %v1336_v39 = vpop.f32.mrf.mxu1 }
 0x1cd   : > { %12440 = vst [vmem:[#allocation238_spill] sm:$0xff] %v9361_v49  ;;  %12441 = vst [vmem:[#allocation239_spill] sm:$0xff] %v9364_v46  ;;  %v9367_v61 = vadd.f32 %v1223_v38, %v9219_v59  ;;  %v9370_v63 = vadd.f32 %v1336_v39, %v9228_v48 }
 0x1ce   : > { %v9372_v44 = vpop.f32.mrf.mxu0  ;;  %v9374_v11 = vpop.f32.mrf.mxu1 }
 0x1cf   : > { %12442 = vst [vmem:[#allocation240_spill] sm:$0xff] %v9367_v61  ;;  %12443 = vst [vmem:[#allocation241_spill] sm:$0xff] %v9370_v63 }
 0x1d0   : > { %12444 = vst [vmem:[#allocation242_spill] sm:$0xff] %v9372_v44  ;;  %12445 = vst [vmem:[#allocation243_spill] sm:$0xff] %v9374_v11  ;;  %v1229_v62 = vpop.f32.mrf.mxu0  ;;  %v1342_v31 = vpop.f32.mrf.mxu1 }
 0x1d1   : > { %v9377_v17 = vadd.f32 %v1229_v62, %v9219_v59  ;;  %v9380_v58 = vadd.f32 %v1342_v31, %v9228_v48 }
 0x1d2   : > { %v1231_v46 = vpop.f32.mrf.mxu0  ;;  %v1344_v49 = vpop.f32.mrf.mxu1 }
 0x1d3   : > { %12446 = vst [vmem:[#allocation244_spill] sm:$0xff] %v9377_v17  ;;  %12447 = vst [vmem:[#allocation245_spill] sm:$0xff] %v9380_v58  ;;  %v9383_v38 = vadd.f32 %v1231_v46, %v9239_v15  ;;  %v9386_v39 = vadd.f32 %v1344_v49, %v9242_v56 }
 0x1d4   : > { %v1233_v63 = vpop.f32.mrf.mxu0  ;;  %v1346_v61 = vpop.f32.mrf.mxu1 }
 0x1d5   : > { %12448 = vst [vmem:[#allocation246_spill] sm:$0xff] %v9383_v38  ;;  %12449 = vst [vmem:[#allocation247_spill] sm:$0xff] %v9386_v39  ;;  %v9389_v11 = vadd.f32 %v1233_v63, %v9219_v59  ;;  %v9392_v44 = vadd.f32 %v1346_v61, %v9228_v48 }
 0x1d6   : > { %v9394_v62 = vpop.f32.mrf.mxu0  ;;  %v9396_v31 = vpop.f32.mrf.mxu1 }
 0x1d7   : > { %12450 = vst [vmem:[#allocation248_spill] sm:$0xff] %v9389_v11  ;;  %12451 = vst [vmem:[#allocation249_spill] sm:$0xff] %v9392_v44 }
 0x1d8   : > { %12452 = vst [vmem:[#allocation250_spill] sm:$0xff] %v9394_v62  ;;  %12453 = vst [vmem:[#allocation251_spill] sm:$0xff] %v9396_v31  ;;  %v1239_v58 = vpop.f32.mrf.mxu0  ;;  %v1352_v17 = vpop.f32.mrf.mxu1 }
 0x1d9   : > { %v9399_v46 = vadd.f32 %v1239_v58, %v9219_v59  ;;  %v9402_v49 = vadd.f32 %v1352_v17, %v9228_v48 }
 0x1da   : > { %v1241_v39 = vpop.f32.mrf.mxu0  ;;  %v1354_v38 = vpop.f32.mrf.mxu1 }
 0x1db   : > { %12454 = vst [vmem:[#allocation252_spill] sm:$0xff] %v9399_v46  ;;  %12455 = vst [vmem:[#allocation253_spill] sm:$0xff] %v9402_v49  ;;  %v9405_v63 = vadd.f32 %v1241_v39, %v9239_v15  ;;  %v9408_v61 = vadd.f32 %v1354_v38, %v9242_v56  ;;  %v944_v56 = vadd.f32 %v8979_v52, %v8992_v0 }
 0x1dc   : > { %v1243_v44 = vpop.f32.mrf.mxu0  ;;  %v1356_v11 = vpop.f32.mrf.mxu1 }
 0x1dd   : > { %12456 = vst [vmem:[#allocation254_spill] sm:$0xff] %v9405_v63  ;;  %12457 = vst [vmem:[#allocation255_spill] sm:$0xff] %v9408_v61  ;;  %v9411_v31 = vadd.f32 %v1243_v44, %v9219_v59  ;;  %v9414_v62 = vadd.f32 %v1356_v11, %v9228_v48  ;;  %v946_v59 = vadd.f32 %v8986_v45, %v9016_v12 }
 0x1de   : > { %v9416_v58 = vpop.f32.mrf.mxu0  ;;  %v9418_v17 = vpop.f32.mrf.mxu1 }
 0x1df   : > { %12458 = vst [vmem:[#allocation256_spill] sm:$0xff] %v9411_v31  ;;  %12459 = vst [vmem:[#allocation257_spill] sm:$0xff] %v9414_v62 }
 0x1e0   : > { %12460 = vst [vmem:[#allocation258_spill] sm:$0xff] %v9416_v58  ;;  %12461 = vst [vmem:[#allocation259_spill] sm:$0xff] %v9418_v17  ;;  %v2302_v49 = vpop.f32.mrf.mxu0  ;;  %v2343_v46 = vpop.f32.mrf.mxu1 }
 0x1e1   : > { %v2432_v48 = vadd.f32 %v2302_v49, %v944_v56  ;;  %v2434_v44 = vadd.f32 %v2343_v46, %v8982_v35 }
 0x1e2   : > { %v2304_v36 = vpop.f32.mrf.mxu0  ;;  %v2345_v39 = vpop.f32.mrf.mxu1 }
 0x1e3   : > { %v2433_v11 = vadd.f32 %v2304_v36, %v946_v59  ;;  %v6807_v62 = vmul.f32 -1.442695, %v2432_v48  ;;  %v2435_v31 = vadd.f32 %v2345_v39, %v8995_v1  ;;  %v6809_v17 = vmul.f32 -1.442695, %v2434_v44 }
 0x1e4   : > { %v2306_v63 = vpop.f32.mrf.mxu0  ;;  %v2347_v15 = vpop.f32.mrf.mxu1 }
 0x1e5   : > { %v6808_v58 = vmul.f32 -1.442695, %v2433_v11  ;;  %7085 = vpow2.f32 %v6807_v62  ;;  %v6810_v63 = vmul.f32 -1.442695, %v2435_v31 }
 0x1e6   : > { %v2307_v38 = vpop.f32.mrf.mxu0  ;;  %v2348_v61 = vpop.f32.mrf.mxu1  ;;  %7087 = vpow2.f32 %v6809_v17 }
 0x1e7   : > { %7089 = vpow2.f32 %v6808_v58 }
 0x1e8   : > { %7091 = vpow2.f32 %v6810_v63 }
 0x1f2   : > { %v7086_v15 = vpop.eup %7085 }
 0x1f3   : > { %v7088_v61 = vpop.eup %7087  ;;  %v2446_v0 = vadd.f32 1.0, %v7086_v15 }
 0x1f4   : > { %v7090_v52 = vpop.eup %7089  ;;  %v2458_v45 = vadd.f32 1.0, %v7088_v61 }
 0x1f5   : > { %v7092_v38 = vpop.eup %7091  ;;  %v2447_v56 = vadd.f32 1.0, %v7090_v52  ;;  %7093 = vrcp.f32 %v2446_v0 }
 0x1f6   : > { %v2459_v35 = vadd.f32 1.0, %v7092_v38  ;;  %7095 = vrcp.f32 %v2458_v45 }
 0x1f7   : > { %7097 = vrcp.f32 %v2447_v56 }
 0x220   : > { %v2384_v36 = vpop.f32.mrf.mxu0  ;;  %v2425_v46 = vpop.f32.mrf.mxu1 }
 0x221   : > { %v2436_v1 = vadd.f32 %v2384_v36, %v9245_v60  ;;  %v2438_v62 = vadd.f32 %v2425_v46, %v9248_v10  ;;  %v7094_v60 = vpop.eup %7093 }
 0x222   : > { %v2386_v31 = vpop.f32.mrf.mxu0  ;;  %v2427_v49 = vpop.f32.mrf.mxu1 }
 0x223   : > { %7099 = vtanh.f32 %v2436_v1  ;;  %v6811_v58 = vmul.f32 -1.442695, %v2438_v62  ;;  %v2437_v17 = vadd.f32 %v2386_v31, %v9251_v51  ;;  %v2439_v39 = vadd.f32 %v2427_v49, %v9254_v16  ;;  %v7096_v10 = vpop.eup %7095 }
 0x224   : > { %7101 = vrcp.f32 %v2459_v35  ;;  %v2388_v59 = vpop.f32.mrf.mxu0  ;;  %v2429_v48 = vpop.f32.mrf.mxu1  ;;  %v2478_v0 = vmul.f32 0.0, %v7096_v10  ;;  %v12465_v10 = vld [vmem:[#allocation75_spill] sm:$0xff] }
 0x225   : > { %7103 = vpow2.f32 %v6811_v58  ;;  %v6812_v44 = vmul.f32 -1.442695, %v2439_v39  ;;  %v7098_v15 = vpop.eup %7097 }
 0x226   : > { %7105 = vtanh.f32 %v2437_v17  ;;  %v2389_v11 = vpop.f32.mrf.mxu0  ;;  %v2430_v63 = vpop.f32.mrf.mxu1 }
 0x227   : > { %7107 = vpow2.f32 %v6812_v44  ;;  %v12462_v11 = vld [vmem:[#allocation72_spill] sm:$0xff]  ;;  %v12463_v63 = vld [vmem:[#allocation73_spill] sm:$0xff] }
 0x230   : > { %v7100_v61 = vpop.eup %7099 }
 0x231   : > { %v7102_v52 = vpop.eup %7101  ;;  %v2480_v38 = vmul.f32 %v7100_v61, %v7094_v60  ;;  %v12464_v60 = vld [vmem:[#allocation74_spill] sm:$0xff]  ;;  %v12467_v61 = vld [vmem:[#allocation77_spill] sm:$0xff] }
 0x232   : > { %v7104_v45 = vpop.eup %7103  ;;  %v2479_v36 = vmul.f32 0.0, %v7102_v52  ;;  %v12468_v52 = vld [vmem:[#allocation78_spill] sm:$0xff] }
 0x233   : > { %v7106_v51 = vpop.eup %7105  ;;  %v9430_v56 = vadd.f32 %v2480_v38, %v2478_v0  ;;  %v2472_v16 = vadd.f32 1.0, %v7104_v45  ;;  %v12469_v0 = vld [vmem:[#allocation79_spill] sm:$0xff]  ;;  %v12470_v38 = vld [vmem:[#allocation80_spill] sm:$0xff]  ;;  %v12471_v45 = vld [vmem:[#allocation81_spill] sm:$0xff] }
 0x234   : > { %v7108_v35 = vpop.eup %7107  ;;  %v2481_v46 = vmul.f32 %v7106_v51, %v7098_v15  ;;  %v12466_v15 = vld [vmem:[#allocation76_spill] sm:$0xff]  ;;  %v12472_v51 = vld [vmem:[#allocation82_spill] sm:$0xff] }
 0x235   : > { %7109 = vtanh.f32 %v9430_v56  ;;  %v2473_v1 = vadd.f32 1.0, %v7108_v35  ;;  %v12474_v35 = vld [vmem:[#allocation84_spill] sm:$0xff] }
 0x236   : > { %7111 = vrcp.f32 %v2472_v16  ;;  %v9433_v62 = vadd.f32 %v2481_v46, %v2479_v36  ;;  %v12473_v16 = vld [vmem:[#allocation83_spill] sm:$0xff]  ;;  %v12475_v36 = vld [vmem:[#allocation85_spill] sm:$0xff]  ;;  %v12476_v46 = vld [vmem:[#allocation86_spill] sm:$0xff] }
 0x237   : > { %7113 = vrcp.f32 %v2473_v1  ;;  %v12477_v1 = vld [vmem:[#allocation87_spill] sm:$0xff] }
 0x238   : > { %7115 = vtanh.f32 %v9433_v62 }
 0x242   : > { %v7110_v31 = vpop.eup %7109 }
 0x243   : > { %v7112_v49 = vpop.eup %7111 }
 0x244   : > { %v7114_v58 = vpop.eup %7113  ;;  %v2486_v39 = vmul.f32 %v7112_v49, %v7110_v31  ;;  %v12478_v31 = vld [vmem:[#allocation88_spill] sm:$0xff]  ;;  %v12479_v49 = vld [vmem:[#allocation89_spill] sm:$0xff] }
 0x245   : > { %v7116_v17 = vpop.eup %7115 }
 0x246   : > { %v2487_v59 = vmul.f32 %v7116_v17, %v7114_v58  ;;  %v9436_v44 = vpack.c.bf16 %v2486_v39, %v2486_v39  ;;  %v12480_v58 = vld [vmem:[#allocation90_spill] sm:$0xff]  ;;  %v12481_v17 = vld [vmem:[#allocation91_spill] sm:$0xff]  ;;  %v12482_v39 = vld [vmem:[#allocation92_spill] sm:$0xff] }
 0x248   : > { %v2500_v48 = vpack.c.bf16 %v2487_v59, %v2487_v59  ;;  %v12483_v59 = vld [vmem:[#allocation93_spill] sm:$0xff] }
 0x24a   : > { %2533 = vmatprep.mubr.bf16.mxu0 %v2500_v48  ;;  %2574 = vmatprep.mubr.bf16.mxu1 %v2500_v48 }
 0x24b   : > { %2534 = vmatmul.mubr.bf16.vlgmr.msra.gmra.mxu0 %v9436_v44  ;;  %2575 = vmatmul.mubr.bf16.vlgmr.msra.gmra.mxu1 %v9436_v44 }
 0x24c   : > { %2584 = vmatpush1.bf16.msra.mxu0 %v12462_v11  ;;  %2625 = vmatpush1.bf16.msra.mxu1 %v12463_v63 }
 0x24d   : > { %2615 = vmatprep.mubr.bf16.mxu0 %v2500_v48  ;;  %2656 = vmatprep.mubr.bf16.mxu1 %v2500_v48  ;;  %v12484_v48 = vld [vmem:[#allocation94_spill] sm:$0xff] }
 0x24e   : > { %2585 = vmatprep.subr.bf16.mxu0 %v12464_v60  ;;  %2626 = vmatprep.subr.bf16.mxu1 %v12465_v10 }
 0x250   : > { %2586 = vmatpush1.bf16.msra.mxu0 %v12466_v15  ;;  %2627 = vmatpush1.bf16.msra.mxu1 %v12467_v61 }
 0x251   : > { %2587 = vmatprep.subr.bf16.mxu0 %v12468_v52  ;;  %2628 = vmatprep.subr.bf16.mxu1 %v12469_v0 }
 0x254   : > { %2588 = vmatpush1.bf16.msra.mxu0 %v12470_v38  ;;  %2629 = vmatpush1.bf16.msra.mxu1 %v12471_v45 }
 0x255   : > { %2589 = vmatprep.subr.bf16.mxu0 %v12472_v51  ;;  %2630 = vmatprep.subr.bf16.mxu1 %v12473_v16 }
 0x258   : > { %2590 = vmatpush1.bf16.msra.mxu0 %v12474_v35  ;;  %2631 = vmatpush1.bf16.msra.mxu1 %v12475_v36  ;;  %v12485_v35 = vld [vmem:[#allocation95_spill] sm:$0xff]  ;;  %v12486_v36 = vld [vmem:[#allocation96_spill] sm:$0xff] }
 0x259   : > { %2591 = vmatprep.subr.bf16.mxu0 %v12476_v46  ;;  %2632 = vmatprep.subr.bf16.mxu1 %v12477_v1  ;;  %v12487_v46 = vld [vmem:[#allocation97_spill] sm:$0xff]  ;;  %v12488_v1 = vld [vmem:[#allocation98_spill] sm:$0xff] }
 0x25c   : > { %2592 = vmatpush1.bf16.msra.mxu0 %v12478_v31  ;;  %2633 = vmatpush1.bf16.msra.mxu1 %v12479_v49  ;;  %v12489_v31 = vld [vmem:[#allocation99_spill] sm:$0xff]  ;;  %v12490_v49 = vld [vmem:[#allocation100_spill] sm:$0xff] }
 0x25d   : > { %2593 = vmatprep.subr.bf16.mxu0 %v12480_v58  ;;  %2634 = vmatprep.subr.bf16.mxu1 %v12481_v17  ;;  %v12491_v58 = vld [vmem:[#allocation101_spill] sm:$0xff]  ;;  %v12492_v17 = vld [vmem:[#allocation102_spill] sm:$0xff] }
 0x260   : > { %2594 = vmatpush1.bf16.msra.mxu0 %v12482_v39  ;;  %2635 = vmatpush1.bf16.msra.mxu1 %v12483_v59  ;;  %v12493_v39 = vld [vmem:[#allocation103_spill] sm:$0xff]  ;;  %v12494_v59 = vld [vmem:[#allocation104_spill] sm:$0xff] }
 0x261   : > { %2595 = vmatprep.subr.bf16.mxu0 %v12484_v48  ;;  %2636 = vmatprep.subr.bf16.mxu1 %v12485_v35  ;;  %v12495_v48 = vld [vmem:[#allocation105_spill] sm:$0xff]  ;;  %v12496_v35 = vld [vmem:[#allocation106_spill] sm:$0xff] }
 0x264   : > { %2596 = vmatpush1.bf16.msra.mxu0 %v12486_v36  ;;  %2637 = vmatpush1.bf16.msra.mxu1 %v12487_v46  ;;  %v12497_v36 = vld [vmem:[#allocation107_spill] sm:$0xff]  ;;  %v12498_v46 = vld [vmem:[#allocation108_spill] sm:$0xff] }
 0x265   : > { %2597 = vmatprep.subr.bf16.mxu0 %v12488_v1  ;;  %2638 = vmatprep.subr.bf16.mxu1 %v12489_v31  ;;  %v12499_v1 = vld [vmem:[#allocation109_spill] sm:$0xff]  ;;  %v12500_v31 = vld [vmem:[#allocation110_spill] sm:$0xff] }
 0x268   : > { %2598 = vmatpush1.bf16.msra.mxu0 %v12490_v49  ;;  %2639 = vmatpush1.bf16.msra.mxu1 %v12491_v58  ;;  %v12501_v49 = vld [vmem:[#allocation111_spill] sm:$0xff]  ;;  %v12502_v58 = vld [vmem:[#allocation112_spill] sm:$0xff] }
 0x269   : > { %2599 = vmatprep.subr.bf16.mxu0 %v12492_v17  ;;  %2640 = vmatprep.subr.bf16.mxu1 %v12493_v39  ;;  %v12503_v17 = vld [vmem:[#allocation113_spill] sm:$0xff]  ;;  %v12504_v39 = vld [vmem:[#allocation114_spill] sm:$0xff] }
 0x26c   : > { %2600 = vmatpush2.bf16.msra.mxu0 %v12494_v59  ;;  %2641 = vmatpush2.bf16.msra.mxu1 %v12495_v48  ;;  %v12505_v59 = vld [vmem:[#allocation115_spill] sm:$0xff]  ;;  %v12506_v48 = vld [vmem:[#allocation116_spill] sm:$0xff] }
 0x26d   : > { %2601 = vmatprep.subr.bf16.mxu0 %v12496_v35  ;;  %2642 = vmatprep.subr.bf16.mxu1 %v12497_v36  ;;  %v12507_v35 = vld [vmem:[#allocation117_spill] sm:$0xff]  ;;  %v12508_v36 = vld [vmem:[#allocation118_spill] sm:$0xff] }
 0x270   : > { %2602 = vmatpush2.bf16.msra.mxu0 %v12498_v46  ;;  %2643 = vmatpush2.bf16.msra.mxu1 %v12499_v1  ;;  %v12509_v46 = vld [vmem:[#allocation119_spill] sm:$0xff]  ;;  %v12510_v1 = vld [vmem:[#allocation120_spill] sm:$0xff] }
 0x271   : > { %2603 = vmatprep.subr.bf16.mxu0 %v12500_v31  ;;  %2644 = vmatprep.subr.bf16.mxu1 %v12501_v49  ;;  %v12511_v31 = vld [vmem:[#allocation121_spill] sm:$0xff]  ;;  %v12512_v49 = vld [vmem:[#allocation122_spill] sm:$0xff] }
 0x274   : > { %2604 = vmatpush2.bf16.msra.mxu0 %v12502_v58  ;;  %2645 = vmatpush2.bf16.msra.mxu1 %v12503_v17  ;;  %v12513_v58 = vld [vmem:[#allocation123_spill] sm:$0xff]  ;;  %v12514_v17 = vld [vmem:[#allocation124_spill] sm:$0xff] }
 0x275   : > { %2605 = vmatprep.subr.bf16.mxu0 %v12504_v39  ;;  %2646 = vmatprep.subr.bf16.mxu1 %v12505_v59 }
 0x278   : > { %2606 = vmatpush2.bf16.msra.mxu0 %v12506_v48  ;;  %2647 = vmatpush2.bf16.msra.mxu1 %v12507_v35 }
 0x279   : > { %2607 = vmatprep.subr.bf16.mxu0 %v12508_v36  ;;  %2648 = vmatprep.subr.bf16.mxu1 %v12509_v46 }
 0x27c   : > { %2608 = vmatpush2.bf16.msra.mxu0 %v12510_v1  ;;  %2649 = vmatpush2.bf16.msra.mxu1 %v12511_v31  ;;  %v12515_v31 = vld [vmem:[#allocation132_spill] sm:$0xff] }
 0x27d   : > { %2609 = vmatprep.subr.bf16.mxu0 %v12512_v49  ;;  %2650 = vmatprep.subr.bf16.mxu1 %v12513_v58  ;;  %v12516_v49 = vld [vmem:[#allocation133_spill] sm:$0xff]  ;;  %v12517_v58 = vld [vmem:[#allocation6_spill] sm:$0xff] }
 0x280   : > { %2610 = vmatpush2.bf16.msra.mxu0 %v12514_v17  ;;  %2651 = vmatpush2.bf16.msra.mxu1 %v8914_v27  ;;  %v12518_v17 = vld [vmem:[#allocation7_spill] sm:$0xff] }
 0x281   : > { %2611 = vmatprep.subr.bf16.mxu0 %v8918_v29  ;;  %2652 = vmatprep.subr.bf16.mxu1 %v8920_v25  ;;  %v12519_v25 = vld [vmem:[#allocation8_spill] sm:$0xff] }
 0x284   : > { %2612 = vmatpush2.bf16.msra.mxu0 %v8939_v3  ;;  %2653 = vmatpush2.bf16.msra.mxu1 %v8941_v26  ;;  %v12520_v3 = vld [vmem:[#allocation9_spill] sm:$0xff]  ;;  %v12521_v26 = vld [vmem:[#allocation10_spill] sm:$0xff] }
 0x285   : > { %2613 = vmatprep.subr.bf16.mxu0 %v8945_v42  ;;  %2654 = vmatprep.subr.bf16.mxu1 %v8947_v50  ;;  %v12522_v42 = vld [vmem:[#allocation11_spill] sm:$0xff] }
 0x288   : > { %2614 = vmatpush2.bf16.msra.mxu0 %v12515_v31  ;;  %2655 = vmatpush2.bf16.msra.mxu1 %v12516_v49 }
 0x289   : > { %2734 = vmatprep.subr.bf16.mxu0 %v12517_v58  ;;  %2775 = vmatprep.subr.bf16.mxu1 %v12518_v17 }
 0x28b   : > { %2616 = vmatmul.mubr.bf16.vlgmr.msra.gmra.mxu0 %v9436_v44  ;;  %2657 = vmatmul.mubr.bf16.vlgmr.msra.gmra.mxu1 %v9436_v44  ;;  %v12523_v44 = vld [vmem:[#allocation18_spill] sm:$0xff] }
 0x28c   : > { %2735 = vmatpush1.bf16.msra.mxu0 %v12519_v25  ;;  %2776 = vmatpush1.bf16.msra.mxu1 %v12520_v3  ;;  %v12524_v25 = vld [vmem:[#allocation19_spill] sm:$0xff] }
 0x28d   : > { %2736 = vmatprep.subr.bf16.mxu0 %v12521_v26  ;;  %2777 = vmatprep.subr.bf16.mxu1 %v12522_v42 }
 0x290   : > { %2737 = vmatpush1.bf16.msra.mxu0 %v8178_v5  ;;  %2778 = vmatpush1.bf16.msra.mxu1 %v8180_v6 }
 0x291   : > { %2738 = vmatprep.subr.bf16.mxu0 %v8184_v7  ;;  %2779 = vmatprep.subr.bf16.mxu1 %v8186_v8 }
 0x294   : > { %2739 = vmatpush1.bf16.msra.mxu0 %v8204_v13  ;;  %2780 = vmatpush1.bf16.msra.mxu1 %v8206_v14 }
 0x295   : > { %2740 = vmatprep.subr.bf16.mxu0 %v12523_v44  ;;  %2781 = vmatprep.subr.bf16.mxu1 %v12524_v25 }
 0x298   : > { %2741 = vmatpush1.bf16.msra.mxu0 %v8234_v21  ;;  %2782 = vmatpush1.bf16.msra.mxu1 %v8236_v22 }
 0x299   : > { %2742 = vmatprep.subr.bf16.mxu0 %v8240_v23  ;;  %2783 = vmatprep.subr.bf16.mxu1 %v8242_v24 }
 0x29c   : > { %2743 = vmatpush1.bf16.msra.mxu0 %v8260_v30  ;;  %2784 = vmatpush1.bf16.msra.mxu1 %v8262_v32 }
 0x29d   : > { %2744 = vmatprep.subr.bf16.mxu0 %v8266_v33  ;;  %2785 = vmatprep.subr.bf16.mxu1 %v8268_v34  ;;  %v12557_v33 = vld [vmem:[#allocation140_spill] sm:$0xff] }
 0x2a0   : > { %2745 = vmatpush1.bf16.msra.mxu0 %v8290_v40  ;;  %2786 = vmatpush1.bf16.msra.mxu1 %v8292_v41 }
 0x2a1   : > { %2746 = vmatprep.subr.bf16.mxu0 %v8296_v43  ;;  %2787 = vmatprep.subr.bf16.mxu1 %v8298_v47 }
 0x2a4   : > { %2747 = vmatpush1.bf16.msra.mxu0 %v8316_v53  ;;  %2788 = vmatpush1.bf16.msra.mxu1 %v8318_v55  ;;  %v12525_v55 = vld [vmem:[#allocation44_spill] sm:$0xff] }
 0x2a5   : > { %2748 = vmatprep.subr.bf16.mxu0 %v8322_v28  ;;  %2789 = vmatprep.subr.bf16.mxu1 %v8324_v57  ;;  %v12526_v28 = vld [vmem:[#allocation45_spill] sm:$0xff]  ;;  %v12527_v57 = vld [vmem:[#allocation46_spill] sm:$0xff] }
 0x2a8   : > { %2749 = vmatpush1.bf16.msra.mxu0 %v8346_v2  ;;  %2790 = vmatpush1.bf16.msra.mxu1 %v8348_v4  ;;  %v12528_v2 = vld [vmem:[#allocation47_spill] sm:$0xff]  ;;  %v12529_v4 = vld [vmem:[#allocation48_spill] sm:$0xff] }
 0x2a9   : > { %2750 = vmatprep.subr.bf16.mxu0 %v8352_v37  ;;  %2791 = vmatprep.subr.bf16.mxu1 %v8354_v9  ;;  %v12530_v37 = vld [vmem:[#allocation49_spill] sm:$0xff]  ;;  %v12531_v9 = vld [vmem:[#allocation50_spill] sm:$0xff] }
 0x2ac   : > { %2751 = vmatpush2.bf16.msra.mxu0 %v8372_v18  ;;  %2792 = vmatpush2.bf16.msra.mxu1 %v8374_v19  ;;  %v12532_v18 = vld [vmem:[#allocation51_spill] sm:$0xff]  ;;  %v12533_v19 = vld [vmem:[#allocation52_spill] sm:$0xff] }
 0x2ad   : > { %2752 = vmatprep.subr.bf16.mxu0 %v8378_v20  ;;  %2793 = vmatprep.subr.bf16.mxu1 %v8380_v54  ;;  %v12534_v20 = vld [vmem:[#allocation53_spill] sm:$0xff]  ;;  %v12535_v54 = vld [vmem:[#allocation54_spill] sm:$0xff] }
 0x2b0   : > { %2753 = vmatpush2.bf16.msra.mxu0 %v12525_v55  ;;  %2794 = vmatpush2.bf16.msra.mxu1 %v12526_v28  ;;  %v12536_v55 = vld [vmem:[#allocation55_spill] sm:$0xff]  ;;  %v12537_v28 = vld [vmem:[#allocation56_spill] sm:$0xff] }
 0x2b1   : > { %2754 = vmatprep.subr.bf16.mxu0 %v12527_v57  ;;  %2795 = vmatprep.subr.bf16.mxu1 %v12528_v2  ;;  %v12538_v57 = vld [vmem:[#allocation57_spill] sm:$0xff]  ;;  %v12539_v2 = vld [vmem:[#allocation58_spill] sm:$0xff] }
 0x2b4   : > { %2755 = vmatpush2.bf16.msra.mxu0 %v12529_v4  ;;  %2796 = vmatpush2.bf16.msra.mxu1 %v12530_v37  ;;  %v12540_v4 = vld [vmem:[#allocation59_spill] sm:$0xff]  ;;  %v12541_v37 = vld [vmem:[#allocation60_spill] sm:$0xff] }
 0x2b5   : > { %2756 = vmatprep.subr.bf16.mxu0 %v12531_v9  ;;  %2797 = vmatprep.subr.bf16.mxu1 %v12532_v18  ;;  %v12542_v9 = vld [vmem:[#allocation61_spill] sm:$0xff]  ;;  %v12543_v18 = vld [vmem:[#allocation62_spill] sm:$0xff] }
 0x2b8   : > { %2757 = vmatpush2.bf16.msra.mxu0 %v12533_v19  ;;  %2798 = vmatpush2.bf16.msra.mxu1 %v12534_v20  ;;  %v12544_v19 = vld [vmem:[#allocation63_spill] sm:$0xff]  ;;  %v12545_v20 = vld [vmem:[#allocation64_spill] sm:$0xff] }
 0x2b9   : > { %2758 = vmatprep.subr.bf16.mxu0 %v12535_v54  ;;  %2799 = vmatprep.subr.bf16.mxu1 %v12536_v55  ;;  %v12546_v54 = vld [vmem:[#allocation65_spill] sm:$0xff]  ;;  %v12547_v55 = vld [vmem:[#allocation66_spill] sm:$0xff] }
 0x2bc   : > { %2759 = vmatpush2.bf16.msra.mxu0 %v12537_v28  ;;  %2800 = vmatpush2.bf16.msra.mxu1 %v12538_v57  ;;  %v12548_v28 = vld [vmem:[#allocation67_spill] sm:$0xff]  ;;  %v12549_v57 = vld [vmem:[#allocation68_spill] sm:$0xff] }
 0x2bd   : > { %2760 = vmatprep.subr.bf16.mxu0 %v12539_v2  ;;  %2801 = vmatprep.subr.bf16.mxu1 %v12540_v4  ;;  %v12550_v2 = vld [vmem:[#allocation69_spill] sm:$0xff]  ;;  %v12551_v4 = vld [vmem:[#allocation70_spill] sm:$0xff] }
 0x2c0   : > { %2761 = vmatpush2.bf16.msra.mxu0 %v12541_v37  ;;  %2802 = vmatpush2.bf16.msra.mxu1 %v12542_v9  ;;  %v12552_v37 = vld [vmem:[#allocation71_spill] sm:$0xff] }
 0x2c1   : > { %2762 = vmatprep.subr.bf16.mxu0 %v12543_v18  ;;  %2803 = vmatprep.subr.bf16.mxu1 %v12544_v19 }
 0x2c4   : > { %2763 = vmatpush2.bf16.msra.mxu0 %v12545_v20  ;;  %2804 = vmatpush2.bf16.msra.mxu1 %v12546_v54 }
 0x2c5   : > { %2764 = vmatprep.subr.bf16.mxu0 %v12547_v55  ;;  %2805 = vmatprep.subr.bf16.mxu1 %v12548_v28  ;;  %v12553_v55 = vld [vmem:[#allocation139_spill] sm:$0xff]  ;;  %v12554_v28 = vld [vmem:[#allocation137_spill] sm:$0xff] }
 0x2c6   : > { %v950_v41 = vadd.f32 %v12553_v55, %v9016_v12  ;;  %v12559_v12 = vld [vmem:[#allocation202_spill] sm:$0xff] }
 0x2c8   : > { %2765 = vmatpush2.bf16.msra.mxu0 %v12549_v57  ;;  %2806 = vmatpush2.bf16.msra.mxu1 %v12550_v2  ;;  %v12555_v57 = vld [vmem:[#allocation138_spill] sm:$0xff]  ;;  %v12556_v2 = vld [vmem:[#allocation135_spill] sm:$0xff] }
 0x2c9   : > { %2816 = vmatprep.subr.bf16.mxu0 %v12551_v4  ;;  %2857 = vmatprep.subr.bf16.mxu1 %v12552_v37  ;;  %v1063_v4 = vadd.f32 %v12557_v33, %v12556_v2  ;;  %v12585_v2 = vld [vmem:[#allocation105_spill] sm:$0xff] }
 0x30b   : > { %v2535_v9 = vpop.f32.mrf.mxu0  ;;  %v2576_v18 = vpop.f32.mrf.mxu1 }
 0x30c   : > { %v2665_v40 = vadd.f32 %v2535_v9, %v12554_v28  ;;  %v2667_v34 = vadd.f32 %v2576_v18, %v12555_v57  ;;  %v12558_v18 = vld [vmem:[#allocation198_spill] sm:$0xff] }
 0x30d   : > { %v2537_v53 = vpop.f32.mrf.mxu0  ;;  %v2578_v19 = vpop.f32.mrf.mxu1  ;;  %v1176_v33 = vadd.f32 %v12559_v12, %v12558_v18 }
 0x30e   : > { %v2666_v32 = vadd.f32 %v2537_v53, %v950_v41  ;;  %v6813_v37 = vmul.f32 -1.442695, %v2665_v40  ;;  %v2668_v30 = vadd.f32 %v2578_v19, %v1063_v4  ;;  %v6815_v24 = vmul.f32 -1.442695, %v2667_v34  ;;  %v12561_v53 = vld [vmem:[#allocation203_spill] sm:$0xff]  ;;  %v12563_v4 = vld [vmem:[#allocation201_spill] sm:$0xff] }
 0x30f   : > { %v2539_v47 = vpop.f32.mrf.mxu0  ;;  %v2580_v20 = vpop.f32.mrf.mxu1 }
 0x310   : > { %v6814_v23 = vmul.f32 -1.442695, %v2666_v32  ;;  %7117 = vpow2.f32 %v6813_v37  ;;  %v6816_v47 = vmul.f32 -1.442695, %v2668_v30  ;;  %v12560_v32 = vld [vmem:[#allocation199_spill] sm:$0xff] }
 0x311   : > { %v2540_v43 = vpop.f32.mrf.mxu0  ;;  %v2581_v54 = vpop.f32.mrf.mxu1  ;;  %7119 = vpow2.f32 %v6815_v24  ;;  %v1289_v30 = vadd.f32 %v12561_v53, %v12560_v32  ;;  %v12584_v32 = vld [vmem:[#allocation104_spill] sm:$0xff] }
 0x312   : > { %7121 = vpow2.f32 %v6814_v23  ;;  %v12562_v23 = vld [vmem:[#allocation200_spill] sm:$0xff] }
 0x313   : > { %7123 = vpow2.f32 %v6816_v47 }
 0x31d   : > { %v7118_v43 = vpop.eup %7117 }
 0x31e   : > { %v7120_v20 = vpop.eup %7119  ;;  %v2679_v54 = vadd.f32 1.0, %v7118_v43 }
 0x31f   : > { %v7122_v55 = vpop.eup %7121  ;;  %v2691_v9 = vadd.f32 1.0, %v7120_v20 }
 0x320   : > { %v7124_v28 = vpop.eup %7123  ;;  %v2680_v57 = vadd.f32 1.0, %v7122_v55  ;;  %7125 = vrcp.f32 %v2679_v54 }
 0x321   : > { %v2692_v40 = vadd.f32 1.0, %v7124_v28  ;;  %7127 = vrcp.f32 %v2691_v9 }
 0x322   : > { %7129 = vrcp.f32 %v2680_v57 }
 0x32d   : > { %v7126_v9 = vpop.eup %7125 }
 0x34b   : > { %v2617_v41 = vpop.f32.mrf.mxu0  ;;  %v2658_v34 = vpop.f32.mrf.mxu1 }
 0x34c   : > { %v2669_v24 = vadd.f32 %v2617_v41, %v12562_v23  ;;  %v2671_v37 = vadd.f32 %v2658_v34, %v12563_v4  ;;  %v7128_v41 = vpop.eup %7127 }
 0x34d   : > { %v2619_v19 = vpop.f32.mrf.mxu0  ;;  %v2660_v47 = vpop.f32.mrf.mxu1  ;;  %v2711_v4 = vmul.f32 %v7128_v41, %v9430_v56 }
 0x34e   : > { %7131 = vtanh.f32 %v2669_v24  ;;  %v6817_v43 = vmul.f32 -1.442695, %v2671_v37  ;;  %v2670_v20 = vadd.f32 %v2619_v19, %v1176_v33  ;;  %v2672_v55 = vadd.f32 %v2660_v47, %v1289_v30  ;;  %v7130_v23 = vpop.eup %7129 }
 0x34f   : > { %7133 = vrcp.f32 %v2692_v40  ;;  %v2621_v12 = vpop.f32.mrf.mxu0  ;;  %v2662_v54 = vpop.f32.mrf.mxu1 }
 0x350   : > { %7135 = vpow2.f32 %v6817_v43  ;;  %v6818_v28 = vmul.f32 -1.442695, %v2672_v55 }
 0x351   : > { %7137 = vtanh.f32 %v2670_v20  ;;  %v2622_v18 = vpop.f32.mrf.mxu0  ;;  %v2663_v53 = vpop.f32.mrf.mxu1 }
 0x352   : > { %7139 = vpow2.f32 %v6818_v28 }
 0x35b   : > { %v7132_v34 = vpop.eup %7131 }
 0x35c   : > { %v7134_v57 = vpop.eup %7133  ;;  %v2713_v24 = vmul.f32 %v7132_v34, %v7126_v9  ;;  %v12566_v34 = vld [vmem:[#allocation86_spill] sm:$0xff] }
 0x35d   : > { %v7136_v37 = vpop.eup %7135  ;;  %v2712_v47 = vmul.f32 %v7134_v57, %v9433_v62  ;;  %v12564_v62 = vld [vmem:[#allocation84_spill] sm:$0xff]  ;;  %v12567_v57 = vld [vmem:[#allocation87_spill] sm:$0xff] }
 0x35e   : > { %v7138_v33 = vpop.eup %7137  ;;  %v9583_v30 = vadd.f32 %v2713_v24, %v2711_v4  ;;  %v2705_v40 = vadd.f32 1.0, %v7136_v37  ;;  %v12568_v4 = vld [vmem:[#allocation88_spill] sm:$0xff]  ;;  %v12569_v24 = vld [vmem:[#allocation89_spill] sm:$0xff]  ;;  %v12570_v37 = vld [vmem:[#allocation90_spill] sm:$0xff] }
 0x35f   : > { %v7140_v19 = vpop.eup %7139  ;;  %v2714_v43 = vmul.f32 %v7138_v33, %v7130_v23  ;;  %v12565_v23 = vld [vmem:[#allocation85_spill] sm:$0xff]  ;;  %v12571_v33 = vld [vmem:[#allocation91_spill] sm:$0xff] }
 0x360   : > { %7141 = vtanh.f32 %v9583_v30  ;;  %v2706_v18 = vadd.f32 1.0, %v7140_v19  ;;  %v12573_v19 = vld [vmem:[#allocation93_spill] sm:$0xff] }
 0x361   : > { %7143 = vrcp.f32 %v2705_v40  ;;  %v9587_v20 = vadd.f32 %v2714_v43, %v2712_v47  ;;  %v12572_v40 = vld [vmem:[#allocation92_spill] sm:$0xff]  ;;  %v12574_v47 = vld [vmem:[#allocation94_spill] sm:$0xff]  ;;  %v12575_v43 = vld [vmem:[#allocation95_spill] sm:$0xff] }
 0x362   : > { %7145 = vrcp.f32 %v2706_v18  ;;  %v12576_v18 = vld [vmem:[#allocation96_spill] sm:$0xff] }
 0x363   : > { %7147 = vtanh.f32 %v9587_v20 }
 0x36d   : > { %v7142_v56 = vpop.eup %7141 }
 0x36e   : > { %v7144_v55 = vpop.eup %7143 }
 0x36f   : > { %v7146_v12 = vpop.eup %7145  ;;  %v2719_v28 = vmul.f32 %v7144_v55, %v7142_v56  ;;  %v12577_v56 = vld [vmem:[#allocation97_spill] sm:$0xff]  ;;  %v12578_v55 = vld [vmem:[#allocation98_spill] sm:$0xff] }
 0x370   : > { %v7148_v54 = vpop.eup %7147 }
 0x371   : > { %v2720_v53 = vmul.f32 %v7148_v54, %v7146_v12  ;;  %v9590_v41 = vpack.c.bf16 %v2719_v28, %v2719_v28  ;;  %v12579_v12 = vld [vmem:[#allocation99_spill] sm:$0xff]  ;;  %v12580_v54 = vld [vmem:[#allocation100_spill] sm:$0xff]  ;;  %v12581_v28 = vld [vmem:[#allocation101_spill] sm:$0xff] }
 0x373   : > { %v2733_v9 = vpack.c.bf16 %v2720_v53, %v2720_v53  ;;  %v12582_v53 = vld [vmem:[#allocation102_spill] sm:$0xff] }
 0x375   : > { %2766 = vmatprep.mubr.bf16.mxu0 %v2733_v9  ;;  %2807 = vmatprep.mubr.bf16.mxu1 %v2733_v9 }
 0x376   : > { %2767 = vmatmul.mubr.bf16.vlgmr.msra.gmra.mxu0 %v9590_v41  ;;  %2808 = vmatmul.mubr.bf16.vlgmr.msra.gmra.mxu1 %v9590_v41 }
 0x377   : > { %2817 = vmatpush1.bf16.msra.mxu0 %v12462_v11  ;;  %2858 = vmatpush1.bf16.msra.mxu1 %v12463_v63 }
 0x378   : > { %2848 = vmatprep.mubr.bf16.mxu0 %v2733_v9  ;;  %2889 = vmatprep.mubr.bf16.mxu1 %v2733_v9  ;;  %v12583_v9 = vld [vmem:[#allocation103_spill] sm:$0xff] }
 0x379   : > { %2818 = vmatprep.subr.bf16.mxu0 %v12464_v60  ;;  %2859 = vmatprep.subr.bf16.mxu1 %v12465_v10 }
 0x37b   : > { %2819 = vmatpush1.bf16.msra.mxu0 %v12466_v15  ;;  %2860 = vmatpush1.bf16.msra.mxu1 %v12467_v61 }
 0x37c   : > { %2820 = vmatprep.subr.bf16.mxu0 %v12468_v52  ;;  %2861 = vmatprep.subr.bf16.mxu1 %v12469_v0 }
 0x37f   : > { %2821 = vmatpush1.bf16.msra.mxu0 %v12470_v38  ;;  %2862 = vmatpush1.bf16.msra.mxu1 %v12471_v45 }
 0x380   : > { %2822 = vmatprep.subr.bf16.mxu0 %v12472_v51  ;;  %2863 = vmatprep.subr.bf16.mxu1 %v12473_v16 }
 0x383   : > { %2823 = vmatpush1.bf16.msra.mxu0 %v12564_v62  ;;  %2864 = vmatpush1.bf16.msra.mxu1 %v12565_v23 }
 0x384   : > { %2824 = vmatprep.subr.bf16.mxu0 %v12566_v34  ;;  %2865 = vmatprep.subr.bf16.mxu1 %v12567_v57 }
 0x387   : > { %2825 = vmatpush1.bf16.msra.mxu0 %v12568_v4  ;;  %2866 = vmatpush1.bf16.msra.mxu1 %v12569_v24 }
 0x388   : > { %2826 = vmatprep.subr.bf16.mxu0 %v12570_v37  ;;  %2867 = vmatprep.subr.bf16.mxu1 %v12571_v33 }
 0x38b   : > { %2827 = vmatpush1.bf16.msra.mxu0 %v12572_v40  ;;  %2868 = vmatpush1.bf16.msra.mxu1 %v12573_v19 }
 0x38c   : > { %2828 = vmatprep.subr.bf16.mxu0 %v12574_v47  ;;  %2869 = vmatprep.subr.bf16.mxu1 %v12575_v43  ;;  %v12586_v43 = vld [vmem:[#allocation106_spill] sm:$0xff] }
 0x38f   : > { %2829 = vmatpush1.bf16.msra.mxu0 %v12576_v18  ;;  %2870 = vmatpush1.bf16.msra.mxu1 %v12577_v56  ;;  %v12587_v18 = vld [vmem:[#allocation107_spill] sm:$0xff]  ;;  %v12588_v56 = vld [vmem:[#allocation108_spill] sm:$0xff] }
 0x390   : > { %2830 = vmatprep.subr.bf16.mxu0 %v12578_v55  ;;  %2871 = vmatprep.subr.bf16.mxu1 %v12579_v12  ;;  %v12589_v55 = vld [vmem:[#allocation109_spill] sm:$0xff]  ;;  %v12590_v12 = vld [vmem:[#allocation110_spill] sm:$0xff] }
 0x393   : > { %2831 = vmatpush1.bf16.msra.mxu0 %v12580_v54  ;;  %2872 = vmatpush1.bf16.msra.mxu1 %v12581_v28  ;;  %v12591_v54 = vld [vmem:[#allocation111_spill] sm:$0xff]  ;;  %v12592_v28 = vld [vmem:[#allocation112_spill] sm:$0xff] }
 0x394   : > { %2832 = vmatprep.subr.bf16.mxu0 %v12582_v53  ;;  %2873 = vmatprep.subr.bf16.mxu1 %v12583_v9  ;;  %v12593_v53 = vld [vmem:[#allocation113_spill] sm:$0xff] }
 0x397   : > { %2833 = vmatpush2.bf16.msra.mxu0 %v12584_v32  ;;  %2874 = vmatpush2.bf16.msra.mxu1 %v12585_v2 }
 0x398   : > { %2834 = vmatprep.subr.bf16.mxu0 %v12586_v43  ;;  %2875 = vmatprep.subr.bf16.mxu1 %v12587_v18 }
 0x39b   : > { %2835 = vmatpush2.bf16.msra.mxu0 %v12588_v56  ;;  %2876 = vmatpush2.bf16.msra.mxu1 %v12589_v55 }
 0x39c   : > { %2836 = vmatprep.subr.bf16.mxu0 %v12590_v12  ;;  %2877 = vmatprep.subr.bf16.mxu1 %v12591_v54  ;;  %v12594_v12 = vld [vmem:[#allocation121_spill] sm:$0xff]  ;;  %v12595_v54 = vld [vmem:[#allocation122_spill] sm:$0xff] }
 0x39f   : > { %2837 = vmatpush2.bf16.msra.mxu0 %v12592_v28  ;;  %2878 = vmatpush2.bf16.msra.mxu1 %v12593_v53  ;;  %v12596_v28 = vld [vmem:[#allocation123_spill] sm:$0xff]  ;;  %v12597_v53 = vld [vmem:[#allocation124_spill] sm:$0xff] }
 0x3a0   : > { %2838 = vmatprep.subr.bf16.mxu0 %v12504_v39  ;;  %2879 = vmatprep.subr.bf16.mxu1 %v12505_v59 }
 0x3a3   : > { %2839 = vmatpush2.bf16.msra.mxu0 %v12506_v48  ;;  %2880 = vmatpush2.bf16.msra.mxu1 %v12507_v35  ;;  %v12598_v48 = vld [vmem:[#allocation127_spill] sm:$0xff]  ;;  %v12599_v35 = vld [vmem:[#allocation128_spill] sm:$0xff] }
 0x3a4   : > { %2840 = vmatprep.subr.bf16.mxu0 %v12508_v36  ;;  %2881 = vmatprep.subr.bf16.mxu1 %v12509_v46  ;;  %v12600_v36 = vld [vmem:[#allocation129_spill] sm:$0xff]  ;;  %v12601_v46 = vld [vmem:[#allocation130_spill] sm:$0xff] }
 0x3a7   : > { %2841 = vmatpush2.bf16.msra.mxu0 %v12510_v1  ;;  %2882 = vmatpush2.bf16.msra.mxu1 %v12594_v12 }
 0x3a8   : > { %2842 = vmatprep.subr.bf16.mxu0 %v12595_v54  ;;  %2883 = vmatprep.subr.bf16.mxu1 %v12596_v28 }
 0x3ab   : > { %2843 = vmatpush2.bf16.msra.mxu0 %v12597_v53  ;;  %2884 = vmatpush2.bf16.msra.mxu1 %v8914_v27 }
 0x3ac   : > { %2844 = vmatprep.subr.bf16.mxu0 %v8918_v29  ;;  %2885 = vmatprep.subr.bf16.mxu1 %v12598_v48  ;;  %v12602_v48 = vld [vmem:[#allocation8_spill] sm:$0xff] }
 0x3af   : > { %2845 = vmatpush2.bf16.msra.mxu0 %v12599_v35  ;;  %2886 = vmatpush2.bf16.msra.mxu1 %v12600_v36 }
 0x3b0   : > { %2846 = vmatprep.subr.bf16.mxu0 %v12601_v46  ;;  %2887 = vmatprep.subr.bf16.mxu1 %v8947_v50 }
 0x3b3   : > { %2847 = vmatpush2.bf16.msra.mxu0 %v12515_v31  ;;  %2888 = vmatpush2.bf16.msra.mxu1 %v12516_v49 }
 0x3b4   : > { %2967 = vmatprep.subr.bf16.mxu0 %v12517_v58  ;;  %3008 = vmatprep.subr.bf16.mxu1 %v12518_v17  ;;  %v12654_v17 = vld [vmem:[#allocation143_spill] sm:$0xff]  ;;  %v12655_v58 = vld [vmem:[#allocation144_spill] sm:$0xff] }
 0x3b6   : > { %2849 = vmatmul.mubr.bf16.vlgmr.msra.gmra.mxu0 %v9590_v41  ;;  %2890 = vmatmul.mubr.bf16.vlgmr.msra.gmra.mxu1 %v9590_v41  ;;  %v12603_v41 = vld [vmem:[#allocation22_spill] sm:$0xff] }
 0x3b7   : > { %2968 = vmatpush1.bf16.msra.mxu0 %v12602_v48  ;;  %3009 = vmatpush1.bf16.msra.mxu1 %v12520_v3  ;;  %v12653_v48 = vld [vmem:[#allocation142_spill] sm:$0xff] }
 0x3b8   : > { %2969 = vmatprep.subr.bf16.mxu0 %v12521_v26  ;;  %3010 = vmatprep.subr.bf16.mxu1 %v12522_v42 }
 0x3bb   : > { %2970 = vmatpush1.bf16.msra.mxu0 %v8178_v5  ;;  %3011 = vmatpush1.bf16.msra.mxu1 %v8180_v6  ;;  %v12604_v5 = vld [vmem:[#allocation23_spill] sm:$0xff]  ;;  %v12605_v6 = vld [vmem:[#allocation24_spill] sm:$0xff] }
 0x3bc   : > { %2971 = vmatprep.subr.bf16.mxu0 %v8184_v7  ;;  %3012 = vmatprep.subr.bf16.mxu1 %v8186_v8  ;;  %v12606_v7 = vld [vmem:[#allocation25_spill] sm:$0xff]  ;;  %v12607_v8 = vld [vmem:[#allocation26_spill] sm:$0xff] }
 0x3bf   : > { %2972 = vmatpush1.bf16.msra.mxu0 %v8204_v13  ;;  %3013 = vmatpush1.bf16.msra.mxu1 %v8206_v14  ;;  %v12608_v13 = vld [vmem:[#allocation27_spill] sm:$0xff]  ;;  %v12609_v14 = vld [vmem:[#allocation28_spill] sm:$0xff] }
 0x3c0   : > { %2973 = vmatprep.subr.bf16.mxu0 %v12523_v44  ;;  %3014 = vmatprep.subr.bf16.mxu1 %v12524_v25  ;;  %v12610_v44 = vld [vmem:[#allocation29_spill] sm:$0xff]  ;;  %v12611_v25 = vld [vmem:[#allocation30_spill] sm:$0xff] }
 0x3c3   : > { %2974 = vmatpush1.bf16.msra.mxu0 %v8234_v21  ;;  %3015 = vmatpush1.bf16.msra.mxu1 %v8236_v22  ;;  %v12612_v21 = vld [vmem:[#allocation31_spill] sm:$0xff]  ;;  %v12613_v22 = vld [vmem:[#allocation32_spill] sm:$0xff] }
 0x3c4   : > { %2975 = vmatprep.subr.bf16.mxu0 %v12603_v41  ;;  %3016 = vmatprep.subr.bf16.mxu1 %v12604_v5  ;;  %v12614_v41 = vld [vmem:[#allocation33_spill] sm:$0xff]  ;;  %v12615_v5 = vld [vmem:[#allocation34_spill] sm:$0xff] }
 0x3c7   : > { %2976 = vmatpush1.bf16.msra.mxu0 %v12605_v6  ;;  %3017 = vmatpush1.bf16.msra.mxu1 %v12606_v7  ;;  %v12616_v6 = vld [vmem:[#allocation35_spill] sm:$0xff]  ;;  %v12617_v7 = vld [vmem:[#allocation36_spill] sm:$0xff] }
 0x3c8   : > { %2977 = vmatprep.subr.bf16.mxu0 %v12607_v8  ;;  %3018 = vmatprep.subr.bf16.mxu1 %v12608_v13  ;;  %v12618_v8 = vld [vmem:[#allocation37_spill] sm:$0xff]  ;;  %v12619_v13 = vld [vmem:[#allocation38_spill] sm:$0xff] }
 0x3cb   : > { %2978 = vmatpush1.bf16.msra.mxu0 %v12609_v14  ;;  %3019 = vmatpush1.bf16.msra.mxu1 %v12610_v44  ;;  %v12620_v14 = vld [vmem:[#allocation39_spill] sm:$0xff]  ;;  %v12621_v44 = vld [vmem:[#allocation40_spill] sm:$0xff] }
 0x3cc   : > { %2979 = vmatprep.subr.bf16.mxu0 %v12611_v25  ;;  %3020 = vmatprep.subr.bf16.mxu1 %v12612_v21  ;;  %v12622_v25 = vld [vmem:[#allocation41_spill] sm:$0xff]  ;;  %v12623_v21 = vld [vmem:[#allocation42_spill] sm:$0xff] }
 0x3cf   : > { %2980 = vmatpush1.bf16.msra.mxu0 %v12613_v22  ;;  %3021 = vmatpush1.bf16.msra.mxu1 %v12614_v41  ;;  %v12624_v22 = vld [vmem:[#allocation43_spill] sm:$0xff]  ;;  %v12625_v41 = vld [vmem:[#allocation44_spill] sm:$0xff] }
 0x3d0   : > { %2981 = vmatprep.subr.bf16.mxu0 %v12615_v5  ;;  %3022 = vmatprep.subr.bf16.mxu1 %v12616_v6  ;;  %v12626_v5 = vld [vmem:[#allocation45_spill] sm:$0xff]  ;;  %v12627_v6 = vld [vmem:[#allocation46_spill] sm:$0xff] }
 0x3d3   : > { %2982 = vmatpush1.bf16.msra.mxu0 %v12617_v7  ;;  %3023 = vmatpush1.bf16.msra.mxu1 %v12618_v8  ;;  %v12628_v7 = vld [vmem:[#allocation47_spill] sm:$0xff]  ;;  %v12629_v8 = vld [vmem:[#allocation48_spill] sm:$0xff] }
 0x3d4   : > { %2983 = vmatprep.subr.bf16.mxu0 %v12619_v13  ;;  %3024 = vmatprep.subr.bf16.mxu1 %v12620_v14  ;;  %v12630_v13 = vld [vmem:[#allocation49_spill] sm:$0xff]  ;;  %v12631_v14 = vld [vmem:[#allocation50_spill] sm:$0xff] }
 0x3d7   : > { %2984 = vmatpush2.bf16.msra.mxu0 %v12621_v44  ;;  %3025 = vmatpush2.bf16.msra.mxu1 %v12622_v25  ;;  %v12632_v44 = vld [vmem:[#allocation51_spill] sm:$0xff]  ;;  %v12633_v25 = vld [vmem:[#allocation52_spill] sm:$0xff] }
 0x3d8   : > { %2985 = vmatprep.subr.bf16.mxu0 %v12623_v21  ;;  %3026 = vmatprep.subr.bf16.mxu1 %v12624_v22  ;;  %v12634_v21 = vld [vmem:[#allocation53_spill] sm:$0xff]  ;;  %v12635_v22 = vld [vmem:[#allocation54_spill] sm:$0xff] }
 0x3db   : > { %2986 = vmatpush2.bf16.msra.mxu0 %v12625_v41  ;;  %3027 = vmatpush2.bf16.msra.mxu1 %v12626_v5  ;;  %v12636_v41 = vld [vmem:[#allocation55_spill] sm:$0xff]  ;;  %v12637_v5 = vld [vmem:[#allocation56_spill] sm:$0xff] }
 0x3dc   : > { %2987 = vmatprep.subr.bf16.mxu0 %v12627_v6  ;;  %3028 = vmatprep.subr.bf16.mxu1 %v12628_v7  ;;  %v12638_v6 = vld [vmem:[#allocation57_spill] sm:$0xff]  ;;  %v12639_v7 = vld [vmem:[#allocation58_spill] sm:$0xff] }
 0x3df   : > { %2988 = vmatpush2.bf16.msra.mxu0 %v12629_v8  ;;  %3029 = vmatpush2.bf16.msra.mxu1 %v12630_v13  ;;  %v12640_v8 = vld [vmem:[#allocation59_spill] sm:$0xff]  ;;  %v12641_v13 = vld [vmem:[#allocation60_spill] sm:$0xff] }
 0x3e0   : > { %2989 = vmatprep.subr.bf16.mxu0 %v12631_v14  ;;  %3030 = vmatprep.subr.bf16.mxu1 %v12632_v44  ;;  %v12642_v14 = vld [vmem:[#allocation61_spill] sm:$0xff]  ;;  %v12643_v44 = vld [vmem:[#allocation62_spill] sm:$0xff] }
 0x3e3   : > { %2990 = vmatpush2.bf16.msra.mxu0 %v12633_v25  ;;  %3031 = vmatpush2.bf16.msra.mxu1 %v12634_v21  ;;  %v12644_v25 = vld [vmem:[#allocation63_spill] sm:$0xff]  ;;  %v12645_v21 = vld [vmem:[#allocation64_spill] sm:$0xff] }
 0x3e4   : > { %2991 = vmatprep.subr.bf16.mxu0 %v12635_v22  ;;  %3032 = vmatprep.subr.bf16.mxu1 %v12636_v41  ;;  %v12646_v22 = vld [vmem:[#allocation65_spill] sm:$0xff]  ;;  %v12647_v41 = vld [vmem:[#allocation66_spill] sm:$0xff] }
 0x3e7   : > { %2992 = vmatpush2.bf16.msra.mxu0 %v12637_v5  ;;  %3033 = vmatpush2.bf16.msra.mxu1 %v12638_v6  ;;  %v12648_v5 = vld [vmem:[#allocation67_spill] sm:$0xff]  ;;  %v12649_v6 = vld [vmem:[#allocation68_spill] sm:$0xff] }
 0x3e8   : > { %2993 = vmatprep.subr.bf16.mxu0 %v12639_v7  ;;  %3034 = vmatprep.subr.bf16.mxu1 %v12640_v8  ;;  %v12650_v7 = vld [vmem:[#allocation69_spill] sm:$0xff]  ;;  %v12651_v8 = vld [vmem:[#allocation70_spill] sm:$0xff] }
 0x3eb   : > { %2994 = vmatpush2.bf16.msra.mxu0 %v12641_v13  ;;  %3035 = vmatpush2.bf16.msra.mxu1 %v12642_v14  ;;  %v12652_v13 = vld [vmem:[#allocation71_spill] sm:$0xff] }
 0x3ec   : > { %2995 = vmatprep.subr.bf16.mxu0 %v12643_v44  ;;  %3036 = vmatprep.subr.bf16.mxu1 %v12644_v25 }
 0x3ef   : > { %2996 = vmatpush2.bf16.msra.mxu0 %v12645_v21  ;;  %3037 = vmatpush2.bf16.msra.mxu1 %v12646_v22 }
 0x3f0   : > { %2997 = vmatprep.subr.bf16.mxu0 %v12647_v41  ;;  %3038 = vmatprep.subr.bf16.mxu1 %v12648_v5 }
 0x3f3   : > { %2998 = vmatpush2.bf16.msra.mxu0 %v12649_v6  ;;  %3039 = vmatpush2.bf16.msra.mxu1 %v12650_v7  ;;  %v12656_v7 = vld [vmem:[#allocation145_spill] sm:$0xff] }
 0x3f4   : > { %3049 = vmatprep.subr.bf16.mxu0 %v12651_v8  ;;  %3090 = vmatprep.subr.bf16.mxu1 %v12652_v13 }
 0x436   : > { %v2768_v14 = vpop.f32.mrf.mxu0  ;;  %v2809_v44 = vpop.f32.mrf.mxu1 }
 0x437   : > { %v2898_v41 = vadd.f32 %v2768_v14, %v12653_v48  ;;  %v2900_v5 = vadd.f32 %v2809_v44, %v12654_v17  ;;  %v12660_v44 = vld [vmem:[#allocation207_spill] sm:$0xff] }
 0x438   : > { %v2770_v42 = vpop.f32.mrf.mxu0  ;;  %v2811_v25 = vpop.f32.mrf.mxu1 }
 0x439   : > { %v2899_v6 = vadd.f32 %v2770_v42, %v12655_v58  ;;  %v6819_v49 = vmul.f32 -1.442695, %v2898_v41  ;;  %v2901_v31 = vadd.f32 %v2811_v25, %v12656_v7  ;;  %v6821_v8 = vmul.f32 -1.442695, %v2900_v5  ;;  %v12657_v7 = vld [vmem:[#allocation204_spill] sm:$0xff] }
 0x43a   : > { %v2772_v26 = vpop.f32.mrf.mxu0  ;;  %v2813_v21 = vpop.f32.mrf.mxu1 }
 0x43b   : > { %v6820_v50 = vmul.f32 -1.442695, %v2899_v6  ;;  %7149 = vpow2.f32 %v6819_v49  ;;  %v6822_v13 = vmul.f32 -1.442695, %v2901_v31  ;;  %v12658_v6 = vld [vmem:[#allocation205_spill] sm:$0xff]  ;;  %v12659_v31 = vld [vmem:[#allocation206_spill] sm:$0xff] }
 0x43c   : > { %v2773_v3 = vpop.f32.mrf.mxu0  ;;  %v2814_v22 = vpop.f32.mrf.mxu1  ;;  %7151 = vpow2.f32 %v6821_v8 }
 0x43d   : > { %7153 = vpow2.f32 %v6820_v50 }
 0x43e   : > { %7155 = vpow2.f32 %v6822_v13 }
 0x448   : > { %v7150_v26 = vpop.eup %7149 }
 0x449   : > { %v7152_v21 = vpop.eup %7151  ;;  %v2912_v22 = vadd.f32 1.0, %v7150_v26 }
 0x44a   : > { %v7154_v3 = vpop.eup %7153  ;;  %v2924_v14 = vadd.f32 1.0, %v7152_v21 }
 0x44b   : > { %v7156_v46 = vpop.eup %7155  ;;  %v2913_v48 = vadd.f32 1.0, %v7154_v3  ;;  %7157 = vrcp.f32 %v2912_v22 }
 0x44c   : > { %v2925_v17 = vadd.f32 1.0, %v7156_v46  ;;  %7159 = vrcp.f32 %v2924_v14 }
 0x44d   : > { %7161 = vrcp.f32 %v2913_v48 }
 0x458   : > { %v7158_v14 = vpop.eup %7157 }
 0x476   : > { %v2850_v42 = vpop.f32.mrf.mxu0  ;;  %v2891_v58 = vpop.f32.mrf.mxu1 }
 0x477   : > { %v2902_v5 = vadd.f32 %v2850_v42, %v12657_v7  ;;  %v2904_v25 = vadd.f32 %v2891_v58, %v12658_v6  ;;  %v7160_v42 = vpop.eup %7159 }
 0x478   : > { %v2852_v8 = vpop.f32.mrf.mxu0  ;;  %v2893_v50 = vpop.f32.mrf.mxu1 }
 0x479   : > { %7163 = vtanh.f32 %v2902_v5  ;;  %v6823_v13 = vmul.f32 -1.442695, %v2904_v25  ;;  %v2903_v49 = vadd.f32 %v2852_v8, %v12659_v31  ;;  %v2905_v41 = vadd.f32 %v2893_v50, %v12660_v44  ;;  %v7162_v48 = vpop.eup %7161 }
 0x47a   : > { %7165 = vrcp.f32 %v2925_v17  ;;  %v2854_v26 = vpop.f32.mrf.mxu0  ;;  %v2895_v21 = vpop.f32.mrf.mxu1  ;;  %v2944_v5 = vmul.f32 %v7160_v42, %v9583_v30 }
 0x47b   : > { %7167 = vpow2.f32 %v6823_v13  ;;  %v6824_v46 = vmul.f32 -1.442695, %v2905_v41 }
 0x47c   : > { %7169 = vtanh.f32 %v2903_v49  ;;  %v2855_v3 = vpop.f32.mrf.mxu0  ;;  %v2896_v22 = vpop.f32.mrf.mxu1 }
 0x47d   : > { %7171 = vpow2.f32 %v6824_v46 }
 0x486   : > { %v7164_v58 = vpop.eup %7163 }
 0x487   : > { %v7166_v7 = vpop.eup %7165  ;;  %v2946_v6 = vmul.f32 %v7164_v58, %v7158_v14  ;;  %v12663_v58 = vld [vmem:[#allocation97_spill] sm:$0xff] }
 0x488   : > { %v7168_v25 = vpop.eup %7167  ;;  %v2945_v13 = vmul.f32 %v7166_v7, %v9587_v20  ;;  %v12661_v20 = vld [vmem:[#allocation95_spill] sm:$0xff]  ;;  %v12664_v7 = vld [vmem:[#allocation98_spill] sm:$0xff] }
 0x489   : > { %v7170_v8 = vpop.eup %7169  ;;  %v9733_v50 = vadd.f32 %v2946_v6, %v2944_v5  ;;  %v2938_v17 = vadd.f32 1.0, %v7168_v25  ;;  %v12665_v5 = vld [vmem:[#allocation99_spill] sm:$0xff]  ;;  %v12666_v6 = vld [vmem:[#allocation100_spill] sm:$0xff]  ;;  %v12667_v25 = vld [vmem:[#allocation101_spill] sm:$0xff] }
 0x48a   : > { %v7172_v31 = vpop.eup %7171  ;;  %v2947_v49 = vmul.f32 %v7170_v8, %v7162_v48  ;;  %v12662_v48 = vld [vmem:[#allocation96_spill] sm:$0xff]  ;;  %v12668_v8 = vld [vmem:[#allocation102_spill] sm:$0xff] }
 0x48b   : > { %7173 = vtanh.f32 %v9733_v50  ;;  %v2939_v44 = vadd.f32 1.0, %v7172_v31  ;;  %v12670_v31 = vld [vmem:[#allocation111_spill] sm:$0xff] }
 0x48c   : > { %7175 = vrcp.f32 %v2938_v17  ;;  %v9737_v41 = vadd.f32 %v2947_v49, %v2945_v13  ;;  %v12669_v17 = vld [vmem:[#allocation110_spill] sm:$0xff]  ;;  %v12671_v13 = vld [vmem:[#allocation112_spill] sm:$0xff]  ;;  %v12672_v49 = vld [vmem:[#allocation113_spill] sm:$0xff] }
 0x48d   : > { %7177 = vrcp.f32 %v2939_v44  ;;  %v12673_v44 = vld [vmem:[#allocation116_spill] sm:$0xff] }
 0x48e   : > { %7179 = vtanh.f32 %v9737_v41 }
 0x498   : > { %v7174_v30 = vpop.eup %7173 }
 0x499   : > { %v7176_v26 = vpop.eup %7175 }
 0x49a   : > { %v7178_v21 = vpop.eup %7177  ;;  %v2952_v3 = vmul.f32 %v7176_v26, %v7174_v30  ;;  %v12674_v30 = vld [vmem:[#allocation117_spill] sm:$0xff]  ;;  %v12675_v26 = vld [vmem:[#allocation118_spill] sm:$0xff] }
 0x49b   : > { %v7180_v46 = vpop.eup %7179 }
 0x49c   : > { %v2953_v22 = vmul.f32 %v7180_v46, %v7178_v21  ;;  %v9740_v42 = vpack.c.bf16 %v2952_v3, %v2952_v3  ;;  %v12676_v21 = vld [vmem:[#allocation119_spill] sm:$0xff]  ;;  %v12678_v3 = vld [vmem:[#allocation130_spill] sm:$0xff] }
 0x49d   : > { %v12677_v46 = vld [vmem:[#allocation127_spill] sm:$0xff] }
 0x49e   : > { %v2966_v14 = vpack.c.bf16 %v2953_v22, %v2953_v22  ;;  %v12679_v22 = vld [vmem:[#allocation131_spill] sm:$0xff] }
 0x4a0   : > { %2999 = vmatprep.mubr.bf16.mxu0 %v2966_v14  ;;  %3040 = vmatprep.mubr.bf16.mxu1 %v2966_v14 }
 0x4a1   : > { %3000 = vmatmul.mubr.bf16.vlgmr.msra.gmra.mxu0 %v9740_v42  ;;  %3041 = vmatmul.mubr.bf16.vlgmr.msra.gmra.mxu1 %v9740_v42 }
 0x4a2   : > { %3050 = vmatpush1.bf16.msra.mxu0 %v12462_v11  ;;  %3091 = vmatpush1.bf16.msra.mxu1 %v12463_v63 }
 0x4a3   : > { %3081 = vmatprep.mubr.bf16.mxu0 %v2966_v14  ;;  %3122 = vmatprep.mubr.bf16.mxu1 %v2966_v14  ;;  %v12680_v14 = vld [vmem:[#allocation132_spill] sm:$0xff] }
 0x4a4   : > { %3051 = vmatprep.subr.bf16.mxu0 %v12464_v60  ;;  %3092 = vmatprep.subr.bf16.mxu1 %v12465_v10 }
 0x4a6   : > { %3052 = vmatpush1.bf16.msra.mxu0 %v12466_v15  ;;  %3093 = vmatpush1.bf16.msra.mxu1 %v12467_v61 }
 0x4a7   : > { %3053 = vmatprep.subr.bf16.mxu0 %v12468_v52  ;;  %3094 = vmatprep.subr.bf16.mxu1 %v12469_v0 }
 0x4aa   : > { %3054 = vmatpush1.bf16.msra.mxu0 %v12470_v38  ;;  %3095 = vmatpush1.bf16.msra.mxu1 %v12471_v45 }
 0x4ab   : > { %3055 = vmatprep.subr.bf16.mxu0 %v12472_v51  ;;  %3096 = vmatprep.subr.bf16.mxu1 %v12473_v16 }
 0x4ae   : > { %3056 = vmatpush1.bf16.msra.mxu0 %v12564_v62  ;;  %3097 = vmatpush1.bf16.msra.mxu1 %v12565_v23 }
 0x4af   : > { %3057 = vmatprep.subr.bf16.mxu0 %v12566_v34  ;;  %3098 = vmatprep.subr.bf16.mxu1 %v12567_v57 }
 0x4b2   : > { %3058 = vmatpush1.bf16.msra.mxu0 %v12568_v4  ;;  %3099 = vmatpush1.bf16.msra.mxu1 %v12569_v24 }
 0x4b3   : > { %3059 = vmatprep.subr.bf16.mxu0 %v12570_v37  ;;  %3100 = vmatprep.subr.bf16.mxu1 %v12571_v33 }
 0x4b6   : > { %3060 = vmatpush1.bf16.msra.mxu0 %v12572_v40  ;;  %3101 = vmatpush1.bf16.msra.mxu1 %v12573_v19 }
 0x4b7   : > { %3061 = vmatprep.subr.bf16.mxu0 %v12574_v47  ;;  %3102 = vmatprep.subr.bf16.mxu1 %v12661_v20 }
 0x4ba   : > { %3062 = vmatpush1.bf16.msra.mxu0 %v12662_v48  ;;  %3103 = vmatpush1.bf16.msra.mxu1 %v12663_v58 }
 0x4bb   : > { %3063 = vmatprep.subr.bf16.mxu0 %v12664_v7  ;;  %3104 = vmatprep.subr.bf16.mxu1 %v12665_v5 }
 0x4be   : > { %3064 = vmatpush1.bf16.msra.mxu0 %v12666_v6  ;;  %3105 = vmatpush1.bf16.msra.mxu1 %v12667_v25 }
 0x4bf   : > { %3065 = vmatprep.subr.bf16.mxu0 %v12668_v8  ;;  %3106 = vmatprep.subr.bf16.mxu1 %v12583_v9 }
 0x4c2   : > { %3066 = vmatpush2.bf16.msra.mxu0 %v12584_v32  ;;  %3107 = vmatpush2.bf16.msra.mxu1 %v12585_v2 }
 0x4c3   : > { %3067 = vmatprep.subr.bf16.mxu0 %v12586_v43  ;;  %3108 = vmatprep.subr.bf16.mxu1 %v12587_v18 }
 0x4c6   : > { %3068 = vmatpush2.bf16.msra.mxu0 %v12588_v56  ;;  %3109 = vmatpush2.bf16.msra.mxu1 %v12589_v55 }
 0x4c7   : > { %3069 = vmatprep.subr.bf16.mxu0 %v12669_v17  ;;  %3110 = vmatprep.subr.bf16.mxu1 %v12670_v31 }
 0x4ca   : > { %3070 = vmatpush2.bf16.msra.mxu0 %v12671_v13  ;;  %3111 = vmatpush2.bf16.msra.mxu1 %v12672_v49 }
 0x4cb   : > { %3071 = vmatprep.subr.bf16.mxu0 %v12504_v39  ;;  %3112 = vmatprep.subr.bf16.mxu1 %v12505_v59  ;;  %v12753_v59 = vld [vmem:[#allocation149_spill] sm:$0xff] }
 0x4ce   : > { %3072 = vmatpush2.bf16.msra.mxu0 %v12673_v44  ;;  %3113 = vmatpush2.bf16.msra.mxu1 %v12674_v30 }
 0x4cf   : > { %3073 = vmatprep.subr.bf16.mxu0 %v12675_v26  ;;  %3114 = vmatprep.subr.bf16.mxu1 %v12676_v21  ;;  %v12748_v21 = vld [vmem:[#allocation141_spill] sm:$0xff] }
 0x4d2   : > { %3074 = vmatpush2.bf16.msra.mxu0 %v12510_v1  ;;  %3115 = vmatpush2.bf16.msra.mxu1 %v12594_v12 }
 0x4d3   : > { %3075 = vmatprep.subr.bf16.mxu0 %v12595_v54  ;;  %3116 = vmatprep.subr.bf16.mxu1 %v12596_v28  ;;  %v12681_v54 = vld [vmem:[#allocation133_spill] sm:$0xff]  ;;  %v12682_v28 = vld [vmem:[#allocation6_spill] sm:$0xff] }
 0x4d6   : > { %3076 = vmatpush2.bf16.msra.mxu0 %v12597_v53  ;;  %3117 = vmatpush2.bf16.msra.mxu1 %v8914_v27  ;;  %v12683_v53 = vld [vmem:[#allocation7_spill] sm:$0xff] }
 0x4d7   : > { %3077 = vmatprep.subr.bf16.mxu0 %v8918_v29  ;;  %3118 = vmatprep.subr.bf16.mxu1 %v12677_v46  ;;  %v12684_v46 = vld [vmem:[#allocation8_spill] sm:$0xff]  ;;  %v12693_v29 = vld [vmem:[#allocation17_spill] sm:$0xff] }
 0x4da   : > { %3078 = vmatpush2.bf16.msra.mxu0 %v12599_v35  ;;  %3119 = vmatpush2.bf16.msra.mxu1 %v12600_v36  ;;  %v12685_v35 = vld [vmem:[#allocation9_spill] sm:$0xff]  ;;  %v12686_v36 = vld [vmem:[#allocation10_spill] sm:$0xff] }
 0x4db   : > { %3079 = vmatprep.subr.bf16.mxu0 %v12678_v3  ;;  %3120 = vmatprep.subr.bf16.mxu1 %v12679_v22  ;;  %v12687_v3 = vld [vmem:[#allocation11_spill] sm:$0xff]  ;;  %v12688_v22 = vld [vmem:[#allocation12_spill] sm:$0xff] }
 0x4de   : > { %3080 = vmatpush2.bf16.msra.mxu0 %v12680_v14  ;;  %3121 = vmatpush2.bf16.msra.mxu1 %v12681_v54  ;;  %v12689_v14 = vld [vmem:[#allocation13_spill] sm:$0xff]  ;;  %v12690_v54 = vld [vmem:[#allocation14_spill] sm:$0xff] }
 0x4df   : > { %3200 = vmatprep.subr.bf16.mxu0 %v12682_v28  ;;  %3241 = vmatprep.subr.bf16.mxu1 %v12683_v53  ;;  %v12691_v28 = vld [vmem:[#allocation15_spill] sm:$0xff]  ;;  %v12692_v53 = vld [vmem:[#allocation16_spill] sm:$0xff] }
 0x4e1   : > { %3082 = vmatmul.mubr.bf16.vlgmr.msra.gmra.mxu0 %v9740_v42  ;;  %3123 = vmatmul.mubr.bf16.vlgmr.msra.gmra.mxu1 %v9740_v42  ;;  %v12694_v42 = vld [vmem:[#allocation18_spill] sm:$0xff] }
 0x4e2   : > { %3201 = vmatpush1.bf16.msra.mxu0 %v12684_v46  ;;  %3242 = vmatpush1.bf16.msra.mxu1 %v12685_v35  ;;  %v12695_v46 = vld [vmem:[#allocation19_spill] sm:$0xff]  ;;  %v12696_v35 = vld [vmem:[#allocation20_spill] sm:$0xff] }
 0x4e3   : > { %3202 = vmatprep.subr.bf16.mxu0 %v12686_v36  ;;  %3243 = vmatprep.subr.bf16.mxu1 %v12687_v3  ;;  %v12697_v36 = vld [vmem:[#allocation21_spill] sm:$0xff]  ;;  %v12698_v3 = vld [vmem:[#allocation22_spill] sm:$0xff] }
 0x4e6   : > { %3203 = vmatpush1.bf16.msra.mxu0 %v12688_v22  ;;  %3244 = vmatpush1.bf16.msra.mxu1 %v12689_v14  ;;  %v12699_v22 = vld [vmem:[#allocation23_spill] sm:$0xff]  ;;  %v12700_v14 = vld [vmem:[#allocation24_spill] sm:$0xff] }
 0x4e7   : > { %3204 = vmatprep.subr.bf16.mxu0 %v12690_v54  ;;  %3245 = vmatprep.subr.bf16.mxu1 %v12691_v28  ;;  %v12701_v54 = vld [vmem:[#allocation25_spill] sm:$0xff]  ;;  %v12702_v28 = vld [vmem:[#allocation26_spill] sm:$0xff] }
 0x4ea   : > { %3205 = vmatpush1.bf16.msra.mxu0 %v12692_v53  ;;  %3246 = vmatpush1.bf16.msra.mxu1 %v12693_v29  ;;  %v12703_v53 = vld [vmem:[#allocation27_spill] sm:$0xff]  ;;  %v12704_v29 = vld [vmem:[#allocation28_spill] sm:$0xff] }
 0x4eb   : > { %3206 = vmatprep.subr.bf16.mxu0 %v12694_v42  ;;  %3247 = vmatprep.subr.bf16.mxu1 %v12695_v46  ;;  %v12705_v42 = vld [vmem:[#allocation29_spill] sm:$0xff]  ;;  %v12706_v46 = vld [vmem:[#allocation30_spill] sm:$0xff] }
 0x4ee   : > { %3207 = vmatpush1.bf16.msra.mxu0 %v12696_v35  ;;  %3248 = vmatpush1.bf16.msra.mxu1 %v12697_v36  ;;  %v12707_v35 = vld [vmem:[#allocation31_spill] sm:$0xff]  ;;  %v12708_v36 = vld [vmem:[#allocation32_spill] sm:$0xff] }
 0x4ef   : > { %3208 = vmatprep.subr.bf16.mxu0 %v12698_v3  ;;  %3249 = vmatprep.subr.bf16.mxu1 %v12699_v22  ;;  %v12709_v3 = vld [vmem:[#allocation33_spill] sm:$0xff]  ;;  %v12710_v22 = vld [vmem:[#allocation34_spill] sm:$0xff] }
 0x4f2   : > { %3209 = vmatpush1.bf16.msra.mxu0 %v12700_v14  ;;  %3250 = vmatpush1.bf16.msra.mxu1 %v12701_v54  ;;  %v12711_v14 = vld [vmem:[#allocation35_spill] sm:$0xff]  ;;  %v12712_v54 = vld [vmem:[#allocation36_spill] sm:$0xff] }
 0x4f3   : > { %3210 = vmatprep.subr.bf16.mxu0 %v12702_v28  ;;  %3251 = vmatprep.subr.bf16.mxu1 %v12703_v53  ;;  %v12713_v28 = vld [vmem:[#allocation37_spill] sm:$0xff]  ;;  %v12714_v53 = vld [vmem:[#allocation38_spill] sm:$0xff] }
 0x4f6   : > { %3211 = vmatpush1.bf16.msra.mxu0 %v12704_v29  ;;  %3252 = vmatpush1.bf16.msra.mxu1 %v12705_v42  ;;  %v12715_v29 = vld [vmem:[#allocation39_spill] sm:$0xff]  ;;  %v12716_v42 = vld [vmem:[#allocation40_spill] sm:$0xff] }
 0x4f7   : > { %3212 = vmatprep.subr.bf16.mxu0 %v12706_v46  ;;  %3253 = vmatprep.subr.bf16.mxu1 %v12707_v35  ;;  %v12717_v46 = vld [vmem:[#allocation41_spill] sm:$0xff]  ;;  %v12718_v35 = vld [vmem:[#allocation42_spill] sm:$0xff] }
 0x4fa   : > { %3213 = vmatpush1.bf16.msra.mxu0 %v12708_v36  ;;  %3254 = vmatpush1.bf16.msra.mxu1 %v12709_v3  ;;  %v12719_v36 = vld [vmem:[#allocation43_spill] sm:$0xff]  ;;  %v12720_v3 = vld [vmem:[#allocation44_spill] sm:$0xff] }
 0x4fb   : > { %3214 = vmatprep.subr.bf16.mxu0 %v12710_v22  ;;  %3255 = vmatprep.subr.bf16.mxu1 %v12711_v14  ;;  %v12721_v22 = vld [vmem:[#allocation45_spill] sm:$0xff]  ;;  %v12722_v14 = vld [vmem:[#allocation46_spill] sm:$0xff] }
 0x4fe   : > { %3215 = vmatpush1.bf16.msra.mxu0 %v12712_v54  ;;  %3256 = vmatpush1.bf16.msra.mxu1 %v12713_v28  ;;  %v12723_v54 = vld [vmem:[#allocation47_spill] sm:$0xff]  ;;  %v12724_v28 = vld [vmem:[#allocation48_spill] sm:$0xff] }
 0x4ff   : > { %3216 = vmatprep.subr.bf16.mxu0 %v12714_v53  ;;  %3257 = vmatprep.subr.bf16.mxu1 %v12715_v29  ;;  %v12725_v53 = vld [vmem:[#allocation49_spill] sm:$0xff]  ;;  %v12726_v29 = vld [vmem:[#allocation50_spill] sm:$0xff] }
 0x502   : > { %3217 = vmatpush2.bf16.msra.mxu0 %v12716_v42  ;;  %3258 = vmatpush2.bf16.msra.mxu1 %v12717_v46  ;;  %v12727_v42 = vld [vmem:[#allocation51_spill] sm:$0xff]  ;;  %v12728_v46 = vld [vmem:[#allocation52_spill] sm:$0xff] }
 0x503   : > { %3218 = vmatprep.subr.bf16.mxu0 %v12718_v35  ;;  %3259 = vmatprep.subr.bf16.mxu1 %v12719_v36  ;;  %v12729_v35 = vld [vmem:[#allocation53_spill] sm:$0xff]  ;;  %v12730_v36 = vld [vmem:[#allocation54_spill] sm:$0xff] }
 0x506   : > { %3219 = vmatpush2.bf16.msra.mxu0 %v12720_v3  ;;  %3260 = vmatpush2.bf16.msra.mxu1 %v12721_v22  ;;  %v12731_v3 = vld [vmem:[#allocation55_spill] sm:$0xff]  ;;  %v12732_v22 = vld [vmem:[#allocation56_spill] sm:$0xff] }
 0x507   : > { %3220 = vmatprep.subr.bf16.mxu0 %v12722_v14  ;;  %3261 = vmatprep.subr.bf16.mxu1 %v12723_v54  ;;  %v12733_v14 = vld [vmem:[#allocation57_spill] sm:$0xff]  ;;  %v12734_v54 = vld [vmem:[#allocation58_spill] sm:$0xff] }
 0x50a   : > { %3221 = vmatpush2.bf16.msra.mxu0 %v12724_v28  ;;  %3262 = vmatpush2.bf16.msra.mxu1 %v12725_v53  ;;  %v12735_v28 = vld [vmem:[#allocation59_spill] sm:$0xff]  ;;  %v12736_v53 = vld [vmem:[#allocation60_spill] sm:$0xff] }
 0x50b   : > { %3222 = vmatprep.subr.bf16.mxu0 %v12726_v29  ;;  %3263 = vmatprep.subr.bf16.mxu1 %v12727_v42  ;;  %v12737_v29 = vld [vmem:[#allocation61_spill] sm:$0xff]  ;;  %v12738_v42 = vld [vmem:[#allocation62_spill] sm:$0xff] }
 0x50e   : > { %3223 = vmatpush2.bf16.msra.mxu0 %v12728_v46  ;;  %3264 = vmatpush2.bf16.msra.mxu1 %v12729_v35  ;;  %v12739_v46 = vld [vmem:[#allocation63_spill] sm:$0xff]  ;;  %v12740_v35 = vld [vmem:[#allocation64_spill] sm:$0xff] }
 0x50f   : > { %3224 = vmatprep.subr.bf16.mxu0 %v12730_v36  ;;  %3265 = vmatprep.subr.bf16.mxu1 %v12731_v3  ;;  %v12741_v36 = vld [vmem:[#allocation65_spill] sm:$0xff]  ;;  %v12742_v3 = vld [vmem:[#allocation66_spill] sm:$0xff] }
 0x512   : > { %3225 = vmatpush2.bf16.msra.mxu0 %v12732_v22  ;;  %3266 = vmatpush2.bf16.msra.mxu1 %v12733_v14  ;;  %v12743_v22 = vld [vmem:[#allocation67_spill] sm:$0xff]  ;;  %v12744_v14 = vld [vmem:[#allocation68_spill] sm:$0xff] }
 0x513   : > { %3226 = vmatprep.subr.bf16.mxu0 %v12734_v54  ;;  %3267 = vmatprep.subr.bf16.mxu1 %v12735_v28  ;;  %v12745_v54 = vld [vmem:[#allocation69_spill] sm:$0xff]  ;;  %v12746_v28 = vld [vmem:[#allocation70_spill] sm:$0xff] }
 0x516   : > { %3227 = vmatpush2.bf16.msra.mxu0 %v12736_v53  ;;  %3268 = vmatpush2.bf16.msra.mxu1 %v12737_v29  ;;  %v12747_v53 = vld [vmem:[#allocation71_spill] sm:$0xff] }
 0x517   : > { %3228 = vmatprep.subr.bf16.mxu0 %v12738_v42  ;;  %3269 = vmatprep.subr.bf16.mxu1 %v12739_v46 }
 0x51a   : > { %3229 = vmatpush2.bf16.msra.mxu0 %v12740_v35  ;;  %3270 = vmatpush2.bf16.msra.mxu1 %v12741_v36 }
 0x51b   : > { %3230 = vmatprep.subr.bf16.mxu0 %v12742_v3  ;;  %3271 = vmatprep.subr.bf16.mxu1 %v12743_v22  ;;  %v12749_v3 = vld [vmem:[#allocation148_spill] sm:$0xff]  ;;  %v12750_v22 = vld [vmem:[#allocation146_spill] sm:$0xff] }
 0x51c   : > { %v960_v26 = vadd.f32 %v12749_v3, %v12748_v21  ;;  %v12755_v21 = vld [vmem:[#allocation210_spill] sm:$0xff] }
 0x51e   : > { %3231 = vmatpush2.bf16.msra.mxu0 %v12744_v14  ;;  %3272 = vmatpush2.bf16.msra.mxu1 %v12745_v54  ;;  %v12751_v14 = vld [vmem:[#allocation147_spill] sm:$0xff] }
 0x51f   : > { %3282 = vmatprep.subr.bf16.mxu0 %v12746_v28  ;;  %3323 = vmatprep.subr.bf16.mxu1 %v12747_v53  ;;  %v12752_v54 = vld [vmem:[#allocation135_spill] sm:$0xff] }
 0x520   : > { %v1073_v28 = vadd.f32 %v12753_v59, %v12752_v54  ;;  %v12781_v54 = vld [vmem:[#allocation132_spill] sm:$0xff] }
 0x561   : > { %v3001_v29 = vpop.f32.mrf.mxu0  ;;  %v3042_v42 = vpop.f32.mrf.mxu1 }
 0x562   : > { %v3131_v30 = vadd.f32 %v3001_v29, %v12750_v22  ;;  %v3133_v44 = vadd.f32 %v3042_v42, %v12751_v14  ;;  %v12754_v42 = vld [vmem:[#allocation198_spill] sm:$0xff] }
 0x563   : > { %v3003_v27 = vpop.f32.mrf.mxu0  ;;  %v3044_v46 = vpop.f32.mrf.mxu1  ;;  %v1186_v59 = vadd.f32 %v12755_v21, %v12754_v42 }
 0x564   : > { %v3132_v39 = vadd.f32 %v3003_v27, %v960_v26  ;;  %v6825_v53 = vmul.f32 -1.442695, %v3131_v30  ;;  %v3134_v49 = vadd.f32 %v3044_v46, %v1073_v28  ;;  %v6827_v13 = vmul.f32 -1.442695, %v3133_v44  ;;  %v12759_v30 = vld [vmem:[#allocation209_spill] sm:$0xff] }
 0x565   : > { %v3005_v12 = vpop.f32.mrf.mxu0  ;;  %v3046_v35 = vpop.f32.mrf.mxu1 }
 0x566   : > { %v6826_v31 = vmul.f32 -1.442695, %v3132_v39  ;;  %7181 = vpow2.f32 %v6825_v53  ;;  %v6828_v12 = vmul.f32 -1.442695, %v3134_v49  ;;  %v12756_v39 = vld [vmem:[#allocation199_spill] sm:$0xff] }
 0x567   : > { %v3006_v1 = vpop.f32.mrf.mxu0  ;;  %v3047_v36 = vpop.f32.mrf.mxu1  ;;  %7183 = vpow2.f32 %v6827_v13  ;;  %v12757_v53 = vld [vmem:[#allocation211_spill] sm:$0xff] }
 0x568   : > { %7185 = vpow2.f32 %v6826_v31  ;;  %v1299_v49 = vadd.f32 %v12757_v53, %v12756_v39  ;;  %v12758_v31 = vld [vmem:[#allocation208_spill] sm:$0xff]  ;;  %v12780_v39 = vld [vmem:[#allocation131_spill] sm:$0xff] }
 0x569   : > { %7187 = vpow2.f32 %v6828_v12 }
 0x573   : > { %v7182_v35 = vpop.eup %7181 }
 0x574   : > { %v7184_v36 = vpop.eup %7183  ;;  %v3145_v3 = vadd.f32 1.0, %v7182_v35 }
 0x575   : > { %v7186_v1 = vpop.eup %7185  ;;  %v3157_v22 = vadd.f32 1.0, %v7184_v36 }
 0x576   : > { %v7188_v29 = vpop.eup %7187  ;;  %v3146_v14 = vadd.f32 1.0, %v7186_v1  ;;  %7189 = vrcp.f32 %v3145_v3 }
 0x577   : > { %v3158_v27 = vadd.f32 1.0, %v7188_v29  ;;  %7191 = vrcp.f32 %v3157_v22 }
 0x578   : > { %7193 = vrcp.f32 %v3146_v14 }
 0x583   : > { %v7190_v22 = vpop.eup %7189 }
 0x5a1   : > { %v3083_v28 = vpop.f32.mrf.mxu0  ;;  %v3124_v44 = vpop.f32.mrf.mxu1 }
 0x5a2   : > { %v3135_v13 = vadd.f32 %v3083_v28, %v12758_v31  ;;  %v3137_v26 = vadd.f32 %v3124_v44, %v12759_v30  ;;  %v7192_v28 = vpop.eup %7191 }
 0x5a3   : > { %v3085_v46 = vpop.f32.mrf.mxu0  ;;  %v3126_v12 = vpop.f32.mrf.mxu1  ;;  %v3177_v30 = vmul.f32 %v7192_v28, %v9733_v50 }
 0x5a4   : > { %7195 = vtanh.f32 %v3135_v13  ;;  %v6829_v35 = vmul.f32 -1.442695, %v3137_v26  ;;  %v3136_v36 = vadd.f32 %v3085_v46, %v1186_v59  ;;  %v3138_v1 = vadd.f32 %v3126_v12, %v1299_v49  ;;  %v7194_v31 = vpop.eup %7193 }
 0x5a5   : > { %7197 = vrcp.f32 %v3158_v27  ;;  %v3087_v21 = vpop.f32.mrf.mxu0  ;;  %v3128_v3 = vpop.f32.mrf.mxu1 }
 0x5a6   : > { %7199 = vpow2.f32 %v6829_v35  ;;  %v6830_v29 = vmul.f32 -1.442695, %v3138_v1 }
 0x5a7   : > { %7201 = vtanh.f32 %v3136_v36  ;;  %v3088_v42 = vpop.f32.mrf.mxu0  ;;  %v3129_v53 = vpop.f32.mrf.mxu1 }
 0x5a8   : > { %7203 = vpow2.f32 %v6830_v29 }
 0x5b1   : > { %v7196_v44 = vpop.eup %7195 }
 0x5b2   : > { %v7198_v14 = vpop.eup %7197  ;;  %v3179_v13 = vmul.f32 %v7196_v44, %v7190_v22  ;;  %v12762_v44 = vld [vmem:[#allocation113_spill] sm:$0xff] }
 0x5b3   : > { %v7200_v26 = vpop.eup %7199  ;;  %v3178_v12 = vmul.f32 %v7198_v14, %v9737_v41  ;;  %v12760_v41 = vld [vmem:[#allocation111_spill] sm:$0xff]  ;;  %v12763_v14 = vld [vmem:[#allocation114_spill] sm:$0xff] }
 0x5b4   : > { %v7202_v59 = vpop.eup %7201  ;;  %v9887_v49 = vadd.f32 %v3179_v13, %v3177_v30  ;;  %v3171_v27 = vadd.f32 1.0, %v7200_v26  ;;  %v12764_v30 = vld [vmem:[#allocation115_spill] sm:$0xff]  ;;  %v12765_v13 = vld [vmem:[#allocation116_spill] sm:$0xff]  ;;  %v12766_v26 = vld [vmem:[#allocation117_spill] sm:$0xff] }
 0x5b5   : > { %v7204_v46 = vpop.eup %7203  ;;  %v3180_v35 = vmul.f32 %v7202_v59, %v7194_v31  ;;  %v12761_v31 = vld [vmem:[#allocation112_spill] sm:$0xff]  ;;  %v12767_v59 = vld [vmem:[#allocation118_spill] sm:$0xff] }
 0x5b6   : > { %7205 = vtanh.f32 %v9887_v49  ;;  %v3172_v42 = vadd.f32 1.0, %v7204_v46  ;;  %v12769_v46 = vld [vmem:[#allocation120_spill] sm:$0xff] }
 0x5b7   : > { %7207 = vrcp.f32 %v3171_v27  ;;  %v9891_v36 = vadd.f32 %v3180_v35, %v3178_v12  ;;  %v12768_v27 = vld [vmem:[#allocation119_spill] sm:$0xff]  ;;  %v12770_v12 = vld [vmem:[#allocation121_spill] sm:$0xff]  ;;  %v12771_v35 = vld [vmem:[#allocation122_spill] sm:$0xff] }
 0x5b8   : > { %7209 = vrcp.f32 %v3172_v42  ;;  %v12772_v42 = vld [vmem:[#allocation123_spill] sm:$0xff] }
 0x5b9   : > { %7211 = vtanh.f32 %v9891_v36 }
 0x5c3   : > { %v7206_v50 = vpop.eup %7205 }
 0x5c4   : > { %v7208_v1 = vpop.eup %7207 }
 0x5c5   : > { %v7210_v21 = vpop.eup %7209  ;;  %v3185_v29 = vmul.f32 %v7208_v1, %v7206_v50  ;;  %v12773_v50 = vld [vmem:[#allocation124_spill] sm:$0xff]  ;;  %v12774_v1 = vld [vmem:[#allocation125_spill] sm:$0xff] }
 0x5c6   : > { %v7212_v3 = vpop.eup %7211 }
 0x5c7   : > { %v3186_v53 = vmul.f32 %v7212_v3, %v7210_v21  ;;  %v9894_v28 = vpack.c.bf16 %v3185_v29, %v3185_v29  ;;  %v12775_v21 = vld [vmem:[#allocation126_spill] sm:$0xff]  ;;  %v12776_v3 = vld [vmem:[#allocation127_spill] sm:$0xff]  ;;  %v12777_v29 = vld [vmem:[#allocation128_spill] sm:$0xff] }
 0x5c9   : > { %v3199_v22 = vpack.c.bf16 %v3186_v53, %v3186_v53  ;;  %v12778_v53 = vld [vmem:[#allocation129_spill] sm:$0xff] }
 0x5cb   : > { %3232 = vmatprep.mubr.bf16.mxu0 %v3199_v22  ;;  %3273 = vmatprep.mubr.bf16.mxu1 %v3199_v22 }
 0x5cc   : > { %3233 = vmatmul.mubr.bf16.vlgmr.msra.gmra.mxu0 %v9894_v28  ;;  %3274 = vmatmul.mubr.bf16.vlgmr.msra.gmra.mxu1 %v9894_v28 }
 0x5cd   : > { %3283 = vmatpush1.bf16.msra.mxu0 %v12462_v11  ;;  %3324 = vmatpush1.bf16.msra.mxu1 %v12463_v63 }
 0x5ce   : > { %3314 = vmatprep.mubr.bf16.mxu0 %v3199_v22  ;;  %3355 = vmatprep.mubr.bf16.mxu1 %v3199_v22  ;;  %v12779_v22 = vld [vmem:[#allocation130_spill] sm:$0xff] }
 0x5cf   : > { %3284 = vmatprep.subr.bf16.mxu0 %v12464_v60  ;;  %3325 = vmatprep.subr.bf16.mxu1 %v12465_v10 }
 0x5d1   : > { %3285 = vmatpush1.bf16.msra.mxu0 %v12466_v15  ;;  %3326 = vmatpush1.bf16.msra.mxu1 %v12467_v61 }
 0x5d2   : > { %3286 = vmatprep.subr.bf16.mxu0 %v12468_v52  ;;  %3327 = vmatprep.subr.bf16.mxu1 %v12469_v0 }
 0x5d5   : > { %3287 = vmatpush1.bf16.msra.mxu0 %v12470_v38  ;;  %3328 = vmatpush1.bf16.msra.mxu1 %v12471_v45 }
 0x5d6   : > { %3288 = vmatprep.subr.bf16.mxu0 %v12472_v51  ;;  %3329 = vmatprep.subr.bf16.mxu1 %v12473_v16 }
 0x5d9   : > { %3289 = vmatpush1.bf16.msra.mxu0 %v12564_v62  ;;  %3330 = vmatpush1.bf16.msra.mxu1 %v12565_v23 }
 0x5da   : > { %3290 = vmatprep.subr.bf16.mxu0 %v12566_v34  ;;  %3331 = vmatprep.subr.bf16.mxu1 %v12567_v57 }
 0x5dd   : > { %3291 = vmatpush1.bf16.msra.mxu0 %v12568_v4  ;;  %3332 = vmatpush1.bf16.msra.mxu1 %v12569_v24 }
 0x5de   : > { %3292 = vmatprep.subr.bf16.mxu0 %v12570_v37  ;;  %3333 = vmatprep.subr.bf16.mxu1 %v12571_v33 }
 0x5e1   : > { %3293 = vmatpush1.bf16.msra.mxu0 %v12572_v40  ;;  %3334 = vmatpush1.bf16.msra.mxu1 %v12573_v19 }
 0x5e2   : > { %3294 = vmatprep.subr.bf16.mxu0 %v12574_v47  ;;  %3335 = vmatprep.subr.bf16.mxu1 %v12661_v20 }
 0x5e5   : > { %3295 = vmatpush1.bf16.msra.mxu0 %v12662_v48  ;;  %3336 = vmatpush1.bf16.msra.mxu1 %v12663_v58 }
 0x5e6   : > { %3296 = vmatprep.subr.bf16.mxu0 %v12664_v7  ;;  %3337 = vmatprep.subr.bf16.mxu1 %v12665_v5 }
 0x5e9   : > { %3297 = vmatpush1.bf16.msra.mxu0 %v12666_v6  ;;  %3338 = vmatpush1.bf16.msra.mxu1 %v12667_v25 }
 0x5ea   : > { %3298 = vmatprep.subr.bf16.mxu0 %v12668_v8  ;;  %3339 = vmatprep.subr.bf16.mxu1 %v12583_v9 }
 0x5ed   : > { %3299 = vmatpush2.bf16.msra.mxu0 %v12584_v32  ;;  %3340 = vmatpush2.bf16.msra.mxu1 %v12585_v2 }
 0x5ee   : > { %3300 = vmatprep.subr.bf16.mxu0 %v12586_v43  ;;  %3341 = vmatprep.subr.bf16.mxu1 %v12587_v18 }
 0x5f1   : > { %3301 = vmatpush2.bf16.msra.mxu0 %v12588_v56  ;;  %3342 = vmatpush2.bf16.msra.mxu1 %v12589_v55 }
 0x5f2   : > { %3302 = vmatprep.subr.bf16.mxu0 %v12669_v17  ;;  %3343 = vmatprep.subr.bf16.mxu1 %v12760_v41 }
 0x5f5   : > { %3303 = vmatpush2.bf16.msra.mxu0 %v12761_v31  ;;  %3344 = vmatpush2.bf16.msra.mxu1 %v12762_v44 }
 0x5f6   : > { %3304 = vmatprep.subr.bf16.mxu0 %v12763_v14  ;;  %3345 = vmatprep.subr.bf16.mxu1 %v12764_v30 }
 0x5f9   : > { %3305 = vmatpush2.bf16.msra.mxu0 %v12765_v13  ;;  %3346 = vmatpush2.bf16.msra.mxu1 %v12766_v26  ;;  %v12851_v26 = vld [vmem:[#allocation152_spill] sm:$0xff] }
 0x5fa   : > { %3306 = vmatprep.subr.bf16.mxu0 %v12767_v59  ;;  %3347 = vmatprep.subr.bf16.mxu1 %v12768_v27  ;;  %v12849_v27 = vld [vmem:[#allocation150_spill] sm:$0xff]  ;;  %v12850_v59 = vld [vmem:[#allocation151_spill] sm:$0xff] }
 0x5fd   : > { %3307 = vmatpush2.bf16.msra.mxu0 %v12769_v46  ;;  %3348 = vmatpush2.bf16.msra.mxu1 %v12770_v12 }
 0x5fe   : > { %3308 = vmatprep.subr.bf16.mxu0 %v12771_v35  ;;  %3349 = vmatprep.subr.bf16.mxu1 %v12772_v42  ;;  %v12782_v35 = vld [vmem:[#allocation133_spill] sm:$0xff]  ;;  %v12783_v42 = vld [vmem:[#allocation6_spill] sm:$0xff] }
 0x601   : > { %3309 = vmatpush2.bf16.msra.mxu0 %v12773_v50  ;;  %3350 = vmatpush2.bf16.msra.mxu1 %v12774_v1  ;;  %v12784_v50 = vld [vmem:[#allocation7_spill] sm:$0xff] }
 0x602   : > { %3310 = vmatprep.subr.bf16.mxu0 %v12775_v21  ;;  %3351 = vmatprep.subr.bf16.mxu1 %v12776_v3  ;;  %v12785_v3 = vld [vmem:[#allocation8_spill] sm:$0xff]  ;;  %v12794_v21 = vld [vmem:[#allocation17_spill] sm:$0xff] }
 0x605   : > { %3311 = vmatpush2.bf16.msra.mxu0 %v12777_v29  ;;  %3352 = vmatpush2.bf16.msra.mxu1 %v12778_v53  ;;  %v12786_v29 = vld [vmem:[#allocation9_spill] sm:$0xff]  ;;  %v12787_v53 = vld [vmem:[#allocation10_spill] sm:$0xff] }
 0x606   : > { %3312 = vmatprep.subr.bf16.mxu0 %v12779_v22  ;;  %3353 = vmatprep.subr.bf16.mxu1 %v12780_v39  ;;  %v12788_v22 = vld [vmem:[#allocation11_spill] sm:$0xff]  ;;  %v12789_v39 = vld [vmem:[#allocation12_spill] sm:$0xff] }
 0x609   : > { %3313 = vmatpush2.bf16.msra.mxu0 %v12781_v54  ;;  %3354 = vmatpush2.bf16.msra.mxu1 %v12782_v35  ;;  %v12790_v54 = vld [vmem:[#allocation13_spill] sm:$0xff]  ;;  %v12791_v35 = vld [vmem:[#allocation14_spill] sm:$0xff] }
 0x60a   : > { %3433 = vmatprep.subr.bf16.mxu0 %v12783_v42  ;;  %3474 = vmatprep.subr.bf16.mxu1 %v12784_v50  ;;  %v12792_v42 = vld [vmem:[#allocation15_spill] sm:$0xff]  ;;  %v12793_v50 = vld [vmem:[#allocation16_spill] sm:$0xff] }
 0x60c   : > { %3315 = vmatmul.mubr.bf16.vlgmr.msra.gmra.mxu0 %v9894_v28  ;;  %3356 = vmatmul.mubr.bf16.vlgmr.msra.gmra.mxu1 %v9894_v28  ;;  %v12795_v28 = vld [vmem:[#allocation18_spill] sm:$0xff] }
 0x60d   : > { %3434 = vmatpush1.bf16.msra.mxu0 %v12785_v3  ;;  %3475 = vmatpush1.bf16.msra.mxu1 %v12786_v29  ;;  %v12796_v3 = vld [vmem:[#allocation19_spill] sm:$0xff]  ;;  %v12797_v29 = vld [vmem:[#allocation20_spill] sm:$0xff] }
 0x60e   : > { %3435 = vmatprep.subr.bf16.mxu0 %v12787_v53  ;;  %3476 = vmatprep.subr.bf16.mxu1 %v12788_v22  ;;  %v12798_v53 = vld [vmem:[#allocation21_spill] sm:$0xff]  ;;  %v12799_v22 = vld [vmem:[#allocation22_spill] sm:$0xff] }
 0x611   : > { %3436 = vmatpush1.bf16.msra.mxu0 %v12789_v39  ;;  %3477 = vmatpush1.bf16.msra.mxu1 %v12790_v54  ;;  %v12800_v39 = vld [vmem:[#allocation23_spill] sm:$0xff]  ;;  %v12801_v54 = vld [vmem:[#allocation24_spill] sm:$0xff] }
 0x612   : > { %3437 = vmatprep.subr.bf16.mxu0 %v12791_v35  ;;  %3478 = vmatprep.subr.bf16.mxu1 %v12792_v42  ;;  %v12802_v35 = vld [vmem:[#allocation25_spill] sm:$0xff]  ;;  %v12803_v42 = vld [vmem:[#allocation26_spill] sm:$0xff] }
 0x615   : > { %3438 = vmatpush1.bf16.msra.mxu0 %v12793_v50  ;;  %3479 = vmatpush1.bf16.msra.mxu1 %v12794_v21  ;;  %v12804_v50 = vld [vmem:[#allocation27_spill] sm:$0xff]  ;;  %v12805_v21 = vld [vmem:[#allocation28_spill] sm:$0xff] }
 0x616   : > { %3439 = vmatprep.subr.bf16.mxu0 %v12795_v28  ;;  %3480 = vmatprep.subr.bf16.mxu1 %v12796_v3  ;;  %v12806_v28 = vld [vmem:[#allocation29_spill] sm:$0xff]  ;;  %v12807_v3 = vld [vmem:[#allocation30_spill] sm:$0xff] }
 0x619   : > { %3440 = vmatpush1.bf16.msra.mxu0 %v12797_v29  ;;  %3481 = vmatpush1.bf16.msra.mxu1 %v12798_v53  ;;  %v12808_v29 = vld [vmem:[#allocation31_spill] sm:$0xff]  ;;  %v12809_v53 = vld [vmem:[#allocation32_spill] sm:$0xff] }
 0x61a   : > { %3441 = vmatprep.subr.bf16.mxu0 %v12799_v22  ;;  %3482 = vmatprep.subr.bf16.mxu1 %v12800_v39  ;;  %v12810_v22 = vld [vmem:[#allocation33_spill] sm:$0xff]  ;;  %v12811_v39 = vld [vmem:[#allocation34_spill] sm:$0xff] }
 0x61d   : > { %3442 = vmatpush1.bf16.msra.mxu0 %v12801_v54  ;;  %3483 = vmatpush1.bf16.msra.mxu1 %v12802_v35  ;;  %v12812_v54 = vld [vmem:[#allocation35_spill] sm:$0xff]  ;;  %v12813_v35 = vld [vmem:[#allocation36_spill] sm:$0xff] }
 0x61e   : > { %3443 = vmatprep.subr.bf16.mxu0 %v12803_v42  ;;  %3484 = vmatprep.subr.bf16.mxu1 %v12804_v50  ;;  %v12814_v42 = vld [vmem:[#allocation37_spill] sm:$0xff]  ;;  %v12815_v50 = vld [vmem:[#allocation38_spill] sm:$0xff] }
 0x621   : > { %3444 = vmatpush1.bf16.msra.mxu0 %v12805_v21  ;;  %3485 = vmatpush1.bf16.msra.mxu1 %v12806_v28  ;;  %v12816_v21 = vld [vmem:[#allocation39_spill] sm:$0xff]  ;;  %v12817_v28 = vld [vmem:[#allocation40_spill] sm:$0xff] }
 0x622   : > { %3445 = vmatprep.subr.bf16.mxu0 %v12807_v3  ;;  %3486 = vmatprep.subr.bf16.mxu1 %v12808_v29  ;;  %v12818_v3 = vld [vmem:[#allocation41_spill] sm:$0xff]  ;;  %v12819_v29 = vld [vmem:[#allocation42_spill] sm:$0xff] }
 0x625   : > { %3446 = vmatpush1.bf16.msra.mxu0 %v12809_v53  ;;  %3487 = vmatpush1.bf16.msra.mxu1 %v12810_v22  ;;  %v12820_v53 = vld [vmem:[#allocation43_spill] sm:$0xff]  ;;  %v12821_v22 = vld [vmem:[#allocation44_spill] sm:$0xff] }
 0x626   : > { %3447 = vmatprep.subr.bf16.mxu0 %v12811_v39  ;;  %3488 = vmatprep.subr.bf16.mxu1 %v12812_v54  ;;  %v12822_v39 = vld [vmem:[#allocation45_spill] sm:$0xff]  ;;  %v12823_v54 = vld [vmem:[#allocation46_spill] sm:$0xff] }
 0x629   : > { %3448 = vmatpush1.bf16.msra.mxu0 %v12813_v35  ;;  %3489 = vmatpush1.bf16.msra.mxu1 %v12814_v42  ;;  %v12824_v35 = vld [vmem:[#allocation47_spill] sm:$0xff]  ;;  %v12825_v42 = vld [vmem:[#allocation48_spill] sm:$0xff] }
 0x62a   : > { %3449 = vmatprep.subr.bf16.mxu0 %v12815_v50  ;;  %3490 = vmatprep.subr.bf16.mxu1 %v12816_v21  ;;  %v12826_v50 = vld [vmem:[#allocation49_spill] sm:$0xff]  ;;  %v12827_v21 = vld [vmem:[#allocation50_spill] sm:$0xff] }
 0x62d   : > { %3450 = vmatpush2.bf16.msra.mxu0 %v12817_v28  ;;  %3491 = vmatpush2.bf16.msra.mxu1 %v12818_v3  ;;  %v12828_v28 = vld [vmem:[#allocation51_spill] sm:$0xff]  ;;  %v12829_v3 = vld [vmem:[#allocation52_spill] sm:$0xff] }
 0x62e   : > { %3451 = vmatprep.subr.bf16.mxu0 %v12819_v29  ;;  %3492 = vmatprep.subr.bf16.mxu1 %v12820_v53  ;;  %v12830_v29 = vld [vmem:[#allocation53_spill] sm:$0xff]  ;;  %v12831_v53 = vld [vmem:[#allocation54_spill] sm:$0xff] }
 0x631   : > { %3452 = vmatpush2.bf16.msra.mxu0 %v12821_v22  ;;  %3493 = vmatpush2.bf16.msra.mxu1 %v12822_v39  ;;  %v12832_v22 = vld [vmem:[#allocation55_spill] sm:$0xff]  ;;  %v12833_v39 = vld [vmem:[#allocation56_spill] sm:$0xff] }
 0x632   : > { %3453 = vmatprep.subr.bf16.mxu0 %v12823_v54  ;;  %3494 = vmatprep.subr.bf16.mxu1 %v12824_v35  ;;  %v12834_v54 = vld [vmem:[#allocation57_spill] sm:$0xff]  ;;  %v12835_v35 = vld [vmem:[#allocation58_spill] sm:$0xff] }
 0x635   : > { %3454 = vmatpush2.bf16.msra.mxu0 %v12825_v42  ;;  %3495 = vmatpush2.bf16.msra.mxu1 %v12826_v50  ;;  %v12836_v42 = vld [vmem:[#allocation59_spill] sm:$0xff]  ;;  %v12837_v50 = vld [vmem:[#allocation60_spill] sm:$0xff] }
 0x636   : > { %3455 = vmatprep.subr.bf16.mxu0 %v12827_v21  ;;  %3496 = vmatprep.subr.bf16.mxu1 %v12828_v28  ;;  %v12838_v21 = vld [vmem:[#allocation61_spill] sm:$0xff]  ;;  %v12839_v28 = vld [vmem:[#allocation62_spill] sm:$0xff] }
 0x639   : > { %3456 = vmatpush2.bf16.msra.mxu0 %v12829_v3  ;;  %3497 = vmatpush2.bf16.msra.mxu1 %v12830_v29  ;;  %v12840_v3 = vld [vmem:[#allocation63_spill] sm:$0xff]  ;;  %v12841_v29 = vld [vmem:[#allocation64_spill] sm:$0xff] }
 0x63a   : > { %3457 = vmatprep.subr.bf16.mxu0 %v12831_v53  ;;  %3498 = vmatprep.subr.bf16.mxu1 %v12832_v22  ;;  %v12842_v53 = vld [vmem:[#allocation65_spill] sm:$0xff]  ;;  %v12843_v22 = vld [vmem:[#allocation66_spill] sm:$0xff] }
 0x63d   : > { %3458 = vmatpush2.bf16.msra.mxu0 %v12833_v39  ;;  %3499 = vmatpush2.bf16.msra.mxu1 %v12834_v54  ;;  %v12844_v39 = vld [vmem:[#allocation67_spill] sm:$0xff]  ;;  %v12845_v54 = vld [vmem:[#allocation68_spill] sm:$0xff] }
 0x63e   : > { %3459 = vmatprep.subr.bf16.mxu0 %v12835_v35  ;;  %3500 = vmatprep.subr.bf16.mxu1 %v12836_v42  ;;  %v12846_v35 = vld [vmem:[#allocation69_spill] sm:$0xff]  ;;  %v12847_v42 = vld [vmem:[#allocation70_spill] sm:$0xff] }
 0x641   : > { %3460 = vmatpush2.bf16.msra.mxu0 %v12837_v50  ;;  %3501 = vmatpush2.bf16.msra.mxu1 %v12838_v21  ;;  %v12848_v50 = vld [vmem:[#allocation71_spill] sm:$0xff] }
 0x642   : > { %3461 = vmatprep.subr.bf16.mxu0 %v12839_v28  ;;  %3502 = vmatprep.subr.bf16.mxu1 %v12840_v3 }
 0x645   : > { %3462 = vmatpush2.bf16.msra.mxu0 %v12841_v29  ;;  %3503 = vmatpush2.bf16.msra.mxu1 %v12842_v53 }
 0x646   : > { %3463 = vmatprep.subr.bf16.mxu0 %v12843_v22  ;;  %3504 = vmatprep.subr.bf16.mxu1 %v12844_v39 }
 0x649   : > { %3464 = vmatpush2.bf16.msra.mxu0 %v12845_v54  ;;  %3505 = vmatpush2.bf16.msra.mxu1 %v12846_v35  ;;  %v12852_v35 = vld [vmem:[#allocation153_spill] sm:$0xff] }
 0x64a   : > { %3515 = vmatprep.subr.bf16.mxu0 %v12847_v42  ;;  %3556 = vmatprep.subr.bf16.mxu1 %v12848_v50 }
 0x68c   : > { %v3234_v21 = vpop.f32.mrf.mxu0  ;;  %v3275_v28 = vpop.f32.mrf.mxu1 }
 0x68d   : > { %v3364_v22 = vadd.f32 %v3234_v21, %v12849_v27  ;;  %v3366_v39 = vadd.f32 %v3275_v28, %v12850_v59 }
 0x68e   : > { %v3236_v1 = vpop.f32.mrf.mxu0  ;;  %v3277_v3 = vpop.f32.mrf.mxu1 }
 0x68f   : > { %v3365_v54 = vadd.f32 %v3236_v1, %v12851_v26  ;;  %v6831_v13 = vmul.f32 -1.442695, %v3364_v22  ;;  %v3367_v30 = vadd.f32 %v3277_v3, %v12852_v35  ;;  %v6833_v42 = vmul.f32 -1.442695, %v3366_v39  ;;  %v12853_v35 = vld [vmem:[#allocation212_spill] sm:$0xff]  ;;  %v12856_v22 = vld [vmem:[#allocation215_spill] sm:$0xff] }
 0x690   : > { %v3238_v12 = vpop.f32.mrf.mxu0  ;;  %v3279_v29 = vpop.f32.mrf.mxu1 }
 0x691   : > { %v6832_v14 = vmul.f32 -1.442695, %v3365_v54  ;;  %7213 = vpow2.f32 %v6831_v13  ;;  %v6834_v50 = vmul.f32 -1.442695, %v3367_v30  ;;  %v12854_v54 = vld [vmem:[#allocation213_spill] sm:$0xff] }
 0x692   : > { %v3239_v46 = vpop.f32.mrf.mxu0  ;;  %v3280_v53 = vpop.f32.mrf.mxu1  ;;  %7215 = vpow2.f32 %v6833_v42 }
 0x693   : > { %7217 = vpow2.f32 %v6832_v14 }
 0x694   : > { %7219 = vpow2.f32 %v6834_v50  ;;  %v12855_v50 = vld [vmem:[#allocation214_spill] sm:$0xff] }
 0x69e   : > { %v7214_v12 = vpop.eup %7213 }
 0x69f   : > { %v7216_v29 = vpop.eup %7215  ;;  %v3378_v53 = vadd.f32 1.0, %v7214_v12 }
 0x6a0   : > { %v7218_v46 = vpop.eup %7217  ;;  %v3390_v27 = vadd.f32 1.0, %v7216_v29 }
 0x6a1   : > { %v7220_v44 = vpop.eup %7219  ;;  %v3379_v21 = vadd.f32 1.0, %v7218_v46  ;;  %7221 = vrcp.f32 %v3378_v53 }
 0x6a2   : > { %v3391_v59 = vadd.f32 1.0, %v7220_v44  ;;  %7223 = vrcp.f32 %v3390_v27 }
 0x6a3   : > { %7225 = vrcp.f32 %v3379_v21 }
 0x6ae   : > { %v7222_v27 = vpop.eup %7221 }
 0x6cc   : > { %v3316_v26 = vpop.f32.mrf.mxu0  ;;  %v3357_v1 = vpop.f32.mrf.mxu1 }
 0x6cd   : > { %v3368_v39 = vadd.f32 %v3316_v26, %v12853_v35  ;;  %v3370_v13 = vadd.f32 %v3357_v1, %v12854_v54  ;;  %v7224_v26 = vpop.eup %7223 }
 0x6ce   : > { %v3318_v30 = vpop.f32.mrf.mxu0  ;;  %v3359_v14 = vpop.f32.mrf.mxu1 }
 0x6cf   : > { %7227 = vtanh.f32 %v3368_v39  ;;  %v6835_v42 = vmul.f32 -1.442695, %v3370_v13  ;;  %v3369_v3 = vadd.f32 %v3318_v30, %v12855_v50  ;;  %v3371_v28 = vadd.f32 %v3359_v14, %v12856_v22  ;;  %v7226_v21 = vpop.eup %7225 }
 0x6d0   : > { %7229 = vrcp.f32 %v3391_v59  ;;  %v3320_v12 = vpop.f32.mrf.mxu0  ;;  %v3361_v29 = vpop.f32.mrf.mxu1  ;;  %v3410_v39 = vmul.f32 %v7224_v26, %v9887_v49 }
 0x6d1   : > { %7231 = vpow2.f32 %v6835_v42  ;;  %v6836_v44 = vmul.f32 -1.442695, %v3371_v28 }
 0x6d2   : > { %7233 = vtanh.f32 %v3369_v3  ;;  %v3321_v46 = vpop.f32.mrf.mxu0  ;;  %v3362_v53 = vpop.f32.mrf.mxu1 }
 0x6d3   : > { %7235 = vpow2.f32 %v6836_v44 }
 0x6dc   : > { %v7228_v1 = vpop.eup %7227 }
 0x6dd   : > { %v7230_v35 = vpop.eup %7229  ;;  %v3412_v54 = vmul.f32 %v7228_v1, %v7222_v27  ;;  %v12859_v1 = vld [vmem:[#allocation115_spill] sm:$0xff] }
 0x6de   : > { %v7232_v13 = vpop.eup %7231  ;;  %v3411_v42 = vmul.f32 %v7230_v35, %v9891_v36  ;;  %v12857_v36 = vld [vmem:[#allocation113_spill] sm:$0xff]  ;;  %v12860_v35 = vld [vmem:[#allocation116_spill] sm:$0xff] }
 0x6df   : > { %v7234_v30 = vpop.eup %7233  ;;  %v10037_v14 = vadd.f32 %v3412_v54, %v3410_v39  ;;  %v3404_v59 = vadd.f32 1.0, %v7232_v13  ;;  %v12861_v39 = vld [vmem:[#allocation117_spill] sm:$0xff]  ;;  %v12862_v54 = vld [vmem:[#allocation118_spill] sm:$0xff]  ;;  %v12863_v13 = vld [vmem:[#allocation119_spill] sm:$0xff] }
 0x6e0   : > { %v7236_v50 = vpop.eup %7235  ;;  %v3413_v3 = vmul.f32 %v7234_v30, %v7226_v21  ;;  %v12858_v21 = vld [vmem:[#allocation114_spill] sm:$0xff]  ;;  %v12864_v30 = vld [vmem:[#allocation120_spill] sm:$0xff] }
 0x6e1   : > { %7237 = vtanh.f32 %v10037_v14  ;;  %v3405_v22 = vadd.f32 1.0, %v7236_v50  ;;  %v12866_v50 = vld [vmem:[#allocation122_spill] sm:$0xff] }
 0x6e2   : > { %7239 = vrcp.f32 %v3404_v59  ;;  %v10041_v28 = vadd.f32 %v3413_v3, %v3411_v42  ;;  %v12865_v59 = vld [vmem:[#allocation121_spill] sm:$0xff]  ;;  %v12867_v42 = vld [vmem:[#allocation123_spill] sm:$0xff]  ;;  %v12868_v3 = vld [vmem:[#allocation124_spill] sm:$0xff] }
 0x6e3   : > { %7241 = vrcp.f32 %v3405_v22  ;;  %v12869_v22 = vld [vmem:[#allocation125_spill] sm:$0xff] }
 0x6e4   : > { %7243 = vtanh.f32 %v10041_v28 }
 0x6ee   : > { %v7238_v49 = vpop.eup %7237 }
 0x6ef   : > { %v7240_v12 = vpop.eup %7239 }
 0x6f0   : > { %v7242_v29 = vpop.eup %7241  ;;  %v3418_v46 = vmul.f32 %v7240_v12, %v7238_v49  ;;  %v12870_v49 = vld [vmem:[#allocation126_spill] sm:$0xff]  ;;  %v12871_v12 = vld [vmem:[#allocation127_spill] sm:$0xff] }
 0x6f1   : > { %v7244_v44 = vpop.eup %7243 }
 0x6f2   : > { %v3419_v53 = vmul.f32 %v7244_v44, %v7242_v29  ;;  %v10044_v26 = vpack.c.bf16 %v3418_v46, %v3418_v46  ;;  %v12872_v29 = vld [vmem:[#allocation128_spill] sm:$0xff]  ;;  %v12873_v44 = vld [vmem:[#allocation129_spill] sm:$0xff]  ;;  %v12874_v46 = vld [vmem:[#allocation130_spill] sm:$0xff] }
 0x6f4   : > { %v3432_v27 = vpack.c.bf16 %v3419_v53, %v3419_v53  ;;  %v12875_v53 = vld [vmem:[#allocation131_spill] sm:$0xff] }
 0x6f6   : > { %3465 = vmatprep.mubr.bf16.mxu0 %v3432_v27  ;;  %3506 = vmatprep.mubr.bf16.mxu1 %v3432_v27 }
 0x6f7   : > { %3466 = vmatmul.mubr.bf16.vlgmr.msra.gmra.mxu0 %v10044_v26  ;;  %3507 = vmatmul.mubr.bf16.vlgmr.msra.gmra.mxu1 %v10044_v26 }
 0x6f8   : > { %3516 = vmatpush1.bf16.msra.mxu0 %v12462_v11  ;;  %3557 = vmatpush1.bf16.msra.mxu1 %v12463_v63 }
 0x6f9   : > { %3547 = vmatprep.mubr.bf16.mxu0 %v3432_v27  ;;  %3588 = vmatprep.mubr.bf16.mxu1 %v3432_v27  ;;  %v12876_v27 = vld [vmem:[#allocation132_spill] sm:$0xff] }
 0x6fa   : > { %3517 = vmatprep.subr.bf16.mxu0 %v12464_v60  ;;  %3558 = vmatprep.subr.bf16.mxu1 %v12465_v10 }
 0x6fc   : > { %3518 = vmatpush1.bf16.msra.mxu0 %v12466_v15  ;;  %3559 = vmatpush1.bf16.msra.mxu1 %v12467_v61 }
 0x6fd   : > { %3519 = vmatprep.subr.bf16.mxu0 %v12468_v52  ;;  %3560 = vmatprep.subr.bf16.mxu1 %v12469_v0 }
 0x700   : > { %3520 = vmatpush1.bf16.msra.mxu0 %v12470_v38  ;;  %3561 = vmatpush1.bf16.msra.mxu1 %v12471_v45 }
 0x701   : > { %3521 = vmatprep.subr.bf16.mxu0 %v12472_v51  ;;  %3562 = vmatprep.subr.bf16.mxu1 %v12473_v16 }
 0x704   : > { %3522 = vmatpush1.bf16.msra.mxu0 %v12564_v62  ;;  %3563 = vmatpush1.bf16.msra.mxu1 %v12565_v23 }
 0x705   : > { %3523 = vmatprep.subr.bf16.mxu0 %v12566_v34  ;;  %3564 = vmatprep.subr.bf16.mxu1 %v12567_v57 }
 0x708   : > { %3524 = vmatpush1.bf16.msra.mxu0 %v12568_v4  ;;  %3565 = vmatpush1.bf16.msra.mxu1 %v12569_v24 }
 0x709   : > { %3525 = vmatprep.subr.bf16.mxu0 %v12570_v37  ;;  %3566 = vmatprep.subr.bf16.mxu1 %v12571_v33 }
 0x70c   : > { %3526 = vmatpush1.bf16.msra.mxu0 %v12572_v40  ;;  %3567 = vmatpush1.bf16.msra.mxu1 %v12573_v19 }
 0x70d   : > { %3527 = vmatprep.subr.bf16.mxu0 %v12574_v47  ;;  %3568 = vmatprep.subr.bf16.mxu1 %v12661_v20 }
 0x710   : > { %3528 = vmatpush1.bf16.msra.mxu0 %v12662_v48  ;;  %3569 = vmatpush1.bf16.msra.mxu1 %v12663_v58 }
 0x711   : > { %3529 = vmatprep.subr.bf16.mxu0 %v12664_v7  ;;  %3570 = vmatprep.subr.bf16.mxu1 %v12665_v5 }
 0x714   : > { %3530 = vmatpush1.bf16.msra.mxu0 %v12666_v6  ;;  %3571 = vmatpush1.bf16.msra.mxu1 %v12667_v25 }
 0x715   : > { %3531 = vmatprep.subr.bf16.mxu0 %v12668_v8  ;;  %3572 = vmatprep.subr.bf16.mxu1 %v12583_v9 }
 0x718   : > { %3532 = vmatpush2.bf16.msra.mxu0 %v12584_v32  ;;  %3573 = vmatpush2.bf16.msra.mxu1 %v12585_v2 }
 0x719   : > { %3533 = vmatprep.subr.bf16.mxu0 %v12586_v43  ;;  %3574 = vmatprep.subr.bf16.mxu1 %v12587_v18 }
 0x71c   : > { %3534 = vmatpush2.bf16.msra.mxu0 %v12588_v56  ;;  %3575 = vmatpush2.bf16.msra.mxu1 %v12589_v55 }
 0x71d   : > { %3535 = vmatprep.subr.bf16.mxu0 %v12669_v17  ;;  %3576 = vmatprep.subr.bf16.mxu1 %v12760_v41 }
 0x720   : > { %3536 = vmatpush2.bf16.msra.mxu0 %v12761_v31  ;;  %3577 = vmatpush2.bf16.msra.mxu1 %v12857_v36 }
 0x721   : > { %3537 = vmatprep.subr.bf16.mxu0 %v12858_v21  ;;  %3578 = vmatprep.subr.bf16.mxu1 %v12859_v1  ;;  %v12949_v1 = vld [vmem:[#allocation157_spill] sm:$0xff] }
 0x724   : > { %3538 = vmatpush2.bf16.msra.mxu0 %v12860_v35  ;;  %3579 = vmatpush2.bf16.msra.mxu1 %v12861_v39 }
 0x725   : > { %3539 = vmatprep.subr.bf16.mxu0 %v12862_v54  ;;  %3580 = vmatprep.subr.bf16.mxu1 %v12863_v13  ;;  %v12944_v13 = vld [vmem:[#allocation141_spill] sm:$0xff] }
 0x728   : > { %3540 = vmatpush2.bf16.msra.mxu0 %v12864_v30  ;;  %3581 = vmatpush2.bf16.msra.mxu1 %v12865_v59 }
 0x729   : > { %3541 = vmatprep.subr.bf16.mxu0 %v12866_v50  ;;  %3582 = vmatprep.subr.bf16.mxu1 %v12867_v42  ;;  %v12877_v50 = vld [vmem:[#allocation133_spill] sm:$0xff]  ;;  %v12878_v42 = vld [vmem:[#allocation6_spill] sm:$0xff] }
 0x72c   : > { %3542 = vmatpush2.bf16.msra.mxu0 %v12868_v3  ;;  %3583 = vmatpush2.bf16.msra.mxu1 %v12869_v22  ;;  %v12879_v3 = vld [vmem:[#allocation7_spill] sm:$0xff] }
 0x72d   : > { %3543 = vmatprep.subr.bf16.mxu0 %v12870_v49  ;;  %3584 = vmatprep.subr.bf16.mxu1 %v12871_v12  ;;  %v12880_v12 = vld [vmem:[#allocation8_spill] sm:$0xff]  ;;  %v12889_v49 = vld [vmem:[#allocation17_spill] sm:$0xff] }
 0x730   : > { %3544 = vmatpush2.bf16.msra.mxu0 %v12872_v29  ;;  %3585 = vmatpush2.bf16.msra.mxu1 %v12873_v44  ;;  %v12881_v29 = vld [vmem:[#allocation9_spill] sm:$0xff]  ;;  %v12882_v44 = vld [vmem:[#allocation10_spill] sm:$0xff] }
 0x731   : > { %3545 = vmatprep.subr.bf16.mxu0 %v12874_v46  ;;  %3586 = vmatprep.subr.bf16.mxu1 %v12875_v53  ;;  %v12883_v46 = vld [vmem:[#allocation11_spill] sm:$0xff]  ;;  %v12884_v53 = vld [vmem:[#allocation12_spill] sm:$0xff] }
 0x734   : > { %3546 = vmatpush2.bf16.msra.mxu0 %v12876_v27  ;;  %3587 = vmatpush2.bf16.msra.mxu1 %v12877_v50  ;;  %v12885_v27 = vld [vmem:[#allocation13_spill] sm:$0xff]  ;;  %v12886_v50 = vld [vmem:[#allocation14_spill] sm:$0xff] }
 0x735   : > { %3666 = vmatprep.subr.bf16.mxu0 %v12878_v42  ;;  %3707 = vmatprep.subr.bf16.mxu1 %v12879_v3  ;;  %v12887_v42 = vld [vmem:[#allocation15_spill] sm:$0xff]  ;;  %v12888_v3 = vld [vmem:[#allocation16_spill] sm:$0xff] }
 0x737   : > { %3548 = vmatmul.mubr.bf16.vlgmr.msra.gmra.mxu0 %v10044_v26  ;;  %3589 = vmatmul.mubr.bf16.vlgmr.msra.gmra.mxu1 %v10044_v26  ;;  %v12890_v26 = vld [vmem:[#allocation18_spill] sm:$0xff] }
 0x738   : > { %3667 = vmatpush1.bf16.msra.mxu0 %v12880_v12  ;;  %3708 = vmatpush1.bf16.msra.mxu1 %v12881_v29  ;;  %v12891_v12 = vld [vmem:[#allocation19_spill] sm:$0xff]  ;;  %v12892_v29 = vld [vmem:[#allocation20_spill] sm:$0xff] }
 0x739   : > { %3668 = vmatprep.subr.bf16.mxu0 %v12882_v44  ;;  %3709 = vmatprep.subr.bf16.mxu1 %v12883_v46  ;;  %v12893_v44 = vld [vmem:[#allocation21_spill] sm:$0xff]  ;;  %v12894_v46 = vld [vmem:[#allocation22_spill] sm:$0xff] }
 0x73c   : > { %3669 = vmatpush1.bf16.msra.mxu0 %v12884_v53  ;;  %3710 = vmatpush1.bf16.msra.mxu1 %v12885_v27  ;;  %v12895_v53 = vld [vmem:[#allocation23_spill] sm:$0xff]  ;;  %v12896_v27 = vld [vmem:[#allocation24_spill] sm:$0xff] }
 0x73d   : > { %3670 = vmatprep.subr.bf16.mxu0 %v12886_v50  ;;  %3711 = vmatprep.subr.bf16.mxu1 %v12887_v42  ;;  %v12897_v50 = vld [vmem:[#allocation25_spill] sm:$0xff]  ;;  %v12898_v42 = vld [vmem:[#allocation26_spill] sm:$0xff] }
 0x740   : > { %3671 = vmatpush1.bf16.msra.mxu0 %v12888_v3  ;;  %3712 = vmatpush1.bf16.msra.mxu1 %v12889_v49  ;;  %v12899_v3 = vld [vmem:[#allocation27_spill] sm:$0xff]  ;;  %v12900_v49 = vld [vmem:[#allocation28_spill] sm:$0xff] }
 0x741   : > { %3672 = vmatprep.subr.bf16.mxu0 %v12890_v26  ;;  %3713 = vmatprep.subr.bf16.mxu1 %v12891_v12  ;;  %v12901_v26 = vld [vmem:[#allocation29_spill] sm:$0xff]  ;;  %v12902_v12 = vld [vmem:[#allocation30_spill] sm:$0xff] }
 0x744   : > { %3673 = vmatpush1.bf16.msra.mxu0 %v12892_v29  ;;  %3714 = vmatpush1.bf16.msra.mxu1 %v12893_v44  ;;  %v12903_v29 = vld [vmem:[#allocation31_spill] sm:$0xff]  ;;  %v12904_v44 = vld [vmem:[#allocation32_spill] sm:$0xff] }
 0x745   : > { %3674 = vmatprep.subr.bf16.mxu0 %v12894_v46  ;;  %3715 = vmatprep.subr.bf16.mxu1 %v12895_v53  ;;  %v12905_v46 = vld [vmem:[#allocation33_spill] sm:$0xff]  ;;  %v12906_v53 = vld [vmem:[#allocation34_spill] sm:$0xff] }
 0x748   : > { %3675 = vmatpush1.bf16.msra.mxu0 %v12896_v27  ;;  %3716 = vmatpush1.bf16.msra.mxu1 %v12897_v50  ;;  %v12907_v27 = vld [vmem:[#allocation35_spill] sm:$0xff]  ;;  %v12908_v50 = vld [vmem:[#allocation36_spill] sm:$0xff] }
 0x749   : > { %3676 = vmatprep.subr.bf16.mxu0 %v12898_v42  ;;  %3717 = vmatprep.subr.bf16.mxu1 %v12899_v3  ;;  %v12909_v42 = vld [vmem:[#allocation37_spill] sm:$0xff]  ;;  %v12910_v3 = vld [vmem:[#allocation38_spill] sm:$0xff] }
 0x74c   : > { %3677 = vmatpush1.bf16.msra.mxu0 %v12900_v49  ;;  %3718 = vmatpush1.bf16.msra.mxu1 %v12901_v26  ;;  %v12911_v49 = vld [vmem:[#allocation39_spill] sm:$0xff]  ;;  %v12912_v26 = vld [vmem:[#allocation40_spill] sm:$0xff] }
 0x74d   : > { %3678 = vmatprep.subr.bf16.mxu0 %v12902_v12  ;;  %3719 = vmatprep.subr.bf16.mxu1 %v12903_v29  ;;  %v12913_v12 = vld [vmem:[#allocation41_spill] sm:$0xff]  ;;  %v12914_v29 = vld [vmem:[#allocation42_spill] sm:$0xff] }
 0x750   : > { %3679 = vmatpush1.bf16.msra.mxu0 %v12904_v44  ;;  %3720 = vmatpush1.bf16.msra.mxu1 %v12905_v46  ;;  %v12915_v44 = vld [vmem:[#allocation43_spill] sm:$0xff]  ;;  %v12916_v46 = vld [vmem:[#allocation44_spill] sm:$0xff] }
 0x751   : > { %3680 = vmatprep.subr.bf16.mxu0 %v12906_v53  ;;  %3721 = vmatprep.subr.bf16.mxu1 %v12907_v27  ;;  %v12917_v53 = vld [vmem:[#allocation45_spill] sm:$0xff]  ;;  %v12918_v27 = vld [vmem:[#allocation46_spill] sm:$0xff] }
 0x754   : > { %3681 = vmatpush1.bf16.msra.mxu0 %v12908_v50  ;;  %3722 = vmatpush1.bf16.msra.mxu1 %v12909_v42  ;;  %v12919_v50 = vld [vmem:[#allocation47_spill] sm:$0xff]  ;;  %v12920_v42 = vld [vmem:[#allocation48_spill] sm:$0xff] }
 0x755   : > { %3682 = vmatprep.subr.bf16.mxu0 %v12910_v3  ;;  %3723 = vmatprep.subr.bf16.mxu1 %v12911_v49  ;;  %v12921_v3 = vld [vmem:[#allocation49_spill] sm:$0xff]  ;;  %v12922_v49 = vld [vmem:[#allocation50_spill] sm:$0xff] }
 0x758   : > { %3683 = vmatpush2.bf16.msra.mxu0 %v12912_v26  ;;  %3724 = vmatpush2.bf16.msra.mxu1 %v12913_v12  ;;  %v12923_v26 = vld [vmem:[#allocation51_spill] sm:$0xff]  ;;  %v12924_v12 = vld [vmem:[#allocation52_spill] sm:$0xff] }
 0x759   : > { %3684 = vmatprep.subr.bf16.mxu0 %v12914_v29  ;;  %3725 = vmatprep.subr.bf16.mxu1 %v12915_v44  ;;  %v12925_v29 = vld [vmem:[#allocation53_spill] sm:$0xff]  ;;  %v12926_v44 = vld [vmem:[#allocation54_spill] sm:$0xff] }
 0x75c   : > { %3685 = vmatpush2.bf16.msra.mxu0 %v12916_v46  ;;  %3726 = vmatpush2.bf16.msra.mxu1 %v12917_v53  ;;  %v12927_v46 = vld [vmem:[#allocation55_spill] sm:$0xff]  ;;  %v12928_v53 = vld [vmem:[#allocation56_spill] sm:$0xff] }
 0x75d   : > { %3686 = vmatprep.subr.bf16.mxu0 %v12918_v27  ;;  %3727 = vmatprep.subr.bf16.mxu1 %v12919_v50  ;;  %v12929_v27 = vld [vmem:[#allocation57_spill] sm:$0xff]  ;;  %v12930_v50 = vld [vmem:[#allocation58_spill] sm:$0xff] }
 0x760   : > { %3687 = vmatpush2.bf16.msra.mxu0 %v12920_v42  ;;  %3728 = vmatpush2.bf16.msra.mxu1 %v12921_v3  ;;  %v12931_v42 = vld [vmem:[#allocation59_spill] sm:$0xff]  ;;  %v12932_v3 = vld [vmem:[#allocation60_spill] sm:$0xff] }
 0x761   : > { %3688 = vmatprep.subr.bf16.mxu0 %v12922_v49  ;;  %3729 = vmatprep.subr.bf16.mxu1 %v12923_v26  ;;  %v12933_v49 = vld [vmem:[#allocation61_spill] sm:$0xff]  ;;  %v12934_v26 = vld [vmem:[#allocation62_spill] sm:$0xff] }
 0x764   : > { %3689 = vmatpush2.bf16.msra.mxu0 %v12924_v12  ;;  %3730 = vmatpush2.bf16.msra.mxu1 %v12925_v29  ;;  %v12935_v12 = vld [vmem:[#allocation63_spill] sm:$0xff]  ;;  %v12936_v29 = vld [vmem:[#allocation64_spill] sm:$0xff] }
 0x765   : > { %3690 = vmatprep.subr.bf16.mxu0 %v12926_v44  ;;  %3731 = vmatprep.subr.bf16.mxu1 %v12927_v46  ;;  %v12937_v44 = vld [vmem:[#allocation65_spill] sm:$0xff]  ;;  %v12938_v46 = vld [vmem:[#allocation66_spill] sm:$0xff] }
 0x768   : > { %3691 = vmatpush2.bf16.msra.mxu0 %v12928_v53  ;;  %3732 = vmatpush2.bf16.msra.mxu1 %v12929_v27  ;;  %v12939_v53 = vld [vmem:[#allocation67_spill] sm:$0xff]  ;;  %v12940_v27 = vld [vmem:[#allocation68_spill] sm:$0xff] }
 0x769   : > { %3692 = vmatprep.subr.bf16.mxu0 %v12930_v50  ;;  %3733 = vmatprep.subr.bf16.mxu1 %v12931_v42  ;;  %v12941_v50 = vld [vmem:[#allocation69_spill] sm:$0xff]  ;;  %v12942_v42 = vld [vmem:[#allocation70_spill] sm:$0xff] }
 0x76c   : > { %3693 = vmatpush2.bf16.msra.mxu0 %v12932_v3  ;;  %3734 = vmatpush2.bf16.msra.mxu1 %v12933_v49  ;;  %v12943_v3 = vld [vmem:[#allocation71_spill] sm:$0xff] }
 0x76d   : > { %3694 = vmatprep.subr.bf16.mxu0 %v12934_v26  ;;  %3735 = vmatprep.subr.bf16.mxu1 %v12935_v12 }
 0x770   : > { %3695 = vmatpush2.bf16.msra.mxu0 %v12936_v29  ;;  %3736 = vmatpush2.bf16.msra.mxu1 %v12937_v44 }
 0x771   : > { %3696 = vmatprep.subr.bf16.mxu0 %v12938_v46  ;;  %3737 = vmatprep.subr.bf16.mxu1 %v12939_v53  ;;  %v12945_v46 = vld [vmem:[#allocation156_spill] sm:$0xff]  ;;  %v12946_v53 = vld [vmem:[#allocation154_spill] sm:$0xff] }
 0x772   : > { %v970_v54 = vadd.f32 %v12945_v46, %v12944_v13  ;;  %v12951_v13 = vld [vmem:[#allocation218_spill] sm:$0xff] }
 0x774   : > { %3697 = vmatpush2.bf16.msra.mxu0 %v12940_v27  ;;  %3738 = vmatpush2.bf16.msra.mxu1 %v12941_v50  ;;  %v12947_v27 = vld [vmem:[#allocation155_spill] sm:$0xff] }
 0x775   : > { %3748 = vmatprep.subr.bf16.mxu0 %v12942_v42  ;;  %3789 = vmatprep.subr.bf16.mxu1 %v12943_v3  ;;  %v12948_v50 = vld [vmem:[#allocation135_spill] sm:$0xff] }
 0x776   : > { %v1083_v42 = vadd.f32 %v12949_v1, %v12948_v50  ;;  %v12977_v50 = vld [vmem:[#allocation132_spill] sm:$0xff] }
 0x7b7   : > { %v3467_v49 = vpop.f32.mrf.mxu0  ;;  %v3508_v26 = vpop.f32.mrf.mxu1 }
 0x7b8   : > { %v3597_v39 = vadd.f32 %v3467_v49, %v12946_v53  ;;  %v3599_v35 = vadd.f32 %v3508_v26, %v12947_v27  ;;  %v12950_v26 = vld [vmem:[#allocation198_spill] sm:$0xff] }
 0x7b9   : > { %v3469_v22 = vpop.f32.mrf.mxu0  ;;  %v3510_v12 = vpop.f32.mrf.mxu1  ;;  %v1196_v1 = vadd.f32 %v12951_v13, %v12950_v26 }
 0x7ba   : > { %v3598_v21 = vadd.f32 %v3469_v22, %v970_v54  ;;  %v6837_v3 = vmul.f32 -1.442695, %v3597_v39  ;;  %v3600_v36 = vadd.f32 %v3510_v12, %v1083_v42  ;;  %v6839_v31 = vmul.f32 -1.442695, %v3599_v35  ;;  %v12953_v42 = vld [vmem:[#allocation219_spill] sm:$0xff] }
 0x7bb   : > { %v3471_v59 = vpop.f32.mrf.mxu0  ;;  %v3512_v29 = vpop.f32.mrf.mxu1 }
 0x7bc   : > { %v6838_v41 = vmul.f32 -1.442695, %v3598_v21  ;;  %7245 = vpow2.f32 %v6837_v3  ;;  %v6840_v59 = vmul.f32 -1.442695, %v3600_v36  ;;  %v12952_v21 = vld [vmem:[#allocation199_spill] sm:$0xff]  ;;  %v12955_v3 = vld [vmem:[#allocation217_spill] sm:$0xff] }
 0x7bd   : > { %v3472_v30 = vpop.f32.mrf.mxu0  ;;  %v3513_v44 = vpop.f32.mrf.mxu1  ;;  %7247 = vpow2.f32 %v6839_v31  ;;  %v1309_v36 = vadd.f32 %v12953_v42, %v12952_v21  ;;  %v12976_v21 = vld [vmem:[#allocation131_spill] sm:$0xff] }
 0x7be   : > { %7249 = vpow2.f32 %v6838_v41  ;;  %v12954_v41 = vld [vmem:[#allocation216_spill] sm:$0xff] }
 0x7bf   : > { %7251 = vpow2.f32 %v6840_v59 }
 0x7c9   : > { %v7246_v30 = vpop.eup %7245 }
 0x7ca   : > { %v7248_v29 = vpop.eup %7247  ;;  %v3611_v46 = vadd.f32 1.0, %v7246_v30 }
 0x7cb   : > { %v7250_v44 = vpop.eup %7249  ;;  %v3623_v53 = vadd.f32 1.0, %v7248_v29 }
 0x7cc   : > { %v7252_v49 = vpop.eup %7251  ;;  %v3612_v27 = vadd.f32 1.0, %v7250_v44  ;;  %7253 = vrcp.f32 %v3611_v46 }
 0x7cd   : > { %v3624_v39 = vadd.f32 1.0, %v7252_v49  ;;  %7255 = vrcp.f32 %v3623_v53 }
 0x7ce   : > { %7257 = vrcp.f32 %v3612_v27 }
 0x7d9   : > { %v7254_v53 = vpop.eup %7253 }
 0x7f7   : > { %v3549_v54 = vpop.f32.mrf.mxu0  ;;  %v3590_v35 = vpop.f32.mrf.mxu1 }
 0x7f8   : > { %v3601_v31 = vadd.f32 %v3549_v54, %v12954_v41  ;;  %v3603_v22 = vadd.f32 %v3590_v35, %v12955_v3  ;;  %v7256_v54 = vpop.eup %7255 }
 0x7f9   : > { %v3551_v12 = vpop.f32.mrf.mxu0  ;;  %v3592_v59 = vpop.f32.mrf.mxu1  ;;  %v3643_v3 = vmul.f32 %v7256_v54, %v10037_v14 }
 0x7fa   : > { %7259 = vtanh.f32 %v3601_v31  ;;  %v6841_v30 = vmul.f32 -1.442695, %v3603_v22  ;;  %v3602_v29 = vadd.f32 %v3551_v12, %v1196_v1  ;;  %v3604_v44 = vadd.f32 %v3592_v59, %v1309_v36  ;;  %v7258_v41 = vpop.eup %7257 }
 0x7fb   : > { %7261 = vrcp.f32 %v3624_v39  ;;  %v3553_v13 = vpop.f32.mrf.mxu0  ;;  %v3594_v46 = vpop.f32.mrf.mxu1 }
 0x7fc   : > { %7263 = vpow2.f32 %v6841_v30  ;;  %v6842_v49 = vmul.f32 -1.442695, %v3604_v44 }
 0x7fd   : > { %7265 = vtanh.f32 %v3602_v29  ;;  %v3554_v26 = vpop.f32.mrf.mxu0  ;;  %v3595_v42 = vpop.f32.mrf.mxu1 }
 0x7fe   : > { %7267 = vpow2.f32 %v6842_v49 }
 0x807   : > { %v7260_v35 = vpop.eup %7259 }
 0x808   : > { %v7262_v27 = vpop.eup %7261  ;;  %v3645_v31 = vmul.f32 %v7260_v35, %v7254_v53  ;;  %v12958_v35 = vld [vmem:[#allocation113_spill] sm:$0xff] }
 0x809   : > { %v7264_v22 = vpop.eup %7263  ;;  %v3644_v59 = vmul.f32 %v7262_v27, %v10041_v28  ;;  %v12956_v28 = vld [vmem:[#allocation111_spill] sm:$0xff]  ;;  %v12959_v27 = vld [vmem:[#allocation114_spill] sm:$0xff] }
 0x80a   : > { %v7266_v1 = vpop.eup %7265  ;;  %v10191_v36 = vadd.f32 %v3645_v31, %v3643_v3  ;;  %v3637_v39 = vadd.f32 1.0, %v7264_v22  ;;  %v12960_v3 = vld [vmem:[#allocation115_spill] sm:$0xff]  ;;  %v12961_v31 = vld [vmem:[#allocation116_spill] sm:$0xff]  ;;  %v12962_v22 = vld [vmem:[#allocation117_spill] sm:$0xff] }
 0x80b   : > { %v7268_v12 = vpop.eup %7267  ;;  %v3646_v30 = vmul.f32 %v7266_v1, %v7258_v41  ;;  %v12957_v41 = vld [vmem:[#allocation112_spill] sm:$0xff]  ;;  %v12963_v1 = vld [vmem:[#allocation118_spill] sm:$0xff] }
 0x80c   : > { %7269 = vtanh.f32 %v10191_v36  ;;  %v3638_v26 = vadd.f32 1.0, %v7268_v12  ;;  %v12965_v12 = vld [vmem:[#allocation120_spill] sm:$0xff] }
 0x80d   : > { %7271 = vrcp.f32 %v3637_v39  ;;  %v10195_v29 = vadd.f32 %v3646_v30, %v3644_v59  ;;  %v12964_v39 = vld [vmem:[#allocation119_spill] sm:$0xff]  ;;  %v12966_v59 = vld [vmem:[#allocation121_spill] sm:$0xff]  ;;  %v12967_v30 = vld [vmem:[#allocation122_spill] sm:$0xff] }
 0x80e   : > { %7273 = vrcp.f32 %v3638_v26  ;;  %v12968_v26 = vld [vmem:[#allocation123_spill] sm:$0xff] }
 0x80f   : > { %7275 = vtanh.f32 %v10195_v29 }
 0x819   : > { %v7270_v14 = vpop.eup %7269 }
 0x81a   : > { %v7272_v44 = vpop.eup %7271 }
 0x81b   : > { %v7274_v13 = vpop.eup %7273  ;;  %v3651_v49 = vmul.f32 %v7272_v44, %v7270_v14  ;;  %v12969_v14 = vld [vmem:[#allocation124_spill] sm:$0xff]  ;;  %v12970_v44 = vld [vmem:[#allocation125_spill] sm:$0xff] }
 0x81c   : > { %v7276_v46 = vpop.eup %7275 }
 0x81d   : > { %v3652_v42 = vmul.f32 %v7276_v46, %v7274_v13  ;;  %v10198_v54 = vpack.c.bf16 %v3651_v49, %v3651_v49  ;;  %v12971_v13 = vld [vmem:[#allocation126_spill] sm:$0xff]  ;;  %v12972_v46 = vld [vmem:[#allocation127_spill] sm:$0xff]  ;;  %v12973_v49 = vld [vmem:[#allocation128_spill] sm:$0xff] }
 0x81f   : > { %v3665_v53 = vpack.c.bf16 %v3652_v42, %v3652_v42  ;;  %v12974_v42 = vld [vmem:[#allocation129_spill] sm:$0xff] }
 0x821   : > { %3698 = vmatprep.mubr.bf16.mxu0 %v3665_v53  ;;  %3739 = vmatprep.mubr.bf16.mxu1 %v3665_v53 }
 0x822   : > { %3699 = vmatmul.mubr.bf16.vlgmr.msra.gmra.mxu0 %v10198_v54  ;;  %3740 = vmatmul.mubr.bf16.vlgmr.msra.gmra.mxu1 %v10198_v54 }
 0x823   : > { %3749 = vmatpush1.bf16.msra.mxu0 %v12462_v11  ;;  %3790 = vmatpush1.bf16.msra.mxu1 %v12463_v63 }
 0x824   : > { %3780 = vmatprep.mubr.bf16.mxu0 %v3665_v53  ;;  %3821 = vmatprep.mubr.bf16.mxu1 %v3665_v53  ;;  %v12975_v53 = vld [vmem:[#allocation130_spill] sm:$0xff] }
 0x825   : > { %3750 = vmatprep.subr.bf16.mxu0 %v12464_v60  ;;  %3791 = vmatprep.subr.bf16.mxu1 %v12465_v10 }
 0x827   : > { %3751 = vmatpush1.bf16.msra.mxu0 %v12466_v15  ;;  %3792 = vmatpush1.bf16.msra.mxu1 %v12467_v61 }
 0x828   : > { %3752 = vmatprep.subr.bf16.mxu0 %v12468_v52  ;;  %3793 = vmatprep.subr.bf16.mxu1 %v12469_v0 }
 0x82b   : > { %3753 = vmatpush1.bf16.msra.mxu0 %v12470_v38  ;;  %3794 = vmatpush1.bf16.msra.mxu1 %v12471_v45 }
 0x82c   : > { %3754 = vmatprep.subr.bf16.mxu0 %v12472_v51  ;;  %3795 = vmatprep.subr.bf16.mxu1 %v12473_v16 }
 0x82f   : > { %3755 = vmatpush1.bf16.msra.mxu0 %v12564_v62  ;;  %3796 = vmatpush1.bf16.msra.mxu1 %v12565_v23 }
 0x830   : > { %3756 = vmatprep.subr.bf16.mxu0 %v12566_v34  ;;  %3797 = vmatprep.subr.bf16.mxu1 %v12567_v57 }
 0x833   : > { %3757 = vmatpush1.bf16.msra.mxu0 %v12568_v4  ;;  %3798 = vmatpush1.bf16.msra.mxu1 %v12569_v24 }
 0x834   : > { %3758 = vmatprep.subr.bf16.mxu0 %v12570_v37  ;;  %3799 = vmatprep.subr.bf16.mxu1 %v12571_v33 }
 0x837   : > { %3759 = vmatpush1.bf16.msra.mxu0 %v12572_v40  ;;  %3800 = vmatpush1.bf16.msra.mxu1 %v12573_v19 }
 0x838   : > { %3760 = vmatprep.subr.bf16.mxu0 %v12574_v47  ;;  %3801 = vmatprep.subr.bf16.mxu1 %v12661_v20 }
 0x83b   : > { %3761 = vmatpush1.bf16.msra.mxu0 %v12662_v48  ;;  %3802 = vmatpush1.bf16.msra.mxu1 %v12663_v58 }
 0x83c   : > { %3762 = vmatprep.subr.bf16.mxu0 %v12664_v7  ;;  %3803 = vmatprep.subr.bf16.mxu1 %v12665_v5 }
 0x83f   : > { %3763 = vmatpush1.bf16.msra.mxu0 %v12666_v6  ;;  %3804 = vmatpush1.bf16.msra.mxu1 %v12667_v25 }
 0x840   : > { %3764 = vmatprep.subr.bf16.mxu0 %v12668_v8  ;;  %3805 = vmatprep.subr.bf16.mxu1 %v12583_v9 }
 0x843   : > { %3765 = vmatpush2.bf16.msra.mxu0 %v12584_v32  ;;  %3806 = vmatpush2.bf16.msra.mxu1 %v12585_v2 }
 0x844   : > { %3766 = vmatprep.subr.bf16.mxu0 %v12586_v43  ;;  %3807 = vmatprep.subr.bf16.mxu1 %v12587_v18 }
 0x847   : > { %3767 = vmatpush2.bf16.msra.mxu0 %v12588_v56  ;;  %3808 = vmatpush2.bf16.msra.mxu1 %v12589_v55 }
 0x848   : > { %3768 = vmatprep.subr.bf16.mxu0 %v12669_v17  ;;  %3809 = vmatprep.subr.bf16.mxu1 %v12956_v28 }
 0x84b   : > { %3769 = vmatpush2.bf16.msra.mxu0 %v12957_v41  ;;  %3810 = vmatpush2.bf16.msra.mxu1 %v12958_v35 }
 0x84c   : > { %3770 = vmatprep.subr.bf16.mxu0 %v12959_v27  ;;  %3811 = vmatprep.subr.bf16.mxu1 %v12960_v3 }
 0x84f   : > { %3771 = vmatpush2.bf16.msra.mxu0 %v12961_v31  ;;  %3812 = vmatpush2.bf16.msra.mxu1 %v12962_v22  ;;  %v13047_v22 = vld [vmem:[#allocation160_spill] sm:$0xff] }
 0x850   : > { %3772 = vmatprep.subr.bf16.mxu0 %v12963_v1  ;;  %3813 = vmatprep.subr.bf16.mxu1 %v12964_v39  ;;  %v13045_v39 = vld [vmem:[#allocation158_spill] sm:$0xff]  ;;  %v13046_v1 = vld [vmem:[#allocation159_spill] sm:$0xff] }
 0x853   : > { %3773 = vmatpush2.bf16.msra.mxu0 %v12965_v12  ;;  %3814 = vmatpush2.bf16.msra.mxu1 %v12966_v59 }
 0x854   : > { %3774 = vmatprep.subr.bf16.mxu0 %v12967_v30  ;;  %3815 = vmatprep.subr.bf16.mxu1 %v12968_v26  ;;  %v12978_v30 = vld [vmem:[#allocation133_spill] sm:$0xff]  ;;  %v12979_v26 = vld [vmem:[#allocation6_spill] sm:$0xff] }
 0x857   : > { %3775 = vmatpush2.bf16.msra.mxu0 %v12969_v14  ;;  %3816 = vmatpush2.bf16.msra.mxu1 %v12970_v44  ;;  %v12980_v14 = vld [vmem:[#allocation7_spill] sm:$0xff] }
 0x858   : > { %3776 = vmatprep.subr.bf16.mxu0 %v12971_v13  ;;  %3817 = vmatprep.subr.bf16.mxu1 %v12972_v46  ;;  %v12981_v46 = vld [vmem:[#allocation8_spill] sm:$0xff]  ;;  %v12990_v13 = vld [vmem:[#allocation17_spill] sm:$0xff] }
 0x85b   : > { %3777 = vmatpush2.bf16.msra.mxu0 %v12973_v49  ;;  %3818 = vmatpush2.bf16.msra.mxu1 %v12974_v42  ;;  %v12982_v49 = vld [vmem:[#allocation9_spill] sm:$0xff]  ;;  %v12983_v42 = vld [vmem:[#allocation10_spill] sm:$0xff] }
 0x85c   : > { %3778 = vmatprep.subr.bf16.mxu0 %v12975_v53  ;;  %3819 = vmatprep.subr.bf16.mxu1 %v12976_v21  ;;  %v12984_v53 = vld [vmem:[#allocation11_spill] sm:$0xff]  ;;  %v12985_v21 = vld [vmem:[#allocation12_spill] sm:$0xff] }
 0x85f   : > { %3779 = vmatpush2.bf16.msra.mxu0 %v12977_v50  ;;  %3820 = vmatpush2.bf16.msra.mxu1 %v12978_v30  ;;  %v12986_v50 = vld [vmem:[#allocation13_spill] sm:$0xff]  ;;  %v12987_v30 = vld [vmem:[#allocation14_spill] sm:$0xff] }
 0x860   : > { %3899 = vmatprep.subr.bf16.mxu0 %v12979_v26  ;;  %3940 = vmatprep.subr.bf16.mxu1 %v12980_v14  ;;  %v12988_v26 = vld [vmem:[#allocation15_spill] sm:$0xff]  ;;  %v12989_v14 = vld [vmem:[#allocation16_spill] sm:$0xff] }
 0x862   : > { %3781 = vmatmul.mubr.bf16.vlgmr.msra.gmra.mxu0 %v10198_v54  ;;  %3822 = vmatmul.mubr.bf16.vlgmr.msra.gmra.mxu1 %v10198_v54  ;;  %v12991_v54 = vld [vmem:[#allocation18_spill] sm:$0xff] }
 0x863   : > { %3900 = vmatpush1.bf16.msra.mxu0 %v12981_v46  ;;  %3941 = vmatpush1.bf16.msra.mxu1 %v12982_v49  ;;  %v12992_v46 = vld [vmem:[#allocation19_spill] sm:$0xff]  ;;  %v12993_v49 = vld [vmem:[#allocation20_spill] sm:$0xff] }
 0x864   : > { %3901 = vmatprep.subr.bf16.mxu0 %v12983_v42  ;;  %3942 = vmatprep.subr.bf16.mxu1 %v12984_v53  ;;  %v12994_v42 = vld [vmem:[#allocation21_spill] sm:$0xff]  ;;  %v12995_v53 = vld [vmem:[#allocation22_spill] sm:$0xff] }
 0x867   : > { %3902 = vmatpush1.bf16.msra.mxu0 %v12985_v21  ;;  %3943 = vmatpush1.bf16.msra.mxu1 %v12986_v50  ;;  %v12996_v21 = vld [vmem:[#allocation23_spill] sm:$0xff]  ;;  %v12997_v50 = vld [vmem:[#allocation24_spill] sm:$0xff] }
 0x868   : > { %3903 = vmatprep.subr.bf16.mxu0 %v12987_v30  ;;  %3944 = vmatprep.subr.bf16.mxu1 %v12988_v26  ;;  %v12998_v30 = vld [vmem:[#allocation25_spill] sm:$0xff]  ;;  %v12999_v26 = vld [vmem:[#allocation26_spill] sm:$0xff] }
 0x86b   : > { %3904 = vmatpush1.bf16.msra.mxu0 %v12989_v14  ;;  %3945 = vmatpush1.bf16.msra.mxu1 %v12990_v13  ;;  %v13000_v14 = vld [vmem:[#allocation27_spill] sm:$0xff]  ;;  %v13001_v13 = vld [vmem:[#allocation28_spill] sm:$0xff] }
 0x86c   : > { %3905 = vmatprep.subr.bf16.mxu0 %v12991_v54  ;;  %3946 = vmatprep.subr.bf16.mxu1 %v12992_v46  ;;  %v13002_v54 = vld [vmem:[#allocation29_spill] sm:$0xff]  ;;  %v13003_v46 = vld [vmem:[#allocation30_spill] sm:$0xff] }
 0x86f   : > { %3906 = vmatpush1.bf16.msra.mxu0 %v12993_v49  ;;  %3947 = vmatpush1.bf16.msra.mxu1 %v12994_v42  ;;  %v13004_v49 = vld [vmem:[#allocation31_spill] sm:$0xff]  ;;  %v13005_v42 = vld [vmem:[#allocation32_spill] sm:$0xff] }
 0x870   : > { %3907 = vmatprep.subr.bf16.mxu0 %v12995_v53  ;;  %3948 = vmatprep.subr.bf16.mxu1 %v12996_v21  ;;  %v13006_v53 = vld [vmem:[#allocation33_spill] sm:$0xff]  ;;  %v13007_v21 = vld [vmem:[#allocation34_spill] sm:$0xff] }
 0x873   : > { %3908 = vmatpush1.bf16.msra.mxu0 %v12997_v50  ;;  %3949 = vmatpush1.bf16.msra.mxu1 %v12998_v30  ;;  %v13008_v50 = vld [vmem:[#allocation35_spill] sm:$0xff]  ;;  %v13009_v30 = vld [vmem:[#allocation36_spill] sm:$0xff] }
 0x874   : > { %3909 = vmatprep.subr.bf16.mxu0 %v12999_v26  ;;  %3950 = vmatprep.subr.bf16.mxu1 %v13000_v14  ;;  %v13010_v26 = vld [vmem:[#allocation37_spill] sm:$0xff]  ;;  %v13011_v14 = vld [vmem:[#allocation38_spill] sm:$0xff] }
 0x877   : > { %3910 = vmatpush1.bf16.msra.mxu0 %v13001_v13  ;;  %3951 = vmatpush1.bf16.msra.mxu1 %v13002_v54  ;;  %v13012_v13 = vld [vmem:[#allocation39_spill] sm:$0xff]  ;;  %v13013_v54 = vld [vmem:[#allocation40_spill] sm:$0xff] }
 0x878   : > { %3911 = vmatprep.subr.bf16.mxu0 %v13003_v46  ;;  %3952 = vmatprep.subr.bf16.mxu1 %v13004_v49  ;;  %v13014_v46 = vld [vmem:[#allocation41_spill] sm:$0xff]  ;;  %v13015_v49 = vld [vmem:[#allocation42_spill] sm:$0xff] }
 0x87b   : > { %3912 = vmatpush1.bf16.msra.mxu0 %v13005_v42  ;;  %3953 = vmatpush1.bf16.msra.mxu1 %v13006_v53  ;;  %v13016_v42 = vld [vmem:[#allocation43_spill] sm:$0xff]  ;;  %v13017_v53 = vld [vmem:[#allocation44_spill] sm:$0xff] }
 0x87c   : > { %3913 = vmatprep.subr.bf16.mxu0 %v13007_v21  ;;  %3954 = vmatprep.subr.bf16.mxu1 %v13008_v50  ;;  %v13018_v21 = vld [vmem:[#allocation45_spill] sm:$0xff]  ;;  %v13019_v50 = vld [vmem:[#allocation46_spill] sm:$0xff] }
 0x87f   : > { %3914 = vmatpush1.bf16.msra.mxu0 %v13009_v30  ;;  %3955 = vmatpush1.bf16.msra.mxu1 %v13010_v26  ;;  %v13020_v30 = vld [vmem:[#allocation47_spill] sm:$0xff]  ;;  %v13021_v26 = vld [vmem:[#allocation48_spill] sm:$0xff] }
 0x880   : > { %3915 = vmatprep.subr.bf16.mxu0 %v13011_v14  ;;  %3956 = vmatprep.subr.bf16.mxu1 %v13012_v13  ;;  %v13022_v14 = vld [vmem:[#allocation49_spill] sm:$0xff]  ;;  %v13023_v13 = vld [vmem:[#allocation50_spill] sm:$0xff] }
 0x883   : > { %3916 = vmatpush2.bf16.msra.mxu0 %v13013_v54  ;;  %3957 = vmatpush2.bf16.msra.mxu1 %v13014_v46  ;;  %v13024_v54 = vld [vmem:[#allocation51_spill] sm:$0xff]  ;;  %v13025_v46 = vld [vmem:[#allocation52_spill] sm:$0xff] }
 0x884   : > { %3917 = vmatprep.subr.bf16.mxu0 %v13015_v49  ;;  %3958 = vmatprep.subr.bf16.mxu1 %v13016_v42  ;;  %v13026_v49 = vld [vmem:[#allocation53_spill] sm:$0xff]  ;;  %v13027_v42 = vld [vmem:[#allocation54_spill] sm:$0xff] }
 0x887   : > { %3918 = vmatpush2.bf16.msra.mxu0 %v13017_v53  ;;  %3959 = vmatpush2.bf16.msra.mxu1 %v13018_v21  ;;  %v13028_v53 = vld [vmem:[#allocation55_spill] sm:$0xff]  ;;  %v13029_v21 = vld [vmem:[#allocation56_spill] sm:$0xff] }
 0x888   : > { %3919 = vmatprep.subr.bf16.mxu0 %v13019_v50  ;;  %3960 = vmatprep.subr.bf16.mxu1 %v13020_v30  ;;  %v13030_v50 = vld [vmem:[#allocation57_spill] sm:$0xff]  ;;  %v13031_v30 = vld [vmem:[#allocation58_spill] sm:$0xff] }
 0x88b   : > { %3920 = vmatpush2.bf16.msra.mxu0 %v13021_v26  ;;  %3961 = vmatpush2.bf16.msra.mxu1 %v13022_v14  ;;  %v13032_v26 = vld [vmem:[#allocation59_spill] sm:$0xff]  ;;  %v13033_v14 = vld [vmem:[#allocation60_spill] sm:$0xff] }
 0x88c   : > { %3921 = vmatprep.subr.bf16.mxu0 %v13023_v13  ;;  %3962 = vmatprep.subr.bf16.mxu1 %v13024_v54  ;;  %v13034_v13 = vld [vmem:[#allocation61_spill] sm:$0xff]  ;;  %v13035_v54 = vld [vmem:[#allocation62_spill] sm:$0xff] }
 0x88f   : > { %3922 = vmatpush2.bf16.msra.mxu0 %v13025_v46  ;;  %3963 = vmatpush2.bf16.msra.mxu1 %v13026_v49  ;;  %v13036_v46 = vld [vmem:[#allocation63_spill] sm:$0xff]  ;;  %v13037_v49 = vld [vmem:[#allocation64_spill] sm:$0xff] }
 0x890   : > { %3923 = vmatprep.subr.bf16.mxu0 %v13027_v42  ;;  %3964 = vmatprep.subr.bf16.mxu1 %v13028_v53  ;;  %v13038_v42 = vld [vmem:[#allocation65_spill] sm:$0xff]  ;;  %v13039_v53 = vld [vmem:[#allocation66_spill] sm:$0xff] }
 0x893   : > { %3924 = vmatpush2.bf16.msra.mxu0 %v13029_v21  ;;  %3965 = vmatpush2.bf16.msra.mxu1 %v13030_v50  ;;  %v13040_v21 = vld [vmem:[#allocation67_spill] sm:$0xff]  ;;  %v13041_v50 = vld [vmem:[#allocation68_spill] sm:$0xff] }
 0x894   : > { %3925 = vmatprep.subr.bf16.mxu0 %v13031_v30  ;;  %3966 = vmatprep.subr.bf16.mxu1 %v13032_v26  ;;  %v13042_v30 = vld [vmem:[#allocation69_spill] sm:$0xff]  ;;  %v13043_v26 = vld [vmem:[#allocation70_spill] sm:$0xff] }
 0x897   : > { %3926 = vmatpush2.bf16.msra.mxu0 %v13033_v14  ;;  %3967 = vmatpush2.bf16.msra.mxu1 %v13034_v13  ;;  %v13044_v14 = vld [vmem:[#allocation71_spill] sm:$0xff] }
 0x898   : > { %3927 = vmatprep.subr.bf16.mxu0 %v13035_v54  ;;  %3968 = vmatprep.subr.bf16.mxu1 %v13036_v46 }
 0x89b   : > { %3928 = vmatpush2.bf16.msra.mxu0 %v13037_v49  ;;  %3969 = vmatpush2.bf16.msra.mxu1 %v13038_v42 }
 0x89c   : > { %3929 = vmatprep.subr.bf16.mxu0 %v13039_v53  ;;  %3970 = vmatprep.subr.bf16.mxu1 %v13040_v21 }
 0x89f   : > { %3930 = vmatpush2.bf16.msra.mxu0 %v13041_v50  ;;  %3971 = vmatpush2.bf16.msra.mxu1 %v13042_v30  ;;  %v13048_v30 = vld [vmem:[#allocation161_spill] sm:$0xff] }
 0x8a0   : > { %3981 = vmatprep.subr.bf16.mxu0 %v13043_v26  ;;  %4022 = vmatprep.subr.bf16.mxu1 %v13044_v14 }
 0x8e2   : > { %v3700_v13 = vpop.f32.mrf.mxu0  ;;  %v3741_v54 = vpop.f32.mrf.mxu1 }
 0x8e3   : > { %v3830_v53 = vadd.f32 %v3700_v13, %v13045_v39  ;;  %v3832_v21 = vadd.f32 %v3741_v54, %v13046_v1 }
 0x8e4   : > { %v3702_v44 = vpop.f32.mrf.mxu0  ;;  %v3743_v46 = vpop.f32.mrf.mxu1 }
 0x8e5   : > { %v3831_v50 = vadd.f32 %v3702_v44, %v13047_v22  ;;  %v6843_v31 = vmul.f32 -1.442695, %v3830_v53  ;;  %v3833_v3 = vadd.f32 %v3743_v46, %v13048_v30  ;;  %v6845_v26 = vmul.f32 -1.442695, %v3832_v21  ;;  %v13049_v30 = vld [vmem:[#allocation220_spill] sm:$0xff]  ;;  %v13052_v53 = vld [vmem:[#allocation223_spill] sm:$0xff] }
 0x8e6   : > { %v3704_v59 = vpop.f32.mrf.mxu0  ;;  %v3745_v49 = vpop.f32.mrf.mxu1 }
 0x8e7   : > { %v6844_v27 = vmul.f32 -1.442695, %v3831_v50  ;;  %7277 = vpow2.f32 %v6843_v31  ;;  %v6846_v14 = vmul.f32 -1.442695, %v3833_v3  ;;  %v13050_v50 = vld [vmem:[#allocation221_spill] sm:$0xff] }
 0x8e8   : > { %v3705_v12 = vpop.f32.mrf.mxu0  ;;  %v3746_v42 = vpop.f32.mrf.mxu1  ;;  %7279 = vpow2.f32 %v6845_v26 }
 0x8e9   : > { %7281 = vpow2.f32 %v6844_v27 }
 0x8ea   : > { %7283 = vpow2.f32 %v6846_v14  ;;  %v13051_v14 = vld [vmem:[#allocation222_spill] sm:$0xff] }
 0x8f4   : > { %v7278_v59 = vpop.eup %7277 }
 0x8f5   : > { %v7280_v49 = vpop.eup %7279  ;;  %v3844_v42 = vadd.f32 1.0, %v7278_v59 }
 0x8f6   : > { %v7282_v12 = vpop.eup %7281  ;;  %v3856_v39 = vadd.f32 1.0, %v7280_v49 }
 0x8f7   : > { %v7284_v35 = vpop.eup %7283  ;;  %v3845_v13 = vadd.f32 1.0, %v7282_v12  ;;  %7285 = vrcp.f32 %v3844_v42 }
 0x8f8   : > { %v3857_v1 = vadd.f32 1.0, %v7284_v35  ;;  %7287 = vrcp.f32 %v3856_v39 }
 0x8f9   : > { %7289 = vrcp.f32 %v3845_v13 }
 0x904   : > { %v7286_v39 = vpop.eup %7285 }
 0x922   : > { %v3782_v22 = vpop.f32.mrf.mxu0  ;;  %v3823_v44 = vpop.f32.mrf.mxu1 }
 0x923   : > { %v3834_v21 = vadd.f32 %v3782_v22, %v13049_v30  ;;  %v3836_v31 = vadd.f32 %v3823_v44, %v13050_v50  ;;  %v7288_v22 = vpop.eup %7287 }
 0x924   : > { %v3784_v3 = vpop.f32.mrf.mxu0  ;;  %v3825_v27 = vpop.f32.mrf.mxu1 }
 0x925   : > { %7291 = vtanh.f32 %v3834_v21  ;;  %v6847_v26 = vmul.f32 -1.442695, %v3836_v31  ;;  %v3835_v46 = vadd.f32 %v3784_v3, %v13051_v14  ;;  %v3837_v54 = vadd.f32 %v3825_v27, %v13052_v53  ;;  %v7290_v13 = vpop.eup %7289 }
 0x926   : > { %7293 = vrcp.f32 %v3857_v1  ;;  %v3786_v59 = vpop.f32.mrf.mxu0  ;;  %v3827_v49 = vpop.f32.mrf.mxu1  ;;  %v3876_v21 = vmul.f32 %v7288_v22, %v10191_v36 }
 0x927   : > { %7295 = vpow2.f32 %v6847_v26  ;;  %v6848_v35 = vmul.f32 -1.442695, %v3837_v54 }
 0x928   : > { %7297 = vtanh.f32 %v3835_v46  ;;  %v3787_v12 = vpop.f32.mrf.mxu0  ;;  %v3828_v42 = vpop.f32.mrf.mxu1 }
 0x929   : > { %7299 = vpow2.f32 %v6848_v35 }
 0x932   : > { %v7292_v44 = vpop.eup %7291 }
 0x933   : > { %v7294_v30 = vpop.eup %7293  ;;  %v3878_v50 = vmul.f32 %v7292_v44, %v7286_v39  ;;  %v13055_v44 = vld [vmem:[#allocation115_spill] sm:$0xff] }
 0x934   : > { %v7296_v31 = vpop.eup %7295  ;;  %v3877_v26 = vmul.f32 %v7294_v30, %v10195_v29  ;;  %v13053_v29 = vld [vmem:[#allocation113_spill] sm:$0xff]  ;;  %v13056_v30 = vld [vmem:[#allocation116_spill] sm:$0xff] }
 0x935   : > { %v7298_v3 = vpop.eup %7297  ;;  %v10341_v27 = vadd.f32 %v3878_v50, %v3876_v21  ;;  %v3870_v1 = vadd.f32 1.0, %v7296_v31  ;;  %v13057_v21 = vld [vmem:[#allocation117_spill] sm:$0xff]  ;;  %v13058_v50 = vld [vmem:[#allocation118_spill] sm:$0xff]  ;;  %v13059_v31 = vld [vmem:[#allocation119_spill] sm:$0xff] }
 0x936   : > { %v7300_v14 = vpop.eup %7299  ;;  %v3879_v46 = vmul.f32 %v7298_v3, %v7290_v13  ;;  %v13054_v13 = vld [vmem:[#allocation114_spill] sm:$0xff]  ;;  %v13060_v3 = vld [vmem:[#allocation120_spill] sm:$0xff] }
 0x937   : > { %7301 = vtanh.f32 %v10341_v27  ;;  %v3871_v53 = vadd.f32 1.0, %v7300_v14  ;;  %v13062_v14 = vld [vmem:[#allocation122_spill] sm:$0xff] }
 0x938   : > { %7303 = vrcp.f32 %v3870_v1  ;;  %v10345_v54 = vadd.f32 %v3879_v46, %v3877_v26  ;;  %v13061_v1 = vld [vmem:[#allocation121_spill] sm:$0xff]  ;;  %v13063_v26 = vld [vmem:[#allocation123_spill] sm:$0xff]  ;;  %v13064_v46 = vld [vmem:[#allocation124_spill] sm:$0xff] }
 0x939   : > { %7305 = vrcp.f32 %v3871_v53  ;;  %v13065_v53 = vld [vmem:[#allocation125_spill] sm:$0xff] }
 0x93a   : > { %7307 = vtanh.f32 %v10345_v54 }
 0x944   : > { %v7302_v36 = vpop.eup %7301 }
 0x945   : > { %v7304_v59 = vpop.eup %7303 }
 0x946   : > { %v7306_v49 = vpop.eup %7305  ;;  %v3884_v12 = vmul.f32 %v7304_v59, %v7302_v36  ;;  %v13066_v36 = vld [vmem:[#allocation126_spill] sm:$0xff]  ;;  %v13067_v59 = vld [vmem:[#allocation127_spill] sm:$0xff] }
 0x947   : > { %v7308_v35 = vpop.eup %7307 }
 0x948   : > { %v3885_v42 = vmul.f32 %v7308_v35, %v7306_v49  ;;  %v10348_v22 = vpack.c.bf16 %v3884_v12, %v3884_v12  ;;  %v13068_v49 = vld [vmem:[#allocation128_spill] sm:$0xff]  ;;  %v13069_v35 = vld [vmem:[#allocation129_spill] sm:$0xff]  ;;  %v13070_v12 = vld [vmem:[#allocation130_spill] sm:$0xff] }
 0x94a   : > { %v3898_v39 = vpack.c.bf16 %v3885_v42, %v3885_v42  ;;  %v13071_v42 = vld [vmem:[#allocation131_spill] sm:$0xff] }
 0x94c   : > { %3931 = vmatprep.mubr.bf16.mxu0 %v3898_v39  ;;  %3972 = vmatprep.mubr.bf16.mxu1 %v3898_v39 }
 0x94d   : > { %3932 = vmatmul.mubr.bf16.vlgmr.msra.gmra.mxu0 %v10348_v22  ;;  %3973 = vmatmul.mubr.bf16.vlgmr.msra.gmra.mxu1 %v10348_v22 }
 0x94e   : > { %3982 = vmatpush1.bf16.msra.mxu0 %v12462_v11  ;;  %4023 = vmatpush1.bf16.msra.mxu1 %v12463_v63 }
 0x94f   : > { %4013 = vmatprep.mubr.bf16.mxu0 %v3898_v39  ;;  %4054 = vmatprep.mubr.bf16.mxu1 %v3898_v39  ;;  %v13072_v39 = vld [vmem:[#allocation132_spill] sm:$0xff] }
 0x950   : > { %3983 = vmatprep.subr.bf16.mxu0 %v12464_v60  ;;  %4024 = vmatprep.subr.bf16.mxu1 %v12465_v10 }
 0x952   : > { %3984 = vmatpush1.bf16.msra.mxu0 %v12466_v15  ;;  %4025 = vmatpush1.bf16.msra.mxu1 %v12467_v61 }
 0x953   : > { %3985 = vmatprep.subr.bf16.mxu0 %v12468_v52  ;;  %4026 = vmatprep.subr.bf16.mxu1 %v12469_v0 }
 0x956   : > { %3986 = vmatpush1.bf16.msra.mxu0 %v12470_v38  ;;  %4027 = vmatpush1.bf16.msra.mxu1 %v12471_v45 }
 0x957   : > { %3987 = vmatprep.subr.bf16.mxu0 %v12472_v51  ;;  %4028 = vmatprep.subr.bf16.mxu1 %v12473_v16 }
 0x95a   : > { %3988 = vmatpush1.bf16.msra.mxu0 %v12564_v62  ;;  %4029 = vmatpush1.bf16.msra.mxu1 %v12565_v23 }
 0x95b   : > { %3989 = vmatprep.subr.bf16.mxu0 %v12566_v34  ;;  %4030 = vmatprep.subr.bf16.mxu1 %v12567_v57 }
 0x95e   : > { %3990 = vmatpush1.bf16.msra.mxu0 %v12568_v4  ;;  %4031 = vmatpush1.bf16.msra.mxu1 %v12569_v24 }
 0x95f   : > { %3991 = vmatprep.subr.bf16.mxu0 %v12570_v37  ;;  %4032 = vmatprep.subr.bf16.mxu1 %v12571_v33 }
 0x962   : > { %3992 = vmatpush1.bf16.msra.mxu0 %v12572_v40  ;;  %4033 = vmatpush1.bf16.msra.mxu1 %v12573_v19 }
 0x963   : > { %3993 = vmatprep.subr.bf16.mxu0 %v12574_v47  ;;  %4034 = vmatprep.subr.bf16.mxu1 %v12661_v20 }
 0x966   : > { %3994 = vmatpush1.bf16.msra.mxu0 %v12662_v48  ;;  %4035 = vmatpush1.bf16.msra.mxu1 %v12663_v58 }
 0x967   : > { %3995 = vmatprep.subr.bf16.mxu0 %v12664_v7  ;;  %4036 = vmatprep.subr.bf16.mxu1 %v12665_v5 }
 0x96a   : > { %3996 = vmatpush1.bf16.msra.mxu0 %v12666_v6  ;;  %4037 = vmatpush1.bf16.msra.mxu1 %v12667_v25 }
 0x96b   : > { %3997 = vmatprep.subr.bf16.mxu0 %v12668_v8  ;;  %4038 = vmatprep.subr.bf16.mxu1 %v12583_v9 }
 0x96e   : > { %3998 = vmatpush2.bf16.msra.mxu0 %v12584_v32  ;;  %4039 = vmatpush2.bf16.msra.mxu1 %v12585_v2 }
 0x96f   : > { %3999 = vmatprep.subr.bf16.mxu0 %v12586_v43  ;;  %4040 = vmatprep.subr.bf16.mxu1 %v12587_v18 }
 0x972   : > { %4000 = vmatpush2.bf16.msra.mxu0 %v12588_v56  ;;  %4041 = vmatpush2.bf16.msra.mxu1 %v12589_v55 }
 0x973   : > { %4001 = vmatprep.subr.bf16.mxu0 %v12669_v17  ;;  %4042 = vmatprep.subr.bf16.mxu1 %v12956_v28 }
 0x976   : > { %4002 = vmatpush2.bf16.msra.mxu0 %v12957_v41  ;;  %4043 = vmatpush2.bf16.msra.mxu1 %v13053_v29 }
 0x977   : > { %4003 = vmatprep.subr.bf16.mxu0 %v13054_v13  ;;  %4044 = vmatprep.subr.bf16.mxu1 %v13055_v44  ;;  %v13145_v44 = vld [vmem:[#allocation165_spill] sm:$0xff] }
 0x97a   : > { %4004 = vmatpush2.bf16.msra.mxu0 %v13056_v30  ;;  %4045 = vmatpush2.bf16.msra.mxu1 %v13057_v21 }
 0x97b   : > { %4005 = vmatprep.subr.bf16.mxu0 %v13058_v50  ;;  %4046 = vmatprep.subr.bf16.mxu1 %v13059_v31  ;;  %v13140_v31 = vld [vmem:[#allocation141_spill] sm:$0xff] }
 0x97e   : > { %4006 = vmatpush2.bf16.msra.mxu0 %v13060_v3  ;;  %4047 = vmatpush2.bf16.msra.mxu1 %v13061_v1 }
 0x97f   : > { %4007 = vmatprep.subr.bf16.mxu0 %v13062_v14  ;;  %4048 = vmatprep.subr.bf16.mxu1 %v13063_v26  ;;  %v13073_v14 = vld [vmem:[#allocation133_spill] sm:$0xff]  ;;  %v13074_v26 = vld [vmem:[#allocation6_spill] sm:$0xff] }
 0x982   : > { %4008 = vmatpush2.bf16.msra.mxu0 %v13064_v46  ;;  %4049 = vmatpush2.bf16.msra.mxu1 %v13065_v53  ;;  %v13075_v46 = vld [vmem:[#allocation7_spill] sm:$0xff] }
 0x983   : > { %4009 = vmatprep.subr.bf16.mxu0 %v13066_v36  ;;  %4050 = vmatprep.subr.bf16.mxu1 %v13067_v59  ;;  %v13076_v59 = vld [vmem:[#allocation8_spill] sm:$0xff]  ;;  %v13085_v36 = vld [vmem:[#allocation17_spill] sm:$0xff] }
 0x986   : > { %4010 = vmatpush2.bf16.msra.mxu0 %v13068_v49  ;;  %4051 = vmatpush2.bf16.msra.mxu1 %v13069_v35  ;;  %v13077_v49 = vld [vmem:[#allocation9_spill] sm:$0xff]  ;;  %v13078_v35 = vld [vmem:[#allocation10_spill] sm:$0xff] }
 0x987   : > { %4011 = vmatprep.subr.bf16.mxu0 %v13070_v12  ;;  %4052 = vmatprep.subr.bf16.mxu1 %v13071_v42  ;;  %v13079_v12 = vld [vmem:[#allocation11_spill] sm:$0xff]  ;;  %v13080_v42 = vld [vmem:[#allocation12_spill] sm:$0xff] }
 0x98a   : > { %4012 = vmatpush2.bf16.msra.mxu0 %v13072_v39  ;;  %4053 = vmatpush2.bf16.msra.mxu1 %v13073_v14  ;;  %v13081_v39 = vld [vmem:[#allocation13_spill] sm:$0xff]  ;;  %v13082_v14 = vld [vmem:[#allocation14_spill] sm:$0xff] }
 0x98b   : > { %4132 = vmatprep.subr.bf16.mxu0 %v13074_v26  ;;  %4173 = vmatprep.subr.bf16.mxu1 %v13075_v46  ;;  %v13083_v26 = vld [vmem:[#allocation15_spill] sm:$0xff]  ;;  %v13084_v46 = vld [vmem:[#allocation16_spill] sm:$0xff] }
 0x98d   : > { %4014 = vmatmul.mubr.bf16.vlgmr.msra.gmra.mxu0 %v10348_v22  ;;  %4055 = vmatmul.mubr.bf16.vlgmr.msra.gmra.mxu1 %v10348_v22  ;;  %v13086_v22 = vld [vmem:[#allocation18_spill] sm:$0xff] }
 0x98e   : > { %4133 = vmatpush1.bf16.msra.mxu0 %v13076_v59  ;;  %4174 = vmatpush1.bf16.msra.mxu1 %v13077_v49  ;;  %v13087_v59 = vld [vmem:[#allocation19_spill] sm:$0xff]  ;;  %v13088_v49 = vld [vmem:[#allocation20_spill] sm:$0xff] }
 0x98f   : > { %4134 = vmatprep.subr.bf16.mxu0 %v13078_v35  ;;  %4175 = vmatprep.subr.bf16.mxu1 %v13079_v12  ;;  %v13089_v35 = vld [vmem:[#allocation21_spill] sm:$0xff]  ;;  %v13090_v12 = vld [vmem:[#allocation22_spill] sm:$0xff] }
 0x992   : > { %4135 = vmatpush1.bf16.msra.mxu0 %v13080_v42  ;;  %4176 = vmatpush1.bf16.msra.mxu1 %v13081_v39  ;;  %v13091_v42 = vld [vmem:[#allocation23_spill] sm:$0xff]  ;;  %v13092_v39 = vld [vmem:[#allocation24_spill] sm:$0xff] }
 0x993   : > { %4136 = vmatprep.subr.bf16.mxu0 %v13082_v14  ;;  %4177 = vmatprep.subr.bf16.mxu1 %v13083_v26  ;;  %v13093_v14 = vld [vmem:[#allocation25_spill] sm:$0xff]  ;;  %v13094_v26 = vld [vmem:[#allocation26_spill] sm:$0xff] }
 0x996   : > { %4137 = vmatpush1.bf16.msra.mxu0 %v13084_v46  ;;  %4178 = vmatpush1.bf16.msra.mxu1 %v13085_v36  ;;  %v13095_v46 = vld [vmem:[#allocation27_spill] sm:$0xff]  ;;  %v13096_v36 = vld [vmem:[#allocation28_spill] sm:$0xff] }
 0x997   : > { %4138 = vmatprep.subr.bf16.mxu0 %v13086_v22  ;;  %4179 = vmatprep.subr.bf16.mxu1 %v13087_v59  ;;  %v13097_v22 = vld [vmem:[#allocation29_spill] sm:$0xff]  ;;  %v13098_v59 = vld [vmem:[#allocation30_spill] sm:$0xff] }
 0x99a   : > { %4139 = vmatpush1.bf16.msra.mxu0 %v13088_v49  ;;  %4180 = vmatpush1.bf16.msra.mxu1 %v13089_v35  ;;  %v13099_v49 = vld [vmem:[#allocation31_spill] sm:$0xff]  ;;  %v13100_v35 = vld [vmem:[#allocation32_spill] sm:$0xff] }
 0x99b   : > { %4140 = vmatprep.subr.bf16.mxu0 %v13090_v12  ;;  %4181 = vmatprep.subr.bf16.mxu1 %v13091_v42  ;;  %v13101_v12 = vld [vmem:[#allocation33_spill] sm:$0xff]  ;;  %v13102_v42 = vld [vmem:[#allocation34_spill] sm:$0xff] }
 0x99e   : > { %4141 = vmatpush1.bf16.msra.mxu0 %v13092_v39  ;;  %4182 = vmatpush1.bf16.msra.mxu1 %v13093_v14  ;;  %v13103_v39 = vld [vmem:[#allocation35_spill] sm:$0xff]  ;;  %v13104_v14 = vld [vmem:[#allocation36_spill] sm:$0xff] }
 0x99f   : > { %4142 = vmatprep.subr.bf16.mxu0 %v13094_v26  ;;  %4183 = vmatprep.subr.bf16.mxu1 %v13095_v46  ;;  %v13105_v26 = vld [vmem:[#allocation37_spill] sm:$0xff]  ;;  %v13106_v46 = vld [vmem:[#allocation38_spill] sm:$0xff] }
 0x9a2   : > { %4143 = vmatpush1.bf16.msra.mxu0 %v13096_v36  ;;  %4184 = vmatpush1.bf16.msra.mxu1 %v13097_v22  ;;  %v13107_v36 = vld [vmem:[#allocation39_spill] sm:$0xff]  ;;  %v13108_v22 = vld [vmem:[#allocation40_spill] sm:$0xff] }
 0x9a3   : > { %4144 = vmatprep.subr.bf16.mxu0 %v13098_v59  ;;  %4185 = vmatprep.subr.bf16.mxu1 %v13099_v49  ;;  %v13109_v59 = vld [vmem:[#allocation41_spill] sm:$0xff]  ;;  %v13110_v49 = vld [vmem:[#allocation42_spill] sm:$0xff] }
 0x9a6   : > { %4145 = vmatpush1.bf16.msra.mxu0 %v13100_v35  ;;  %4186 = vmatpush1.bf16.msra.mxu1 %v13101_v12  ;;  %v13111_v35 = vld [vmem:[#allocation43_spill] sm:$0xff]  ;;  %v13112_v12 = vld [vmem:[#allocation44_spill] sm:$0xff] }
 0x9a7   : > { %4146 = vmatprep.subr.bf16.mxu0 %v13102_v42  ;;  %4187 = vmatprep.subr.bf16.mxu1 %v13103_v39  ;;  %v13113_v42 = vld [vmem:[#allocation45_spill] sm:$0xff]  ;;  %v13114_v39 = vld [vmem:[#allocation46_spill] sm:$0xff] }
 0x9aa   : > { %4147 = vmatpush1.bf16.msra.mxu0 %v13104_v14  ;;  %4188 = vmatpush1.bf16.msra.mxu1 %v13105_v26  ;;  %v13115_v14 = vld [vmem:[#allocation47_spill] sm:$0xff]  ;;  %v13116_v26 = vld [vmem:[#allocation48_spill] sm:$0xff] }
 0x9ab   : > { %4148 = vmatprep.subr.bf16.mxu0 %v13106_v46  ;;  %4189 = vmatprep.subr.bf16.mxu1 %v13107_v36  ;;  %v13117_v46 = vld [vmem:[#allocation49_spill] sm:$0xff]  ;;  %v13118_v36 = vld [vmem:[#allocation50_spill] sm:$0xff] }
 0x9ae   : > { %4149 = vmatpush2.bf16.msra.mxu0 %v13108_v22  ;;  %4190 = vmatpush2.bf16.msra.mxu1 %v13109_v59  ;;  %v13119_v22 = vld [vmem:[#allocation51_spill] sm:$0xff]  ;;  %v13120_v59 = vld [vmem:[#allocation52_spill] sm:$0xff] }
 0x9af   : > { %4150 = vmatprep.subr.bf16.mxu0 %v13110_v49  ;;  %4191 = vmatprep.subr.bf16.mxu1 %v13111_v35  ;;  %v13121_v49 = vld [vmem:[#allocation53_spill] sm:$0xff]  ;;  %v13122_v35 = vld [vmem:[#allocation54_spill] sm:$0xff] }
 0x9b2   : > { %4151 = vmatpush2.bf16.msra.mxu0 %v13112_v12  ;;  %4192 = vmatpush2.bf16.msra.mxu1 %v13113_v42  ;;  %v13123_v12 = vld [vmem:[#allocation55_spill] sm:$0xff]  ;;  %v13124_v42 = vld [vmem:[#allocation56_spill] sm:$0xff] }
 0x9b3   : > { %4152 = vmatprep.subr.bf16.mxu0 %v13114_v39  ;;  %4193 = vmatprep.subr.bf16.mxu1 %v13115_v14  ;;  %v13125_v39 = vld [vmem:[#allocation57_spill] sm:$0xff]  ;;  %v13126_v14 = vld [vmem:[#allocation58_spill] sm:$0xff] }
 0x9b6   : > { %4153 = vmatpush2.bf16.msra.mxu0 %v13116_v26  ;;  %4194 = vmatpush2.bf16.msra.mxu1 %v13117_v46  ;;  %v13127_v26 = vld [vmem:[#allocation59_spill] sm:$0xff]  ;;  %v13128_v46 = vld [vmem:[#allocation60_spill] sm:$0xff] }
 0x9b7   : > { %4154 = vmatprep.subr.bf16.mxu0 %v13118_v36  ;;  %4195 = vmatprep.subr.bf16.mxu1 %v13119_v22  ;;  %v13129_v36 = vld [vmem:[#allocation61_spill] sm:$0xff]  ;;  %v13130_v22 = vld [vmem:[#allocation62_spill] sm:$0xff] }
 0x9ba   : > { %4155 = vmatpush2.bf16.msra.mxu0 %v13120_v59  ;;  %4196 = vmatpush2.bf16.msra.mxu1 %v13121_v49  ;;  %v13131_v59 = vld [vmem:[#allocation63_spill] sm:$0xff]  ;;  %v13132_v49 = vld [vmem:[#allocation64_spill] sm:$0xff] }
 0x9bb   : > { %4156 = vmatprep.subr.bf16.mxu0 %v13122_v35  ;;  %4197 = vmatprep.subr.bf16.mxu1 %v13123_v12  ;;  %v13133_v35 = vld [vmem:[#allocation65_spill] sm:$0xff]  ;;  %v13134_v12 = vld [vmem:[#allocation66_spill] sm:$0xff] }
 0x9be   : > { %4157 = vmatpush2.bf16.msra.mxu0 %v13124_v42  ;;  %4198 = vmatpush2.bf16.msra.mxu1 %v13125_v39  ;;  %v13135_v42 = vld [vmem:[#allocation67_spill] sm:$0xff]  ;;  %v13136_v39 = vld [vmem:[#allocation68_spill] sm:$0xff] }
 0x9bf   : > { %4158 = vmatprep.subr.bf16.mxu0 %v13126_v14  ;;  %4199 = vmatprep.subr.bf16.mxu1 %v13127_v26  ;;  %v13137_v14 = vld [vmem:[#allocation69_spill] sm:$0xff]  ;;  %v13138_v26 = vld [vmem:[#allocation70_spill] sm:$0xff] }
 0x9c2   : > { %4159 = vmatpush2.bf16.msra.mxu0 %v13128_v46  ;;  %4200 = vmatpush2.bf16.msra.mxu1 %v13129_v36  ;;  %v13139_v46 = vld [vmem:[#allocation71_spill] sm:$0xff] }
 0x9c3   : > { %4160 = vmatprep.subr.bf16.mxu0 %v13130_v22  ;;  %4201 = vmatprep.subr.bf16.mxu1 %v13131_v59 }
 0x9c6   : > { %4161 = vmatpush2.bf16.msra.mxu0 %v13132_v49  ;;  %4202 = vmatpush2.bf16.msra.mxu1 %v13133_v35 }
 0x9c7   : > { %4162 = vmatprep.subr.bf16.mxu0 %v13134_v12  ;;  %4203 = vmatprep.subr.bf16.mxu1 %v13135_v42  ;;  %v13141_v12 = vld [vmem:[#allocation164_spill] sm:$0xff]  ;;  %v13142_v42 = vld [vmem:[#allocation162_spill] sm:$0xff] }
 0x9c8   : > { %v980_v50 = vadd.f32 %v13141_v12, %v13140_v31  ;;  %v13147_v31 = vld [vmem:[#allocation226_spill] sm:$0xff] }
 0x9ca   : > { %4163 = vmatpush2.bf16.msra.mxu0 %v13136_v39  ;;  %4204 = vmatpush2.bf16.msra.mxu1 %v13137_v14  ;;  %v13143_v39 = vld [vmem:[#allocation163_spill] sm:$0xff] }
 0x9cb   : > { %4214 = vmatprep.subr.bf16.mxu0 %v13138_v26  ;;  %4255 = vmatprep.subr.bf16.mxu1 %v13139_v46  ;;  %v13144_v14 = vld [vmem:[#allocation135_spill] sm:$0xff] }
 0x9cc   : > { %v1093_v26 = vadd.f32 %v13145_v44, %v13144_v14  ;;  %v13173_v14 = vld [vmem:[#allocation132_spill] sm:$0xff] }
 0xa0d   : > { %v3933_v36 = vpop.f32.mrf.mxu0  ;;  %v3974_v22 = vpop.f32.mrf.mxu1 }
 0xa0e   : > { %v4063_v21 = vadd.f32 %v3933_v36, %v13142_v42  ;;  %v4065_v30 = vadd.f32 %v3974_v22, %v13143_v39  ;;  %v13146_v22 = vld [vmem:[#allocation198_spill] sm:$0xff] }
 0xa0f   : > { %v3935_v53 = vpop.f32.mrf.mxu0  ;;  %v3976_v59 = vpop.f32.mrf.mxu1  ;;  %v1206_v44 = vadd.f32 %v13147_v31, %v13146_v22 }
 0xa10   : > { %v4064_v13 = vadd.f32 %v3935_v53, %v980_v50  ;;  %v6849_v46 = vmul.f32 -1.442695, %v4063_v21  ;;  %v4066_v29 = vadd.f32 %v3976_v59, %v1093_v26  ;;  %v6851_v41 = vmul.f32 -1.442695, %v4065_v30  ;;  %v13149_v26 = vld [vmem:[#allocation227_spill] sm:$0xff] }
 0xa11   : > { %v3937_v1 = vpop.f32.mrf.mxu0  ;;  %v3978_v49 = vpop.f32.mrf.mxu1 }
 0xa12   : > { %v6850_v28 = vmul.f32 -1.442695, %v4064_v13  ;;  %7309 = vpow2.f32 %v6849_v46  ;;  %v6852_v1 = vmul.f32 -1.442695, %v4066_v29  ;;  %v13148_v13 = vld [vmem:[#allocation199_spill] sm:$0xff]  ;;  %v13151_v46 = vld [vmem:[#allocation225_spill] sm:$0xff] }
 0xa13   : > { %v3938_v3 = vpop.f32.mrf.mxu0  ;;  %v3979_v35 = vpop.f32.mrf.mxu1  ;;  %7311 = vpow2.f32 %v6851_v41  ;;  %v1319_v29 = vadd.f32 %v13149_v26, %v13148_v13  ;;  %v13172_v13 = vld [vmem:[#allocation131_spill] sm:$0xff] }
 0xa14   : > { %7313 = vpow2.f32 %v6850_v28  ;;  %v13150_v28 = vld [vmem:[#allocation224_spill] sm:$0xff] }
 0xa15   : > { %7315 = vpow2.f32 %v6852_v1 }
 0xa1f   : > { %v7310_v3 = vpop.eup %7309 }
 0xa20   : > { %v7312_v49 = vpop.eup %7311  ;;  %v4077_v12 = vadd.f32 1.0, %v7310_v3 }
 0xa21   : > { %v7314_v35 = vpop.eup %7313  ;;  %v4089_v42 = vadd.f32 1.0, %v7312_v49 }
 0xa22   : > { %v7316_v36 = vpop.eup %7315  ;;  %v4078_v39 = vadd.f32 1.0, %v7314_v35  ;;  %7317 = vrcp.f32 %v4077_v12 }
 0xa23   : > { %v4090_v21 = vadd.f32 1.0, %v7316_v36  ;;  %7319 = vrcp.f32 %v4089_v42 }
 0xa24   : > { %7321 = vrcp.f32 %v4078_v39 }
 0xa2f   : > { %v7318_v42 = vpop.eup %7317 }
 0xa4d   : > { %v4015_v50 = vpop.f32.mrf.mxu0  ;;  %v4056_v30 = vpop.f32.mrf.mxu1 }
 0xa4e   : > { %v4067_v41 = vadd.f32 %v4015_v50, %v13150_v28  ;;  %v4069_v53 = vadd.f32 %v4056_v30, %v13151_v46  ;;  %v7320_v50 = vpop.eup %7319 }
 0xa4f   : > { %v4017_v59 = vpop.f32.mrf.mxu0  ;;  %v4058_v1 = vpop.f32.mrf.mxu1  ;;  %v4109_v46 = vmul.f32 %v7320_v50, %v10341_v27 }
 0xa50   : > { %7323 = vtanh.f32 %v4067_v41  ;;  %v6853_v3 = vmul.f32 -1.442695, %v4069_v53  ;;  %v4068_v49 = vadd.f32 %v4017_v59, %v1206_v44  ;;  %v4070_v35 = vadd.f32 %v4058_v1, %v1319_v29  ;;  %v7322_v28 = vpop.eup %7321 }
 0xa51   : > { %7325 = vrcp.f32 %v4090_v21  ;;  %v4019_v31 = vpop.f32.mrf.mxu0  ;;  %v4060_v12 = vpop.f32.mrf.mxu1 }
 0xa52   : > { %7327 = vpow2.f32 %v6853_v3  ;;  %v6854_v36 = vmul.f32 -1.442695, %v4070_v35 }
 0xa53   : > { %7329 = vtanh.f32 %v4068_v49  ;;  %v4020_v22 = vpop.f32.mrf.mxu0  ;;  %v4061_v26 = vpop.f32.mrf.mxu1 }
 0xa54   : > { %7331 = vpow2.f32 %v6854_v36 }
 0xa5d   : > { %v7324_v30 = vpop.eup %7323 }
 0xa5e   : > { %v7326_v39 = vpop.eup %7325  ;;  %v4111_v41 = vmul.f32 %v7324_v30, %v7318_v42  ;;  %v13154_v30 = vld [vmem:[#allocation113_spill] sm:$0xff] }
 0xa5f   : > { %v7328_v53 = vpop.eup %7327  ;;  %v4110_v1 = vmul.f32 %v7326_v39, %v10345_v54  ;;  %v13152_v54 = vld [vmem:[#allocation111_spill] sm:$0xff]  ;;  %v13155_v39 = vld [vmem:[#allocation114_spill] sm:$0xff] }
 0xa60   : > { %v7330_v44 = vpop.eup %7329  ;;  %v10495_v29 = vadd.f32 %v4111_v41, %v4109_v46  ;;  %v4103_v21 = vadd.f32 1.0, %v7328_v53  ;;  %v13156_v46 = vld [vmem:[#allocation115_spill] sm:$0xff]  ;;  %v13157_v41 = vld [vmem:[#allocation116_spill] sm:$0xff]  ;;  %v13158_v53 = vld [vmem:[#allocation117_spill] sm:$0xff] }
 0xa61   : > { %v7332_v59 = vpop.eup %7331  ;;  %v4112_v3 = vmul.f32 %v7330_v44, %v7322_v28  ;;  %v13153_v28 = vld [vmem:[#allocation112_spill] sm:$0xff]  ;;  %v13159_v44 = vld [vmem:[#allocation118_spill] sm:$0xff] }
 0xa62   : > { %7333 = vtanh.f32 %v10495_v29  ;;  %v4104_v22 = vadd.f32 1.0, %v7332_v59  ;;  %v13161_v59 = vld [vmem:[#allocation120_spill] sm:$0xff] }
 0xa63   : > { %7335 = vrcp.f32 %v4103_v21  ;;  %v10499_v49 = vadd.f32 %v4112_v3, %v4110_v1  ;;  %v13160_v21 = vld [vmem:[#allocation119_spill] sm:$0xff]  ;;  %v13162_v1 = vld [vmem:[#allocation121_spill] sm:$0xff]  ;;  %v13163_v3 = vld [vmem:[#allocation122_spill] sm:$0xff] }
 0xa64   : > { %7337 = vrcp.f32 %v4104_v22  ;;  %v13164_v22 = vld [vmem:[#allocation123_spill] sm:$0xff] }
 0xa65   : > { %7339 = vtanh.f32 %v10499_v49 }
 0xa6f   : > { %v7334_v27 = vpop.eup %7333 }
 0xa70   : > { %v7336_v35 = vpop.eup %7335 }
 0xa71   : > { %v7338_v31 = vpop.eup %7337  ;;  %v4117_v36 = vmul.f32 %v7336_v35, %v7334_v27  ;;  %v13165_v27 = vld [vmem:[#allocation124_spill] sm:$0xff]  ;;  %v13166_v35 = vld [vmem:[#allocation125_spill] sm:$0xff] }
 0xa72   : > { %v7340_v12 = vpop.eup %7339 }
 0xa73   : > { %v4118_v26 = vmul.f32 %v7340_v12, %v7338_v31  ;;  %v10502_v50 = vpack.c.bf16 %v4117_v36, %v4117_v36  ;;  %v13167_v31 = vld [vmem:[#allocation126_spill] sm:$0xff]  ;;  %v13168_v12 = vld [vmem:[#allocation127_spill] sm:$0xff]  ;;  %v13169_v36 = vld [vmem:[#allocation128_spill] sm:$0xff] }
 0xa75   : > { %v4131_v42 = vpack.c.bf16 %v4118_v26, %v4118_v26  ;;  %v13170_v26 = vld [vmem:[#allocation129_spill] sm:$0xff] }
 0xa77   : > { %4164 = vmatprep.mubr.bf16.mxu0 %v4131_v42  ;;  %4205 = vmatprep.mubr.bf16.mxu1 %v4131_v42 }
 0xa78   : > { %4165 = vmatmul.mubr.bf16.vlgmr.msra.gmra.mxu0 %v10502_v50  ;;  %4206 = vmatmul.mubr.bf16.vlgmr.msra.gmra.mxu1 %v10502_v50 }
 0xa79   : > { %4215 = vmatpush1.bf16.msra.mxu0 %v12462_v11  ;;  %4256 = vmatpush1.bf16.msra.mxu1 %v12463_v63 }
 0xa7a   : > { %4246 = vmatprep.mubr.bf16.mxu0 %v4131_v42  ;;  %4287 = vmatprep.mubr.bf16.mxu1 %v4131_v42  ;;  %v13171_v42 = vld [vmem:[#allocation130_spill] sm:$0xff] }
 0xa7b   : > { %4216 = vmatprep.subr.bf16.mxu0 %v12464_v60  ;;  %4257 = vmatprep.subr.bf16.mxu1 %v12465_v10 }
 0xa7d   : > { %4217 = vmatpush1.bf16.msra.mxu0 %v12466_v15  ;;  %4258 = vmatpush1.bf16.msra.mxu1 %v12467_v61 }
 0xa7e   : > { %4218 = vmatprep.subr.bf16.mxu0 %v12468_v52  ;;  %4259 = vmatprep.subr.bf16.mxu1 %v12469_v0 }
 0xa81   : > { %4219 = vmatpush1.bf16.msra.mxu0 %v12470_v38  ;;  %4260 = vmatpush1.bf16.msra.mxu1 %v12471_v45 }
 0xa82   : > { %4220 = vmatprep.subr.bf16.mxu0 %v12472_v51  ;;  %4261 = vmatprep.subr.bf16.mxu1 %v12473_v16 }
 0xa85   : > { %4221 = vmatpush1.bf16.msra.mxu0 %v12564_v62  ;;  %4262 = vmatpush1.bf16.msra.mxu1 %v12565_v23 }
 0xa86   : > { %4222 = vmatprep.subr.bf16.mxu0 %v12566_v34  ;;  %4263 = vmatprep.subr.bf16.mxu1 %v12567_v57 }
 0xa89   : > { %4223 = vmatpush1.bf16.msra.mxu0 %v12568_v4  ;;  %4264 = vmatpush1.bf16.msra.mxu1 %v12569_v24 }
 0xa8a   : > { %4224 = vmatprep.subr.bf16.mxu0 %v12570_v37  ;;  %4265 = vmatprep.subr.bf16.mxu1 %v12571_v33 }
 0xa8d   : > { %4225 = vmatpush1.bf16.msra.mxu0 %v12572_v40  ;;  %4266 = vmatpush1.bf16.msra.mxu1 %v12573_v19 }
 0xa8e   : > { %4226 = vmatprep.subr.bf16.mxu0 %v12574_v47  ;;  %4267 = vmatprep.subr.bf16.mxu1 %v12661_v20 }
 0xa91   : > { %4227 = vmatpush1.bf16.msra.mxu0 %v12662_v48  ;;  %4268 = vmatpush1.bf16.msra.mxu1 %v12663_v58 }
 0xa92   : > { %4228 = vmatprep.subr.bf16.mxu0 %v12664_v7  ;;  %4269 = vmatprep.subr.bf16.mxu1 %v12665_v5 }
 0xa95   : > { %4229 = vmatpush1.bf16.msra.mxu0 %v12666_v6  ;;  %4270 = vmatpush1.bf16.msra.mxu1 %v12667_v25 }
 0xa96   : > { %4230 = vmatprep.subr.bf16.mxu0 %v12668_v8  ;;  %4271 = vmatprep.subr.bf16.mxu1 %v12583_v9 }
 0xa99   : > { %4231 = vmatpush2.bf16.msra.mxu0 %v12584_v32  ;;  %4272 = vmatpush2.bf16.msra.mxu1 %v12585_v2 }
 0xa9a   : > { %4232 = vmatprep.subr.bf16.mxu0 %v12586_v43  ;;  %4273 = vmatprep.subr.bf16.mxu1 %v12587_v18 }
 0xa9d   : > { %4233 = vmatpush2.bf16.msra.mxu0 %v12588_v56  ;;  %4274 = vmatpush2.bf16.msra.mxu1 %v12589_v55 }
 0xa9e   : > { %4234 = vmatprep.subr.bf16.mxu0 %v12669_v17  ;;  %4275 = vmatprep.subr.bf16.mxu1 %v13152_v54 }
 0xaa1   : > { %4235 = vmatpush2.bf16.msra.mxu0 %v13153_v28  ;;  %4276 = vmatpush2.bf16.msra.mxu1 %v13154_v30 }
 0xaa2   : > { %4236 = vmatprep.subr.bf16.mxu0 %v13155_v39  ;;  %4277 = vmatprep.subr.bf16.mxu1 %v13156_v46 }
 0xaa5   : > { %4237 = vmatpush2.bf16.msra.mxu0 %v13157_v41  ;;  %4278 = vmatpush2.bf16.msra.mxu1 %v13158_v53  ;;  %v13243_v53 = vld [vmem:[#allocation168_spill] sm:$0xff] }
 0xaa6   : > { %4238 = vmatprep.subr.bf16.mxu0 %v13159_v44  ;;  %4279 = vmatprep.subr.bf16.mxu1 %v13160_v21  ;;  %v13241_v21 = vld [vmem:[#allocation166_spill] sm:$0xff]  ;;  %v13242_v44 = vld [vmem:[#allocation167_spill] sm:$0xff] }
 0xaa9   : > { %4239 = vmatpush2.bf16.msra.mxu0 %v13161_v59  ;;  %4280 = vmatpush2.bf16.msra.mxu1 %v13162_v1 }
 0xaaa   : > { %4240 = vmatprep.subr.bf16.mxu0 %v13163_v3  ;;  %4281 = vmatprep.subr.bf16.mxu1 %v13164_v22  ;;  %v13174_v3 = vld [vmem:[#allocation133_spill] sm:$0xff]  ;;  %v13175_v22 = vld [vmem:[#allocation6_spill] sm:$0xff] }
 0xaad   : > { %4241 = vmatpush2.bf16.msra.mxu0 %v13165_v27  ;;  %4282 = vmatpush2.bf16.msra.mxu1 %v13166_v35  ;;  %v13176_v27 = vld [vmem:[#allocation7_spill] sm:$0xff] }
 0xaae   : > { %4242 = vmatprep.subr.bf16.mxu0 %v13167_v31  ;;  %4283 = vmatprep.subr.bf16.mxu1 %v13168_v12  ;;  %v13177_v12 = vld [vmem:[#allocation8_spill] sm:$0xff]  ;;  %v13186_v31 = vld [vmem:[#allocation17_spill] sm:$0xff] }
 0xab1   : > { %4243 = vmatpush2.bf16.msra.mxu0 %v13169_v36  ;;  %4284 = vmatpush2.bf16.msra.mxu1 %v13170_v26  ;;  %v13178_v36 = vld [vmem:[#allocation9_spill] sm:$0xff]  ;;  %v13179_v26 = vld [vmem:[#allocation10_spill] sm:$0xff] }
 0xab2   : > { %4244 = vmatprep.subr.bf16.mxu0 %v13171_v42  ;;  %4285 = vmatprep.subr.bf16.mxu1 %v13172_v13  ;;  %v13180_v42 = vld [vmem:[#allocation11_spill] sm:$0xff]  ;;  %v13181_v13 = vld [vmem:[#allocation12_spill] sm:$0xff] }
 0xab5   : > { %4245 = vmatpush2.bf16.msra.mxu0 %v13173_v14  ;;  %4286 = vmatpush2.bf16.msra.mxu1 %v13174_v3  ;;  %v13182_v14 = vld [vmem:[#allocation13_spill] sm:$0xff]  ;;  %v13183_v3 = vld [vmem:[#allocation14_spill] sm:$0xff] }
 0xab6   : > { %4365 = vmatprep.subr.bf16.mxu0 %v13175_v22  ;;  %4406 = vmatprep.subr.bf16.mxu1 %v13176_v27  ;;  %v13184_v22 = vld [vmem:[#allocation15_spill] sm:$0xff]  ;;  %v13185_v27 = vld [vmem:[#allocation16_spill] sm:$0xff] }
 0xab8   : > { %4247 = vmatmul.mubr.bf16.vlgmr.msra.gmra.mxu0 %v10502_v50  ;;  %4288 = vmatmul.mubr.bf16.vlgmr.msra.gmra.mxu1 %v10502_v50  ;;  %v13187_v50 = vld [vmem:[#allocation18_spill] sm:$0xff] }
 0xab9   : > { %4366 = vmatpush1.bf16.msra.mxu0 %v13177_v12  ;;  %4407 = vmatpush1.bf16.msra.mxu1 %v13178_v36  ;;  %v13188_v12 = vld [vmem:[#allocation19_spill] sm:$0xff]  ;;  %v13189_v36 = vld [vmem:[#allocation20_spill] sm:$0xff] }
 0xaba   : > { %4367 = vmatprep.subr.bf16.mxu0 %v13179_v26  ;;  %4408 = vmatprep.subr.bf16.mxu1 %v13180_v42  ;;  %v13190_v26 = vld [vmem:[#allocation21_spill] sm:$0xff]  ;;  %v13191_v42 = vld [vmem:[#allocation22_spill] sm:$0xff] }
 0xabd   : > { %4368 = vmatpush1.bf16.msra.mxu0 %v13181_v13  ;;  %4409 = vmatpush1.bf16.msra.mxu1 %v13182_v14  ;;  %v13192_v13 = vld [vmem:[#allocation23_spill] sm:$0xff]  ;;  %v13193_v14 = vld [vmem:[#allocation24_spill] sm:$0xff] }
 0xabe   : > { %4369 = vmatprep.subr.bf16.mxu0 %v13183_v3  ;;  %4410 = vmatprep.subr.bf16.mxu1 %v13184_v22  ;;  %v13194_v3 = vld [vmem:[#allocation25_spill] sm:$0xff]  ;;  %v13195_v22 = vld [vmem:[#allocation26_spill] sm:$0xff] }
 0xac1   : > { %4370 = vmatpush1.bf16.msra.mxu0 %v13185_v27  ;;  %4411 = vmatpush1.bf16.msra.mxu1 %v13186_v31  ;;  %v13196_v27 = vld [vmem:[#allocation27_spill] sm:$0xff]  ;;  %v13197_v31 = vld [vmem:[#allocation28_spill] sm:$0xff] }
 0xac2   : > { %4371 = vmatprep.subr.bf16.mxu0 %v13187_v50  ;;  %4412 = vmatprep.subr.bf16.mxu1 %v13188_v12  ;;  %v13198_v50 = vld [vmem:[#allocation29_spill] sm:$0xff]  ;;  %v13199_v12 = vld [vmem:[#allocation30_spill] sm:$0xff] }
 0xac5   : > { %4372 = vmatpush1.bf16.msra.mxu0 %v13189_v36  ;;  %4413 = vmatpush1.bf16.msra.mxu1 %v13190_v26  ;;  %v13200_v36 = vld [vmem:[#allocation31_spill] sm:$0xff]  ;;  %v13201_v26 = vld [vmem:[#allocation32_spill] sm:$0xff] }
 0xac6   : > { %4373 = vmatprep.subr.bf16.mxu0 %v13191_v42  ;;  %4414 = vmatprep.subr.bf16.mxu1 %v13192_v13  ;;  %v13202_v42 = vld [vmem:[#allocation33_spill] sm:$0xff]  ;;  %v13203_v13 = vld [vmem:[#allocation34_spill] sm:$0xff] }
 0xac9   : > { %4374 = vmatpush1.bf16.msra.mxu0 %v13193_v14  ;;  %4415 = vmatpush1.bf16.msra.mxu1 %v13194_v3  ;;  %v13204_v14 = vld [vmem:[#allocation35_spill] sm:$0xff]  ;;  %v13205_v3 = vld [vmem:[#allocation36_spill] sm:$0xff] }
 0xaca   : > { %4375 = vmatprep.subr.bf16.mxu0 %v13195_v22  ;;  %4416 = vmatprep.subr.bf16.mxu1 %v13196_v27  ;;  %v13206_v22 = vld [vmem:[#allocation37_spill] sm:$0xff]  ;;  %v13207_v27 = vld [vmem:[#allocation38_spill] sm:$0xff] }
 0xacd   : > { %4376 = vmatpush1.bf16.msra.mxu0 %v13197_v31  ;;  %4417 = vmatpush1.bf16.msra.mxu1 %v13198_v50  ;;  %v13208_v31 = vld [vmem:[#allocation39_spill] sm:$0xff]  ;;  %v13209_v50 = vld [vmem:[#allocation40_spill] sm:$0xff] }
 0xace   : > { %4377 = vmatprep.subr.bf16.mxu0 %v13199_v12  ;;  %4418 = vmatprep.subr.bf16.mxu1 %v13200_v36  ;;  %v13210_v12 = vld [vmem:[#allocation41_spill] sm:$0xff]  ;;  %v13211_v36 = vld [vmem:[#allocation42_spill] sm:$0xff] }
 0xad1   : > { %4378 = vmatpush1.bf16.msra.mxu0 %v13201_v26  ;;  %4419 = vmatpush1.bf16.msra.mxu1 %v13202_v42  ;;  %v13212_v26 = vld [vmem:[#allocation43_spill] sm:$0xff]  ;;  %v13213_v42 = vld [vmem:[#allocation44_spill] sm:$0xff] }
 0xad2   : > { %4379 = vmatprep.subr.bf16.mxu0 %v13203_v13  ;;  %4420 = vmatprep.subr.bf16.mxu1 %v13204_v14  ;;  %v13214_v13 = vld [vmem:[#allocation45_spill] sm:$0xff]  ;;  %v13215_v14 = vld [vmem:[#allocation46_spill] sm:$0xff] }
 0xad5   : > { %4380 = vmatpush1.bf16.msra.mxu0 %v13205_v3  ;;  %4421 = vmatpush1.bf16.msra.mxu1 %v13206_v22  ;;  %v13216_v3 = vld [vmem:[#allocation47_spill] sm:$0xff]  ;;  %v13217_v22 = vld [vmem:[#allocation48_spill] sm:$0xff] }
 0xad6   : > { %4381 = vmatprep.subr.bf16.mxu0 %v13207_v27  ;;  %4422 = vmatprep.subr.bf16.mxu1 %v13208_v31  ;;  %v13218_v27 = vld [vmem:[#allocation49_spill] sm:$0xff]  ;;  %v13219_v31 = vld [vmem:[#allocation50_spill] sm:$0xff] }
 0xad9   : > { %4382 = vmatpush2.bf16.msra.mxu0 %v13209_v50  ;;  %4423 = vmatpush2.bf16.msra.mxu1 %v13210_v12  ;;  %v13220_v50 = vld [vmem:[#allocation51_spill] sm:$0xff]  ;;  %v13221_v12 = vld [vmem:[#allocation52_spill] sm:$0xff] }
 0xada   : > { %4383 = vmatprep.subr.bf16.mxu0 %v13211_v36  ;;  %4424 = vmatprep.subr.bf16.mxu1 %v13212_v26  ;;  %v13222_v36 = vld [vmem:[#allocation53_spill] sm:$0xff]  ;;  %v13223_v26 = vld [vmem:[#allocation54_spill] sm:$0xff] }
 0xadd   : > { %4384 = vmatpush2.bf16.msra.mxu0 %v13213_v42  ;;  %4425 = vmatpush2.bf16.msra.mxu1 %v13214_v13  ;;  %v13224_v42 = vld [vmem:[#allocation55_spill] sm:$0xff]  ;;  %v13225_v13 = vld [vmem:[#allocation56_spill] sm:$0xff] }
 0xade   : > { %4385 = vmatprep.subr.bf16.mxu0 %v13215_v14  ;;  %4426 = vmatprep.subr.bf16.mxu1 %v13216_v3  ;;  %v13226_v14 = vld [vmem:[#allocation57_spill] sm:$0xff]  ;;  %v13227_v3 = vld [vmem:[#allocation58_spill] sm:$0xff] }
 0xae1   : > { %4386 = vmatpush2.bf16.msra.mxu0 %v13217_v22  ;;  %4427 = vmatpush2.bf16.msra.mxu1 %v13218_v27  ;;  %v13228_v22 = vld [vmem:[#allocation59_spill] sm:$0xff]  ;;  %v13229_v27 = vld [vmem:[#allocation60_spill] sm:$0xff] }
 0xae2   : > { %4387 = vmatprep.subr.bf16.mxu0 %v13219_v31  ;;  %4428 = vmatprep.subr.bf16.mxu1 %v13220_v50  ;;  %v13230_v31 = vld [vmem:[#allocation61_spill] sm:$0xff]  ;;  %v13231_v50 = vld [vmem:[#allocation62_spill] sm:$0xff] }
 0xae5   : > { %4388 = vmatpush2.bf16.msra.mxu0 %v13221_v12  ;;  %4429 = vmatpush2.bf16.msra.mxu1 %v13222_v36  ;;  %v13232_v12 = vld [vmem:[#allocation63_spill] sm:$0xff]  ;;  %v13233_v36 = vld [vmem:[#allocation64_spill] sm:$0xff] }
 0xae6   : > { %4389 = vmatprep.subr.bf16.mxu0 %v13223_v26  ;;  %4430 = vmatprep.subr.bf16.mxu1 %v13224_v42  ;;  %v13234_v26 = vld [vmem:[#allocation65_spill] sm:$0xff]  ;;  %v13235_v42 = vld [vmem:[#allocation66_spill] sm:$0xff] }
 0xae9   : > { %4390 = vmatpush2.bf16.msra.mxu0 %v13225_v13  ;;  %4431 = vmatpush2.bf16.msra.mxu1 %v13226_v14  ;;  %v13236_v13 = vld [vmem:[#allocation67_spill] sm:$0xff]  ;;  %v13237_v14 = vld [vmem:[#allocation68_spill] sm:$0xff] }
 0xaea   : > { %4391 = vmatprep.subr.bf16.mxu0 %v13227_v3  ;;  %4432 = vmatprep.subr.bf16.mxu1 %v13228_v22  ;;  %v13238_v3 = vld [vmem:[#allocation69_spill] sm:$0xff]  ;;  %v13239_v22 = vld [vmem:[#allocation70_spill] sm:$0xff] }
 0xaed   : > { %4392 = vmatpush2.bf16.msra.mxu0 %v13229_v27  ;;  %4433 = vmatpush2.bf16.msra.mxu1 %v13230_v31  ;;  %v13240_v27 = vld [vmem:[#allocation71_spill] sm:$0xff] }
 0xaee   : > { %4393 = vmatprep.subr.bf16.mxu0 %v13231_v50  ;;  %4434 = vmatprep.subr.bf16.mxu1 %v13232_v12 }
 0xaf1   : > { %4394 = vmatpush2.bf16.msra.mxu0 %v13233_v36  ;;  %4435 = vmatpush2.bf16.msra.mxu1 %v13234_v26 }
 0xaf2   : > { %4395 = vmatprep.subr.bf16.mxu0 %v13235_v42  ;;  %4436 = vmatprep.subr.bf16.mxu1 %v13236_v13 }
 0xaf5   : > { %4396 = vmatpush2.bf16.msra.mxu0 %v13237_v14  ;;  %4437 = vmatpush2.bf16.msra.mxu1 %v13238_v3  ;;  %v13244_v3 = vld [vmem:[#allocation169_spill] sm:$0xff] }
 0xaf6   : > { %4447 = vmatprep.subr.bf16.mxu0 %v13239_v22  ;;  %4488 = vmatprep.subr.bf16.mxu1 %v13240_v27 }
 0xb38   : > { %v4166_v31 = vpop.f32.mrf.mxu0  ;;  %v4207_v50 = vpop.f32.mrf.mxu1 }
 0xb39   : > { %v4296_v42 = vadd.f32 %v4166_v31, %v13241_v21  ;;  %v4298_v13 = vadd.f32 %v4207_v50, %v13242_v44 }
 0xb3a   : > { %v4168_v35 = vpop.f32.mrf.mxu0  ;;  %v4209_v12 = vpop.f32.mrf.mxu1 }
 0xb3b   : > { %v4297_v14 = vadd.f32 %v4168_v35, %v13243_v53  ;;  %v6855_v41 = vmul.f32 -1.442695, %v4296_v42  ;;  %v4299_v46 = vadd.f32 %v4209_v12, %v13244_v3  ;;  %v6857_v22 = vmul.f32 -1.442695, %v4298_v13  ;;  %v13245_v3 = vld [vmem:[#allocation228_spill] sm:$0xff]  ;;  %v13248_v42 = vld [vmem:[#allocation231_spill] sm:$0xff] }
 0xb3c   : > { %v4170_v1 = vpop.f32.mrf.mxu0  ;;  %v4211_v36 = vpop.f32.mrf.mxu1 }
 0xb3d   : > { %v6856_v39 = vmul.f32 -1.442695, %v4297_v14  ;;  %7341 = vpow2.f32 %v6855_v41  ;;  %v6858_v27 = vmul.f32 -1.442695, %v4299_v46  ;;  %v13246_v14 = vld [vmem:[#allocation229_spill] sm:$0xff] }
 0xb3e   : > { %v4171_v59 = vpop.f32.mrf.mxu0  ;;  %v4212_v26 = vpop.f32.mrf.mxu1  ;;  %7343 = vpow2.f32 %v6857_v22 }
 0xb3f   : > { %7345 = vpow2.f32 %v6856_v39 }
 0xb40   : > { %7347 = vpow2.f32 %v6858_v27  ;;  %v13247_v27 = vld [vmem:[#allocation230_spill] sm:$0xff] }
 0xb4a   : > { %v7342_v1 = vpop.eup %7341 }
 0xb4b   : > { %v7344_v36 = vpop.eup %7343  ;;  %v4310_v26 = vadd.f32 1.0, %v7342_v1 }
 0xb4c   : > { %v7346_v59 = vpop.eup %7345  ;;  %v4322_v21 = vadd.f32 1.0, %v7344_v36 }
 0xb4d   : > { %v7348_v30 = vpop.eup %7347  ;;  %v4311_v31 = vadd.f32 1.0, %v7346_v59  ;;  %7349 = vrcp.f32 %v4310_v26 }
 0xb4e   : > { %v4323_v44 = vadd.f32 1.0, %v7348_v30  ;;  %7351 = vrcp.f32 %v4322_v21 }
 0xb4f   : > { %7353 = vrcp.f32 %v4311_v31 }
 0xb5a   : > { %v7350_v21 = vpop.eup %7349 }
 0xb78   : > { %v4248_v53 = vpop.f32.mrf.mxu0  ;;  %v4289_v35 = vpop.f32.mrf.mxu1 }
 0xb79   : > { %v4300_v13 = vadd.f32 %v4248_v53, %v13245_v3  ;;  %v4302_v41 = vadd.f32 %v4289_v35, %v13246_v14  ;;  %v7352_v53 = vpop.eup %7351 }
 0xb7a   : > { %v4250_v46 = vpop.f32.mrf.mxu0  ;;  %v4291_v39 = vpop.f32.mrf.mxu1 }
 0xb7b   : > { %7355 = vtanh.f32 %v4300_v13  ;;  %v6859_v22 = vmul.f32 -1.442695, %v4302_v41  ;;  %v4301_v12 = vadd.f32 %v4250_v46, %v13247_v27  ;;  %v4303_v50 = vadd.f32 %v4291_v39, %v13248_v42  ;;  %v7354_v31 = vpop.eup %7353 }
 0xb7c   : > { %7357 = vrcp.f32 %v4323_v44  ;;  %v4252_v1 = vpop.f32.mrf.mxu0  ;;  %v4293_v36 = vpop.f32.mrf.mxu1  ;;  %v4342_v13 = vmul.f32 %v7352_v53, %v10495_v29 }
 0xb7d   : > { %7359 = vpow2.f32 %v6859_v22  ;;  %v6860_v30 = vmul.f32 -1.442695, %v4303_v50 }
 0xb7e   : > { %7361 = vtanh.f32 %v4301_v12  ;;  %v4253_v59 = vpop.f32.mrf.mxu0  ;;  %v4294_v26 = vpop.f32.mrf.mxu1 }
 0xb7f   : > { %7363 = vpow2.f32 %v6860_v30 }
 0xb88   : > { %v7356_v35 = vpop.eup %7355 }
 0xb89   : > { %v7358_v3 = vpop.eup %7357  ;;  %v4344_v14 = vmul.f32 %v7356_v35, %v7350_v21  ;;  %v13251_v35 = vld [vmem:[#allocation115_spill] sm:$0xff] }
 0xb8a   : > { %v7360_v41 = vpop.eup %7359  ;;  %v4343_v22 = vmul.f32 %v7358_v3, %v10499_v49  ;;  %v13249_v49 = vld [vmem:[#allocation113_spill] sm:$0xff]  ;;  %v13252_v3 = vld [vmem:[#allocation116_spill] sm:$0xff] }
 0xb8b   : > { %v7362_v46 = vpop.eup %7361  ;;  %v10645_v39 = vadd.f32 %v4344_v14, %v4342_v13  ;;  %v4336_v44 = vadd.f32 1.0, %v7360_v41  ;;  %v13253_v13 = vld [vmem:[#allocation117_spill] sm:$0xff]  ;;  %v13254_v14 = vld [vmem:[#allocation118_spill] sm:$0xff]  ;;  %v13255_v41 = vld [vmem:[#allocation119_spill] sm:$0xff] }
 0xb8c   : > { %v7364_v27 = vpop.eup %7363  ;;  %v4345_v12 = vmul.f32 %v7362_v46, %v7354_v31  ;;  %v13250_v31 = vld [vmem:[#allocation114_spill] sm:$0xff]  ;;  %v13256_v46 = vld [vmem:[#allocation120_spill] sm:$0xff] }
 0xb8d   : > { %7365 = vtanh.f32 %v10645_v39  ;;  %v4337_v42 = vadd.f32 1.0, %v7364_v27  ;;  %v13258_v27 = vld [vmem:[#allocation122_spill] sm:$0xff] }
 0xb8e   : > { %7367 = vrcp.f32 %v4336_v44  ;;  %v10649_v50 = vadd.f32 %v4345_v12, %v4343_v22  ;;  %v13257_v44 = vld [vmem:[#allocation121_spill] sm:$0xff]  ;;  %v13259_v22 = vld [vmem:[#allocation123_spill] sm:$0xff]  ;;  %v13260_v12 = vld [vmem:[#allocation124_spill] sm:$0xff] }
 0xb8f   : > { %7369 = vrcp.f32 %v4337_v42  ;;  %v13261_v42 = vld [vmem:[#allocation125_spill] sm:$0xff] }
 0xb90   : > { %7371 = vtanh.f32 %v10649_v50 }
 0xb9a   : > { %v7366_v29 = vpop.eup %7365 }
 0xb9b   : > { %v7368_v1 = vpop.eup %7367 }
 0xb9c   : > { %v7370_v36 = vpop.eup %7369  ;;  %v4350_v59 = vmul.f32 %v7368_v1, %v7366_v29  ;;  %v13262_v29 = vld [vmem:[#allocation126_spill] sm:$0xff]  ;;  %v13263_v1 = vld [vmem:[#allocation127_spill] sm:$0xff] }
 0xb9d   : > { %v7372_v30 = vpop.eup %7371 }
 0xb9e   : > { %v4351_v26 = vmul.f32 %v7372_v30, %v7370_v36  ;;  %v10652_v53 = vpack.c.bf16 %v4350_v59, %v4350_v59  ;;  %v13264_v36 = vld [vmem:[#allocation128_spill] sm:$0xff]  ;;  %v13265_v30 = vld [vmem:[#allocation129_spill] sm:$0xff]  ;;  %v13266_v59 = vld [vmem:[#allocation130_spill] sm:$0xff] }
 0xba0   : > { %v4364_v21 = vpack.c.bf16 %v4351_v26, %v4351_v26  ;;  %v13267_v26 = vld [vmem:[#allocation131_spill] sm:$0xff] }
 0xba2   : > { %4397 = vmatprep.mubr.bf16.mxu0 %v4364_v21  ;;  %4438 = vmatprep.mubr.bf16.mxu1 %v4364_v21 }
 0xba3   : > { %4398 = vmatmul.mubr.bf16.vlgmr.msra.gmra.mxu0 %v10652_v53  ;;  %4439 = vmatmul.mubr.bf16.vlgmr.msra.gmra.mxu1 %v10652_v53 }
 0xba4   : > { %4448 = vmatpush1.bf16.msra.mxu0 %v12462_v11  ;;  %4489 = vmatpush1.bf16.msra.mxu1 %v12463_v63 }
 0xba5   : > { %4479 = vmatprep.mubr.bf16.mxu0 %v4364_v21  ;;  %4520 = vmatprep.mubr.bf16.mxu1 %v4364_v21  ;;  %v13268_v21 = vld [vmem:[#allocation132_spill] sm:$0xff] }
 0xba6   : > { %4449 = vmatprep.subr.bf16.mxu0 %v12464_v60  ;;  %4490 = vmatprep.subr.bf16.mxu1 %v12465_v10 }
 0xba8   : > { %4450 = vmatpush1.bf16.msra.mxu0 %v12466_v15  ;;  %4491 = vmatpush1.bf16.msra.mxu1 %v12467_v61 }
 0xba9   : > { %4451 = vmatprep.subr.bf16.mxu0 %v12468_v52  ;;  %4492 = vmatprep.subr.bf16.mxu1 %v12469_v0 }
 0xbac   : > { %4452 = vmatpush1.bf16.msra.mxu0 %v12470_v38  ;;  %4493 = vmatpush1.bf16.msra.mxu1 %v12471_v45 }
 0xbad   : > { %4453 = vmatprep.subr.bf16.mxu0 %v12472_v51  ;;  %4494 = vmatprep.subr.bf16.mxu1 %v12473_v16 }
 0xbb0   : > { %4454 = vmatpush1.bf16.msra.mxu0 %v12564_v62  ;;  %4495 = vmatpush1.bf16.msra.mxu1 %v12565_v23 }
 0xbb1   : > { %4455 = vmatprep.subr.bf16.mxu0 %v12566_v34  ;;  %4496 = vmatprep.subr.bf16.mxu1 %v12567_v57 }
 0xbb4   : > { %4456 = vmatpush1.bf16.msra.mxu0 %v12568_v4  ;;  %4497 = vmatpush1.bf16.msra.mxu1 %v12569_v24 }
 0xbb5   : > { %4457 = vmatprep.subr.bf16.mxu0 %v12570_v37  ;;  %4498 = vmatprep.subr.bf16.mxu1 %v12571_v33 }
 0xbb8   : > { %4458 = vmatpush1.bf16.msra.mxu0 %v12572_v40  ;;  %4499 = vmatpush1.bf16.msra.mxu1 %v12573_v19 }
 0xbb9   : > { %4459 = vmatprep.subr.bf16.mxu0 %v12574_v47  ;;  %4500 = vmatprep.subr.bf16.mxu1 %v12661_v20 }
 0xbbc   : > { %4460 = vmatpush1.bf16.msra.mxu0 %v12662_v48  ;;  %4501 = vmatpush1.bf16.msra.mxu1 %v12663_v58 }
 0xbbd   : > { %4461 = vmatprep.subr.bf16.mxu0 %v12664_v7  ;;  %4502 = vmatprep.subr.bf16.mxu1 %v12665_v5 }
 0xbc0   : > { %4462 = vmatpush1.bf16.msra.mxu0 %v12666_v6  ;;  %4503 = vmatpush1.bf16.msra.mxu1 %v12667_v25 }
 0xbc1   : > { %4463 = vmatprep.subr.bf16.mxu0 %v12668_v8  ;;  %4504 = vmatprep.subr.bf16.mxu1 %v12583_v9 }
 0xbc4   : > { %4464 = vmatpush2.bf16.msra.mxu0 %v12584_v32  ;;  %4505 = vmatpush2.bf16.msra.mxu1 %v12585_v2 }
 0xbc5   : > { %4465 = vmatprep.subr.bf16.mxu0 %v12586_v43  ;;  %4506 = vmatprep.subr.bf16.mxu1 %v12587_v18 }
 0xbc8   : > { %4466 = vmatpush2.bf16.msra.mxu0 %v12588_v56  ;;  %4507 = vmatpush2.bf16.msra.mxu1 %v12589_v55 }
 0xbc9   : > { %4467 = vmatprep.subr.bf16.mxu0 %v12669_v17  ;;  %4508 = vmatprep.subr.bf16.mxu1 %v13152_v54 }
 0xbcc   : > { %4468 = vmatpush2.bf16.msra.mxu0 %v13153_v28  ;;  %4509 = vmatpush2.bf16.msra.mxu1 %v13249_v49 }
 0xbcd   : > { %4469 = vmatprep.subr.bf16.mxu0 %v13250_v31  ;;  %4510 = vmatprep.subr.bf16.mxu1 %v13251_v35  ;;  %v13341_v35 = vld [vmem:[#allocation173_spill] sm:$0xff] }
 0xbd0   : > { %4470 = vmatpush2.bf16.msra.mxu0 %v13252_v3  ;;  %4511 = vmatpush2.bf16.msra.mxu1 %v13253_v13 }
 0xbd1   : > { %4471 = vmatprep.subr.bf16.mxu0 %v13254_v14  ;;  %4512 = vmatprep.subr.bf16.mxu1 %v13255_v41  ;;  %v13336_v41 = vld [vmem:[#allocation141_spill] sm:$0xff] }
 0xbd4   : > { %4472 = vmatpush2.bf16.msra.mxu0 %v13256_v46  ;;  %4513 = vmatpush2.bf16.msra.mxu1 %v13257_v44 }
 0xbd5   : > { %4473 = vmatprep.subr.bf16.mxu0 %v13258_v27  ;;  %4514 = vmatprep.subr.bf16.mxu1 %v13259_v22  ;;  %v13269_v27 = vld [vmem:[#allocation133_spill] sm:$0xff]  ;;  %v13270_v22 = vld [vmem:[#allocation6_spill] sm:$0xff] }
 0xbd8   : > { %4474 = vmatpush2.bf16.msra.mxu0 %v13260_v12  ;;  %4515 = vmatpush2.bf16.msra.mxu1 %v13261_v42  ;;  %v13271_v12 = vld [vmem:[#allocation7_spill] sm:$0xff] }
 0xbd9   : > { %4475 = vmatprep.subr.bf16.mxu0 %v13262_v29  ;;  %4516 = vmatprep.subr.bf16.mxu1 %v13263_v1  ;;  %v13272_v1 = vld [vmem:[#allocation8_spill] sm:$0xff]  ;;  %v13281_v29 = vld [vmem:[#allocation17_spill] sm:$0xff] }
 0xbdc   : > { %4476 = vmatpush2.bf16.msra.mxu0 %v13264_v36  ;;  %4517 = vmatpush2.bf16.msra.mxu1 %v13265_v30  ;;  %v13273_v36 = vld [vmem:[#allocation9_spill] sm:$0xff]  ;;  %v13274_v30 = vld [vmem:[#allocation10_spill] sm:$0xff] }
 0xbdd   : > { %4477 = vmatprep.subr.bf16.mxu0 %v13266_v59  ;;  %4518 = vmatprep.subr.bf16.mxu1 %v13267_v26  ;;  %v13275_v59 = vld [vmem:[#allocation11_spill] sm:$0xff]  ;;  %v13276_v26 = vld [vmem:[#allocation12_spill] sm:$0xff] }
 0xbe0   : > { %4478 = vmatpush2.bf16.msra.mxu0 %v13268_v21  ;;  %4519 = vmatpush2.bf16.msra.mxu1 %v13269_v27  ;;  %v13277_v21 = vld [vmem:[#allocation13_spill] sm:$0xff]  ;;  %v13278_v27 = vld [vmem:[#allocation14_spill] sm:$0xff] }
 0xbe1   : > { %4598 = vmatprep.subr.bf16.mxu0 %v13270_v22  ;;  %4639 = vmatprep.subr.bf16.mxu1 %v13271_v12  ;;  %v13279_v22 = vld [vmem:[#allocation15_spill] sm:$0xff]  ;;  %v13280_v12 = vld [vmem:[#allocation16_spill] sm:$0xff] }
 0xbe3   : > { %4480 = vmatmul.mubr.bf16.vlgmr.msra.gmra.mxu0 %v10652_v53  ;;  %4521 = vmatmul.mubr.bf16.vlgmr.msra.gmra.mxu1 %v10652_v53  ;;  %v13282_v53 = vld [vmem:[#allocation18_spill] sm:$0xff] }
 0xbe4   : > { %4599 = vmatpush1.bf16.msra.mxu0 %v13272_v1  ;;  %4640 = vmatpush1.bf16.msra.mxu1 %v13273_v36  ;;  %v13283_v1 = vld [vmem:[#allocation19_spill] sm:$0xff]  ;;  %v13284_v36 = vld [vmem:[#allocation20_spill] sm:$0xff] }
 0xbe5   : > { %4600 = vmatprep.subr.bf16.mxu0 %v13274_v30  ;;  %4641 = vmatprep.subr.bf16.mxu1 %v13275_v59  ;;  %v13285_v30 = vld [vmem:[#allocation21_spill] sm:$0xff]  ;;  %v13286_v59 = vld [vmem:[#allocation22_spill] sm:$0xff] }
 0xbe8   : > { %4601 = vmatpush1.bf16.msra.mxu0 %v13276_v26  ;;  %4642 = vmatpush1.bf16.msra.mxu1 %v13277_v21  ;;  %v13287_v26 = vld [vmem:[#allocation23_spill] sm:$0xff]  ;;  %v13288_v21 = vld [vmem:[#allocation24_spill] sm:$0xff] }
 0xbe9   : > { %4602 = vmatprep.subr.bf16.mxu0 %v13278_v27  ;;  %4643 = vmatprep.subr.bf16.mxu1 %v13279_v22  ;;  %v13289_v27 = vld [vmem:[#allocation25_spill] sm:$0xff]  ;;  %v13290_v22 = vld [vmem:[#allocation26_spill] sm:$0xff] }
 0xbec   : > { %4603 = vmatpush1.bf16.msra.mxu0 %v13280_v12  ;;  %4644 = vmatpush1.bf16.msra.mxu1 %v13281_v29  ;;  %v13291_v12 = vld [vmem:[#allocation27_spill] sm:$0xff]  ;;  %v13292_v29 = vld [vmem:[#allocation28_spill] sm:$0xff] }
 0xbed   : > { %4604 = vmatprep.subr.bf16.mxu0 %v13282_v53  ;;  %4645 = vmatprep.subr.bf16.mxu1 %v13283_v1  ;;  %v13293_v53 = vld [vmem:[#allocation29_spill] sm:$0xff]  ;;  %v13294_v1 = vld [vmem:[#allocation30_spill] sm:$0xff] }
 0xbf0   : > { %4605 = vmatpush1.bf16.msra.mxu0 %v13284_v36  ;;  %4646 = vmatpush1.bf16.msra.mxu1 %v13285_v30  ;;  %v13295_v36 = vld [vmem:[#allocation31_spill] sm:$0xff]  ;;  %v13296_v30 = vld [vmem:[#allocation32_spill] sm:$0xff] }
 0xbf1   : > { %4606 = vmatprep.subr.bf16.mxu0 %v13286_v59  ;;  %4647 = vmatprep.subr.bf16.mxu1 %v13287_v26  ;;  %v13297_v59 = vld [vmem:[#allocation33_spill] sm:$0xff]  ;;  %v13298_v26 = vld [vmem:[#allocation34_spill] sm:$0xff] }
 0xbf4   : > { %4607 = vmatpush1.bf16.msra.mxu0 %v13288_v21  ;;  %4648 = vmatpush1.bf16.msra.mxu1 %v13289_v27  ;;  %v13299_v21 = vld [vmem:[#allocation35_spill] sm:$0xff]  ;;  %v13300_v27 = vld [vmem:[#allocation36_spill] sm:$0xff] }
 0xbf5   : > { %4608 = vmatprep.subr.bf16.mxu0 %v13290_v22  ;;  %4649 = vmatprep.subr.bf16.mxu1 %v13291_v12  ;;  %v13301_v22 = vld [vmem:[#allocation37_spill] sm:$0xff]  ;;  %v13302_v12 = vld [vmem:[#allocation38_spill] sm:$0xff] }
 0xbf8   : > { %4609 = vmatpush1.bf16.msra.mxu0 %v13292_v29  ;;  %4650 = vmatpush1.bf16.msra.mxu1 %v13293_v53  ;;  %v13303_v29 = vld [vmem:[#allocation39_spill] sm:$0xff]  ;;  %v13304_v53 = vld [vmem:[#allocation40_spill] sm:$0xff] }
 0xbf9   : > { %4610 = vmatprep.subr.bf16.mxu0 %v13294_v1  ;;  %4651 = vmatprep.subr.bf16.mxu1 %v13295_v36  ;;  %v13305_v1 = vld [vmem:[#allocation41_spill] sm:$0xff]  ;;  %v13306_v36 = vld [vmem:[#allocation42_spill] sm:$0xff] }
 0xbfc   : > { %4611 = vmatpush1.bf16.msra.mxu0 %v13296_v30  ;;  %4652 = vmatpush1.bf16.msra.mxu1 %v13297_v59  ;;  %v13307_v30 = vld [vmem:[#allocation43_spill] sm:$0xff]  ;;  %v13308_v59 = vld [vmem:[#allocation44_spill] sm:$0xff] }
 0xbfd   : > { %4612 = vmatprep.subr.bf16.mxu0 %v13298_v26  ;;  %4653 = vmatprep.subr.bf16.mxu1 %v13299_v21  ;;  %v13309_v26 = vld [vmem:[#allocation45_spill] sm:$0xff]  ;;  %v13310_v21 = vld [vmem:[#allocation46_spill] sm:$0xff] }
 0xc00   : > { %4613 = vmatpush1.bf16.msra.mxu0 %v13300_v27  ;;  %4654 = vmatpush1.bf16.msra.mxu1 %v13301_v22  ;;  %v13311_v27 = vld [vmem:[#allocation47_spill] sm:$0xff]  ;;  %v13312_v22 = vld [vmem:[#allocation48_spill] sm:$0xff] }
 0xc01   : > { %4614 = vmatprep.subr.bf16.mxu0 %v13302_v12  ;;  %4655 = vmatprep.subr.bf16.mxu1 %v13303_v29  ;;  %v13313_v12 = vld [vmem:[#allocation49_spill] sm:$0xff]  ;;  %v13314_v29 = vld [vmem:[#allocation50_spill] sm:$0xff] }
 0xc04   : > { %4615 = vmatpush2.bf16.msra.mxu0 %v13304_v53  ;;  %4656 = vmatpush2.bf16.msra.mxu1 %v13305_v1  ;;  %v13315_v53 = vld [vmem:[#allocation51_spill] sm:$0xff]  ;;  %v13316_v1 = vld [vmem:[#allocation52_spill] sm:$0xff] }
 0xc05   : > { %4616 = vmatprep.subr.bf16.mxu0 %v13306_v36  ;;  %4657 = vmatprep.subr.bf16.mxu1 %v13307_v30  ;;  %v13317_v36 = vld [vmem:[#allocation53_spill] sm:$0xff]  ;;  %v13318_v30 = vld [vmem:[#allocation54_spill] sm:$0xff] }
 0xc08   : > { %4617 = vmatpush2.bf16.msra.mxu0 %v13308_v59  ;;  %4658 = vmatpush2.bf16.msra.mxu1 %v13309_v26  ;;  %v13319_v59 = vld [vmem:[#allocation55_spill] sm:$0xff]  ;;  %v13320_v26 = vld [vmem:[#allocation56_spill] sm:$0xff] }
 0xc09   : > { %4618 = vmatprep.subr.bf16.mxu0 %v13310_v21  ;;  %4659 = vmatprep.subr.bf16.mxu1 %v13311_v27  ;;  %v13321_v21 = vld [vmem:[#allocation57_spill] sm:$0xff]  ;;  %v13322_v27 = vld [vmem:[#allocation58_spill] sm:$0xff] }
 0xc0c   : > { %4619 = vmatpush2.bf16.msra.mxu0 %v13312_v22  ;;  %4660 = vmatpush2.bf16.msra.mxu1 %v13313_v12  ;;  %v13323_v22 = vld [vmem:[#allocation59_spill] sm:$0xff]  ;;  %v13324_v12 = vld [vmem:[#allocation60_spill] sm:$0xff] }
 0xc0d   : > { %4620 = vmatprep.subr.bf16.mxu0 %v13314_v29  ;;  %4661 = vmatprep.subr.bf16.mxu1 %v13315_v53  ;;  %v13325_v29 = vld [vmem:[#allocation61_spill] sm:$0xff]  ;;  %v13326_v53 = vld [vmem:[#allocation62_spill] sm:$0xff] }
 0xc10   : > { %4621 = vmatpush2.bf16.msra.mxu0 %v13316_v1  ;;  %4662 = vmatpush2.bf16.msra.mxu1 %v13317_v36  ;;  %v13327_v1 = vld [vmem:[#allocation63_spill] sm:$0xff]  ;;  %v13328_v36 = vld [vmem:[#allocation64_spill] sm:$0xff] }
 0xc11   : > { %4622 = vmatprep.subr.bf16.mxu0 %v13318_v30  ;;  %4663 = vmatprep.subr.bf16.mxu1 %v13319_v59  ;;  %v13329_v30 = vld [vmem:[#allocation65_spill] sm:$0xff]  ;;  %v13330_v59 = vld [vmem:[#allocation66_spill] sm:$0xff] }
 0xc14   : > { %4623 = vmatpush2.bf16.msra.mxu0 %v13320_v26  ;;  %4664 = vmatpush2.bf16.msra.mxu1 %v13321_v21  ;;  %v13331_v26 = vld [vmem:[#allocation67_spill] sm:$0xff]  ;;  %v13332_v21 = vld [vmem:[#allocation68_spill] sm:$0xff] }
 0xc15   : > { %4624 = vmatprep.subr.bf16.mxu0 %v13322_v27  ;;  %4665 = vmatprep.subr.bf16.mxu1 %v13323_v22  ;;  %v13333_v27 = vld [vmem:[#allocation69_spill] sm:$0xff]  ;;  %v13334_v22 = vld [vmem:[#allocation70_spill] sm:$0xff] }
 0xc18   : > { %4625 = vmatpush2.bf16.msra.mxu0 %v13324_v12  ;;  %4666 = vmatpush2.bf16.msra.mxu1 %v13325_v29  ;;  %v13335_v12 = vld [vmem:[#allocation71_spill] sm:$0xff] }
 0xc19   : > { %4626 = vmatprep.subr.bf16.mxu0 %v13326_v53  ;;  %4667 = vmatprep.subr.bf16.mxu1 %v13327_v1 }
 0xc1c   : > { %4627 = vmatpush2.bf16.msra.mxu0 %v13328_v36  ;;  %4668 = vmatpush2.bf16.msra.mxu1 %v13329_v30 }
 0xc1d   : > { %4628 = vmatprep.subr.bf16.mxu0 %v13330_v59  ;;  %4669 = vmatprep.subr.bf16.mxu1 %v13331_v26  ;;  %v13337_v59 = vld [vmem:[#allocation172_spill] sm:$0xff]  ;;  %v13338_v26 = vld [vmem:[#allocation170_spill] sm:$0xff] }
 0xc1e   : > { %v990_v14 = vadd.f32 %v13337_v59, %v13336_v41  ;;  %v13343_v41 = vld [vmem:[#allocation234_spill] sm:$0xff] }
 0xc20   : > { %4629 = vmatpush2.bf16.msra.mxu0 %v13332_v21  ;;  %4670 = vmatpush2.bf16.msra.mxu1 %v13333_v27  ;;  %v13339_v21 = vld [vmem:[#allocation171_spill] sm:$0xff] }
 0xc21   : > { %4680 = vmatprep.subr.bf16.mxu0 %v13334_v22  ;;  %4721 = vmatprep.subr.bf16.mxu1 %v13335_v12  ;;  %v13340_v27 = vld [vmem:[#allocation135_spill] sm:$0xff] }
 0xc22   : > { %v1103_v22 = vadd.f32 %v13341_v35, %v13340_v27  ;;  %v13369_v27 = vld [vmem:[#allocation132_spill] sm:$0xff] }
 0xc63   : > { %v4399_v29 = vpop.f32.mrf.mxu0  ;;  %v4440_v53 = vpop.f32.mrf.mxu1 }
 0xc64   : > { %v4529_v13 = vadd.f32 %v4399_v29, %v13338_v26  ;;  %v4531_v3 = vadd.f32 %v4440_v53, %v13339_v21  ;;  %v13342_v53 = vld [vmem:[#allocation198_spill] sm:$0xff] }
 0xc65   : > { %v4401_v42 = vpop.f32.mrf.mxu0  ;;  %v4442_v1 = vpop.f32.mrf.mxu1  ;;  %v1216_v35 = vadd.f32 %v13343_v41, %v13342_v53 }
 0xc66   : > { %v4530_v31 = vadd.f32 %v4401_v42, %v990_v14  ;;  %v6861_v12 = vmul.f32 -1.442695, %v4529_v13  ;;  %v4532_v49 = vadd.f32 %v4442_v1, %v1103_v22  ;;  %v6863_v28 = vmul.f32 -1.442695, %v4531_v3  ;;  %v13345_v22 = vld [vmem:[#allocation235_spill] sm:$0xff] }
 0xc67   : > { %v4403_v44 = vpop.f32.mrf.mxu0  ;;  %v4444_v36 = vpop.f32.mrf.mxu1 }
 0xc68   : > { %v6862_v54 = vmul.f32 -1.442695, %v4530_v31  ;;  %7373 = vpow2.f32 %v6861_v12  ;;  %v6864_v44 = vmul.f32 -1.442695, %v4532_v49  ;;  %v13344_v31 = vld [vmem:[#allocation199_spill] sm:$0xff]  ;;  %v13347_v12 = vld [vmem:[#allocation233_spill] sm:$0xff] }
 0xc69   : > { %v4404_v46 = vpop.f32.mrf.mxu0  ;;  %v4445_v30 = vpop.f32.mrf.mxu1  ;;  %7375 = vpow2.f32 %v6863_v28  ;;  %v1329_v49 = vadd.f32 %v13345_v22, %v13344_v31  ;;  %v13368_v31 = vld [vmem:[#allocation131_spill] sm:$0xff] }
 0xc6a   : > { %7377 = vpow2.f32 %v6862_v54  ;;  %v13346_v54 = vld [vmem:[#allocation232_spill] sm:$0xff] }
 0xc6b   : > { %7379 = vpow2.f32 %v6864_v44 }
 0xc75   : > { %v7374_v46 = vpop.eup %7373 }
 0xc76   : > { %v7376_v36 = vpop.eup %7375  ;;  %v4543_v59 = vadd.f32 1.0, %v7374_v46 }
 0xc77   : > { %v7378_v30 = vpop.eup %7377  ;;  %v4555_v26 = vadd.f32 1.0, %v7376_v36 }
 0xc78   : > { %v7380_v29 = vpop.eup %7379  ;;  %v4544_v21 = vadd.f32 1.0, %v7378_v30  ;;  %7381 = vrcp.f32 %v4543_v59 }
 0xc79   : > { %v4556_v13 = vadd.f32 1.0, %v7380_v29  ;;  %7383 = vrcp.f32 %v4555_v26 }
 0xc7a   : > { %7385 = vrcp.f32 %v4544_v21 }
 0xc85   : > { %v7382_v26 = vpop.eup %7381 }
 0xca3   : > { %v4481_v14 = vpop.f32.mrf.mxu0  ;;  %v4522_v3 = vpop.f32.mrf.mxu1 }
 0xca4   : > { %v4533_v28 = vadd.f32 %v4481_v14, %v13346_v54  ;;  %v4535_v42 = vadd.f32 %v4522_v3, %v13347_v12  ;;  %v7384_v14 = vpop.eup %7383 }
 0xca5   : > { %v4483_v1 = vpop.f32.mrf.mxu0  ;;  %v4524_v44 = vpop.f32.mrf.mxu1  ;;  %v4575_v12 = vmul.f32 %v7384_v14, %v10645_v39 }
 0xca6   : > { %7387 = vtanh.f32 %v4533_v28  ;;  %v6865_v46 = vmul.f32 -1.442695, %v4535_v42  ;;  %v4534_v36 = vadd.f32 %v4483_v1, %v1216_v35  ;;  %v4536_v30 = vadd.f32 %v4524_v44, %v1329_v49  ;;  %v7386_v54 = vpop.eup %7385 }
 0xca7   : > { %7389 = vrcp.f32 %v4556_v13  ;;  %v4485_v41 = vpop.f32.mrf.mxu0  ;;  %v4526_v59 = vpop.f32.mrf.mxu1 }
 0xca8   : > { %7391 = vpow2.f32 %v6865_v46  ;;  %v6866_v29 = vmul.f32 -1.442695, %v4536_v30 }
 0xca9   : > { %7393 = vtanh.f32 %v4534_v36  ;;  %v4486_v53 = vpop.f32.mrf.mxu0  ;;  %v4527_v22 = vpop.f32.mrf.mxu1 }
 0xcaa   : > { %7395 = vpow2.f32 %v6866_v29 }
 0xcb3   : > { %v7388_v3 = vpop.eup %7387 }
 0xcb4   : > { %v7390_v21 = vpop.eup %7389  ;;  %v4577_v28 = vmul.f32 %v7388_v3, %v7382_v26  ;;  %v13350_v3 = vld [vmem:[#allocation113_spill] sm:$0xff] }
 0xcb5   : > { %v7392_v42 = vpop.eup %7391  ;;  %v4576_v44 = vmul.f32 %v7390_v21, %v10649_v50  ;;  %v13348_v50 = vld [vmem:[#allocation111_spill] sm:$0xff]  ;;  %v13351_v21 = vld [vmem:[#allocation114_spill] sm:$0xff] }
 0xcb6   : > { %v7394_v35 = vpop.eup %7393  ;;  %v10799_v49 = vadd.f32 %v4577_v28, %v4575_v12  ;;  %v4569_v13 = vadd.f32 1.0, %v7392_v42  ;;  %v13352_v12 = vld [vmem:[#allocation115_spill] sm:$0xff]  ;;  %v13353_v28 = vld [vmem:[#allocation116_spill] sm:$0xff]  ;;  %v13354_v42 = vld [vmem:[#allocation117_spill] sm:$0xff] }
 0xcb7   : > { %v7396_v1 = vpop.eup %7395  ;;  %v4578_v46 = vmul.f32 %v7394_v35, %v7386_v54  ;;  %v13349_v54 = vld [vmem:[#allocation112_spill] sm:$0xff]  ;;  %v13355_v35 = vld [vmem:[#allocation118_spill] sm:$0xff] }
 0xcb8   : > { %7397 = vtanh.f32 %v10799_v49  ;;  %v4570_v53 = vadd.f32 1.0, %v7396_v1  ;;  %v13357_v1 = vld [vmem:[#allocation120_spill] sm:$0xff] }
 0xcb9   : > { %7399 = vrcp.f32 %v4569_v13  ;;  %v10803_v36 = vadd.f32 %v4578_v46, %v4576_v44  ;;  %v13356_v13 = vld [vmem:[#allocation119_spill] sm:$0xff]  ;;  %v13358_v44 = vld [vmem:[#allocation121_spill] sm:$0xff]  ;;  %v13359_v46 = vld [vmem:[#allocation122_spill] sm:$0xff] }
 0xcba   : > { %7401 = vrcp.f32 %v4570_v53  ;;  %v13360_v53 = vld [vmem:[#allocation123_spill] sm:$0xff] }
 0xcbb   : > { %7403 = vtanh.f32 %v10803_v36 }
 0xcc5   : > { %v7398_v39 = vpop.eup %7397 }
 0xcc6   : > { %v7400_v30 = vpop.eup %7399 }
 0xcc7   : > { %v7402_v41 = vpop.eup %7401  ;;  %v4583_v29 = vmul.f32 %v7400_v30, %v7398_v39  ;;  %v13361_v39 = vld [vmem:[#allocation124_spill] sm:$0xff]  ;;  %v13362_v30 = vld [vmem:[#allocation125_spill] sm:$0xff] }
 0xcc8   : > { %v7404_v59 = vpop.eup %7403 }
 0xcc9   : > { %v4584_v22 = vmul.f32 %v7404_v59, %v7402_v41  ;;  %v10806_v14 = vpack.c.bf16 %v4583_v29, %v4583_v29  ;;  %v13363_v41 = vld [vmem:[#allocation126_spill] sm:$0xff]  ;;  %v13364_v59 = vld [vmem:[#allocation127_spill] sm:$0xff]  ;;  %v13365_v29 = vld [vmem:[#allocation128_spill] sm:$0xff] }
 0xccb   : > { %v4597_v26 = vpack.c.bf16 %v4584_v22, %v4584_v22  ;;  %v13366_v22 = vld [vmem:[#allocation129_spill] sm:$0xff] }
 0xccd   : > { %4630 = vmatprep.mubr.bf16.mxu0 %v4597_v26  ;;  %4671 = vmatprep.mubr.bf16.mxu1 %v4597_v26 }
 0xcce   : > { %4631 = vmatmul.mubr.bf16.vlgmr.msra.gmra.mxu0 %v10806_v14  ;;  %4672 = vmatmul.mubr.bf16.vlgmr.msra.gmra.mxu1 %v10806_v14 }
 0xccf   : > { %4681 = vmatpush1.bf16.msra.mxu0 %v12462_v11  ;;  %4722 = vmatpush1.bf16.msra.mxu1 %v12463_v63 }
 0xcd0   : > { %4712 = vmatprep.mubr.bf16.mxu0 %v4597_v26  ;;  %4753 = vmatprep.mubr.bf16.mxu1 %v4597_v26  ;;  %v13367_v26 = vld [vmem:[#allocation130_spill] sm:$0xff] }
 0xcd1   : > { %4682 = vmatprep.subr.bf16.mxu0 %v12464_v60  ;;  %4723 = vmatprep.subr.bf16.mxu1 %v12465_v10 }
 0xcd3   : > { %4683 = vmatpush1.bf16.msra.mxu0 %v12466_v15  ;;  %4724 = vmatpush1.bf16.msra.mxu1 %v12467_v61 }
 0xcd4   : > { %4684 = vmatprep.subr.bf16.mxu0 %v12468_v52  ;;  %4725 = vmatprep.subr.bf16.mxu1 %v12469_v0 }
 0xcd7   : > { %4685 = vmatpush1.bf16.msra.mxu0 %v12470_v38  ;;  %4726 = vmatpush1.bf16.msra.mxu1 %v12471_v45 }
 0xcd8   : > { %4686 = vmatprep.subr.bf16.mxu0 %v12472_v51  ;;  %4727 = vmatprep.subr.bf16.mxu1 %v12473_v16 }
 0xcdb   : > { %4687 = vmatpush1.bf16.msra.mxu0 %v12564_v62  ;;  %4728 = vmatpush1.bf16.msra.mxu1 %v12565_v23 }
 0xcdc   : > { %4688 = vmatprep.subr.bf16.mxu0 %v12566_v34  ;;  %4729 = vmatprep.subr.bf16.mxu1 %v12567_v57 }
 0xcdf   : > { %4689 = vmatpush1.bf16.msra.mxu0 %v12568_v4  ;;  %4730 = vmatpush1.bf16.msra.mxu1 %v12569_v24 }
 0xce0   : > { %4690 = vmatprep.subr.bf16.mxu0 %v12570_v37  ;;  %4731 = vmatprep.subr.bf16.mxu1 %v12571_v33 }
 0xce3   : > { %4691 = vmatpush1.bf16.msra.mxu0 %v12572_v40  ;;  %4732 = vmatpush1.bf16.msra.mxu1 %v12573_v19 }
 0xce4   : > { %4692 = vmatprep.subr.bf16.mxu0 %v12574_v47  ;;  %4733 = vmatprep.subr.bf16.mxu1 %v12661_v20 }
 0xce7   : > { %4693 = vmatpush1.bf16.msra.mxu0 %v12662_v48  ;;  %4734 = vmatpush1.bf16.msra.mxu1 %v12663_v58 }
 0xce8   : > { %4694 = vmatprep.subr.bf16.mxu0 %v12664_v7  ;;  %4735 = vmatprep.subr.bf16.mxu1 %v12665_v5 }
 0xceb   : > { %4695 = vmatpush1.bf16.msra.mxu0 %v12666_v6  ;;  %4736 = vmatpush1.bf16.msra.mxu1 %v12667_v25 }
 0xcec   : > { %4696 = vmatprep.subr.bf16.mxu0 %v12668_v8  ;;  %4737 = vmatprep.subr.bf16.mxu1 %v12583_v9 }
 0xcef   : > { %4697 = vmatpush2.bf16.msra.mxu0 %v12584_v32  ;;  %4738 = vmatpush2.bf16.msra.mxu1 %v12585_v2 }
 0xcf0   : > { %4698 = vmatprep.subr.bf16.mxu0 %v12586_v43  ;;  %4739 = vmatprep.subr.bf16.mxu1 %v12587_v18 }
 0xcf3   : > { %4699 = vmatpush2.bf16.msra.mxu0 %v12588_v56  ;;  %4740 = vmatpush2.bf16.msra.mxu1 %v12589_v55 }
 0xcf4   : > { %4700 = vmatprep.subr.bf16.mxu0 %v12669_v17  ;;  %4741 = vmatprep.subr.bf16.mxu1 %v13348_v50 }
 0xcf7   : > { %4701 = vmatpush2.bf16.msra.mxu0 %v13349_v54  ;;  %4742 = vmatpush2.bf16.msra.mxu1 %v13350_v3 }
 0xcf8   : > { %4702 = vmatprep.subr.bf16.mxu0 %v13351_v21  ;;  %4743 = vmatprep.subr.bf16.mxu1 %v13352_v12 }
 0xcfb   : > { %4703 = vmatpush2.bf16.msra.mxu0 %v13353_v28  ;;  %4744 = vmatpush2.bf16.msra.mxu1 %v13354_v42  ;;  %v13439_v42 = vld [vmem:[#allocation176_spill] sm:$0xff] }
 0xcfc   : > { %4704 = vmatprep.subr.bf16.mxu0 %v13355_v35  ;;  %4745 = vmatprep.subr.bf16.mxu1 %v13356_v13  ;;  %v13437_v13 = vld [vmem:[#allocation174_spill] sm:$0xff]  ;;  %v13438_v35 = vld [vmem:[#allocation175_spill] sm:$0xff] }
 0xcff   : > { %4705 = vmatpush2.bf16.msra.mxu0 %v13357_v1  ;;  %4746 = vmatpush2.bf16.msra.mxu1 %v13358_v44 }
 0xd00   : > { %4706 = vmatprep.subr.bf16.mxu0 %v13359_v46  ;;  %4747 = vmatprep.subr.bf16.mxu1 %v13360_v53  ;;  %v13370_v46 = vld [vmem:[#allocation133_spill] sm:$0xff]  ;;  %v13371_v53 = vld [vmem:[#allocation6_spill] sm:$0xff] }
 0xd03   : > { %4707 = vmatpush2.bf16.msra.mxu0 %v13361_v39  ;;  %4748 = vmatpush2.bf16.msra.mxu1 %v13362_v30  ;;  %v13372_v39 = vld [vmem:[#allocation7_spill] sm:$0xff] }
 0xd04   : > { %4708 = vmatprep.subr.bf16.mxu0 %v13363_v41  ;;  %4749 = vmatprep.subr.bf16.mxu1 %v13364_v59  ;;  %v13373_v59 = vld [vmem:[#allocation8_spill] sm:$0xff]  ;;  %v13382_v41 = vld [vmem:[#allocation17_spill] sm:$0xff] }
 0xd07   : > { %4709 = vmatpush2.bf16.msra.mxu0 %v13365_v29  ;;  %4750 = vmatpush2.bf16.msra.mxu1 %v13366_v22  ;;  %v13374_v29 = vld [vmem:[#allocation9_spill] sm:$0xff]  ;;  %v13375_v22 = vld [vmem:[#allocation10_spill] sm:$0xff] }
 0xd08   : > { %4710 = vmatprep.subr.bf16.mxu0 %v13367_v26  ;;  %4751 = vmatprep.subr.bf16.mxu1 %v13368_v31  ;;  %v13376_v26 = vld [vmem:[#allocation11_spill] sm:$0xff]  ;;  %v13377_v31 = vld [vmem:[#allocation12_spill] sm:$0xff] }
 0xd0b   : > { %4711 = vmatpush2.bf16.msra.mxu0 %v13369_v27  ;;  %4752 = vmatpush2.bf16.msra.mxu1 %v13370_v46  ;;  %v13378_v27 = vld [vmem:[#allocation13_spill] sm:$0xff]  ;;  %v13379_v46 = vld [vmem:[#allocation14_spill] sm:$0xff] }
 0xd0c   : > { %4831 = vmatprep.subr.bf16.mxu0 %v13371_v53  ;;  %4872 = vmatprep.subr.bf16.mxu1 %v13372_v39  ;;  %v13380_v53 = vld [vmem:[#allocation15_spill] sm:$0xff]  ;;  %v13381_v39 = vld [vmem:[#allocation16_spill] sm:$0xff] }
 0xd0e   : > { %4713 = vmatmul.mubr.bf16.vlgmr.msra.gmra.mxu0 %v10806_v14  ;;  %4754 = vmatmul.mubr.bf16.vlgmr.msra.gmra.mxu1 %v10806_v14  ;;  %v13383_v14 = vld [vmem:[#allocation18_spill] sm:$0xff] }
 0xd0f   : > { %4832 = vmatpush1.bf16.msra.mxu0 %v13373_v59  ;;  %4873 = vmatpush1.bf16.msra.mxu1 %v13374_v29  ;;  %v13384_v59 = vld [vmem:[#allocation19_spill] sm:$0xff]  ;;  %v13385_v29 = vld [vmem:[#allocation20_spill] sm:$0xff] }
 0xd10   : > { %4833 = vmatprep.subr.bf16.mxu0 %v13375_v22  ;;  %4874 = vmatprep.subr.bf16.mxu1 %v13376_v26  ;;  %v13386_v22 = vld [vmem:[#allocation21_spill] sm:$0xff]  ;;  %v13387_v26 = vld [vmem:[#allocation22_spill] sm:$0xff] }
 0xd13   : > { %4834 = vmatpush1.bf16.msra.mxu0 %v13377_v31  ;;  %4875 = vmatpush1.bf16.msra.mxu1 %v13378_v27  ;;  %v13388_v31 = vld [vmem:[#allocation23_spill] sm:$0xff]  ;;  %v13389_v27 = vld [vmem:[#allocation24_spill] sm:$0xff] }
 0xd14   : > { %4835 = vmatprep.subr.bf16.mxu0 %v13379_v46  ;;  %4876 = vmatprep.subr.bf16.mxu1 %v13380_v53  ;;  %v13390_v46 = vld [vmem:[#allocation25_spill] sm:$0xff]  ;;  %v13391_v53 = vld [vmem:[#allocation26_spill] sm:$0xff] }
 0xd17   : > { %4836 = vmatpush1.bf16.msra.mxu0 %v13381_v39  ;;  %4877 = vmatpush1.bf16.msra.mxu1 %v13382_v41  ;;  %v13392_v39 = vld [vmem:[#allocation27_spill] sm:$0xff]  ;;  %v13393_v41 = vld [vmem:[#allocation28_spill] sm:$0xff] }
 0xd18   : > { %4837 = vmatprep.subr.bf16.mxu0 %v13383_v14  ;;  %4878 = vmatprep.subr.bf16.mxu1 %v13384_v59  ;;  %v13394_v14 = vld [vmem:[#allocation29_spill] sm:$0xff]  ;;  %v13395_v59 = vld [vmem:[#allocation30_spill] sm:$0xff] }
 0xd1b   : > { %4838 = vmatpush1.bf16.msra.mxu0 %v13385_v29  ;;  %4879 = vmatpush1.bf16.msra.mxu1 %v13386_v22  ;;  %v13396_v29 = vld [vmem:[#allocation31_spill] sm:$0xff]  ;;  %v13397_v22 = vld [vmem:[#allocation32_spill] sm:$0xff] }
 0xd1c   : > { %4839 = vmatprep.subr.bf16.mxu0 %v13387_v26  ;;  %4880 = vmatprep.subr.bf16.mxu1 %v13388_v31  ;;  %v13398_v26 = vld [vmem:[#allocation33_spill] sm:$0xff]  ;;  %v13399_v31 = vld [vmem:[#allocation34_spill] sm:$0xff] }
 0xd1f   : > { %4840 = vmatpush1.bf16.msra.mxu0 %v13389_v27  ;;  %4881 = vmatpush1.bf16.msra.mxu1 %v13390_v46  ;;  %v13400_v27 = vld [vmem:[#allocation35_spill] sm:$0xff]  ;;  %v13401_v46 = vld [vmem:[#allocation36_spill] sm:$0xff] }
 0xd20   : > { %4841 = vmatprep.subr.bf16.mxu0 %v13391_v53  ;;  %4882 = vmatprep.subr.bf16.mxu1 %v13392_v39  ;;  %v13402_v53 = vld [vmem:[#allocation37_spill] sm:$0xff]  ;;  %v13403_v39 = vld [vmem:[#allocation38_spill] sm:$0xff] }
 0xd23   : > { %4842 = vmatpush1.bf16.msra.mxu0 %v13393_v41  ;;  %4883 = vmatpush1.bf16.msra.mxu1 %v13394_v14  ;;  %v13404_v41 = vld [vmem:[#allocation39_spill] sm:$0xff]  ;;  %v13405_v14 = vld [vmem:[#allocation40_spill] sm:$0xff] }
 0xd24   : > { %4843 = vmatprep.subr.bf16.mxu0 %v13395_v59  ;;  %4884 = vmatprep.subr.bf16.mxu1 %v13396_v29  ;;  %v13406_v59 = vld [vmem:[#allocation41_spill] sm:$0xff]  ;;  %v13407_v29 = vld [vmem:[#allocation42_spill] sm:$0xff] }
 0xd27   : > { %4844 = vmatpush1.bf16.msra.mxu0 %v13397_v22  ;;  %4885 = vmatpush1.bf16.msra.mxu1 %v13398_v26  ;;  %v13408_v22 = vld [vmem:[#allocation43_spill] sm:$0xff]  ;;  %v13409_v26 = vld [vmem:[#allocation44_spill] sm:$0xff] }
 0xd28   : > { %4845 = vmatprep.subr.bf16.mxu0 %v13399_v31  ;;  %4886 = vmatprep.subr.bf16.mxu1 %v13400_v27  ;;  %v13410_v31 = vld [vmem:[#allocation45_spill] sm:$0xff]  ;;  %v13411_v27 = vld [vmem:[#allocation46_spill] sm:$0xff] }
 0xd2b   : > { %4846 = vmatpush1.bf16.msra.mxu0 %v13401_v46  ;;  %4887 = vmatpush1.bf16.msra.mxu1 %v13402_v53  ;;  %v13412_v46 = vld [vmem:[#allocation47_spill] sm:$0xff]  ;;  %v13413_v53 = vld [vmem:[#allocation48_spill] sm:$0xff] }
 0xd2c   : > { %4847 = vmatprep.subr.bf16.mxu0 %v13403_v39  ;;  %4888 = vmatprep.subr.bf16.mxu1 %v13404_v41  ;;  %v13414_v39 = vld [vmem:[#allocation49_spill] sm:$0xff]  ;;  %v13415_v41 = vld [vmem:[#allocation50_spill] sm:$0xff] }
 0xd2f   : > { %4848 = vmatpush2.bf16.msra.mxu0 %v13405_v14  ;;  %4889 = vmatpush2.bf16.msra.mxu1 %v13406_v59  ;;  %v13416_v14 = vld [vmem:[#allocation51_spill] sm:$0xff]  ;;  %v13417_v59 = vld [vmem:[#allocation52_spill] sm:$0xff] }
 0xd30   : > { %4849 = vmatprep.subr.bf16.mxu0 %v13407_v29  ;;  %4890 = vmatprep.subr.bf16.mxu1 %v13408_v22  ;;  %v13418_v29 = vld [vmem:[#allocation53_spill] sm:$0xff]  ;;  %v13419_v22 = vld [vmem:[#allocation54_spill] sm:$0xff] }
 0xd33   : > { %4850 = vmatpush2.bf16.msra.mxu0 %v13409_v26  ;;  %4891 = vmatpush2.bf16.msra.mxu1 %v13410_v31  ;;  %v13420_v26 = vld [vmem:[#allocation55_spill] sm:$0xff]  ;;  %v13421_v31 = vld [vmem:[#allocation56_spill] sm:$0xff] }
 0xd34   : > { %4851 = vmatprep.subr.bf16.mxu0 %v13411_v27  ;;  %4892 = vmatprep.subr.bf16.mxu1 %v13412_v46  ;;  %v13422_v27 = vld [vmem:[#allocation57_spill] sm:$0xff]  ;;  %v13423_v46 = vld [vmem:[#allocation58_spill] sm:$0xff] }
 0xd37   : > { %4852 = vmatpush2.bf16.msra.mxu0 %v13413_v53  ;;  %4893 = vmatpush2.bf16.msra.mxu1 %v13414_v39  ;;  %v13424_v53 = vld [vmem:[#allocation59_spill] sm:$0xff]  ;;  %v13425_v39 = vld [vmem:[#allocation60_spill] sm:$0xff] }
 0xd38   : > { %4853 = vmatprep.subr.bf16.mxu0 %v13415_v41  ;;  %4894 = vmatprep.subr.bf16.mxu1 %v13416_v14  ;;  %v13426_v41 = vld [vmem:[#allocation61_spill] sm:$0xff]  ;;  %v13427_v14 = vld [vmem:[#allocation62_spill] sm:$0xff] }
 0xd3b   : > { %4854 = vmatpush2.bf16.msra.mxu0 %v13417_v59  ;;  %4895 = vmatpush2.bf16.msra.mxu1 %v13418_v29  ;;  %v13428_v59 = vld [vmem:[#allocation63_spill] sm:$0xff]  ;;  %v13429_v29 = vld [vmem:[#allocation64_spill] sm:$0xff] }
 0xd3c   : > { %4855 = vmatprep.subr.bf16.mxu0 %v13419_v22  ;;  %4896 = vmatprep.subr.bf16.mxu1 %v13420_v26  ;;  %v13430_v22 = vld [vmem:[#allocation65_spill] sm:$0xff]  ;;  %v13431_v26 = vld [vmem:[#allocation66_spill] sm:$0xff] }
 0xd3f   : > { %4856 = vmatpush2.bf16.msra.mxu0 %v13421_v31  ;;  %4897 = vmatpush2.bf16.msra.mxu1 %v13422_v27  ;;  %v13432_v31 = vld [vmem:[#allocation67_spill] sm:$0xff]  ;;  %v13433_v27 = vld [vmem:[#allocation68_spill] sm:$0xff] }
 0xd40   : > { %4857 = vmatprep.subr.bf16.mxu0 %v13423_v46  ;;  %4898 = vmatprep.subr.bf16.mxu1 %v13424_v53  ;;  %v13434_v46 = vld [vmem:[#allocation69_spill] sm:$0xff]  ;;  %v13435_v53 = vld [vmem:[#allocation70_spill] sm:$0xff] }
 0xd43   : > { %4858 = vmatpush2.bf16.msra.mxu0 %v13425_v39  ;;  %4899 = vmatpush2.bf16.msra.mxu1 %v13426_v41  ;;  %v13436_v39 = vld [vmem:[#allocation71_spill] sm:$0xff] }
 0xd44   : > { %4859 = vmatprep.subr.bf16.mxu0 %v13427_v14  ;;  %4900 = vmatprep.subr.bf16.mxu1 %v13428_v59 }
 0xd47   : > { %4860 = vmatpush2.bf16.msra.mxu0 %v13429_v29  ;;  %4901 = vmatpush2.bf16.msra.mxu1 %v13430_v22 }
 0xd48   : > { %4861 = vmatprep.subr.bf16.mxu0 %v13431_v26  ;;  %4902 = vmatprep.subr.bf16.mxu1 %v13432_v31 }
 0xd4b   : > { %4862 = vmatpush2.bf16.msra.mxu0 %v13433_v27  ;;  %4903 = vmatpush2.bf16.msra.mxu1 %v13434_v46  ;;  %v13440_v46 = vld [vmem:[#allocation177_spill] sm:$0xff] }
 0xd4c   : > { %4913 = vmatprep.subr.bf16.mxu0 %v13435_v53  ;;  %4954 = vmatprep.subr.bf16.mxu1 %v13436_v39 }
 0xd8e   : > { %v4632_v41 = vpop.f32.mrf.mxu0  ;;  %v4673_v14 = vpop.f32.mrf.mxu1 }
 0xd8f   : > { %v4762_v26 = vadd.f32 %v4632_v41, %v13437_v13  ;;  %v4764_v31 = vadd.f32 %v4673_v14, %v13438_v35 }
 0xd90   : > { %v4634_v30 = vpop.f32.mrf.mxu0  ;;  %v4675_v59 = vpop.f32.mrf.mxu1 }
 0xd91   : > { %v4763_v27 = vadd.f32 %v4634_v30, %v13439_v42  ;;  %v6867_v28 = vmul.f32 -1.442695, %v4762_v26  ;;  %v4765_v12 = vadd.f32 %v4675_v59, %v13440_v46  ;;  %v6869_v53 = vmul.f32 -1.442695, %v4764_v31  ;;  %v13441_v46 = vld [vmem:[#allocation236_spill] sm:$0xff]  ;;  %v13444_v26 = vld [vmem:[#allocation239_spill] sm:$0xff] }
 0xd92   : > { %v4636_v44 = vpop.f32.mrf.mxu0  ;;  %v4677_v29 = vpop.f32.mrf.mxu1 }
 0xd93   : > { %v6868_v21 = vmul.f32 -1.442695, %v4763_v27  ;;  %7405 = vpow2.f32 %v6867_v28  ;;  %v6870_v39 = vmul.f32 -1.442695, %v4765_v12  ;;  %v13442_v27 = vld [vmem:[#allocation237_spill] sm:$0xff] }
 0xd94   : > { %v4637_v1 = vpop.f32.mrf.mxu0  ;;  %v4678_v22 = vpop.f32.mrf.mxu1  ;;  %7407 = vpow2.f32 %v6869_v53 }
 0xd95   : > { %7409 = vpow2.f32 %v6868_v21 }
 0xd96   : > { %7411 = vpow2.f32 %v6870_v39  ;;  %v13443_v39 = vld [vmem:[#allocation238_spill] sm:$0xff] }
 0xda0   : > { %v7406_v44 = vpop.eup %7405 }
 0xda1   : > { %v7408_v29 = vpop.eup %7407  ;;  %v4776_v22 = vadd.f32 1.0, %v7406_v44 }
 0xda2   : > { %v7410_v1 = vpop.eup %7409  ;;  %v4788_v13 = vadd.f32 1.0, %v7408_v29 }
 0xda3   : > { %v7412_v3 = vpop.eup %7411  ;;  %v4777_v41 = vadd.f32 1.0, %v7410_v1  ;;  %7413 = vrcp.f32 %v4776_v22 }
 0xda4   : > { %v4789_v35 = vadd.f32 1.0, %v7412_v3  ;;  %7415 = vrcp.f32 %v4788_v13 }
 0xda5   : > { %7417 = vrcp.f32 %v4777_v41 }
 0xdb0   : > { %v7414_v13 = vpop.eup %7413 }
 0xdce   : > { %v4714_v42 = vpop.f32.mrf.mxu0  ;;  %v4755_v30 = vpop.f32.mrf.mxu1 }
 0xdcf   : > { %v4766_v31 = vadd.f32 %v4714_v42, %v13441_v46  ;;  %v4768_v28 = vadd.f32 %v4755_v30, %v13442_v27  ;;  %v7416_v42 = vpop.eup %7415 }
 0xdd0   : > { %v4716_v12 = vpop.f32.mrf.mxu0  ;;  %v4757_v21 = vpop.f32.mrf.mxu1 }
 0xdd1   : > { %7419 = vtanh.f32 %v4766_v31  ;;  %v6871_v53 = vmul.f32 -1.442695, %v4768_v28  ;;  %v4767_v59 = vadd.f32 %v4716_v12, %v13443_v39  ;;  %v4769_v14 = vadd.f32 %v4757_v21, %v13444_v26  ;;  %v7418_v41 = vpop.eup %7417 }
 0xdd2   : > { %7421 = vrcp.f32 %v4789_v35  ;;  %v4718_v44 = vpop.f32.mrf.mxu0  ;;  %v4759_v29 = vpop.f32.mrf.mxu1  ;;  %v4808_v31 = vmul.f32 %v7416_v42, %v10799_v49 }
 0xdd3   : > { %7423 = vpow2.f32 %v6871_v53  ;;  %v6872_v3 = vmul.f32 -1.442695, %v4769_v14 }
 0xdd4   : > { %7425 = vtanh.f32 %v4767_v59  ;;  %v4719_v1 = vpop.f32.mrf.mxu0  ;;  %v4760_v22 = vpop.f32.mrf.mxu1 }
 0xdd5   : > { %7427 = vpow2.f32 %v6872_v3 }
 0xdde   : > { %v7420_v30 = vpop.eup %7419 }
 0xddf   : > { %v7422_v46 = vpop.eup %7421  ;;  %v4810_v27 = vmul.f32 %v7420_v30, %v7414_v13  ;;  %v13447_v30 = vld [vmem:[#allocation115_spill] sm:$0xff] }
 0xde0   : > { %v7424_v28 = vpop.eup %7423  ;;  %v4809_v53 = vmul.f32 %v7422_v46, %v10803_v36  ;;  %v13445_v36 = vld [vmem:[#allocation113_spill] sm:$0xff]  ;;  %v13448_v46 = vld [vmem:[#allocation116_spill] sm:$0xff] }
 0xde1   : > { %v7426_v12 = vpop.eup %7425  ;;  %v10949_v21 = vadd.f32 %v4810_v27, %v4808_v31  ;;  %v4802_v35 = vadd.f32 1.0, %v7424_v28  ;;  %v13449_v31 = vld [vmem:[#allocation117_spill] sm:$0xff]  ;;  %v13450_v27 = vld [vmem:[#allocation118_spill] sm:$0xff]  ;;  %v13451_v28 = vld [vmem:[#allocation119_spill] sm:$0xff] }
 0xde2   : > { %v7428_v39 = vpop.eup %7427  ;;  %v4811_v59 = vmul.f32 %v7426_v12, %v7418_v41  ;;  %v13446_v41 = vld [vmem:[#allocation114_spill] sm:$0xff]  ;;  %v13452_v12 = vld [vmem:[#allocation120_spill] sm:$0xff] }
 0xde3   : > { %7429 = vtanh.f32 %v10949_v21  ;;  %v4803_v26 = vadd.f32 1.0, %v7428_v39  ;;  %v13454_v39 = vld [vmem:[#allocation122_spill] sm:$0xff] }
 0xde4   : > { %7431 = vrcp.f32 %v4802_v35  ;;  %v10953_v14 = vadd.f32 %v4811_v59, %v4809_v53  ;;  %v13453_v35 = vld [vmem:[#allocation121_spill] sm:$0xff]  ;;  %v13455_v53 = vld [vmem:[#allocation123_spill] sm:$0xff]  ;;  %v13456_v59 = vld [vmem:[#allocation124_spill] sm:$0xff] }
 0xde5   : > { %7433 = vrcp.f32 %v4803_v26  ;;  %v13457_v26 = vld [vmem:[#allocation125_spill] sm:$0xff] }
 0xde6   : > { %7435 = vtanh.f32 %v10953_v14 }
 0xdf0   : > { %v7430_v49 = vpop.eup %7429 }
 0xdf1   : > { %v7432_v44 = vpop.eup %7431 }
 0xdf2   : > { %v7434_v29 = vpop.eup %7433  ;;  %v4816_v1 = vmul.f32 %v7432_v44, %v7430_v49  ;;  %v13458_v49 = vld [vmem:[#allocation126_spill] sm:$0xff]  ;;  %v13459_v44 = vld [vmem:[#allocation127_spill] sm:$0xff] }
 0xdf3   : > { %v7436_v3 = vpop.eup %7435 }
 0xdf4   : > { %v4817_v22 = vmul.f32 %v7436_v3, %v7434_v29  ;;  %v10956_v42 = vpack.c.bf16 %v4816_v1, %v4816_v1  ;;  %v13460_v29 = vld [vmem:[#allocation128_spill] sm:$0xff]  ;;  %v13461_v3 = vld [vmem:[#allocation129_spill] sm:$0xff]  ;;  %v13462_v1 = vld [vmem:[#allocation130_spill] sm:$0xff] }
 0xdf6   : > { %v4830_v13 = vpack.c.bf16 %v4817_v22, %v4817_v22  ;;  %v13463_v22 = vld [vmem:[#allocation131_spill] sm:$0xff] }
 0xdf8   : > { %4863 = vmatprep.mubr.bf16.mxu0 %v4830_v13  ;;  %4904 = vmatprep.mubr.bf16.mxu1 %v4830_v13 }
 0xdf9   : > { %4864 = vmatmul.mubr.bf16.vlgmr.msra.gmra.mxu0 %v10956_v42  ;;  %4905 = vmatmul.mubr.bf16.vlgmr.msra.gmra.mxu1 %v10956_v42 }
 0xdfa   : > { %4914 = vmatpush1.bf16.msra.mxu0 %v12462_v11  ;;  %4955 = vmatpush1.bf16.msra.mxu1 %v12463_v63 }
 0xdfb   : > { %4945 = vmatprep.mubr.bf16.mxu0 %v4830_v13  ;;  %4986 = vmatprep.mubr.bf16.mxu1 %v4830_v13  ;;  %v13464_v13 = vld [vmem:[#allocation132_spill] sm:$0xff] }
 0xdfc   : > { %4915 = vmatprep.subr.bf16.mxu0 %v12464_v60  ;;  %4956 = vmatprep.subr.bf16.mxu1 %v12465_v10 }
 0xdfe   : > { %4916 = vmatpush1.bf16.msra.mxu0 %v12466_v15  ;;  %4957 = vmatpush1.bf16.msra.mxu1 %v12467_v61 }
 0xdff   : > { %4917 = vmatprep.subr.bf16.mxu0 %v12468_v52  ;;  %4958 = vmatprep.subr.bf16.mxu1 %v12469_v0 }
 0xe02   : > { %4918 = vmatpush1.bf16.msra.mxu0 %v12470_v38  ;;  %4959 = vmatpush1.bf16.msra.mxu1 %v12471_v45 }
 0xe03   : > { %4919 = vmatprep.subr.bf16.mxu0 %v12472_v51  ;;  %4960 = vmatprep.subr.bf16.mxu1 %v12473_v16 }
 0xe06   : > { %4920 = vmatpush1.bf16.msra.mxu0 %v12564_v62  ;;  %4961 = vmatpush1.bf16.msra.mxu1 %v12565_v23 }
 0xe07   : > { %4921 = vmatprep.subr.bf16.mxu0 %v12566_v34  ;;  %4962 = vmatprep.subr.bf16.mxu1 %v12567_v57 }
 0xe0a   : > { %4922 = vmatpush1.bf16.msra.mxu0 %v12568_v4  ;;  %4963 = vmatpush1.bf16.msra.mxu1 %v12569_v24 }
 0xe0b   : > { %4923 = vmatprep.subr.bf16.mxu0 %v12570_v37  ;;  %4964 = vmatprep.subr.bf16.mxu1 %v12571_v33 }
 0xe0e   : > { %4924 = vmatpush1.bf16.msra.mxu0 %v12572_v40  ;;  %4965 = vmatpush1.bf16.msra.mxu1 %v12573_v19 }
 0xe0f   : > { %4925 = vmatprep.subr.bf16.mxu0 %v12574_v47  ;;  %4966 = vmatprep.subr.bf16.mxu1 %v12661_v20 }
 0xe12   : > { %4926 = vmatpush1.bf16.msra.mxu0 %v12662_v48  ;;  %4967 = vmatpush1.bf16.msra.mxu1 %v12663_v58 }
 0xe13   : > { %4927 = vmatprep.subr.bf16.mxu0 %v12664_v7  ;;  %4968 = vmatprep.subr.bf16.mxu1 %v12665_v5 }
 0xe16   : > { %4928 = vmatpush1.bf16.msra.mxu0 %v12666_v6  ;;  %4969 = vmatpush1.bf16.msra.mxu1 %v12667_v25 }
 0xe17   : > { %4929 = vmatprep.subr.bf16.mxu0 %v12668_v8  ;;  %4970 = vmatprep.subr.bf16.mxu1 %v12583_v9 }
 0xe1a   : > { %4930 = vmatpush2.bf16.msra.mxu0 %v12584_v32  ;;  %4971 = vmatpush2.bf16.msra.mxu1 %v12585_v2 }
 0xe1b   : > { %4931 = vmatprep.subr.bf16.mxu0 %v12586_v43  ;;  %4972 = vmatprep.subr.bf16.mxu1 %v12587_v18 }
 0xe1e   : > { %4932 = vmatpush2.bf16.msra.mxu0 %v12588_v56  ;;  %4973 = vmatpush2.bf16.msra.mxu1 %v12589_v55 }
 0xe1f   : > { %4933 = vmatprep.subr.bf16.mxu0 %v12669_v17  ;;  %4974 = vmatprep.subr.bf16.mxu1 %v13348_v50 }
 0xe22   : > { %4934 = vmatpush2.bf16.msra.mxu0 %v13349_v54  ;;  %4975 = vmatpush2.bf16.msra.mxu1 %v13445_v36 }
 0xe23   : > { %4935 = vmatprep.subr.bf16.mxu0 %v13446_v41  ;;  %4976 = vmatprep.subr.bf16.mxu1 %v13447_v30  ;;  %v13537_v30 = vld [vmem:[#allocation181_spill] sm:$0xff] }
 0xe26   : > { %4936 = vmatpush2.bf16.msra.mxu0 %v13448_v46  ;;  %4977 = vmatpush2.bf16.msra.mxu1 %v13449_v31 }
 0xe27   : > { %4937 = vmatprep.subr.bf16.mxu0 %v13450_v27  ;;  %4978 = vmatprep.subr.bf16.mxu1 %v13451_v28  ;;  %v13532_v28 = vld [vmem:[#allocation141_spill] sm:$0xff] }
 0xe2a   : > { %4938 = vmatpush2.bf16.msra.mxu0 %v13452_v12  ;;  %4979 = vmatpush2.bf16.msra.mxu1 %v13453_v35 }
 0xe2b   : > { %4939 = vmatprep.subr.bf16.mxu0 %v13454_v39  ;;  %4980 = vmatprep.subr.bf16.mxu1 %v13455_v53  ;;  %v13465_v39 = vld [vmem:[#allocation133_spill] sm:$0xff]  ;;  %v13466_v53 = vld [vmem:[#allocation6_spill] sm:$0xff] }
 0xe2e   : > { %4940 = vmatpush2.bf16.msra.mxu0 %v13456_v59  ;;  %4981 = vmatpush2.bf16.msra.mxu1 %v13457_v26  ;;  %v13467_v59 = vld [vmem:[#allocation7_spill] sm:$0xff] }
 0xe2f   : > { %4941 = vmatprep.subr.bf16.mxu0 %v13458_v49  ;;  %4982 = vmatprep.subr.bf16.mxu1 %v13459_v44  ;;  %v13468_v44 = vld [vmem:[#allocation8_spill] sm:$0xff]  ;;  %v13477_v49 = vld [vmem:[#allocation17_spill] sm:$0xff] }
 0xe32   : > { %4942 = vmatpush2.bf16.msra.mxu0 %v13460_v29  ;;  %4983 = vmatpush2.bf16.msra.mxu1 %v13461_v3  ;;  %v13469_v29 = vld [vmem:[#allocation9_spill] sm:$0xff]  ;;  %v13470_v3 = vld [vmem:[#allocation10_spill] sm:$0xff] }
 0xe33   : > { %4943 = vmatprep.subr.bf16.mxu0 %v13462_v1  ;;  %4984 = vmatprep.subr.bf16.mxu1 %v13463_v22  ;;  %v13471_v1 = vld [vmem:[#allocation11_spill] sm:$0xff]  ;;  %v13472_v22 = vld [vmem:[#allocation12_spill] sm:$0xff] }
 0xe36   : > { %4944 = vmatpush2.bf16.msra.mxu0 %v13464_v13  ;;  %4985 = vmatpush2.bf16.msra.mxu1 %v13465_v39  ;;  %v13473_v13 = vld [vmem:[#allocation13_spill] sm:$0xff]  ;;  %v13474_v39 = vld [vmem:[#allocation14_spill] sm:$0xff] }
 0xe37   : > { %5064 = vmatprep.subr.bf16.mxu0 %v13466_v53  ;;  %5105 = vmatprep.subr.bf16.mxu1 %v13467_v59  ;;  %v13475_v53 = vld [vmem:[#allocation15_spill] sm:$0xff]  ;;  %v13476_v59 = vld [vmem:[#allocation16_spill] sm:$0xff] }
 0xe39   : > { %4946 = vmatmul.mubr.bf16.vlgmr.msra.gmra.mxu0 %v10956_v42  ;;  %4987 = vmatmul.mubr.bf16.vlgmr.msra.gmra.mxu1 %v10956_v42  ;;  %v13478_v42 = vld [vmem:[#allocation18_spill] sm:$0xff] }
 0xe3a   : > { %5065 = vmatpush1.bf16.msra.mxu0 %v13468_v44  ;;  %5106 = vmatpush1.bf16.msra.mxu1 %v13469_v29  ;;  %v13479_v44 = vld [vmem:[#allocation19_spill] sm:$0xff]  ;;  %v13480_v29 = vld [vmem:[#allocation20_spill] sm:$0xff] }
 0xe3b   : > { %5066 = vmatprep.subr.bf16.mxu0 %v13470_v3  ;;  %5107 = vmatprep.subr.bf16.mxu1 %v13471_v1  ;;  %v13481_v3 = vld [vmem:[#allocation21_spill] sm:$0xff]  ;;  %v13482_v1 = vld [vmem:[#allocation22_spill] sm:$0xff] }
 0xe3e   : > { %5067 = vmatpush1.bf16.msra.mxu0 %v13472_v22  ;;  %5108 = vmatpush1.bf16.msra.mxu1 %v13473_v13  ;;  %v13483_v22 = vld [vmem:[#allocation23_spill] sm:$0xff]  ;;  %v13484_v13 = vld [vmem:[#allocation24_spill] sm:$0xff] }
 0xe3f   : > { %5068 = vmatprep.subr.bf16.mxu0 %v13474_v39  ;;  %5109 = vmatprep.subr.bf16.mxu1 %v13475_v53  ;;  %v13485_v39 = vld [vmem:[#allocation25_spill] sm:$0xff]  ;;  %v13486_v53 = vld [vmem:[#allocation26_spill] sm:$0xff] }
 0xe42   : > { %5069 = vmatpush1.bf16.msra.mxu0 %v13476_v59  ;;  %5110 = vmatpush1.bf16.msra.mxu1 %v13477_v49  ;;  %v13487_v59 = vld [vmem:[#allocation27_spill] sm:$0xff]  ;;  %v13488_v49 = vld [vmem:[#allocation28_spill] sm:$0xff] }
 0xe43   : > { %5070 = vmatprep.subr.bf16.mxu0 %v13478_v42  ;;  %5111 = vmatprep.subr.bf16.mxu1 %v13479_v44  ;;  %v13489_v42 = vld [vmem:[#allocation29_spill] sm:$0xff]  ;;  %v13490_v44 = vld [vmem:[#allocation30_spill] sm:$0xff] }
 0xe46   : > { %5071 = vmatpush1.bf16.msra.mxu0 %v13480_v29  ;;  %5112 = vmatpush1.bf16.msra.mxu1 %v13481_v3  ;;  %v13491_v29 = vld [vmem:[#allocation31_spill] sm:$0xff]  ;;  %v13492_v3 = vld [vmem:[#allocation32_spill] sm:$0xff] }
 0xe47   : > { %5072 = vmatprep.subr.bf16.mxu0 %v13482_v1  ;;  %5113 = vmatprep.subr.bf16.mxu1 %v13483_v22  ;;  %v13493_v1 = vld [vmem:[#allocation33_spill] sm:$0xff]  ;;  %v13494_v22 = vld [vmem:[#allocation34_spill] sm:$0xff] }
 0xe4a   : > { %5073 = vmatpush1.bf16.msra.mxu0 %v13484_v13  ;;  %5114 = vmatpush1.bf16.msra.mxu1 %v13485_v39  ;;  %v13495_v13 = vld [vmem:[#allocation35_spill] sm:$0xff]  ;;  %v13496_v39 = vld [vmem:[#allocation36_spill] sm:$0xff] }
 0xe4b   : > { %5074 = vmatprep.subr.bf16.mxu0 %v13486_v53  ;;  %5115 = vmatprep.subr.bf16.mxu1 %v13487_v59  ;;  %v13497_v53 = vld [vmem:[#allocation37_spill] sm:$0xff]  ;;  %v13498_v59 = vld [vmem:[#allocation38_spill] sm:$0xff] }
 0xe4e   : > { %5075 = vmatpush1.bf16.msra.mxu0 %v13488_v49  ;;  %5116 = vmatpush1.bf16.msra.mxu1 %v13489_v42  ;;  %v13499_v49 = vld [vmem:[#allocation39_spill] sm:$0xff]  ;;  %v13500_v42 = vld [vmem:[#allocation40_spill] sm:$0xff] }
 0xe4f   : > { %5076 = vmatprep.subr.bf16.mxu0 %v13490_v44  ;;  %5117 = vmatprep.subr.bf16.mxu1 %v13491_v29  ;;  %v13501_v44 = vld [vmem:[#allocation41_spill] sm:$0xff]  ;;  %v13502_v29 = vld [vmem:[#allocation42_spill] sm:$0xff] }
 0xe52   : > { %5077 = vmatpush1.bf16.msra.mxu0 %v13492_v3  ;;  %5118 = vmatpush1.bf16.msra.mxu1 %v13493_v1  ;;  %v13503_v3 = vld [vmem:[#allocation43_spill] sm:$0xff]  ;;  %v13504_v1 = vld [vmem:[#allocation44_spill] sm:$0xff] }
 0xe53   : > { %5078 = vmatprep.subr.bf16.mxu0 %v13494_v22  ;;  %5119 = vmatprep.subr.bf16.mxu1 %v13495_v13  ;;  %v13505_v22 = vld [vmem:[#allocation45_spill] sm:$0xff]  ;;  %v13506_v13 = vld [vmem:[#allocation46_spill] sm:$0xff] }
 0xe56   : > { %5079 = vmatpush1.bf16.msra.mxu0 %v13496_v39  ;;  %5120 = vmatpush1.bf16.msra.mxu1 %v13497_v53  ;;  %v13507_v39 = vld [vmem:[#allocation47_spill] sm:$0xff]  ;;  %v13508_v53 = vld [vmem:[#allocation48_spill] sm:$0xff] }
 0xe57   : > { %5080 = vmatprep.subr.bf16.mxu0 %v13498_v59  ;;  %5121 = vmatprep.subr.bf16.mxu1 %v13499_v49  ;;  %v13509_v59 = vld [vmem:[#allocation49_spill] sm:$0xff]  ;;  %v13510_v49 = vld [vmem:[#allocation50_spill] sm:$0xff] }
 0xe5a   : > { %5081 = vmatpush2.bf16.msra.mxu0 %v13500_v42  ;;  %5122 = vmatpush2.bf16.msra.mxu1 %v13501_v44  ;;  %v13511_v42 = vld [vmem:[#allocation51_spill] sm:$0xff]  ;;  %v13512_v44 = vld [vmem:[#allocation52_spill] sm:$0xff] }
 0xe5b   : > { %5082 = vmatprep.subr.bf16.mxu0 %v13502_v29  ;;  %5123 = vmatprep.subr.bf16.mxu1 %v13503_v3  ;;  %v13513_v29 = vld [vmem:[#allocation53_spill] sm:$0xff]  ;;  %v13514_v3 = vld [vmem:[#allocation54_spill] sm:$0xff] }
 0xe5e   : > { %5083 = vmatpush2.bf16.msra.mxu0 %v13504_v1  ;;  %5124 = vmatpush2.bf16.msra.mxu1 %v13505_v22  ;;  %v13515_v1 = vld [vmem:[#allocation55_spill] sm:$0xff]  ;;  %v13516_v22 = vld [vmem:[#allocation56_spill] sm:$0xff] }
 0xe5f   : > { %5084 = vmatprep.subr.bf16.mxu0 %v13506_v13  ;;  %5125 = vmatprep.subr.bf16.mxu1 %v13507_v39  ;;  %v13517_v13 = vld [vmem:[#allocation57_spill] sm:$0xff]  ;;  %v13518_v39 = vld [vmem:[#allocation58_spill] sm:$0xff] }
 0xe62   : > { %5085 = vmatpush2.bf16.msra.mxu0 %v13508_v53  ;;  %5126 = vmatpush2.bf16.msra.mxu1 %v13509_v59  ;;  %v13519_v53 = vld [vmem:[#allocation59_spill] sm:$0xff]  ;;  %v13520_v59 = vld [vmem:[#allocation60_spill] sm:$0xff] }
 0xe63   : > { %5086 = vmatprep.subr.bf16.mxu0 %v13510_v49  ;;  %5127 = vmatprep.subr.bf16.mxu1 %v13511_v42  ;;  %v13521_v49 = vld [vmem:[#allocation61_spill] sm:$0xff]  ;;  %v13522_v42 = vld [vmem:[#allocation62_spill] sm:$0xff] }
 0xe66   : > { %5087 = vmatpush2.bf16.msra.mxu0 %v13512_v44  ;;  %5128 = vmatpush2.bf16.msra.mxu1 %v13513_v29  ;;  %v13523_v44 = vld [vmem:[#allocation63_spill] sm:$0xff]  ;;  %v13524_v29 = vld [vmem:[#allocation64_spill] sm:$0xff] }
 0xe67   : > { %5088 = vmatprep.subr.bf16.mxu0 %v13514_v3  ;;  %5129 = vmatprep.subr.bf16.mxu1 %v13515_v1  ;;  %v13525_v3 = vld [vmem:[#allocation65_spill] sm:$0xff]  ;;  %v13526_v1 = vld [vmem:[#allocation66_spill] sm:$0xff] }
 0xe6a   : > { %5089 = vmatpush2.bf16.msra.mxu0 %v13516_v22  ;;  %5130 = vmatpush2.bf16.msra.mxu1 %v13517_v13  ;;  %v13527_v22 = vld [vmem:[#allocation67_spill] sm:$0xff]  ;;  %v13528_v13 = vld [vmem:[#allocation68_spill] sm:$0xff] }
 0xe6b   : > { %5090 = vmatprep.subr.bf16.mxu0 %v13518_v39  ;;  %5131 = vmatprep.subr.bf16.mxu1 %v13519_v53  ;;  %v13529_v39 = vld [vmem:[#allocation69_spill] sm:$0xff]  ;;  %v13530_v53 = vld [vmem:[#allocation70_spill] sm:$0xff] }
 0xe6e   : > { %5091 = vmatpush2.bf16.msra.mxu0 %v13520_v59  ;;  %5132 = vmatpush2.bf16.msra.mxu1 %v13521_v49  ;;  %v13531_v59 = vld [vmem:[#allocation71_spill] sm:$0xff] }
 0xe6f   : > { %5092 = vmatprep.subr.bf16.mxu0 %v13522_v42  ;;  %5133 = vmatprep.subr.bf16.mxu1 %v13523_v44 }
 0xe72   : > { %5093 = vmatpush2.bf16.msra.mxu0 %v13524_v29  ;;  %5134 = vmatpush2.bf16.msra.mxu1 %v13525_v3 }
 0xe73   : > { %5094 = vmatprep.subr.bf16.mxu0 %v13526_v1  ;;  %5135 = vmatprep.subr.bf16.mxu1 %v13527_v22  ;;  %v13533_v1 = vld [vmem:[#allocation180_spill] sm:$0xff]  ;;  %v13534_v22 = vld [vmem:[#allocation178_spill] sm:$0xff] }
 0xe74   : > { %v1000_v27 = vadd.f32 %v13533_v1, %v13532_v28  ;;  %v13539_v28 = vld [vmem:[#allocation242_spill] sm:$0xff] }
 0xe76   : > { %5095 = vmatpush2.bf16.msra.mxu0 %v13528_v13  ;;  %5136 = vmatpush2.bf16.msra.mxu1 %v13529_v39  ;;  %v13535_v13 = vld [vmem:[#allocation179_spill] sm:$0xff] }
 0xe77   : > { %5146 = vmatprep.subr.bf16.mxu0 %v13530_v53  ;;  %5187 = vmatprep.subr.bf16.mxu1 %v13531_v59  ;;  %v13536_v39 = vld [vmem:[#allocation135_spill] sm:$0xff] }
 0xe78   : > { %v1113_v53 = vadd.f32 %v13537_v30, %v13536_v39  ;;  %v13565_v39 = vld [vmem:[#allocation132_spill] sm:$0xff] }
 0xeb9   : > { %v4865_v49 = vpop.f32.mrf.mxu0  ;;  %v4906_v42 = vpop.f32.mrf.mxu1 }
 0xeba   : > { %v4995_v31 = vadd.f32 %v4865_v49, %v13534_v22  ;;  %v4997_v46 = vadd.f32 %v4906_v42, %v13535_v13  ;;  %v13538_v42 = vld [vmem:[#allocation198_spill] sm:$0xff] }
 0xebb   : > { %v4867_v26 = vpop.f32.mrf.mxu0  ;;  %v4908_v44 = vpop.f32.mrf.mxu1  ;;  %v1226_v30 = vadd.f32 %v13539_v28, %v13538_v42 }
 0xebc   : > { %v4996_v41 = vadd.f32 %v4867_v26, %v1000_v27  ;;  %v6873_v59 = vmul.f32 -1.442695, %v4995_v31  ;;  %v4998_v36 = vadd.f32 %v4908_v44, %v1113_v53  ;;  %v6875_v54 = vmul.f32 -1.442695, %v4997_v46  ;;  %v13541_v53 = vld [vmem:[#allocation243_spill] sm:$0xff] }
 0xebd   : > { %v4869_v35 = vpop.f32.mrf.mxu0  ;;  %v4910_v29 = vpop.f32.mrf.mxu1 }
 0xebe   : > { %v6874_v50 = vmul.f32 -1.442695, %v4996_v41  ;;  %7437 = vpow2.f32 %v6873_v59  ;;  %v6876_v35 = vmul.f32 -1.442695, %v4998_v36  ;;  %v13540_v41 = vld [vmem:[#allocation199_spill] sm:$0xff]  ;;  %v13543_v59 = vld [vmem:[#allocation241_spill] sm:$0xff] }
 0xebf   : > { %v4870_v12 = vpop.f32.mrf.mxu0  ;;  %v4911_v3 = vpop.f32.mrf.mxu1  ;;  %7439 = vpow2.f32 %v6875_v54  ;;  %v1339_v36 = vadd.f32 %v13541_v53, %v13540_v41  ;;  %v13564_v41 = vld [vmem:[#allocation131_spill] sm:$0xff] }
 0xec0   : > { %7441 = vpow2.f32 %v6874_v50  ;;  %v13542_v50 = vld [vmem:[#allocation240_spill] sm:$0xff] }
 0xec1   : > { %7443 = vpow2.f32 %v6876_v35 }
 0xecb   : > { %v7438_v12 = vpop.eup %7437 }
 0xecc   : > { %v7440_v29 = vpop.eup %7439  ;;  %v5009_v1 = vadd.f32 1.0, %v7438_v12 }
 0xecd   : > { %v7442_v3 = vpop.eup %7441  ;;  %v5021_v22 = vadd.f32 1.0, %v7440_v29 }
 0xece   : > { %v7444_v49 = vpop.eup %7443  ;;  %v5010_v13 = vadd.f32 1.0, %v7442_v3  ;;  %7445 = vrcp.f32 %v5009_v1 }
 0xecf   : > { %v5022_v31 = vadd.f32 1.0, %v7444_v49  ;;  %7447 = vrcp.f32 %v5021_v22 }
 0xed0   : > { %7449 = vrcp.f32 %v5010_v13 }
 0xedb   : > { %v7446_v22 = vpop.eup %7445 }
 0xef9   : > { %v4947_v27 = vpop.f32.mrf.mxu0  ;;  %v4988_v46 = vpop.f32.mrf.mxu1 }
 0xefa   : > { %v4999_v54 = vadd.f32 %v4947_v27, %v13542_v50  ;;  %v5001_v26 = vadd.f32 %v4988_v46, %v13543_v59  ;;  %v7448_v27 = vpop.eup %7447 }
 0xefb   : > { %v4949_v44 = vpop.f32.mrf.mxu0  ;;  %v4990_v35 = vpop.f32.mrf.mxu1  ;;  %v5041_v59 = vmul.f32 %v7448_v27, %v10949_v21 }
 0xefc   : > { %7451 = vtanh.f32 %v4999_v54  ;;  %v6877_v12 = vmul.f32 -1.442695, %v5001_v26  ;;  %v5000_v29 = vadd.f32 %v4949_v44, %v1226_v30  ;;  %v5002_v3 = vadd.f32 %v4990_v35, %v1339_v36  ;;  %v7450_v50 = vpop.eup %7449 }
 0xefd   : > { %7453 = vrcp.f32 %v5022_v31  ;;  %v4951_v28 = vpop.f32.mrf.mxu0  ;;  %v4992_v1 = vpop.f32.mrf.mxu1 }
 0xefe   : > { %7455 = vpow2.f32 %v6877_v12  ;;  %v6878_v49 = vmul.f32 -1.442695, %v5002_v3 }
 0xeff   : > { %7457 = vtanh.f32 %v5000_v29  ;;  %v4952_v42 = vpop.f32.mrf.mxu0  ;;  %v4993_v53 = vpop.f32.mrf.mxu1 }
 0xf00   : > { %7459 = vpow2.f32 %v6878_v49 }
 0xf09   : > { %v7452_v46 = vpop.eup %7451 }
 0xf0a   : > { %v7454_v13 = vpop.eup %7453  ;;  %v5043_v54 = vmul.f32 %v7452_v46, %v7446_v22  ;;  %v13546_v46 = vld [vmem:[#allocation113_spill] sm:$0xff] }
 0xf0b   : > { %v7456_v26 = vpop.eup %7455  ;;  %v5042_v35 = vmul.f32 %v7454_v13, %v10953_v14  ;;  %v13544_v14 = vld [vmem:[#allocation111_spill] sm:$0xff]  ;;  %v13547_v13 = vld [vmem:[#allocation114_spill] sm:$0xff] }
 0xf0c   : > { %v7458_v30 = vpop.eup %7457  ;;  %v11103_v36 = vadd.f32 %v5043_v54, %v5041_v59  ;;  %v5035_v31 = vadd.f32 1.0, %v7456_v26  ;;  %v13548_v59 = vld [vmem:[#allocation115_spill] sm:$0xff]  ;;  %v13549_v54 = vld [vmem:[#allocation116_spill] sm:$0xff]  ;;  %v13550_v26 = vld [vmem:[#allocation117_spill] sm:$0xff] }
 0xf0d   : > { %v7460_v44 = vpop.eup %7459  ;;  %v5044_v12 = vmul.f32 %v7458_v30, %v7450_v50  ;;  %v13545_v50 = vld [vmem:[#allocation112_spill] sm:$0xff]  ;;  %v13551_v30 = vld [vmem:[#allocation118_spill] sm:$0xff] }
 0xf0e   : > { %7461 = vtanh.f32 %v11103_v36  ;;  %v5036_v42 = vadd.f32 1.0, %v7460_v44  ;;  %v13553_v44 = vld [vmem:[#allocation120_spill] sm:$0xff] }
 0xf0f   : > { %7463 = vrcp.f32 %v5035_v31  ;;  %v11107_v29 = vadd.f32 %v5044_v12, %v5042_v35  ;;  %v13552_v31 = vld [vmem:[#allocation119_spill] sm:$0xff]  ;;  %v13554_v35 = vld [vmem:[#allocation121_spill] sm:$0xff]  ;;  %v13555_v12 = vld [vmem:[#allocation122_spill] sm:$0xff] }
 0xf10   : > { %7465 = vrcp.f32 %v5036_v42  ;;  %v13556_v42 = vld [vmem:[#allocation123_spill] sm:$0xff] }
 0xf11   : > { %7467 = vtanh.f32 %v11107_v29 }
 0xf1b   : > { %v7462_v21 = vpop.eup %7461 }
 0xf1c   : > { %v7464_v3 = vpop.eup %7463 }
 0xf1d   : > { %v7466_v28 = vpop.eup %7465  ;;  %v5049_v49 = vmul.f32 %v7464_v3, %v7462_v21  ;;  %v13557_v21 = vld [vmem:[#allocation124_spill] sm:$0xff]  ;;  %v13558_v3 = vld [vmem:[#allocation125_spill] sm:$0xff] }
 0xf1e   : > { %v7468_v1 = vpop.eup %7467 }
 0xf1f   : > { %v5050_v53 = vmul.f32 %v7468_v1, %v7466_v28  ;;  %v11110_v27 = vpack.c.bf16 %v5049_v49, %v5049_v49  ;;  %v13559_v28 = vld [vmem:[#allocation126_spill] sm:$0xff]  ;;  %v13560_v1 = vld [vmem:[#allocation127_spill] sm:$0xff]  ;;  %v13561_v49 = vld [vmem:[#allocation128_spill] sm:$0xff] }
 0xf21   : > { %v5063_v22 = vpack.c.bf16 %v5050_v53, %v5050_v53  ;;  %v13562_v53 = vld [vmem:[#allocation129_spill] sm:$0xff] }
 0xf23   : > { %5096 = vmatprep.mubr.bf16.mxu0 %v5063_v22  ;;  %5137 = vmatprep.mubr.bf16.mxu1 %v5063_v22 }
 0xf24   : > { %5097 = vmatmul.mubr.bf16.vlgmr.msra.gmra.mxu0 %v11110_v27  ;;  %5138 = vmatmul.mubr.bf16.vlgmr.msra.gmra.mxu1 %v11110_v27 }
 0xf25   : > { %5147 = vmatpush1.bf16.msra.mxu0 %v12462_v11  ;;  %5188 = vmatpush1.bf16.msra.mxu1 %v12463_v63 }
 0xf26   : > { %5178 = vmatprep.mubr.bf16.mxu0 %v5063_v22  ;;  %5219 = vmatprep.mubr.bf16.mxu1 %v5063_v22  ;;  %v13563_v22 = vld [vmem:[#allocation130_spill] sm:$0xff] }
 0xf27   : > { %5148 = vmatprep.subr.bf16.mxu0 %v12464_v60  ;;  %5189 = vmatprep.subr.bf16.mxu1 %v12465_v10 }
 0xf29   : > { %5149 = vmatpush1.bf16.msra.mxu0 %v12466_v15  ;;  %5190 = vmatpush1.bf16.msra.mxu1 %v12467_v61 }
 0xf2a   : > { %5150 = vmatprep.subr.bf16.mxu0 %v12468_v52  ;;  %5191 = vmatprep.subr.bf16.mxu1 %v12469_v0 }
 0xf2d   : > { %5151 = vmatpush1.bf16.msra.mxu0 %v12470_v38  ;;  %5192 = vmatpush1.bf16.msra.mxu1 %v12471_v45 }
 0xf2e   : > { %5152 = vmatprep.subr.bf16.mxu0 %v12472_v51  ;;  %5193 = vmatprep.subr.bf16.mxu1 %v12473_v16 }
 0xf31   : > { %5153 = vmatpush1.bf16.msra.mxu0 %v12564_v62  ;;  %5194 = vmatpush1.bf16.msra.mxu1 %v12565_v23 }
 0xf32   : > { %5154 = vmatprep.subr.bf16.mxu0 %v12566_v34  ;;  %5195 = vmatprep.subr.bf16.mxu1 %v12567_v57 }
 0xf35   : > { %5155 = vmatpush1.bf16.msra.mxu0 %v12568_v4  ;;  %5196 = vmatpush1.bf16.msra.mxu1 %v12569_v24 }
 0xf36   : > { %5156 = vmatprep.subr.bf16.mxu0 %v12570_v37  ;;  %5197 = vmatprep.subr.bf16.mxu1 %v12571_v33 }
 0xf39   : > { %5157 = vmatpush1.bf16.msra.mxu0 %v12572_v40  ;;  %5198 = vmatpush1.bf16.msra.mxu1 %v12573_v19 }
 0xf3a   : > { %5158 = vmatprep.subr.bf16.mxu0 %v12574_v47  ;;  %5199 = vmatprep.subr.bf16.mxu1 %v12661_v20 }
 0xf3d   : > { %5159 = vmatpush1.bf16.msra.mxu0 %v12662_v48  ;;  %5200 = vmatpush1.bf16.msra.mxu1 %v12663_v58 }
 0xf3e   : > { %5160 = vmatprep.subr.bf16.mxu0 %v12664_v7  ;;  %5201 = vmatprep.subr.bf16.mxu1 %v12665_v5 }
 0xf41   : > { %5161 = vmatpush1.bf16.msra.mxu0 %v12666_v6  ;;  %5202 = vmatpush1.bf16.msra.mxu1 %v12667_v25 }
 0xf42   : > { %5162 = vmatprep.subr.bf16.mxu0 %v12668_v8  ;;  %5203 = vmatprep.subr.bf16.mxu1 %v12583_v9 }
 0xf45   : > { %5163 = vmatpush2.bf16.msra.mxu0 %v12584_v32  ;;  %5204 = vmatpush2.bf16.msra.mxu1 %v12585_v2 }
 0xf46   : > { %5164 = vmatprep.subr.bf16.mxu0 %v12586_v43  ;;  %5205 = vmatprep.subr.bf16.mxu1 %v12587_v18 }
 0xf49   : > { %5165 = vmatpush2.bf16.msra.mxu0 %v12588_v56  ;;  %5206 = vmatpush2.bf16.msra.mxu1 %v12589_v55 }
 0xf4a   : > { %5166 = vmatprep.subr.bf16.mxu0 %v12669_v17  ;;  %5207 = vmatprep.subr.bf16.mxu1 %v13544_v14 }
 0xf4d   : > { %5167 = vmatpush2.bf16.msra.mxu0 %v13545_v50  ;;  %5208 = vmatpush2.bf16.msra.mxu1 %v13546_v46 }
 0xf4e   : > { %5168 = vmatprep.subr.bf16.mxu0 %v13547_v13  ;;  %5209 = vmatprep.subr.bf16.mxu1 %v13548_v59 }
 0xf51   : > { %5169 = vmatpush2.bf16.msra.mxu0 %v13549_v54  ;;  %5210 = vmatpush2.bf16.msra.mxu1 %v13550_v26  ;;  %v13635_v26 = vld [vmem:[#allocation184_spill] sm:$0xff] }
 0xf52   : > { %5170 = vmatprep.subr.bf16.mxu0 %v13551_v30  ;;  %5211 = vmatprep.subr.bf16.mxu1 %v13552_v31  ;;  %v13633_v31 = vld [vmem:[#allocation182_spill] sm:$0xff]  ;;  %v13634_v30 = vld [vmem:[#allocation183_spill] sm:$0xff] }
 0xf55   : > { %5171 = vmatpush2.bf16.msra.mxu0 %v13553_v44  ;;  %5212 = vmatpush2.bf16.msra.mxu1 %v13554_v35 }
 0xf56   : > { %5172 = vmatprep.subr.bf16.mxu0 %v13555_v12  ;;  %5213 = vmatprep.subr.bf16.mxu1 %v13556_v42  ;;  %v13566_v12 = vld [vmem:[#allocation133_spill] sm:$0xff]  ;;  %v13567_v42 = vld [vmem:[#allocation6_spill] sm:$0xff] }
 0xf59   : > { %5173 = vmatpush2.bf16.msra.mxu0 %v13557_v21  ;;  %5214 = vmatpush2.bf16.msra.mxu1 %v13558_v3  ;;  %v13568_v21 = vld [vmem:[#allocation7_spill] sm:$0xff] }
 0xf5a   : > { %5174 = vmatprep.subr.bf16.mxu0 %v13559_v28  ;;  %5215 = vmatprep.subr.bf16.mxu1 %v13560_v1  ;;  %v13569_v1 = vld [vmem:[#allocation8_spill] sm:$0xff]  ;;  %v13578_v28 = vld [vmem:[#allocation17_spill] sm:$0xff] }
 0xf5d   : > { %5175 = vmatpush2.bf16.msra.mxu0 %v13561_v49  ;;  %5216 = vmatpush2.bf16.msra.mxu1 %v13562_v53  ;;  %v13570_v49 = vld [vmem:[#allocation9_spill] sm:$0xff]  ;;  %v13571_v53 = vld [vmem:[#allocation10_spill] sm:$0xff] }
 0xf5e   : > { %5176 = vmatprep.subr.bf16.mxu0 %v13563_v22  ;;  %5217 = vmatprep.subr.bf16.mxu1 %v13564_v41  ;;  %v13572_v22 = vld [vmem:[#allocation11_spill] sm:$0xff]  ;;  %v13573_v41 = vld [vmem:[#allocation12_spill] sm:$0xff] }
 0xf61   : > { %5177 = vmatpush2.bf16.msra.mxu0 %v13565_v39  ;;  %5218 = vmatpush2.bf16.msra.mxu1 %v13566_v12  ;;  %v13574_v39 = vld [vmem:[#allocation13_spill] sm:$0xff]  ;;  %v13575_v12 = vld [vmem:[#allocation14_spill] sm:$0xff] }
 0xf62   : > { %5297 = vmatprep.subr.bf16.mxu0 %v13567_v42  ;;  %5338 = vmatprep.subr.bf16.mxu1 %v13568_v21  ;;  %v13576_v42 = vld [vmem:[#allocation15_spill] sm:$0xff]  ;;  %v13577_v21 = vld [vmem:[#allocation16_spill] sm:$0xff] }
 0xf64   : > { %5179 = vmatmul.mubr.bf16.vlgmr.msra.gmra.mxu0 %v11110_v27  ;;  %5220 = vmatmul.mubr.bf16.vlgmr.msra.gmra.mxu1 %v11110_v27  ;;  %v13579_v27 = vld [vmem:[#allocation18_spill] sm:$0xff] }
 0xf65   : > { %5298 = vmatpush1.bf16.msra.mxu0 %v13569_v1  ;;  %5339 = vmatpush1.bf16.msra.mxu1 %v13570_v49  ;;  %v13580_v1 = vld [vmem:[#allocation19_spill] sm:$0xff]  ;;  %v13581_v49 = vld [vmem:[#allocation20_spill] sm:$0xff] }
 0xf66   : > { %5299 = vmatprep.subr.bf16.mxu0 %v13571_v53  ;;  %5340 = vmatprep.subr.bf16.mxu1 %v13572_v22  ;;  %v13582_v53 = vld [vmem:[#allocation21_spill] sm:$0xff]  ;;  %v13583_v22 = vld [vmem:[#allocation22_spill] sm:$0xff] }
 0xf69   : > { %5300 = vmatpush1.bf16.msra.mxu0 %v13573_v41  ;;  %5341 = vmatpush1.bf16.msra.mxu1 %v13574_v39  ;;  %v13584_v41 = vld [vmem:[#allocation23_spill] sm:$0xff]  ;;  %v13585_v39 = vld [vmem:[#allocation24_spill] sm:$0xff] }
 0xf6a   : > { %5301 = vmatprep.subr.bf16.mxu0 %v13575_v12  ;;  %5342 = vmatprep.subr.bf16.mxu1 %v13576_v42  ;;  %v13586_v12 = vld [vmem:[#allocation25_spill] sm:$0xff]  ;;  %v13587_v42 = vld [vmem:[#allocation26_spill] sm:$0xff] }
 0xf6d   : > { %5302 = vmatpush1.bf16.msra.mxu0 %v13577_v21  ;;  %5343 = vmatpush1.bf16.msra.mxu1 %v13578_v28  ;;  %v13588_v21 = vld [vmem:[#allocation27_spill] sm:$0xff]  ;;  %v13589_v28 = vld [vmem:[#allocation28_spill] sm:$0xff] }
 0xf6e   : > { %5303 = vmatprep.subr.bf16.mxu0 %v13579_v27  ;;  %5344 = vmatprep.subr.bf16.mxu1 %v13580_v1  ;;  %v13590_v27 = vld [vmem:[#allocation29_spill] sm:$0xff]  ;;  %v13591_v1 = vld [vmem:[#allocation30_spill] sm:$0xff] }
 0xf71   : > { %5304 = vmatpush1.bf16.msra.mxu0 %v13581_v49  ;;  %5345 = vmatpush1.bf16.msra.mxu1 %v13582_v53  ;;  %v13592_v49 = vld [vmem:[#allocation31_spill] sm:$0xff]  ;;  %v13593_v53 = vld [vmem:[#allocation32_spill] sm:$0xff] }
 0xf72   : > { %5305 = vmatprep.subr.bf16.mxu0 %v13583_v22  ;;  %5346 = vmatprep.subr.bf16.mxu1 %v13584_v41  ;;  %v13594_v22 = vld [vmem:[#allocation33_spill] sm:$0xff]  ;;  %v13595_v41 = vld [vmem:[#allocation34_spill] sm:$0xff] }
 0xf75   : > { %5306 = vmatpush1.bf16.msra.mxu0 %v13585_v39  ;;  %5347 = vmatpush1.bf16.msra.mxu1 %v13586_v12  ;;  %v13596_v39 = vld [vmem:[#allocation35_spill] sm:$0xff]  ;;  %v13597_v12 = vld [vmem:[#allocation36_spill] sm:$0xff] }
 0xf76   : > { %5307 = vmatprep.subr.bf16.mxu0 %v13587_v42  ;;  %5348 = vmatprep.subr.bf16.mxu1 %v13588_v21  ;;  %v13598_v42 = vld [vmem:[#allocation37_spill] sm:$0xff]  ;;  %v13599_v21 = vld [vmem:[#allocation38_spill] sm:$0xff] }
 0xf79   : > { %5308 = vmatpush1.bf16.msra.mxu0 %v13589_v28  ;;  %5349 = vmatpush1.bf16.msra.mxu1 %v13590_v27  ;;  %v13600_v28 = vld [vmem:[#allocation39_spill] sm:$0xff]  ;;  %v13601_v27 = vld [vmem:[#allocation40_spill] sm:$0xff] }
 0xf7a   : > { %5309 = vmatprep.subr.bf16.mxu0 %v13591_v1  ;;  %5350 = vmatprep.subr.bf16.mxu1 %v13592_v49  ;;  %v13602_v1 = vld [vmem:[#allocation41_spill] sm:$0xff]  ;;  %v13603_v49 = vld [vmem:[#allocation42_spill] sm:$0xff] }
 0xf7d   : > { %5310 = vmatpush1.bf16.msra.mxu0 %v13593_v53  ;;  %5351 = vmatpush1.bf16.msra.mxu1 %v13594_v22  ;;  %v13604_v53 = vld [vmem:[#allocation43_spill] sm:$0xff]  ;;  %v13605_v22 = vld [vmem:[#allocation44_spill] sm:$0xff] }
 0xf7e   : > { %5311 = vmatprep.subr.bf16.mxu0 %v13595_v41  ;;  %5352 = vmatprep.subr.bf16.mxu1 %v13596_v39  ;;  %v13606_v41 = vld [vmem:[#allocation45_spill] sm:$0xff]  ;;  %v13607_v39 = vld [vmem:[#allocation46_spill] sm:$0xff] }
 0xf81   : > { %5312 = vmatpush1.bf16.msra.mxu0 %v13597_v12  ;;  %5353 = vmatpush1.bf16.msra.mxu1 %v13598_v42  ;;  %v13608_v12 = vld [vmem:[#allocation47_spill] sm:$0xff]  ;;  %v13609_v42 = vld [vmem:[#allocation48_spill] sm:$0xff] }
 0xf82   : > { %5313 = vmatprep.subr.bf16.mxu0 %v13599_v21  ;;  %5354 = vmatprep.subr.bf16.mxu1 %v13600_v28  ;;  %v13610_v21 = vld [vmem:[#allocation49_spill] sm:$0xff]  ;;  %v13611_v28 = vld [vmem:[#allocation50_spill] sm:$0xff] }
 0xf85   : > { %5314 = vmatpush2.bf16.msra.mxu0 %v13601_v27  ;;  %5355 = vmatpush2.bf16.msra.mxu1 %v13602_v1  ;;  %v13612_v27 = vld [vmem:[#allocation51_spill] sm:$0xff]  ;;  %v13613_v1 = vld [vmem:[#allocation52_spill] sm:$0xff] }
 0xf86   : > { %5315 = vmatprep.subr.bf16.mxu0 %v13603_v49  ;;  %5356 = vmatprep.subr.bf16.mxu1 %v13604_v53  ;;  %v13614_v49 = vld [vmem:[#allocation53_spill] sm:$0xff]  ;;  %v13615_v53 = vld [vmem:[#allocation54_spill] sm:$0xff] }
 0xf89   : > { %5316 = vmatpush2.bf16.msra.mxu0 %v13605_v22  ;;  %5357 = vmatpush2.bf16.msra.mxu1 %v13606_v41  ;;  %v13616_v22 = vld [vmem:[#allocation55_spill] sm:$0xff]  ;;  %v13617_v41 = vld [vmem:[#allocation56_spill] sm:$0xff] }
 0xf8a   : > { %5317 = vmatprep.subr.bf16.mxu0 %v13607_v39  ;;  %5358 = vmatprep.subr.bf16.mxu1 %v13608_v12  ;;  %v13618_v39 = vld [vmem:[#allocation57_spill] sm:$0xff]  ;;  %v13619_v12 = vld [vmem:[#allocation58_spill] sm:$0xff] }
 0xf8d   : > { %5318 = vmatpush2.bf16.msra.mxu0 %v13609_v42  ;;  %5359 = vmatpush2.bf16.msra.mxu1 %v13610_v21  ;;  %v13620_v42 = vld [vmem:[#allocation59_spill] sm:$0xff]  ;;  %v13621_v21 = vld [vmem:[#allocation60_spill] sm:$0xff] }
 0xf8e   : > { %5319 = vmatprep.subr.bf16.mxu0 %v13611_v28  ;;  %5360 = vmatprep.subr.bf16.mxu1 %v13612_v27  ;;  %v13622_v28 = vld [vmem:[#allocation61_spill] sm:$0xff]  ;;  %v13623_v27 = vld [vmem:[#allocation62_spill] sm:$0xff] }
 0xf91   : > { %5320 = vmatpush2.bf16.msra.mxu0 %v13613_v1  ;;  %5361 = vmatpush2.bf16.msra.mxu1 %v13614_v49  ;;  %v13624_v1 = vld [vmem:[#allocation63_spill] sm:$0xff]  ;;  %v13625_v49 = vld [vmem:[#allocation64_spill] sm:$0xff] }
 0xf92   : > { %5321 = vmatprep.subr.bf16.mxu0 %v13615_v53  ;;  %5362 = vmatprep.subr.bf16.mxu1 %v13616_v22  ;;  %v13626_v53 = vld [vmem:[#allocation65_spill] sm:$0xff]  ;;  %v13627_v22 = vld [vmem:[#allocation66_spill] sm:$0xff] }
 0xf95   : > { %5322 = vmatpush2.bf16.msra.mxu0 %v13617_v41  ;;  %5363 = vmatpush2.bf16.msra.mxu1 %v13618_v39  ;;  %v13628_v41 = vld [vmem:[#allocation67_spill] sm:$0xff]  ;;  %v13629_v39 = vld [vmem:[#allocation68_spill] sm:$0xff] }
 0xf96   : > { %5323 = vmatprep.subr.bf16.mxu0 %v13619_v12  ;;  %5364 = vmatprep.subr.bf16.mxu1 %v13620_v42  ;;  %v13630_v12 = vld [vmem:[#allocation69_spill] sm:$0xff]  ;;  %v13631_v42 = vld [vmem:[#allocation70_spill] sm:$0xff] }
 0xf99   : > { %5324 = vmatpush2.bf16.msra.mxu0 %v13621_v21  ;;  %5365 = vmatpush2.bf16.msra.mxu1 %v13622_v28  ;;  %v13632_v21 = vld [vmem:[#allocation71_spill] sm:$0xff] }
 0xf9a   : > { %5325 = vmatprep.subr.bf16.mxu0 %v13623_v27  ;;  %5366 = vmatprep.subr.bf16.mxu1 %v13624_v1 }
 0xf9d   : > { %5326 = vmatpush2.bf16.msra.mxu0 %v13625_v49  ;;  %5367 = vmatpush2.bf16.msra.mxu1 %v13626_v53 }
 0xf9e   : > { %5327 = vmatprep.subr.bf16.mxu0 %v13627_v22  ;;  %5368 = vmatprep.subr.bf16.mxu1 %v13628_v41 }
 0xfa1   : > { %5328 = vmatpush2.bf16.msra.mxu0 %v13629_v39  ;;  %5369 = vmatpush2.bf16.msra.mxu1 %v13630_v12  ;;  %v13636_v12 = vld [vmem:[#allocation185_spill] sm:$0xff] }
 0xfa2   : > { %5379 = vmatprep.subr.bf16.mxu0 %v13631_v42  ;;  %5420 = vmatprep.subr.bf16.mxu1 %v13632_v21 }
 0xfe4   : > { %v5098_v28 = vpop.f32.mrf.mxu0  ;;  %v5139_v27 = vpop.f32.mrf.mxu1 }
 0xfe5   : > { %v5228_v22 = vadd.f32 %v5098_v28, %v13633_v31  ;;  %v5230_v41 = vadd.f32 %v5139_v27, %v13634_v30 }
 0xfe6   : > { %v5100_v3 = vpop.f32.mrf.mxu0  ;;  %v5141_v1 = vpop.f32.mrf.mxu1 }
 0xfe7   : > { %v5229_v39 = vadd.f32 %v5100_v3, %v13635_v26  ;;  %v6879_v54 = vmul.f32 -1.442695, %v5228_v22  ;;  %v5231_v59 = vadd.f32 %v5141_v1, %v13636_v12  ;;  %v6881_v42 = vmul.f32 -1.442695, %v5230_v41  ;;  %v13637_v12 = vld [vmem:[#allocation244_spill] sm:$0xff]  ;;  %v13640_v22 = vld [vmem:[#allocation247_spill] sm:$0xff] }
 0xfe8   : > { %v5102_v35 = vpop.f32.mrf.mxu0  ;;  %v5143_v49 = vpop.f32.mrf.mxu1 }
 0xfe9   : > { %v6880_v13 = vmul.f32 -1.442695, %v5229_v39  ;;  %7469 = vpow2.f32 %v6879_v54  ;;  %v6882_v21 = vmul.f32 -1.442695, %v5231_v59  ;;  %v13638_v39 = vld [vmem:[#allocation245_spill] sm:$0xff] }
 0xfea   : > { %v5103_v44 = vpop.f32.mrf.mxu0  ;;  %v5144_v53 = vpop.f32.mrf.mxu1  ;;  %7471 = vpow2.f32 %v6881_v42 }
 0xfeb   : > { %7473 = vpow2.f32 %v6880_v13 }
 0xfec   : > { %7475 = vpow2.f32 %v6882_v21  ;;  %v13639_v21 = vld [vmem:[#allocation246_spill] sm:$0xff] }
 0xff6   : > { %v7470_v35 = vpop.eup %7469 }
 0xff7   : > { %v7472_v49 = vpop.eup %7471  ;;  %v5242_v53 = vadd.f32 1.0, %v7470_v35 }
 0xff8   : > { %v7474_v44 = vpop.eup %7473  ;;  %v5254_v31 = vadd.f32 1.0, %v7472_v49 }
 0xff9   : > { %v7476_v46 = vpop.eup %7475  ;;  %v5243_v28 = vadd.f32 1.0, %v7474_v44  ;;  %7477 = vrcp.f32 %v5242_v53 }
 0xffa   : > { %v5255_v30 = vadd.f32 1.0, %v7476_v46  ;;  %7479 = vrcp.f32 %v5254_v31 }
 0xffb   : > { %7481 = vrcp.f32 %v5243_v28 }
0x1006   : > { %v7478_v31 = vpop.eup %7477 }
0x1024   : > { %v5180_v26 = vpop.f32.mrf.mxu0  ;;  %v5221_v3 = vpop.f32.mrf.mxu1 }
0x1025   : > { %v5232_v41 = vadd.f32 %v5180_v26, %v13637_v12  ;;  %v5234_v54 = vadd.f32 %v5221_v3, %v13638_v39  ;;  %v7480_v26 = vpop.eup %7479 }
0x1026   : > { %v5182_v59 = vpop.f32.mrf.mxu0  ;;  %v5223_v13 = vpop.f32.mrf.mxu1 }
0x1027   : > { %7483 = vtanh.f32 %v5232_v41  ;;  %v6883_v42 = vmul.f32 -1.442695, %v5234_v54  ;;  %v5233_v1 = vadd.f32 %v5182_v59, %v13639_v21  ;;  %v5235_v27 = vadd.f32 %v5223_v13, %v13640_v22  ;;  %v7482_v28 = vpop.eup %7481 }
0x1028   : > { %7485 = vrcp.f32 %v5255_v30  ;;  %v5184_v35 = vpop.f32.mrf.mxu0  ;;  %v5225_v49 = vpop.f32.mrf.mxu1  ;;  %v5274_v41 = vmul.f32 %v7480_v26, %v11103_v36 }
0x1029   : > { %7487 = vpow2.f32 %v6883_v42  ;;  %v6884_v46 = vmul.f32 -1.442695, %v5235_v27 }
0x102a   : > { %7489 = vtanh.f32 %v5233_v1  ;;  %v5185_v44 = vpop.f32.mrf.mxu0  ;;  %v5226_v53 = vpop.f32.mrf.mxu1 }
0x102b   : > { %7491 = vpow2.f32 %v6884_v46 }
0x1034   : > { %v7484_v3 = vpop.eup %7483 }
0x1035   : > { %v7486_v12 = vpop.eup %7485  ;;  %v5276_v39 = vmul.f32 %v7484_v3, %v7478_v31  ;;  %v13643_v3 = vld [vmem:[#allocation115_spill] sm:$0xff] }
0x1036   : > { %v7488_v54 = vpop.eup %7487  ;;  %v5275_v42 = vmul.f32 %v7486_v12, %v11107_v29  ;;  %v13641_v29 = vld [vmem:[#allocation113_spill] sm:$0xff]  ;;  %v13644_v12 = vld [vmem:[#allocation116_spill] sm:$0xff] }
0x1037   : > { %v7490_v59 = vpop.eup %7489  ;;  %v11253_v13 = vadd.f32 %v5276_v39, %v5274_v41  ;;  %v5268_v30 = vadd.f32 1.0, %v7488_v54  ;;  %v13645_v41 = vld [vmem:[#allocation117_spill] sm:$0xff]  ;;  %v13646_v39 = vld [vmem:[#allocation118_spill] sm:$0xff]  ;;  %v13647_v54 = vld [vmem:[#allocation119_spill] sm:$0xff] }
0x1038   : > { %v7492_v21 = vpop.eup %7491  ;;  %v5277_v1 = vmul.f32 %v7490_v59, %v7482_v28  ;;  %v13642_v28 = vld [vmem:[#allocation114_spill] sm:$0xff]  ;;  %v13648_v59 = vld [vmem:[#allocation120_spill] sm:$0xff] }
0x1039   : > { %7493 = vtanh.f32 %v11253_v13  ;;  %v5269_v22 = vadd.f32 1.0, %v7492_v21  ;;  %v13650_v21 = vld [vmem:[#allocation122_spill] sm:$0xff] }
0x103a   : > { %7495 = vrcp.f32 %v5268_v30  ;;  %v11257_v27 = vadd.f32 %v5277_v1, %v5275_v42  ;;  %v13649_v30 = vld [vmem:[#allocation121_spill] sm:$0xff]  ;;  %v13651_v42 = vld [vmem:[#allocation123_spill] sm:$0xff]  ;;  %v13652_v1 = vld [vmem:[#allocation124_spill] sm:$0xff] }
0x103b   : > { %7497 = vrcp.f32 %v5269_v22  ;;  %v13653_v22 = vld [vmem:[#allocation125_spill] sm:$0xff] }
0x103c   : > { %7499 = vtanh.f32 %v11257_v27 }
0x1046   : > { %v7494_v36 = vpop.eup %7493 }
0x1047   : > { %v7496_v35 = vpop.eup %7495 }
0x1048   : > { %v7498_v49 = vpop.eup %7497  ;;  %v5282_v44 = vmul.f32 %v7496_v35, %v7494_v36  ;;  %v13654_v36 = vld [vmem:[#allocation126_spill] sm:$0xff]  ;;  %v13655_v35 = vld [vmem:[#allocation127_spill] sm:$0xff] }
0x1049   : > { %v7500_v46 = vpop.eup %7499 }
0x104a   : > { %v5283_v53 = vmul.f32 %v7500_v46, %v7498_v49  ;;  %v11260_v26 = vpack.c.bf16 %v5282_v44, %v5282_v44  ;;  %v13656_v49 = vld [vmem:[#allocation128_spill] sm:$0xff]  ;;  %v13657_v46 = vld [vmem:[#allocation129_spill] sm:$0xff]  ;;  %v13658_v44 = vld [vmem:[#allocation130_spill] sm:$0xff] }
0x104c   : > { %v5296_v31 = vpack.c.bf16 %v5283_v53, %v5283_v53  ;;  %v13659_v53 = vld [vmem:[#allocation131_spill] sm:$0xff] }
0x104e   : > { %5329 = vmatprep.mubr.bf16.mxu0 %v5296_v31  ;;  %5370 = vmatprep.mubr.bf16.mxu1 %v5296_v31 }
0x104f   : > { %5330 = vmatmul.mubr.bf16.vlgmr.msra.gmra.mxu0 %v11260_v26  ;;  %5371 = vmatmul.mubr.bf16.vlgmr.msra.gmra.mxu1 %v11260_v26 }
0x1050   : > { %5380 = vmatpush1.bf16.msra.mxu0 %v12462_v11  ;;  %5421 = vmatpush1.bf16.msra.mxu1 %v12463_v63 }
0x1051   : > { %5411 = vmatprep.mubr.bf16.mxu0 %v5296_v31  ;;  %5452 = vmatprep.mubr.bf16.mxu1 %v5296_v31  ;;  %v13660_v31 = vld [vmem:[#allocation132_spill] sm:$0xff] }
0x1052   : > { %5381 = vmatprep.subr.bf16.mxu0 %v12464_v60  ;;  %5422 = vmatprep.subr.bf16.mxu1 %v12465_v10 }
0x1054   : > { %5382 = vmatpush1.bf16.msra.mxu0 %v12466_v15  ;;  %5423 = vmatpush1.bf16.msra.mxu1 %v12467_v61 }
0x1055   : > { %5383 = vmatprep.subr.bf16.mxu0 %v12468_v52  ;;  %5424 = vmatprep.subr.bf16.mxu1 %v12469_v0 }
0x1058   : > { %5384 = vmatpush1.bf16.msra.mxu0 %v12470_v38  ;;  %5425 = vmatpush1.bf16.msra.mxu1 %v12471_v45 }
0x1059   : > { %5385 = vmatprep.subr.bf16.mxu0 %v12472_v51  ;;  %5426 = vmatprep.subr.bf16.mxu1 %v12473_v16 }
0x105c   : > { %5386 = vmatpush1.bf16.msra.mxu0 %v12564_v62  ;;  %5427 = vmatpush1.bf16.msra.mxu1 %v12565_v23 }
0x105d   : > { %5387 = vmatprep.subr.bf16.mxu0 %v12566_v34  ;;  %5428 = vmatprep.subr.bf16.mxu1 %v12567_v57 }
0x1060   : > { %5388 = vmatpush1.bf16.msra.mxu0 %v12568_v4  ;;  %5429 = vmatpush1.bf16.msra.mxu1 %v12569_v24 }
0x1061   : > { %5389 = vmatprep.subr.bf16.mxu0 %v12570_v37  ;;  %5430 = vmatprep.subr.bf16.mxu1 %v12571_v33 }
0x1064   : > { %5390 = vmatpush1.bf16.msra.mxu0 %v12572_v40  ;;  %5431 = vmatpush1.bf16.msra.mxu1 %v12573_v19 }
0x1065   : > { %5391 = vmatprep.subr.bf16.mxu0 %v12574_v47  ;;  %5432 = vmatprep.subr.bf16.mxu1 %v12661_v20 }
0x1068   : > { %5392 = vmatpush1.bf16.msra.mxu0 %v12662_v48  ;;  %5433 = vmatpush1.bf16.msra.mxu1 %v12663_v58 }
0x1069   : > { %5393 = vmatprep.subr.bf16.mxu0 %v12664_v7  ;;  %5434 = vmatprep.subr.bf16.mxu1 %v12665_v5 }
0x106c   : > { %5394 = vmatpush1.bf16.msra.mxu0 %v12666_v6  ;;  %5435 = vmatpush1.bf16.msra.mxu1 %v12667_v25 }
0x106d   : > { %5395 = vmatprep.subr.bf16.mxu0 %v12668_v8  ;;  %5436 = vmatprep.subr.bf16.mxu1 %v12583_v9 }
0x1070   : > { %5396 = vmatpush2.bf16.msra.mxu0 %v12584_v32  ;;  %5437 = vmatpush2.bf16.msra.mxu1 %v12585_v2 }
0x1071   : > { %5397 = vmatprep.subr.bf16.mxu0 %v12586_v43  ;;  %5438 = vmatprep.subr.bf16.mxu1 %v12587_v18 }
0x1074   : > { %5398 = vmatpush2.bf16.msra.mxu0 %v12588_v56  ;;  %5439 = vmatpush2.bf16.msra.mxu1 %v12589_v55 }
0x1075   : > { %5399 = vmatprep.subr.bf16.mxu0 %v12669_v17  ;;  %5440 = vmatprep.subr.bf16.mxu1 %v13544_v14 }
0x1078   : > { %5400 = vmatpush2.bf16.msra.mxu0 %v13545_v50  ;;  %5441 = vmatpush2.bf16.msra.mxu1 %v13641_v29 }
0x1079   : > { %5401 = vmatprep.subr.bf16.mxu0 %v13642_v28  ;;  %5442 = vmatprep.subr.bf16.mxu1 %v13643_v3  ;;  %v13733_v3 = vld [vmem:[#allocation189_spill] sm:$0xff] }
0x107c   : > { %5402 = vmatpush2.bf16.msra.mxu0 %v13644_v12  ;;  %5443 = vmatpush2.bf16.msra.mxu1 %v13645_v41 }
0x107d   : > { %5403 = vmatprep.subr.bf16.mxu0 %v13646_v39  ;;  %5444 = vmatprep.subr.bf16.mxu1 %v13647_v54  ;;  %v13728_v54 = vld [vmem:[#allocation141_spill] sm:$0xff] }
0x1080   : > { %5404 = vmatpush2.bf16.msra.mxu0 %v13648_v59  ;;  %5445 = vmatpush2.bf16.msra.mxu1 %v13649_v30 }
0x1081   : > { %5405 = vmatprep.subr.bf16.mxu0 %v13650_v21  ;;  %5446 = vmatprep.subr.bf16.mxu1 %v13651_v42  ;;  %v13661_v21 = vld [vmem:[#allocation133_spill] sm:$0xff]  ;;  %v13662_v42 = vld [vmem:[#allocation6_spill] sm:$0xff] }
0x1084   : > { %5406 = vmatpush2.bf16.msra.mxu0 %v13652_v1  ;;  %5447 = vmatpush2.bf16.msra.mxu1 %v13653_v22  ;;  %v13663_v1 = vld [vmem:[#allocation7_spill] sm:$0xff] }
0x1085   : > { %5407 = vmatprep.subr.bf16.mxu0 %v13654_v36  ;;  %5448 = vmatprep.subr.bf16.mxu1 %v13655_v35  ;;  %v13664_v35 = vld [vmem:[#allocation8_spill] sm:$0xff]  ;;  %v13673_v36 = vld [vmem:[#allocation17_spill] sm:$0xff] }
0x1088   : > { %5408 = vmatpush2.bf16.msra.mxu0 %v13656_v49  ;;  %5449 = vmatpush2.bf16.msra.mxu1 %v13657_v46  ;;  %v13665_v49 = vld [vmem:[#allocation9_spill] sm:$0xff]  ;;  %v13666_v46 = vld [vmem:[#allocation10_spill] sm:$0xff] }
0x1089   : > { %5409 = vmatprep.subr.bf16.mxu0 %v13658_v44  ;;  %5450 = vmatprep.subr.bf16.mxu1 %v13659_v53  ;;  %v13667_v44 = vld [vmem:[#allocation11_spill] sm:$0xff]  ;;  %v13668_v53 = vld [vmem:[#allocation12_spill] sm:$0xff] }
0x108c   : > { %5410 = vmatpush2.bf16.msra.mxu0 %v13660_v31  ;;  %5451 = vmatpush2.bf16.msra.mxu1 %v13661_v21  ;;  %v13669_v31 = vld [vmem:[#allocation13_spill] sm:$0xff]  ;;  %v13670_v21 = vld [vmem:[#allocation14_spill] sm:$0xff] }
0x108d   : > { %5530 = vmatprep.subr.bf16.mxu0 %v13662_v42  ;;  %5571 = vmatprep.subr.bf16.mxu1 %v13663_v1  ;;  %v13671_v42 = vld [vmem:[#allocation15_spill] sm:$0xff]  ;;  %v13672_v1 = vld [vmem:[#allocation16_spill] sm:$0xff] }
0x108f   : > { %5412 = vmatmul.mubr.bf16.vlgmr.msra.gmra.mxu0 %v11260_v26  ;;  %5453 = vmatmul.mubr.bf16.vlgmr.msra.gmra.mxu1 %v11260_v26  ;;  %v13674_v26 = vld [vmem:[#allocation18_spill] sm:$0xff] }
0x1090   : > { %5531 = vmatpush1.bf16.msra.mxu0 %v13664_v35  ;;  %5572 = vmatpush1.bf16.msra.mxu1 %v13665_v49  ;;  %v13675_v35 = vld [vmem:[#allocation19_spill] sm:$0xff]  ;;  %v13676_v49 = vld [vmem:[#allocation20_spill] sm:$0xff] }
0x1091   : > { %5532 = vmatprep.subr.bf16.mxu0 %v13666_v46  ;;  %5573 = vmatprep.subr.bf16.mxu1 %v13667_v44  ;;  %v13677_v46 = vld [vmem:[#allocation21_spill] sm:$0xff]  ;;  %v13678_v44 = vld [vmem:[#allocation22_spill] sm:$0xff] }
0x1094   : > { %5533 = vmatpush1.bf16.msra.mxu0 %v13668_v53  ;;  %5574 = vmatpush1.bf16.msra.mxu1 %v13669_v31  ;;  %v13679_v53 = vld [vmem:[#allocation23_spill] sm:$0xff]  ;;  %v13680_v31 = vld [vmem:[#allocation24_spill] sm:$0xff] }
0x1095   : > { %5534 = vmatprep.subr.bf16.mxu0 %v13670_v21  ;;  %5575 = vmatprep.subr.bf16.mxu1 %v13671_v42  ;;  %v13681_v21 = vld [vmem:[#allocation25_spill] sm:$0xff]  ;;  %v13682_v42 = vld [vmem:[#allocation26_spill] sm:$0xff] }
0x1098   : > { %5535 = vmatpush1.bf16.msra.mxu0 %v13672_v1  ;;  %5576 = vmatpush1.bf16.msra.mxu1 %v13673_v36  ;;  %v13683_v1 = vld [vmem:[#allocation27_spill] sm:$0xff]  ;;  %v13684_v36 = vld [vmem:[#allocation28_spill] sm:$0xff] }
0x1099   : > { %5536 = vmatprep.subr.bf16.mxu0 %v13674_v26  ;;  %5577 = vmatprep.subr.bf16.mxu1 %v13675_v35  ;;  %v13685_v26 = vld [vmem:[#allocation29_spill] sm:$0xff]  ;;  %v13686_v35 = vld [vmem:[#allocation30_spill] sm:$0xff] }
0x109c   : > { %5537 = vmatpush1.bf16.msra.mxu0 %v13676_v49  ;;  %5578 = vmatpush1.bf16.msra.mxu1 %v13677_v46  ;;  %v13687_v49 = vld [vmem:[#allocation31_spill] sm:$0xff]  ;;  %v13688_v46 = vld [vmem:[#allocation32_spill] sm:$0xff] }
0x109d   : > { %5538 = vmatprep.subr.bf16.mxu0 %v13678_v44  ;;  %5579 = vmatprep.subr.bf16.mxu1 %v13679_v53  ;;  %v13689_v44 = vld [vmem:[#allocation33_spill] sm:$0xff]  ;;  %v13690_v53 = vld [vmem:[#allocation34_spill] sm:$0xff] }
0x10a0   : > { %5539 = vmatpush1.bf16.msra.mxu0 %v13680_v31  ;;  %5580 = vmatpush1.bf16.msra.mxu1 %v13681_v21  ;;  %v13691_v31 = vld [vmem:[#allocation35_spill] sm:$0xff]  ;;  %v13692_v21 = vld [vmem:[#allocation36_spill] sm:$0xff] }
0x10a1   : > { %5540 = vmatprep.subr.bf16.mxu0 %v13682_v42  ;;  %5581 = vmatprep.subr.bf16.mxu1 %v13683_v1  ;;  %v13693_v42 = vld [vmem:[#allocation37_spill] sm:$0xff]  ;;  %v13694_v1 = vld [vmem:[#allocation38_spill] sm:$0xff] }
0x10a4   : > { %5541 = vmatpush1.bf16.msra.mxu0 %v13684_v36  ;;  %5582 = vmatpush1.bf16.msra.mxu1 %v13685_v26  ;;  %v13695_v36 = vld [vmem:[#allocation39_spill] sm:$0xff]  ;;  %v13696_v26 = vld [vmem:[#allocation40_spill] sm:$0xff] }
0x10a5   : > { %5542 = vmatprep.subr.bf16.mxu0 %v13686_v35  ;;  %5583 = vmatprep.subr.bf16.mxu1 %v13687_v49  ;;  %v13697_v35 = vld [vmem:[#allocation41_spill] sm:$0xff]  ;;  %v13698_v49 = vld [vmem:[#allocation42_spill] sm:$0xff] }
0x10a8   : > { %5543 = vmatpush1.bf16.msra.mxu0 %v13688_v46  ;;  %5584 = vmatpush1.bf16.msra.mxu1 %v13689_v44  ;;  %v13699_v46 = vld [vmem:[#allocation43_spill] sm:$0xff]  ;;  %v13700_v44 = vld [vmem:[#allocation44_spill] sm:$0xff] }
0x10a9   : > { %5544 = vmatprep.subr.bf16.mxu0 %v13690_v53  ;;  %5585 = vmatprep.subr.bf16.mxu1 %v13691_v31  ;;  %v13701_v53 = vld [vmem:[#allocation45_spill] sm:$0xff]  ;;  %v13702_v31 = vld [vmem:[#allocation46_spill] sm:$0xff] }
0x10ac   : > { %5545 = vmatpush1.bf16.msra.mxu0 %v13692_v21  ;;  %5586 = vmatpush1.bf16.msra.mxu1 %v13693_v42  ;;  %v13703_v21 = vld [vmem:[#allocation47_spill] sm:$0xff]  ;;  %v13704_v42 = vld [vmem:[#allocation48_spill] sm:$0xff] }
0x10ad   : > { %5546 = vmatprep.subr.bf16.mxu0 %v13694_v1  ;;  %5587 = vmatprep.subr.bf16.mxu1 %v13695_v36  ;;  %v13705_v1 = vld [vmem:[#allocation49_spill] sm:$0xff]  ;;  %v13706_v36 = vld [vmem:[#allocation50_spill] sm:$0xff] }
0x10b0   : > { %5547 = vmatpush2.bf16.msra.mxu0 %v13696_v26  ;;  %5588 = vmatpush2.bf16.msra.mxu1 %v13697_v35  ;;  %v13707_v26 = vld [vmem:[#allocation51_spill] sm:$0xff]  ;;  %v13708_v35 = vld [vmem:[#allocation52_spill] sm:$0xff] }
0x10b1   : > { %5548 = vmatprep.subr.bf16.mxu0 %v13698_v49  ;;  %5589 = vmatprep.subr.bf16.mxu1 %v13699_v46  ;;  %v13709_v49 = vld [vmem:[#allocation53_spill] sm:$0xff]  ;;  %v13710_v46 = vld [vmem:[#allocation54_spill] sm:$0xff] }
0x10b4   : > { %5549 = vmatpush2.bf16.msra.mxu0 %v13700_v44  ;;  %5590 = vmatpush2.bf16.msra.mxu1 %v13701_v53  ;;  %v13711_v44 = vld [vmem:[#allocation55_spill] sm:$0xff]  ;;  %v13712_v53 = vld [vmem:[#allocation56_spill] sm:$0xff] }
0x10b5   : > { %5550 = vmatprep.subr.bf16.mxu0 %v13702_v31  ;;  %5591 = vmatprep.subr.bf16.mxu1 %v13703_v21  ;;  %v13713_v31 = vld [vmem:[#allocation57_spill] sm:$0xff]  ;;  %v13714_v21 = vld [vmem:[#allocation58_spill] sm:$0xff] }
0x10b8   : > { %5551 = vmatpush2.bf16.msra.mxu0 %v13704_v42  ;;  %5592 = vmatpush2.bf16.msra.mxu1 %v13705_v1  ;;  %v13715_v42 = vld [vmem:[#allocation59_spill] sm:$0xff]  ;;  %v13716_v1 = vld [vmem:[#allocation60_spill] sm:$0xff] }
0x10b9   : > { %5552 = vmatprep.subr.bf16.mxu0 %v13706_v36  ;;  %5593 = vmatprep.subr.bf16.mxu1 %v13707_v26  ;;  %v13717_v36 = vld [vmem:[#allocation61_spill] sm:$0xff]  ;;  %v13718_v26 = vld [vmem:[#allocation62_spill] sm:$0xff] }
0x10bc   : > { %5553 = vmatpush2.bf16.msra.mxu0 %v13708_v35  ;;  %5594 = vmatpush2.bf16.msra.mxu1 %v13709_v49  ;;  %v13719_v35 = vld [vmem:[#allocation63_spill] sm:$0xff]  ;;  %v13720_v49 = vld [vmem:[#allocation64_spill] sm:$0xff] }
0x10bd   : > { %5554 = vmatprep.subr.bf16.mxu0 %v13710_v46  ;;  %5595 = vmatprep.subr.bf16.mxu1 %v13711_v44  ;;  %v13721_v46 = vld [vmem:[#allocation65_spill] sm:$0xff]  ;;  %v13722_v44 = vld [vmem:[#allocation66_spill] sm:$0xff] }
0x10c0   : > { %5555 = vmatpush2.bf16.msra.mxu0 %v13712_v53  ;;  %5596 = vmatpush2.bf16.msra.mxu1 %v13713_v31  ;;  %v13723_v53 = vld [vmem:[#allocation67_spill] sm:$0xff]  ;;  %v13724_v31 = vld [vmem:[#allocation68_spill] sm:$0xff] }
0x10c1   : > { %5556 = vmatprep.subr.bf16.mxu0 %v13714_v21  ;;  %5597 = vmatprep.subr.bf16.mxu1 %v13715_v42  ;;  %v13725_v21 = vld [vmem:[#allocation69_spill] sm:$0xff]  ;;  %v13726_v42 = vld [vmem:[#allocation70_spill] sm:$0xff] }
0x10c4   : > { %5557 = vmatpush2.bf16.msra.mxu0 %v13716_v1  ;;  %5598 = vmatpush2.bf16.msra.mxu1 %v13717_v36  ;;  %v13727_v1 = vld [vmem:[#allocation71_spill] sm:$0xff] }
0x10c5   : > { %5558 = vmatprep.subr.bf16.mxu0 %v13718_v26  ;;  %5599 = vmatprep.subr.bf16.mxu1 %v13719_v35 }
0x10c8   : > { %5559 = vmatpush2.bf16.msra.mxu0 %v13720_v49  ;;  %5600 = vmatpush2.bf16.msra.mxu1 %v13721_v46 }
0x10c9   : > { %5560 = vmatprep.subr.bf16.mxu0 %v13722_v44  ;;  %5601 = vmatprep.subr.bf16.mxu1 %v13723_v53  ;;  %v13729_v44 = vld [vmem:[#allocation188_spill] sm:$0xff]  ;;  %v13730_v53 = vld [vmem:[#allocation186_spill] sm:$0xff] }
0x10ca   : > { %v1010_v39 = vadd.f32 %v13729_v44, %v13728_v54  ;;  %v13735_v54 = vld [vmem:[#allocation250_spill] sm:$0xff] }
0x10cc   : > { %5561 = vmatpush2.bf16.msra.mxu0 %v13724_v31  ;;  %5602 = vmatpush2.bf16.msra.mxu1 %v13725_v21  ;;  %v13731_v31 = vld [vmem:[#allocation187_spill] sm:$0xff] }
0x10cd   : > { %5612 = vmatprep.subr.bf16.mxu0 %v13726_v42  ;;  %5653 = vmatprep.subr.bf16.mxu1 %v13727_v1  ;;  %v13732_v21 = vld [vmem:[#allocation135_spill] sm:$0xff] }
0x10ce   : > { %v1123_v42 = vadd.f32 %v13733_v3, %v13732_v21  ;;  %v13761_v21 = vld [vmem:[#allocation132_spill] sm:$0xff] }
0x110f   : > { %v5331_v36 = vpop.f32.mrf.mxu0  ;;  %v5372_v26 = vpop.f32.mrf.mxu1 }
0x1110   : > { %v5461_v41 = vadd.f32 %v5331_v36, %v13730_v53  ;;  %v5463_v12 = vadd.f32 %v5372_v26, %v13731_v31  ;;  %v13734_v26 = vld [vmem:[#allocation198_spill] sm:$0xff] }
0x1111   : > { %v5333_v22 = vpop.f32.mrf.mxu0  ;;  %v5374_v35 = vpop.f32.mrf.mxu1  ;;  %v1236_v3 = vadd.f32 %v13735_v54, %v13734_v26 }
0x1112   : > { %v5462_v28 = vadd.f32 %v5333_v22, %v1010_v39  ;;  %v6885_v1 = vmul.f32 -1.442695, %v5461_v41  ;;  %v5464_v29 = vadd.f32 %v5374_v35, %v1123_v42  ;;  %v6887_v50 = vmul.f32 -1.442695, %v5463_v12  ;;  %v13737_v42 = vld [vmem:[#allocation251_spill] sm:$0xff] }
0x1113   : > { %v5335_v30 = vpop.f32.mrf.mxu0  ;;  %v5376_v49 = vpop.f32.mrf.mxu1 }
0x1114   : > { %v6886_v14 = vmul.f32 -1.442695, %v5462_v28  ;;  %7501 = vpow2.f32 %v6885_v1  ;;  %v6888_v30 = vmul.f32 -1.442695, %v5464_v29  ;;  %v13736_v28 = vld [vmem:[#allocation199_spill] sm:$0xff]  ;;  %v13739_v1 = vld [vmem:[#allocation249_spill] sm:$0xff] }
0x1115   : > { %v5336_v59 = vpop.f32.mrf.mxu0  ;;  %v5377_v46 = vpop.f32.mrf.mxu1  ;;  %7503 = vpow2.f32 %v6887_v50  ;;  %v1349_v29 = vadd.f32 %v13737_v42, %v13736_v28  ;;  %v13760_v28 = vld [vmem:[#allocation131_spill] sm:$0xff] }
0x1116   : > { %7505 = vpow2.f32 %v6886_v14  ;;  %v13738_v14 = vld [vmem:[#allocation248_spill] sm:$0xff] }
0x1117   : > { %7507 = vpow2.f32 %v6888_v30 }
0x1121   : > { %v7502_v59 = vpop.eup %7501 }
0x1122   : > { %v7504_v49 = vpop.eup %7503  ;;  %v5475_v44 = vadd.f32 1.0, %v7502_v59 }
0x1123   : > { %v7506_v46 = vpop.eup %7505  ;;  %v5487_v53 = vadd.f32 1.0, %v7504_v49 }
0x1124   : > { %v7508_v36 = vpop.eup %7507  ;;  %v5476_v31 = vadd.f32 1.0, %v7506_v46  ;;  %7509 = vrcp.f32 %v5475_v44 }
0x1125   : > { %v5488_v41 = vadd.f32 1.0, %v7508_v36  ;;  %7511 = vrcp.f32 %v5487_v53 }
0x1126   : > { %7513 = vrcp.f32 %v5476_v31 }
0x1131   : > { %v7510_v53 = vpop.eup %7509 }
0x114f   : > { %v5413_v39 = vpop.f32.mrf.mxu0  ;;  %v5454_v12 = vpop.f32.mrf.mxu1 }
0x1150   : > { %v5465_v50 = vadd.f32 %v5413_v39, %v13738_v14  ;;  %v5467_v22 = vadd.f32 %v5454_v12, %v13739_v1  ;;  %v7512_v39 = vpop.eup %7511 }
0x1151   : > { %v5415_v35 = vpop.f32.mrf.mxu0  ;;  %v5456_v30 = vpop.f32.mrf.mxu1  ;;  %v5507_v1 = vmul.f32 %v7512_v39, %v11253_v13 }
0x1152   : > { %7515 = vtanh.f32 %v5465_v50  ;;  %v6889_v59 = vmul.f32 -1.442695, %v5467_v22  ;;  %v5466_v49 = vadd.f32 %v5415_v35, %v1236_v3  ;;  %v5468_v46 = vadd.f32 %v5456_v30, %v1349_v29  ;;  %v7514_v14 = vpop.eup %7513 }
0x1153   : > { %7517 = vrcp.f32 %v5488_v41  ;;  %v5417_v54 = vpop.f32.mrf.mxu0  ;;  %v5458_v44 = vpop.f32.mrf.mxu1 }
0x1154   : > { %7519 = vpow2.f32 %v6889_v59  ;;  %v6890_v36 = vmul.f32 -1.442695, %v5468_v46 }
0x1155   : > { %7521 = vtanh.f32 %v5466_v49  ;;  %v5418_v26 = vpop.f32.mrf.mxu0  ;;  %v5459_v42 = vpop.f32.mrf.mxu1 }
0x1156   : > { %7523 = vpow2.f32 %v6890_v36 }
0x115f   : > { %v7516_v12 = vpop.eup %7515 }
0x1160   : > { %v7518_v31 = vpop.eup %7517  ;;  %v5509_v50 = vmul.f32 %v7516_v12, %v7510_v53  ;;  %v13742_v12 = vld [vmem:[#allocation113_spill] sm:$0xff] }
0x1161   : > { %v7520_v22 = vpop.eup %7519  ;;  %v5508_v30 = vmul.f32 %v7518_v31, %v11257_v27  ;;  %v13740_v27 = vld [vmem:[#allocation111_spill] sm:$0xff]  ;;  %v13743_v31 = vld [vmem:[#allocation114_spill] sm:$0xff] }
0x1162   : > { %v7522_v3 = vpop.eup %7521  ;;  %v11407_v29 = vadd.f32 %v5509_v50, %v5507_v1  ;;  %v5501_v41 = vadd.f32 1.0, %v7520_v22  ;;  %v13744_v1 = vld [vmem:[#allocation115_spill] sm:$0xff]  ;;  %v13745_v50 = vld [vmem:[#allocation116_spill] sm:$0xff]  ;;  %v13746_v22 = vld [vmem:[#allocation117_spill] sm:$0xff] }
0x1163   : > { %v7524_v35 = vpop.eup %7523  ;;  %v5510_v59 = vmul.f32 %v7522_v3, %v7514_v14  ;;  %v13741_v14 = vld [vmem:[#allocation112_spill] sm:$0xff]  ;;  %v13747_v3 = vld [vmem:[#allocation118_spill] sm:$0xff] }
0x1164   : > { %7525 = vtanh.f32 %v11407_v29  ;;  %v5502_v26 = vadd.f32 1.0, %v7524_v35  ;;  %v13749_v35 = vld [vmem:[#allocation120_spill] sm:$0xff] }
0x1165   : > { %7527 = vrcp.f32 %v5501_v41  ;;  %v11411_v49 = vadd.f32 %v5510_v59, %v5508_v30  ;;  %v13748_v41 = vld [vmem:[#allocation119_spill] sm:$0xff]  ;;  %v13750_v30 = vld [vmem:[#allocation121_spill] sm:$0xff]  ;;  %v13751_v59 = vld [vmem:[#allocation122_spill] sm:$0xff] }
0x1166   : > { %7529 = vrcp.f32 %v5502_v26  ;;  %v13752_v26 = vld [vmem:[#allocation123_spill] sm:$0xff] }
0x1167   : > { %7531 = vtanh.f32 %v11411_v49 }
0x1171   : > { %v7526_v13 = vpop.eup %7525 }
0x1172   : > { %v7528_v46 = vpop.eup %7527 }
0x1173   : > { %v7530_v54 = vpop.eup %7529  ;;  %v5515_v36 = vmul.f32 %v7528_v46, %v7526_v13  ;;  %v13753_v13 = vld [vmem:[#allocation124_spill] sm:$0xff]  ;;  %v13754_v46 = vld [vmem:[#allocation125_spill] sm:$0xff] }
0x1174   : > { %v7532_v44 = vpop.eup %7531 }
0x1175   : > { %v5516_v42 = vmul.f32 %v7532_v44, %v7530_v54  ;;  %v11414_v39 = vpack.c.bf16 %v5515_v36, %v5515_v36  ;;  %v13755_v54 = vld [vmem:[#allocation126_spill] sm:$0xff]  ;;  %v13756_v44 = vld [vmem:[#allocation127_spill] sm:$0xff]  ;;  %v13757_v36 = vld [vmem:[#allocation128_spill] sm:$0xff] }
0x1177   : > { %v5529_v53 = vpack.c.bf16 %v5516_v42, %v5516_v42  ;;  %v13758_v42 = vld [vmem:[#allocation129_spill] sm:$0xff] }
0x1179   : > { %5562 = vmatprep.mubr.bf16.mxu0 %v5529_v53  ;;  %5603 = vmatprep.mubr.bf16.mxu1 %v5529_v53 }
0x117a   : > { %5563 = vmatmul.mubr.bf16.vlgmr.msra.gmra.mxu0 %v11414_v39  ;;  %5604 = vmatmul.mubr.bf16.vlgmr.msra.gmra.mxu1 %v11414_v39 }
0x117b   : > { %5613 = vmatpush1.bf16.msra.mxu0 %v12462_v11  ;;  %5654 = vmatpush1.bf16.msra.mxu1 %v12463_v63 }
0x117c   : > { %5644 = vmatprep.mubr.bf16.mxu0 %v5529_v53  ;;  %5685 = vmatprep.mubr.bf16.mxu1 %v5529_v53  ;;  %v13759_v53 = vld [vmem:[#allocation130_spill] sm:$0xff] }
0x117d   : > { %5614 = vmatprep.subr.bf16.mxu0 %v12464_v60  ;;  %5655 = vmatprep.subr.bf16.mxu1 %v12465_v10 }
0x117f   : > { %5615 = vmatpush1.bf16.msra.mxu0 %v12466_v15  ;;  %5656 = vmatpush1.bf16.msra.mxu1 %v12467_v61 }
0x1180   : > { %5616 = vmatprep.subr.bf16.mxu0 %v12468_v52  ;;  %5657 = vmatprep.subr.bf16.mxu1 %v12469_v0 }
0x1183   : > { %5617 = vmatpush1.bf16.msra.mxu0 %v12470_v38  ;;  %5658 = vmatpush1.bf16.msra.mxu1 %v12471_v45 }
0x1184   : > { %5618 = vmatprep.subr.bf16.mxu0 %v12472_v51  ;;  %5659 = vmatprep.subr.bf16.mxu1 %v12473_v16 }
0x1187   : > { %5619 = vmatpush1.bf16.msra.mxu0 %v12564_v62  ;;  %5660 = vmatpush1.bf16.msra.mxu1 %v12565_v23 }
0x1188   : > { %5620 = vmatprep.subr.bf16.mxu0 %v12566_v34  ;;  %5661 = vmatprep.subr.bf16.mxu1 %v12567_v57 }
0x118b   : > { %5621 = vmatpush1.bf16.msra.mxu0 %v12568_v4  ;;  %5662 = vmatpush1.bf16.msra.mxu1 %v12569_v24 }
0x118c   : > { %5622 = vmatprep.subr.bf16.mxu0 %v12570_v37  ;;  %5663 = vmatprep.subr.bf16.mxu1 %v12571_v33 }
0x118f   : > { %5623 = vmatpush1.bf16.msra.mxu0 %v12572_v40  ;;  %5664 = vmatpush1.bf16.msra.mxu1 %v12573_v19 }
0x1190   : > { %5624 = vmatprep.subr.bf16.mxu0 %v12574_v47  ;;  %5665 = vmatprep.subr.bf16.mxu1 %v12661_v20 }
0x1193   : > { %5625 = vmatpush1.bf16.msra.mxu0 %v12662_v48  ;;  %5666 = vmatpush1.bf16.msra.mxu1 %v12663_v58 }
0x1194   : > { %5626 = vmatprep.subr.bf16.mxu0 %v12664_v7  ;;  %5667 = vmatprep.subr.bf16.mxu1 %v12665_v5 }
0x1197   : > { %5627 = vmatpush1.bf16.msra.mxu0 %v12666_v6  ;;  %5668 = vmatpush1.bf16.msra.mxu1 %v12667_v25 }
0x1198   : > { %5628 = vmatprep.subr.bf16.mxu0 %v12668_v8  ;;  %5669 = vmatprep.subr.bf16.mxu1 %v12583_v9 }
0x119b   : > { %5629 = vmatpush2.bf16.msra.mxu0 %v12584_v32  ;;  %5670 = vmatpush2.bf16.msra.mxu1 %v12585_v2 }
0x119c   : > { %5630 = vmatprep.subr.bf16.mxu0 %v12586_v43  ;;  %5671 = vmatprep.subr.bf16.mxu1 %v12587_v18 }
0x119f   : > { %5631 = vmatpush2.bf16.msra.mxu0 %v12588_v56  ;;  %5672 = vmatpush2.bf16.msra.mxu1 %v12589_v55 }
0x11a0   : > { %5632 = vmatprep.subr.bf16.mxu0 %v12669_v17  ;;  %5673 = vmatprep.subr.bf16.mxu1 %v13740_v27 }
0x11a3   : > { %5633 = vmatpush2.bf16.msra.mxu0 %v13741_v14  ;;  %5674 = vmatpush2.bf16.msra.mxu1 %v13742_v12 }
0x11a4   : > { %5634 = vmatprep.subr.bf16.mxu0 %v13743_v31  ;;  %5675 = vmatprep.subr.bf16.mxu1 %v13744_v1 }
0x11a7   : > { %5635 = vmatpush2.bf16.msra.mxu0 %v13745_v50  ;;  %5676 = vmatpush2.bf16.msra.mxu1 %v13746_v22  ;;  %v13831_v22 = vld [vmem:[#allocation192_spill] sm:$0xff] }
0x11a8   : > { %5636 = vmatprep.subr.bf16.mxu0 %v13747_v3  ;;  %5677 = vmatprep.subr.bf16.mxu1 %v13748_v41  ;;  %v13829_v41 = vld [vmem:[#allocation190_spill] sm:$0xff]  ;;  %v13830_v3 = vld [vmem:[#allocation191_spill] sm:$0xff] }
0x11ab   : > { %5637 = vmatpush2.bf16.msra.mxu0 %v13749_v35  ;;  %5678 = vmatpush2.bf16.msra.mxu1 %v13750_v30 }
0x11ac   : > { %5638 = vmatprep.subr.bf16.mxu0 %v13751_v59  ;;  %5679 = vmatprep.subr.bf16.mxu1 %v13752_v26  ;;  %v13762_v59 = vld [vmem:[#allocation133_spill] sm:$0xff]  ;;  %v13763_v26 = vld [vmem:[#allocation6_spill] sm:$0xff] }
0x11af   : > { %5639 = vmatpush2.bf16.msra.mxu0 %v13753_v13  ;;  %5680 = vmatpush2.bf16.msra.mxu1 %v13754_v46  ;;  %v13764_v13 = vld [vmem:[#allocation7_spill] sm:$0xff] }
0x11b0   : > { %5640 = vmatprep.subr.bf16.mxu0 %v13755_v54  ;;  %5681 = vmatprep.subr.bf16.mxu1 %v13756_v44  ;;  %v13765_v44 = vld [vmem:[#allocation8_spill] sm:$0xff]  ;;  %v13774_v54 = vld [vmem:[#allocation17_spill] sm:$0xff] }
0x11b3   : > { %5641 = vmatpush2.bf16.msra.mxu0 %v13757_v36  ;;  %5682 = vmatpush2.bf16.msra.mxu1 %v13758_v42  ;;  %v13766_v36 = vld [vmem:[#allocation9_spill] sm:$0xff]  ;;  %v13767_v42 = vld [vmem:[#allocation10_spill] sm:$0xff] }
0x11b4   : > { %5642 = vmatprep.subr.bf16.mxu0 %v13759_v53  ;;  %5683 = vmatprep.subr.bf16.mxu1 %v13760_v28  ;;  %v13768_v53 = vld [vmem:[#allocation11_spill] sm:$0xff]  ;;  %v13769_v28 = vld [vmem:[#allocation12_spill] sm:$0xff] }
0x11b7   : > { %5643 = vmatpush2.bf16.msra.mxu0 %v13761_v21  ;;  %5684 = vmatpush2.bf16.msra.mxu1 %v13762_v59  ;;  %v13770_v21 = vld [vmem:[#allocation13_spill] sm:$0xff]  ;;  %v13771_v59 = vld [vmem:[#allocation14_spill] sm:$0xff] }
0x11b8   : > { %5763 = vmatprep.subr.bf16.mxu0 %v13763_v26  ;;  %5804 = vmatprep.subr.bf16.mxu1 %v13764_v13  ;;  %v13772_v26 = vld [vmem:[#allocation15_spill] sm:$0xff]  ;;  %v13773_v13 = vld [vmem:[#allocation16_spill] sm:$0xff] }
0x11ba   : > { %5645 = vmatmul.mubr.bf16.vlgmr.msra.gmra.mxu0 %v11414_v39  ;;  %5686 = vmatmul.mubr.bf16.vlgmr.msra.gmra.mxu1 %v11414_v39  ;;  %v13775_v39 = vld [vmem:[#allocation18_spill] sm:$0xff] }
0x11bb   : > { %5764 = vmatpush1.bf16.msra.mxu0 %v13765_v44  ;;  %5805 = vmatpush1.bf16.msra.mxu1 %v13766_v36  ;;  %v13776_v44 = vld [vmem:[#allocation19_spill] sm:$0xff]  ;;  %v13777_v36 = vld [vmem:[#allocation20_spill] sm:$0xff] }
0x11bc   : > { %5765 = vmatprep.subr.bf16.mxu0 %v13767_v42  ;;  %5806 = vmatprep.subr.bf16.mxu1 %v13768_v53  ;;  %v13778_v42 = vld [vmem:[#allocation21_spill] sm:$0xff]  ;;  %v13779_v53 = vld [vmem:[#allocation22_spill] sm:$0xff] }
0x11bf   : > { %5766 = vmatpush1.bf16.msra.mxu0 %v13769_v28  ;;  %5807 = vmatpush1.bf16.msra.mxu1 %v13770_v21  ;;  %v13780_v28 = vld [vmem:[#allocation23_spill] sm:$0xff]  ;;  %v13781_v21 = vld [vmem:[#allocation24_spill] sm:$0xff] }
0x11c0   : > { %5767 = vmatprep.subr.bf16.mxu0 %v13771_v59  ;;  %5808 = vmatprep.subr.bf16.mxu1 %v13772_v26  ;;  %v13782_v59 = vld [vmem:[#allocation25_spill] sm:$0xff]  ;;  %v13783_v26 = vld [vmem:[#allocation26_spill] sm:$0xff] }
0x11c3   : > { %5768 = vmatpush1.bf16.msra.mxu0 %v13773_v13  ;;  %5809 = vmatpush1.bf16.msra.mxu1 %v13774_v54  ;;  %v13784_v13 = vld [vmem:[#allocation27_spill] sm:$0xff]  ;;  %v13785_v54 = vld [vmem:[#allocation28_spill] sm:$0xff] }
0x11c4   : > { %5769 = vmatprep.subr.bf16.mxu0 %v13775_v39  ;;  %5810 = vmatprep.subr.bf16.mxu1 %v13776_v44  ;;  %v13786_v39 = vld [vmem:[#allocation29_spill] sm:$0xff]  ;;  %v13787_v44 = vld [vmem:[#allocation30_spill] sm:$0xff] }
0x11c7   : > { %5770 = vmatpush1.bf16.msra.mxu0 %v13777_v36  ;;  %5811 = vmatpush1.bf16.msra.mxu1 %v13778_v42  ;;  %v13788_v36 = vld [vmem:[#allocation31_spill] sm:$0xff]  ;;  %v13789_v42 = vld [vmem:[#allocation32_spill] sm:$0xff] }
0x11c8   : > { %5771 = vmatprep.subr.bf16.mxu0 %v13779_v53  ;;  %5812 = vmatprep.subr.bf16.mxu1 %v13780_v28  ;;  %v13790_v53 = vld [vmem:[#allocation33_spill] sm:$0xff]  ;;  %v13791_v28 = vld [vmem:[#allocation34_spill] sm:$0xff] }
0x11cb   : > { %5772 = vmatpush1.bf16.msra.mxu0 %v13781_v21  ;;  %5813 = vmatpush1.bf16.msra.mxu1 %v13782_v59  ;;  %v13792_v21 = vld [vmem:[#allocation35_spill] sm:$0xff]  ;;  %v13793_v59 = vld [vmem:[#allocation36_spill] sm:$0xff] }
0x11cc   : > { %5773 = vmatprep.subr.bf16.mxu0 %v13783_v26  ;;  %5814 = vmatprep.subr.bf16.mxu1 %v13784_v13  ;;  %v13794_v26 = vld [vmem:[#allocation37_spill] sm:$0xff]  ;;  %v13795_v13 = vld [vmem:[#allocation38_spill] sm:$0xff] }
0x11cf   : > { %5774 = vmatpush1.bf16.msra.mxu0 %v13785_v54  ;;  %5815 = vmatpush1.bf16.msra.mxu1 %v13786_v39  ;;  %v13796_v54 = vld [vmem:[#allocation39_spill] sm:$0xff]  ;;  %v13797_v39 = vld [vmem:[#allocation40_spill] sm:$0xff] }
0x11d0   : > { %5775 = vmatprep.subr.bf16.mxu0 %v13787_v44  ;;  %5816 = vmatprep.subr.bf16.mxu1 %v13788_v36  ;;  %v13798_v44 = vld [vmem:[#allocation41_spill] sm:$0xff]  ;;  %v13799_v36 = vld [vmem:[#allocation42_spill] sm:$0xff] }
0x11d3   : > { %5776 = vmatpush1.bf16.msra.mxu0 %v13789_v42  ;;  %5817 = vmatpush1.bf16.msra.mxu1 %v13790_v53  ;;  %v13800_v42 = vld [vmem:[#allocation43_spill] sm:$0xff]  ;;  %v13801_v53 = vld [vmem:[#allocation44_spill] sm:$0xff] }
0x11d4   : > { %5777 = vmatprep.subr.bf16.mxu0 %v13791_v28  ;;  %5818 = vmatprep.subr.bf16.mxu1 %v13792_v21  ;;  %v13802_v28 = vld [vmem:[#allocation45_spill] sm:$0xff]  ;;  %v13803_v21 = vld [vmem:[#allocation46_spill] sm:$0xff] }
0x11d7   : > { %5778 = vmatpush1.bf16.msra.mxu0 %v13793_v59  ;;  %5819 = vmatpush1.bf16.msra.mxu1 %v13794_v26  ;;  %v13804_v59 = vld [vmem:[#allocation47_spill] sm:$0xff]  ;;  %v13805_v26 = vld [vmem:[#allocation48_spill] sm:$0xff] }
0x11d8   : > { %5779 = vmatprep.subr.bf16.mxu0 %v13795_v13  ;;  %5820 = vmatprep.subr.bf16.mxu1 %v13796_v54  ;;  %v13806_v13 = vld [vmem:[#allocation49_spill] sm:$0xff]  ;;  %v13807_v54 = vld [vmem:[#allocation50_spill] sm:$0xff] }
0x11db   : > { %5780 = vmatpush2.bf16.msra.mxu0 %v13797_v39  ;;  %5821 = vmatpush2.bf16.msra.mxu1 %v13798_v44  ;;  %v13808_v39 = vld [vmem:[#allocation51_spill] sm:$0xff]  ;;  %v13809_v44 = vld [vmem:[#allocation52_spill] sm:$0xff] }
0x11dc   : > { %5781 = vmatprep.subr.bf16.mxu0 %v13799_v36  ;;  %5822 = vmatprep.subr.bf16.mxu1 %v13800_v42  ;;  %v13810_v36 = vld [vmem:[#allocation53_spill] sm:$0xff]  ;;  %v13811_v42 = vld [vmem:[#allocation54_spill] sm:$0xff] }
0x11df   : > { %5782 = vmatpush2.bf16.msra.mxu0 %v13801_v53  ;;  %5823 = vmatpush2.bf16.msra.mxu1 %v13802_v28  ;;  %v13812_v53 = vld [vmem:[#allocation55_spill] sm:$0xff]  ;;  %v13813_v28 = vld [vmem:[#allocation56_spill] sm:$0xff] }
0x11e0   : > { %5783 = vmatprep.subr.bf16.mxu0 %v13803_v21  ;;  %5824 = vmatprep.subr.bf16.mxu1 %v13804_v59  ;;  %v13814_v21 = vld [vmem:[#allocation57_spill] sm:$0xff]  ;;  %v13815_v59 = vld [vmem:[#allocation58_spill] sm:$0xff] }
0x11e3   : > { %5784 = vmatpush2.bf16.msra.mxu0 %v13805_v26  ;;  %5825 = vmatpush2.bf16.msra.mxu1 %v13806_v13  ;;  %v13816_v26 = vld [vmem:[#allocation59_spill] sm:$0xff]  ;;  %v13817_v13 = vld [vmem:[#allocation60_spill] sm:$0xff] }
0x11e4   : > { %5785 = vmatprep.subr.bf16.mxu0 %v13807_v54  ;;  %5826 = vmatprep.subr.bf16.mxu1 %v13808_v39  ;;  %v13818_v54 = vld [vmem:[#allocation61_spill] sm:$0xff]  ;;  %v13819_v39 = vld [vmem:[#allocation62_spill] sm:$0xff] }
0x11e7   : > { %5786 = vmatpush2.bf16.msra.mxu0 %v13809_v44  ;;  %5827 = vmatpush2.bf16.msra.mxu1 %v13810_v36  ;;  %v13820_v44 = vld [vmem:[#allocation63_spill] sm:$0xff]  ;;  %v13821_v36 = vld [vmem:[#allocation64_spill] sm:$0xff] }
0x11e8   : > { %5787 = vmatprep.subr.bf16.mxu0 %v13811_v42  ;;  %5828 = vmatprep.subr.bf16.mxu1 %v13812_v53  ;;  %v13822_v42 = vld [vmem:[#allocation65_spill] sm:$0xff]  ;;  %v13823_v53 = vld [vmem:[#allocation66_spill] sm:$0xff] }
0x11eb   : > { %5788 = vmatpush2.bf16.msra.mxu0 %v13813_v28  ;;  %5829 = vmatpush2.bf16.msra.mxu1 %v13814_v21  ;;  %v13824_v28 = vld [vmem:[#allocation67_spill] sm:$0xff]  ;;  %v13825_v21 = vld [vmem:[#allocation68_spill] sm:$0xff] }
0x11ec   : > { %5789 = vmatprep.subr.bf16.mxu0 %v13815_v59  ;;  %5830 = vmatprep.subr.bf16.mxu1 %v13816_v26  ;;  %v13826_v59 = vld [vmem:[#allocation69_spill] sm:$0xff]  ;;  %v13827_v26 = vld [vmem:[#allocation70_spill] sm:$0xff] }
0x11ef   : > { %5790 = vmatpush2.bf16.msra.mxu0 %v13817_v13  ;;  %5831 = vmatpush2.bf16.msra.mxu1 %v13818_v54  ;;  %v13828_v13 = vld [vmem:[#allocation71_spill] sm:$0xff] }
0x11f0   : > { %5791 = vmatprep.subr.bf16.mxu0 %v13819_v39  ;;  %5832 = vmatprep.subr.bf16.mxu1 %v13820_v44 }
0x11f3   : > { %5792 = vmatpush2.bf16.msra.mxu0 %v13821_v36  ;;  %5833 = vmatpush2.bf16.msra.mxu1 %v13822_v42 }
0x11f4   : > { %5793 = vmatprep.subr.bf16.mxu0 %v13823_v53  ;;  %5834 = vmatprep.subr.bf16.mxu1 %v13824_v28 }
0x11f7   : > { %5794 = vmatpush2.bf16.msra.mxu0 %v13825_v21  ;;  %5835 = vmatpush2.bf16.msra.mxu1 %v13826_v59  ;;  %v13832_v59 = vld [vmem:[#allocation193_spill] sm:$0xff] }
0x11f8   : > { %5845 = vmatprep.subr.bf16.mxu0 %v13827_v26  ;;  %5886 = vmatprep.subr.bf16.mxu1 %v13828_v13 }
0x123a   : > { %v5564_v54 = vpop.f32.mrf.mxu0  ;;  %v5605_v39 = vpop.f32.mrf.mxu1 }
0x123b   : > { %v5694_v53 = vadd.f32 %v5564_v54, %v13829_v41  ;;  %v5696_v28 = vadd.f32 %v5605_v39, %v13830_v3  ;;  %v13833_v39 = vld [vmem:[#allocation252_spill] sm:$0xff] }
0x123c   : > { %v5566_v46 = vpop.f32.mrf.mxu0  ;;  %v5607_v44 = vpop.f32.mrf.mxu1 }
0x123d   : > { %v5695_v21 = vadd.f32 %v5566_v46, %v13831_v22  ;;  %v6891_v50 = vmul.f32 -1.442695, %v5694_v53  ;;  %v5697_v1 = vadd.f32 %v5607_v44, %v13832_v59  ;;  %v6893_v26 = vmul.f32 -1.442695, %v5696_v28  ;;  %v13834_v53 = vld [vmem:[#allocation253_spill] sm:$0xff] }
0x123e   : > { %v5568_v30 = vpop.f32.mrf.mxu0  ;;  %v5609_v36 = vpop.f32.mrf.mxu1 }
0x123f   : > { %v6892_v31 = vmul.f32 -1.442695, %v5695_v21  ;;  %7533 = vpow2.f32 %v6891_v50  ;;  %v6894_v13 = vmul.f32 -1.442695, %v5697_v1  ;;  %v13835_v21 = vld [vmem:[#allocation254_spill] sm:$0xff] }
0x1240   : > { %v5569_v35 = vpop.f32.mrf.mxu0  ;;  %v5610_v42 = vpop.f32.mrf.mxu1  ;;  %7535 = vpow2.f32 %v6893_v26  ;;  %v13836_v26 = vld [vmem:[#allocation255_spill] sm:$0xff] }
0x1241   : > { %7537 = vpow2.f32 %v6892_v31 }
0x1242   : > { %7539 = vpow2.f32 %v6894_v13 }
0x124c   : > { %v7534_v30 = vpop.eup %7533 }
0x124d   : > { %v7536_v36 = vpop.eup %7535  ;;  %v5708_v42 = vadd.f32 1.0, %v7534_v30 }
0x124e   : > { %v7538_v35 = vpop.eup %7537  ;;  %v5720_v41 = vadd.f32 1.0, %v7536_v36 }
0x124f   : > { %v7540_v12 = vpop.eup %7539  ;;  %v5709_v54 = vadd.f32 1.0, %v7538_v35  ;;  %7541 = vrcp.f32 %v5708_v42 }
0x1250   : > { %v5721_v3 = vadd.f32 1.0, %v7540_v12  ;;  %7543 = vrcp.f32 %v5720_v41 }
0x1251   : > { %7545 = vrcp.f32 %v5709_v54 }
0x125c   : > { %v7542_v41 = vpop.eup %7541 }
0x127a   : > { %v5646_v22 = vpop.f32.mrf.mxu0  ;;  %v5687_v46 = vpop.f32.mrf.mxu1 }
0x127b   : > { %v5698_v44 = vadd.f32 %v5646_v22, %v13833_v39  ;;  %v5700_v50 = vadd.f32 %v5687_v46, %v13834_v53  ;;  %v7544_v22 = vpop.eup %7543 }
0x127c   : > { %v5648_v1 = vpop.f32.mrf.mxu0  ;;  %v5689_v31 = vpop.f32.mrf.mxu1 }
0x127d   : > { %7547 = vtanh.f32 %v5698_v44  ;;  %v6895_v28 = vmul.f32 -1.442695, %v5700_v50  ;;  %v5699_v59 = vadd.f32 %v5648_v1, %v13835_v21  ;;  %v5701_v13 = vadd.f32 %v5689_v31, %v13836_v26  ;;  %v7546_v54 = vpop.eup %7545 }
0x127e   : > { %7549 = vrcp.f32 %v5721_v3  ;;  %v5650_v30 = vpop.f32.mrf.mxu0  ;;  %v5691_v36 = vpop.f32.mrf.mxu1  ;;  %v5740_v44 = vmul.f32 %v7544_v22, %v11407_v29 }
0x127f   : > { %7551 = vpow2.f32 %v6895_v28  ;;  %v6896_v12 = vmul.f32 -1.442695, %v5701_v13 }
0x1280   : > { %7553 = vtanh.f32 %v5699_v59  ;;  %v5651_v35 = vpop.f32.mrf.mxu0  ;;  %v5692_v42 = vpop.f32.mrf.mxu1 }
0x1281   : > { %7555 = vpow2.f32 %v6896_v12 }
0x128a   : > { %v7548_v46 = vpop.eup %7547 }
0x128b   : > { %v7550_v39 = vpop.eup %7549  ;;  %v5742_v53 = vmul.f32 %v7548_v46, %v7542_v41  ;;  %v7056_v46 = vld [vmem:[%s11852_s4 + $0xc4] ss:$8 sps:$4 sm:$0xff]  }
0x128c   : > { %v7552_v50 = vpop.eup %7551  ;;  %v5741_v28 = vmul.f32 %v7550_v39, %v11411_v49  ;;  %v7050_v49 = vld [vmem:[%s11852_s4 + $0xe4] ss:$8 sps:$4 sm:$0xff]   ;;  %v7054_v39 = vld [vmem:[%s11852_s4 + $0xc0] ss:$8 sps:$4 sm:$0xff]  }
0x128d   : > { %v7554_v1 = vpop.eup %7553  ;;  %v11557_v31 = vadd.f32 %v5742_v53, %v5740_v44  ;;  %v5734_v3 = vadd.f32 1.0, %v7552_v50  ;;  %v7057_v44 = vld [vmem:[%s11852_s4 + $0xb0] ss:$8 sps:$4 sm:$0xff]   ;;  %v7059_v53 = vld [vmem:[%s11852_s4 + $0xb4] ss:$8 sps:$4 sm:$0xff]  }
0x128e   : > { %v7556_v21 = vpop.eup %7555  ;;  %v5743_v59 = vmul.f32 %v7554_v1, %v7546_v54  ;;  %v7051_v54 = vld [vmem:[%s11852_s4 + $0xd0] ss:$8 sps:$4 sm:$0xff]   ;;  %v7062_v50 = vld [vmem:[%s11852_s4 + $0xa4] ss:$8 sps:$4 sm:$0xff]   ;;  %v7060_v1 = vld [vmem:[%s11852_s4 + $0xa0] ss:$8 sps:$4 sm:$0xff]  }
0x128f   : > { %7557 = vtanh.f32 %v11557_v31  ;;  %v5735_v26 = vadd.f32 1.0, %v7556_v21  ;;  %v7063_v21 = vld [vmem:[%s11852_s4 + $0x90] ss:$8 sps:$4 sm:$0xff]  }
0x1290   : > { %7559 = vrcp.f32 %v5734_v3  ;;  %v11561_v13 = vadd.f32 %v5743_v59, %v5741_v28  ;;  %v7065_v3 = vld [vmem:[%s11852_s4 + $0x94] ss:$8 sps:$4 sm:$0xff]   ;;  %v7068_v28 = vld [vmem:[%s11852_s4 + $0x84] ss:$8 sps:$4 sm:$0xff]   ;;  %v7066_v59 = vld [vmem:[%s11852_s4 + $0x80] ss:$8 sps:$4 sm:$0xff]  }
0x1291   : > { %7561 = vrcp.f32 %v5735_v26  ;;  %v7069_v26 = vld [vmem:[%s11856_s8 + $0x78] sm:$0xff]  }
0x1292   : > { %7563 = vtanh.f32 %v11561_v13 }
0x129c   : > { %v7558_v29 = vpop.eup %7557 }
0x129d   : > { %v7560_v30 = vpop.eup %7559 }
0x129e   : > { %v7562_v36 = vpop.eup %7561  ;;  %v5748_v35 = vmul.f32 %v7560_v30, %v7558_v29  ;;  %v7070_v29 = vld [vmem:[%s11856_s8 + $0x38] sm:$0xff]   ;;  %v7071_v30 = vld [vmem:[%s11856_s8 + $0x70] sm:$0xff]  }
0x129f   : > { %v7564_v12 = vpop.eup %7563 }
0x12a0   : > { %v5749_v42 = vmul.f32 %v7564_v12, %v7562_v36  ;;  %v11564_v22 = vpack.c.bf16 %v5748_v35, %v5748_v35  ;;  %v7072_v36 = vld [vmem:[%s11856_s8 + $0x30] sm:$0xff]   ;;  %v7073_v12 = vld [vmem:[%s11856_s8 + $0x68] sm:$0xff]  }
0x12a1   : > { %v7074_v35 = vld [vmem:[%s11856_s8 + $0x28] sm:$0xff]  }
0x12a2   : > { %v5762_v41 = vpack.c.bf16 %v5749_v42, %v5749_v42  ;;  %v7075_v42 = vld [vmem:[%s11856_s8 + $0x60] sm:$0xff]  }
0x12a4   : > { %5795 = vmatprep.mubr.bf16.mxu0 %v5762_v41  ;;  %5836 = vmatprep.mubr.bf16.mxu1 %v5762_v41 }
0x12a5   : > { %5796 = vmatmul.mubr.bf16.vlgmr.msra.gmra.mxu0 %v11564_v22  ;;  %5837 = vmatmul.mubr.bf16.vlgmr.msra.gmra.mxu1 %v11564_v22 }
0x12a6   : > { %5846 = vmatpush1.bf16.msra.mxu0 %v12462_v11  ;;  %5887 = vmatpush1.bf16.msra.mxu1 %v12463_v63  ;;  %v13837_v11 = vld [vmem:[#allocation113_spill] sm:$0xff]  ;;  %v13838_v63 = vld [vmem:[#allocation114_spill] sm:$0xff] }
0x12a7   : > { %5877 = vmatprep.mubr.bf16.mxu0 %v5762_v41  ;;  %5918 = vmatprep.mubr.bf16.mxu1 %v5762_v41  ;;  %v7076_v41 = vld [vmem:[%s11856_s8 + $0x20] sm:$0xff]  }
0x12a8   : > { %5847 = vmatprep.subr.bf16.mxu0 %v12464_v60  ;;  %5888 = vmatprep.subr.bf16.mxu1 %v12465_v10  ;;  %v13839_v60 = vld [vmem:[#allocation115_spill] sm:$0xff]  ;;  %v13841_v10 = vld [vmem:[#allocation117_spill] sm:$0xff] }
0x12aa   : > { %5848 = vmatpush1.bf16.msra.mxu0 %v12466_v15  ;;  %5889 = vmatpush1.bf16.msra.mxu1 %v12467_v61  ;;  %v13842_v15 = vld [vmem:[#allocation118_spill] sm:$0xff]  ;;  %v13843_v61 = vld [vmem:[#allocation119_spill] sm:$0xff] }
0x12ab   : > { %5849 = vmatprep.subr.bf16.mxu0 %v12468_v52  ;;  %5890 = vmatprep.subr.bf16.mxu1 %v12469_v0  ;;  %v13844_v52 = vld [vmem:[#allocation120_spill] sm:$0xff]  ;;  %v13845_v0 = vld [vmem:[#allocation121_spill] sm:$0xff] }
0x12ae   : > { %5850 = vmatpush1.bf16.msra.mxu0 %v12470_v38  ;;  %5891 = vmatpush1.bf16.msra.mxu1 %v12471_v45  ;;  %v13846_v38 = vld [vmem:[#allocation122_spill] sm:$0xff]  ;;  %v13847_v45 = vld [vmem:[#allocation123_spill] sm:$0xff] }
0x12af   : > { %5851 = vmatprep.subr.bf16.mxu0 %v12472_v51  ;;  %5892 = vmatprep.subr.bf16.mxu1 %v12473_v16  ;;  %v13848_v51 = vld [vmem:[#allocation124_spill] sm:$0xff]  ;;  %v13849_v16 = vld [vmem:[#allocation125_spill] sm:$0xff] }
0x12b2   : > { %5852 = vmatpush1.bf16.msra.mxu0 %v12564_v62  ;;  %5893 = vmatpush1.bf16.msra.mxu1 %v12565_v23  ;;  %v13851_v62 = vld [vmem:[#allocation127_spill] sm:$0xff]  ;;  %v13852_v23 = vld [vmem:[#allocation128_spill] sm:$0xff] }
0x12b3   : > { %5853 = vmatprep.subr.bf16.mxu0 %v12566_v34  ;;  %5894 = vmatprep.subr.bf16.mxu1 %v12567_v57  ;;  %v13853_v34 = vld [vmem:[#allocation129_spill] sm:$0xff]  ;;  %v13854_v57 = vld [vmem:[#allocation130_spill] sm:$0xff] }
0x12b6   : > { %5854 = vmatpush1.bf16.msra.mxu0 %v12568_v4  ;;  %5895 = vmatpush1.bf16.msra.mxu1 %v12569_v24  ;;  %v13855_v4 = vld [vmem:[#allocation131_spill] sm:$0xff]  ;;  %v13856_v24 = vld [vmem:[#allocation132_spill] sm:$0xff] }
0x12b7   : > { %5855 = vmatprep.subr.bf16.mxu0 %v12570_v37  ;;  %5896 = vmatprep.subr.bf16.mxu1 %v12571_v33  ;;  %v13857_v37 = vld [vmem:[#allocation133_spill] sm:$0xff]  ;;  %v7021_v33 = vld [vmem:[%s11852_s4 + $0x70] ss:$8 sps:$4 sm:$0xff]  }
0x12ba   : > { %5856 = vmatpush1.bf16.msra.mxu0 %v12572_v40  ;;  %5897 = vmatpush1.bf16.msra.mxu1 %v12573_v19  ;;  %v7023_v40 = vld [vmem:[%s11852_s4 + $0x74] ss:$8 sps:$4 sm:$0xff]   ;;  %v7026_v19 = vld [vmem:[%s11852_s4 + $0x64] ss:$8 sps:$4 sm:$0xff]  }
0x12bb   : > { %5857 = vmatprep.subr.bf16.mxu0 %v12574_v47  ;;  %5898 = vmatprep.subr.bf16.mxu1 %v12661_v20  ;;  %v7024_v47 = vld [vmem:[%s11852_s4 + $0x60] ss:$8 sps:$4 sm:$0xff]   ;;  %v7033_v20 = vld [vmem:[%s11852_s4 + $0x30] ss:$8 sps:$4 sm:$0xff]  }
0x12be   : > { %5858 = vmatpush1.bf16.msra.mxu0 %v12662_v48  ;;  %5899 = vmatpush1.bf16.msra.mxu1 %v12663_v58  ;;  %v7038_v48 = vld [vmem:[%s11852_s4 + $0x24] ss:$8 sps:$4 sm:$0xff]   ;;  %v7036_v58 = vld [vmem:[%s11852_s4 + $0x20] ss:$8 sps:$4 sm:$0xff]  }
0x12bf   : > { %5859 = vmatprep.subr.bf16.mxu0 %v12664_v7  ;;  %5900 = vmatprep.subr.bf16.mxu1 %v12665_v5  ;;  %v7041_v7 = vld [vmem:[%s11852_s4 + $0x14] ss:$8 sps:$4 sm:$0xff]   ;;  %v7039_v5 = vld [vmem:[%s11852_s4 + $0x10] ss:$8 sps:$4 sm:$0xff]  }
0x12c2   : > { %5860 = vmatpush1.bf16.msra.mxu0 %v12666_v6  ;;  %5901 = vmatpush1.bf16.msra.mxu1 %v12667_v25  ;;  %v7044_v6 = vld [vmem:[%s11852_s4 + $0x4] ss:$8 sps:$4 sm:$0xff]   ;;  %v7042_v25 = vld [vmem:[%s11852_s4] ss:$8 sps:$4 sm:$0xff]  }
0x12c3   : > { %5861 = vmatprep.subr.bf16.mxu0 %v12668_v8  ;;  %5902 = vmatprep.subr.bf16.mxu1 %v12583_v9  ;;  %v7035_v9 = vld [vmem:[%s11852_s4 + $0x34] ss:$8 sps:$4 sm:$0xff]  }
0x12c4   : > { %v7047_v8 = vld [vmem:[%s11852_s4 + $0xf4] ss:$8 sps:$4 sm:$0xff]  }
0x12c6   : > { %5862 = vmatpush2.bf16.msra.mxu0 %v12584_v32  ;;  %5903 = vmatpush2.bf16.msra.mxu1 %v12585_v2  ;;  %v13840_v2 = vld [vmem:[#allocation116_spill] sm:$0xff]  ;;  %v13850_v32 = vld [vmem:[#allocation126_spill] sm:$0xff] }
0x12c7   : > { %5863 = vmatprep.subr.bf16.mxu0 %v12586_v43  ;;  %5904 = vmatprep.subr.bf16.mxu1 %v12587_v18  ;;  %v7029_v43 = vld [vmem:[%s11852_s4 + $0x54] ss:$8 sps:$4 sm:$0xff]   ;;  %v7027_v18 = vld [vmem:[%s11852_s4 + $0x50] ss:$8 sps:$4 sm:$0xff]  }
0x12ca   : > { %5864 = vmatpush2.bf16.msra.mxu0 %v12588_v56  ;;  %5905 = vmatpush2.bf16.msra.mxu1 %v12589_v55  ;;  %v7032_v56 = vld [vmem:[%s11852_s4 + $0x44] ss:$8 sps:$4 sm:$0xff]   ;;  %v7030_v55 = vld [vmem:[%s11852_s4 + $0x40] ss:$8 sps:$4 sm:$0xff]  }
0x12cb   : > { %5865 = vmatprep.subr.bf16.mxu0 %v12669_v17  ;;  %5906 = vmatprep.subr.bf16.mxu1 %v13740_v27  ;;  %v7045_v17 = vld [vmem:[%s11852_s4 + $0xf0] ss:$8 sps:$4 sm:$0xff]   ;;  %v7048_v27 = vld [vmem:[%s11852_s4 + $0xe0] ss:$8 sps:$4 sm:$0xff]  }
0x12ce   : > { %5866 = vmatpush2.bf16.msra.mxu0 %v13741_v14  ;;  %5907 = vmatpush2.bf16.msra.mxu1 %v13837_v11  ;;  %v7053_v14 = vld [vmem:[%s11852_s4 + $0xd4] ss:$8 sps:$4 sm:$0xff]  }
0x12cf   : > { %5867 = vmatprep.subr.bf16.mxu0 %v13838_v63  ;;  %5908 = vmatprep.subr.bf16.mxu1 %v13839_v60 }
0x12d2   : > { %5868 = vmatpush2.bf16.msra.mxu0 %v13840_v2  ;;  %5909 = vmatpush2.bf16.msra.mxu1 %v13841_v10 }
0x12d3   : > { %5869 = vmatprep.subr.bf16.mxu0 %v13842_v15  ;;  %5910 = vmatprep.subr.bf16.mxu1 %v13843_v61 }
0x12d6   : > { %5870 = vmatpush2.bf16.msra.mxu0 %v13844_v52  ;;  %5911 = vmatpush2.bf16.msra.mxu1 %v13845_v0  ;;  %v13858_v52 = vld [vmem:[#allocation141_spill] sm:$0xff]  ;;  %v13859_v0 = vld [vmem:[#allocation196_spill] sm:$0xff] }
0x12d7   : > { %5871 = vmatprep.subr.bf16.mxu0 %v13846_v38  ;;  %5912 = vmatprep.subr.bf16.mxu1 %v13847_v45  ;;  %v1020_v38 = vadd.f32 %v13859_v0, %v13858_v52  ;;  %v13860_v45 = vld [vmem:[#allocation194_spill] sm:$0xff] }
0x12da   : > { %5872 = vmatpush2.bf16.msra.mxu0 %v13848_v51  ;;  %5913 = vmatpush2.bf16.msra.mxu1 %v13849_v16  ;;  %v13861_v16 = vld [vmem:[#allocation195_spill] sm:$0xff] }
0x12db   : > { %5873 = vmatprep.subr.bf16.mxu0 %v13850_v32  ;;  %5914 = vmatprep.subr.bf16.mxu1 %v13851_v62  ;;  %v13862_v62 = vld [vmem:[#allocation135_spill] sm:$0xff] }
0x12de   : > { %5874 = vmatpush2.bf16.msra.mxu0 %v13852_v23  ;;  %5915 = vmatpush2.bf16.msra.mxu1 %v13853_v34  ;;  %v13863_v23 = vld [vmem:[#allocation197_spill] sm:$0xff] }
0x12df   : > { %5875 = vmatprep.subr.bf16.mxu0 %v13854_v57  ;;  %5916 = vmatprep.subr.bf16.mxu1 %v13855_v4  ;;  %v1133_v34 = vadd.f32 %v13863_v23, %v13862_v62  ;;  %v7078_v62 = vld [vmem:[%s11856_s8 + $0x18] sm:$0xff]   ;;  %v7079_v23 = vld [vmem:[%s11856_s8 + $0x50] sm:$0xff]  }
0x12e2   : > { %5876 = vmatpush2.bf16.msra.mxu0 %v13856_v24  ;;  %5917 = vmatpush2.bf16.msra.mxu1 %v13857_v37 }
0x12e3   : > { %6189 = vmatprep.subr.bf16.mxu0 %v7023_v40  ;;  %6956 = vmatprep.subr.bf16.mxu1 %v7069_v26 }
0x12e5   : > { %5878 = vmatmul.mubr.bf16.vlgmr.msra.gmra.mxu0 %v11564_v22  ;;  %5919 = vmatmul.mubr.bf16.vlgmr.msra.gmra.mxu1 %v11564_v22 }
0x12e6   : > { %6190 = vmatpush1.bf16.msra.mxu0 %v7021_v33  ;;  %6957 = vmatpush3.bf16.msra.mxu1 %v7070_v29 }
0x12e7   : > { %6191 = vmatprep.subr.bf16.mxu0 %v7026_v19  ;;  %6958 = vmatprep.subr.bf16.mxu1 %v7071_v30 }
0x12ea   : > { %6192 = vmatpush1.bf16.msra.mxu0 %v7024_v47  ;;  %6959 = vmatpush3.bf16.msra.mxu1 %v7072_v36 }
0x12eb   : > { %6193 = vmatprep.subr.bf16.mxu0 %v7029_v43  ;;  %6960 = vmatprep.subr.bf16.mxu1 %v7073_v12 }
0x12ee   : > { %6194 = vmatpush1.bf16.msra.mxu0 %v7027_v18  ;;  %6961 = vmatpush3.bf16.msra.mxu1 %v7074_v35 }
0x12ef   : > { %6195 = vmatprep.subr.bf16.mxu0 %v7032_v56  ;;  %6962 = vmatprep.subr.bf16.mxu1 %v7075_v42 }
0x12f2   : > { %6196 = vmatpush1.bf16.msra.mxu0 %v7030_v55  ;;  %6963 = vmatpush3.bf16.msra.mxu1 %v7076_v41 }
0x12f3   : > { %6197 = vmatprep.subr.bf16.mxu0 %v7035_v9 }
0x12f6   : > { %6198 = vmatpush1.bf16.msra.mxu0 %v7033_v20  ;;  %v13864_v20 = vld [vmem:[#allocation198_spill] sm:$0xff] }
0x12f7   : > { %6199 = vmatprep.subr.bf16.mxu0 %v7038_v48  ;;  %v13865_v48 = vld [vmem:[#allocation258_spill] sm:$0xff] }
0x12fa   : > { %6200 = vmatpush1.bf16.msra.mxu0 %v7036_v58  ;;  %v1246_v58 = vadd.f32 %v13865_v48, %v13864_v20 }
0x12fb   : > { %6201 = vmatprep.subr.bf16.mxu0 %v7041_v7 }
0x12fe   : > { %6202 = vmatpush1.bf16.msra.mxu0 %v7039_v5 }
0x12ff   : > { %6203 = vmatprep.subr.bf16.mxu0 %v7044_v6 }
0x1302   : > { %6204 = vmatpush1.bf16.msra.mxu0 %v7042_v25  ;;  %v13866_v25 = vld [vmem:[#allocation199_spill] sm:$0xff] }
0x1303   : > { %6205 = vmatprep.subr.bf16.mxu0 %v7047_v8  ;;  %v13867_v8 = vld [vmem:[#allocation259_spill] sm:$0xff] }
0x1306   : > { %6206 = vmatpush2.bf16.msra.mxu0 %v7045_v17  ;;  %v1359_v17 = vadd.f32 %v13867_v8, %v13866_v25 }
0x1307   : > { %6207 = vmatprep.subr.bf16.mxu0 %v7050_v49  ;;  %v13868_v49 = vld [vmem:[#allocation256_spill] sm:$0xff] }
0x130a   : > { %6208 = vmatpush2.bf16.msra.mxu0 %v7048_v27 }
0x130b   : > { %6209 = vmatprep.subr.bf16.mxu0 %v7053_v14  ;;  %v13869_v14 = vld [vmem:[#allocation257_spill] sm:$0xff] }
0x130e   : > { %6210 = vmatpush2.bf16.msra.mxu0 %v7051_v54 }
0x130f   : > { %6211 = vmatprep.subr.bf16.mxu0 %v7056_v46 }
0x1312   : > { %6212 = vmatpush2.bf16.msra.mxu0 %v7054_v39 }
0x1313   : > { %6213 = vmatprep.subr.bf16.mxu0 %v7059_v53 }
0x1316   : > { %6214 = vmatpush2.bf16.msra.mxu0 %v7057_v44 }
0x1317   : > { %6215 = vmatprep.subr.bf16.mxu0 %v7062_v50 }
0x131a   : > { %6216 = vmatpush2.bf16.msra.mxu0 %v7060_v1 }
0x131b   : > { %6217 = vmatprep.subr.bf16.mxu0 %v7065_v3 }
0x131e   : > { %6218 = vmatpush2.bf16.msra.mxu0 %v7063_v21 }
0x131f   : > { %6219 = vmatprep.subr.bf16.mxu0 %v7068_v28 }
0x1322   : > { %6220 = vmatpush2.bf16.msra.mxu0 %v7066_v59 }
0x1365   : > { %v5797_v22 = vpop.f32.mrf.mxu0  ;;  %v5838_v11 = vpop.f32.mrf.mxu1 }
0x1366   : > { %v5927_v51 = vadd.f32 %v5797_v22, %v13860_v45  ;;  %v5929_v32 = vadd.f32 %v5838_v11, %v13861_v16 }
0x1367   : > { %v5799_v63 = vpop.f32.mrf.mxu0  ;;  %v5840_v60 = vpop.f32.mrf.mxu1 }
0x1368   : > { %v5928_v57 = vadd.f32 %v5799_v63, %v1020_v38  ;;  %v6897_v4 = vmul.f32 -1.442695, %v5927_v51  ;;  %v5930_v24 = vadd.f32 %v5840_v60, %v1133_v34  ;;  %v6899_v37 = vmul.f32 -1.442695, %v5929_v32  ;;  %v7080_v34 = vld [vmem:[%s11856_s8 + $0x10] sm:$0xff]  }
0x1369   : > { %v5801_v2 = vpop.f32.mrf.mxu0  ;;  %v5842_v10 = vpop.f32.mrf.mxu1 }
0x136a   : > { %v6898_v33 = vmul.f32 -1.442695, %v5928_v57  ;;  %7565 = vpow2.f32 %v6897_v4  ;;  %v6900_v40 = vmul.f32 -1.442695, %v5930_v24  ;;  %v7081_v57 = vld [vmem:[%s11856_s8 + $0x48] sm:$0xff]   ;;  %v7083_v24 = vld [vmem:[%s11856_s8 + $0x40] sm:$0xff]  }
0x136b   : > { %v5802_v15 = vpop.f32.mrf.mxu0  ;;  %v5843_v61 = vpop.f32.mrf.mxu1  ;;  %7567 = vpow2.f32 %v6899_v37  ;;  %v7082_v4 = vld [vmem:[%s11856_s8 + $0x8] sm:$0xff]   ;;  %v7084_v37 = vld [vmem:[%s11856_s8] sm:$0xff]  }
0x136c   : > { %7569 = vpow2.f32 %v6898_v33  ;;  %v6017_v33 = vld [vmem:[%s11853_s5] sm:$0x3] }
0x136d   : > { %7571 = vpow2.f32 %v6900_v40  ;;  %v13870_v40 = vld [vmem:[#allocation134_spill] sm:$0xff] }
0x1377   : > { %v7566_v19 = vpop.eup %7565 }
0x1378   : > { %v7568_v47 = vpop.eup %7567  ;;  %v5941_v18 = vadd.f32 1.0, %v7566_v19  ;;  %v6022_v19 = vrot.slane %v6017_v33, %v13870_v40 }
0x1379   : > { %v7570_v43 = vpop.eup %7569  ;;  %v5953_v55 = vadd.f32 1.0, %v7568_v47  ;;  %v6232_v47 = vld [vmem:[%s11854_s6] sm:$0x3] }
0x137a   : > { %v7572_v56 = vpop.eup %7571  ;;  %v5942_v9 = vadd.f32 1.0, %v7570_v43  ;;  %7573 = vrcp.f32 %v5941_v18  ;;  %v13871_v43 = vld [vmem:[#allocation136_spill] sm:$0xff]  ;;  %v6237_v20 = vrot.slane %v6232_v47, %v13870_v40 }
0x137b   : > { %v5954_v7 = vadd.f32 1.0, %v7572_v56  ;;  %7575 = vrcp.f32 %v5953_v55  ;;  %v6026_v18 = vrot.slane %v6017_v33, %v13871_v43  ;;  %v6246_v55 = vld [vmem:[%s11855_s7] sm:$0x3] }
0x137c   : > { %7577 = vrcp.f32 %v5942_v9 }
0x1387   : > { %v7574_v26 = vpop.eup %7573 }
0x1388   : > { %v7576_v29 = vpop.eup %7575 }
0x1389   : > { %v7578_v30 = vpop.eup %7577  ;;  %v5973_v35 = vmul.f32 %v7576_v29, %v11557_v31 }
0x13a5   : > { %v5879_v5 = vpop.f32.mrf.mxu0  ;;  %v5920_v6 = vpop.f32.mrf.mxu1 }
0x13a6   : > { %v5931_v27 = vadd.f32 %v5879_v5, %v13868_v49  ;;  %v5933_v54 = vadd.f32 %v5920_v6, %v13869_v14  ;;  %v6241_v6 = vrot.slane %v6232_v47, %v13871_v43  ;;  %v6255_v49 = vrot.slane %v6246_v55, %v13871_v43 }
0x13a7   : > { %v5881_v46 = vpop.f32.mrf.mxu0  ;;  %v5922_v39 = vpop.f32.mrf.mxu1 }
0x13a8   : > { %7579 = vtanh.f32 %v5931_v27  ;;  %v6901_v44 = vmul.f32 -1.442695, %v5933_v54  ;;  %v5932_v53 = vadd.f32 %v5881_v46, %v1246_v58  ;;  %v5934_v50 = vadd.f32 %v5922_v39, %v1359_v17 }
0x13a9   : > { %7581 = vrcp.f32 %v5954_v7  ;;  %v5883_v1 = vpop.f32.mrf.mxu0  ;;  %v5924_v3 = vpop.f32.mrf.mxu1  ;;  %v6251_v7 = vrot.slane %v6246_v55, %v13870_v40 }
0x13aa   : > { %7583 = vpow2.f32 %v6901_v44  ;;  %v6902_v21 = vmul.f32 -1.442695, %v5934_v50  ;;  %v6935_v3 = vld [vmem:[%s11857_s9] ss:$0 sm:$0xff] }
0x13ab   : > { %7585 = vtanh.f32 %v5932_v53  ;;  %v5884_v28 = vpop.f32.mrf.mxu0  ;;  %v5925_v59 = vpop.f32.mrf.mxu1 }
0x13ac   : > { %7587 = vpow2.f32 %v6902_v21 }
0x13b5   : > { %v7580_v36 = vpop.eup %7579 }
0x13b6   : > { %v7582_v12 = vpop.eup %7581  ;;  %v5975_v42 = vmul.f32 %v7580_v36, %v7574_v26 }
0x13b7   : > { %v7584_v41 = vpop.eup %7583  ;;  %v5974_v2 = vmul.f32 %v7582_v12, %v11561_v13  ;;  %v7077_v13 = vld [vmem:[%s11856_s8 + $0x58] sm:$0xff]  }
0x13b8   : > { %v7586_v22 = vpop.eup %7585  ;;  %v5977_v11 = vadd.f32 %v5975_v42, %v5973_v35  ;;  %v5967_v63 = vadd.f32 1.0, %v7584_v41  ;;  %6964 = vmatprep.subr.bf16.mxu1 %v7077_v13 }
0x13b9   : > { %v7588_v60 = vpop.eup %7587  ;;  %v5976_v10 = vmul.f32 %v7586_v22, %v7578_v30  ;;  %6965 = vmatpush3.bf16.msra.mxu1 %v7078_v62 }
0x13ba   : > { %7589 = vtanh.f32 %v5977_v11  ;;  %v5968_v15 = vadd.f32 1.0, %v7588_v60  ;;  %6966 = vmatprep.subr.bf16.mxu1 %v7079_v23 }
0x13bb   : > { %7591 = vrcp.f32 %v5967_v63  ;;  %v5978_v61 = vadd.f32 %v5976_v10, %v5974_v2 }
0x13bc   : > { %7593 = vrcp.f32 %v5968_v15 }
0x13bd   : > { %7595 = vtanh.f32 %v5978_v61  ;;  %6967 = vmatpush3.bf16.msra.mxu1 %v7080_v34 }
0x13be   : > { %6968 = vmatprep.subr.bf16.mxu1 %v7081_v57 }
0x13c1   : > { %6969 = vmatpush3.bf16.msra.mxu1 %v7082_v4 }
0x13c2   : > { %6970 = vmatprep.subr.bf16.mxu1 %v7083_v24 }
0x13c5   : > { %6971 = vmatpush3.bf16.msra.mxu1 %v7084_v37 }
0x13c7   : > { %v7590_v52 = vpop.eup %7589 }
0x13c8   : > { %v7592_v0 = vpop.eup %7591 }
0x13c9   : > { %v7594_v38 = vpop.eup %7593  ;;  %v5981_v45 = vmul.f32 %v7592_v0, %v7590_v52 }
0x13ca   : > { %v7596_v31 = vpop.eup %7595 }
0x13cb   : > { %v5982_v51 = vmul.f32 %v7596_v31, %v7594_v38  ;;  %v5983_v32 = vpack.c.bf16 %v5981_v45, %v5981_v45 }
0x13cd   : > { %v5984_v16 = vpack.c.bf16 %v5982_v51, %v5982_v51 }
0x13cf   : > { %6221 = vmatprep.mubr.bf16.mxu0 %v5984_v16 }
0x13d0   : > { %6222 = vmatmul.mubr.bf16.vlgmr.msra.gmra.mxu0 %v5983_v32 }
0x1490   : > { %v6223_v56 = vpop.f32.mrf.mxu0 }
0x1491   : > { %v6224_v9 = vadd.f32 %v6223_v56, %v6022_v19 }
0x1492   : > { %v6225_v48 = vpop.f32.mrf.mxu0 }
0x1493   : > { %v6230_v58 = vmax.f32 %v6224_v9, 0.0  ;;  %v6226_v5 = vadd.f32 %v6225_v48, %v6026_v18 }
0x1494   : > { %v6227_v25 = vpop.f32.mrf.mxu0 }
0x1495   : > { %v6244_v8 = vmul.f32 %v6237_v20, %v6230_v58  ;;  %v6231_v17 = vmax.f32 %v6226_v5, 0.0 }
0x1496   : > { %v6228_v27 = vpop.f32.mrf.mxu0 }
0x1497   : > { %v6258_v14 = vadd.f32 %v6251_v7, %v6244_v8  ;;  %v6245_v54 = vmul.f32 %v6241_v6, %v6231_v17 }
0x1499   : > { %v6259_v46 = vadd.f32 %v6255_v49, %v6245_v54  ;;  %v6260_v39 = vadd.f32 %v6258_v14, %v5981_v45 }
0x149b   : > { %v6261_v44 = vadd.f32 %v6259_v46, %v5982_v51  ;;  %v6262_v50 = vpack.c.bf16 %v6260_v39, %v6260_v39 }
0x149d   : > { %v6263_v53 = vpack.c.bf16 %v6261_v44, %v6261_v44 }
0x149f   : > { %6431 = vmatprep.mubr.bf16.mxu1 %v6263_v53 }
0x14a0   : > { %6432 = vmatmul.mubr.bf16.vlgmr.msra.gmra.mxu1 %v6262_v50 }
0x1560   : > { %v6972_v1 = vpop.f32.mrf.mxu1 }
0x1562   : > { %v6973_v21 = vpop.f32.mrf.mxu1 }
0x1563   : > { %v6974_v28 = vadd.f32 %v6973_v21, %v6972_v1 }
0x1564   : > { %v6975_v59 = vpop.f32.mrf.mxu1 }
0x1565   : > { %v6434_v26 = vadd.f32 %v6974_v28, %v6935_v3 }
0x1566   : > { %v6976_v29 = vpop.f32.mrf.mxu1 }
0x1567   : > { %6439 = vst [vmem:[%s353_s21] sm:$0xff] %v6434_v26 }
0x1568   : > { %7610 = shalt.err (!%p7607_p3)
}
0x1569   : > { %s7611_s12 = scalar_lea.hbm %s11813_s27, 128  ;;  %s7615_s21 = scalar_lea.hbm %s11858_s10, 256 }
0x156a   : > { %p7612_p4 = scmp.ne.s32.totalorder %s11813_s27, %s7611_s12  ;;  %p7616_p9 = scmp.lt.s32.totalorder %s11813_s27, %s11858_s10 }
0x156b   : > { %p7617_p10 = scmp.lt.s32.totalorder %s7615_s21, %s7611_s12 }
0x156c   : > { %p7613_p7 = pnand %p7612_p4, %p7755_p5 }
0x156d   : > { %p7618_p11 = por %p7617_p10, %p7616_p9 }
0x156e   : > { %p7614_p8 = pneg %p7613_p7 }
0x1570   : > { %p7619_p12 = pnand %p7618_p11, %p7614_p8 }
0x1572   : > { %7622 = shalt.err (!%p7619_p12)
}
0x1573   : > { %6978 = dma.vmem_to_hbm [thread:$0]  (%p7755_p5), %s6455_s18, 128, %s11813_s27, %s6441_s28  }
0x1574 PF: > { %p6984_p13 = scmp.ge.s32.totalorder %s7657_s16, 2  ;;  %s6466_s0 = sand.u32 1, %s7645_s13  }
0x1575   : > { %s6467_s17 = scalar_lea.sflag [#allocation4], %s6466_s0 }
0x1576   : > { %p6981_p0 = pnand %p6984_p13, %p7759_p6 }
0x1578   : > { %p6982_p1 = pneg %p6981_p0 }
0x157a   : > { %7640 = dma.done.wait (%p6982_p1), %s6467_s17, 128  }
0x157b   : > { %7642 = vsyncadd (%p6982_p1), %s6467_s17, 4294967168  ;;  %p20_p2 = scmp.ge.s32.totalorder %s7742_s19, 4   ;;  %s13872_s13 = smov %s7649_s14 }
0x157c   : > { %s13873_s14 = smov %s7653_s15  ;;  %s13874_s15 = smov %s7753_s22 }
0x157d   : > { %s13875_s16 = smov %s7742_s19  ;;  %22 = sbr.rel (!%p20_p2) target bundleno = 5 (0x5), region = 111 }
0x1582   :  { %6472 = vsyncpa [#allocation4], 1 }
0x1583   :  { %6474 = vsyncpa [#allocation4 + $0x1], 1 }

</bundles_post_ra>
